<compile_context>
chip_gen: v5e
topology: v5e:2x2
jax: 0.10.0
libtpu: 0.0.40
codegen_flags: <defaults>
</compile_context>

<pallas_src>
import functools

import jax
import jax.numpy as jnp
from jax.experimental import pallas as pl
from jax.experimental.pallas import tpu as pltpu

# ---------------- configuration (the `params` object of the PyTorch module) ----------------
BCC = 4            # params.bcc
BATCH = 2          # params.BATCH_SIZE
SEG = 8            # params.seg_size      (timesteps)
NUM_CH = 1         # params.num_channels  (must be 1: conv1 has in_channels=1)
NUM_JOINTS = 8     # params.num_joints    (conv "H" axis; shrinks by 1 per conv)
NUM_COORD = 3      # params.num_coord     (conv "W" axis; untouched by (2,1) kernels)
NUM_CLASSES = 10   # params.num_classes
HIDDEN = 256       # nn.LSTM hidden_size

H_OUT = NUM_JOINTS - 3                  # spatial H after three (2,1) convs
C_OUT = 4 * BCC                         # channels after conv3
FEAT = C_OUT * H_OUT * NUM_COORD        # self._to_lstm (240)
IN_FLAT = NUM_CH * NUM_JOINTS * NUM_COORD  # flattened raw frame (24)
PAD_B = 8                               # batch padded to one full sublane group


# ----------------------------------- fused Pallas kernel -----------------------------------
def convlstm_kernel(x_ref, win_ref, bin_ref, whh_hbm, wout_ref, bout_ref, o_ref,
                    whh_vmem, gates_scr, dma_sem, *, seq, pad_b, hidden):
    # (0) Kick off the bf16 W_hh^T HBM->VMEM DMA; it overlaps with stage (1).
    whh_cp = pltpu.make_async_copy(whh_hbm, whh_vmem, dma_sem)
    whh_cp.start()

    # (1) Folded conv-stack + LSTM input projection for ALL timesteps at once:
    #     one (T*8, 24) @ (24, 4*HIDDEN) MXU matmul, hoisted off the recurrence.
    #     Rows are time-major: row t*pad_b + b  <->  (t, b); rows with b >= BATCH are
    #     zero padding and get discarded in the wrapper.
    gates_scr[...] = (
        jnp.dot(x_ref[...], win_ref[...], preferred_element_type=jnp.float32)
        + bin_ref[...])

    # W_hh must be resident before the serial recurrence starts.
    whh_cp.wait()

    # (2) LSTM recurrence, fully unrolled (static trip count -> straight-line code).
    #     PyTorch gate order: i, f, g, o.  Per-step gate slice is a full aligned
    #     (8, 4*HIDDEN) tile; recurrent matmul uses bf16 operands, f32 accumulation.
    h = jnp.zeros((pad_b, hidden), jnp.float32)
    c = jnp.zeros((pad_b, hidden), jnp.float32)
    for t in range(seq):
        g = gates_scr[pl.ds(t * pad_b, pad_b), :] + jnp.dot(
            h.astype(jnp.bfloat16), whh_vmem[...],
            preferred_element_type=jnp.float32)
        i = jax.nn.sigmoid(g[:, 0:hidden])
        f = jax.nn.sigmoid(g[:, hidden:2 * hidden])
        gg = jnp.tanh(g[:, 2 * hidden:3 * hidden])
        o = jax.nn.sigmoid(g[:, 3 * hidden:4 * hidden])
        c = f * c + i * gg
        h = o * jnp.tanh(c)

    # (3) Folded fc1->fc2 head + log_softmax(dim=1) on the last hidden state.
    z = jnp.dot(h, wout_ref[...], preferred_element_type=jnp.float32) + bout_ref[...]
    s = z - jnp.max(z, axis=-1, keepdims=True)
    o_ref[...] = s - jnp.log(jnp.sum(jnp.exp(s), axis=-1, keepdims=True))


def convlstm_fused(x2d, w_in, b_in, whh_bf16, w_out, b_out, *, seq, pad_b):
    hidden = whh_bf16.shape[0]
    n_cls = w_out.shape[1]
    full2d = lambda a: pl.BlockSpec(a.shape, lambda i: (0, 0))
    return pl.pallas_call(
        functools.partial(convlstm_kernel, seq=seq, pad_b=pad_b, hidden=hidden),
        out_shape=jax.ShapeDtypeStruct((pad_b, n_cls), jnp.float32),
        grid=(1,),
        in_specs=[
            full2d(x2d),                            # (seq*pad_b, 24)   f32
            full2d(w_in),                           # (24, 4*HIDDEN)    f32
            full2d(b_in),                           # (1, 4*HIDDEN)     f32
            pl.BlockSpec(memory_space=pl.ANY),      # W_hh^T stays in HBM; manual DMA
            full2d(w_out),                          # (HIDDEN, n_cls)   f32
            full2d(b_out),                          # (1, n_cls)        f32
        ],
        out_specs=pl.BlockSpec((pad_b, n_cls), lambda i: (0, 0)),
        scratch_shapes=[
            pltpu.VMEM((hidden, 4 * hidden), jnp.bfloat16),      # W_hh landing buffer
            pltpu.VMEM((seq * pad_b, 4 * hidden), jnp.float32),  # gate pre-activations
            pltpu.SemaphoreType.DMA(()),                         # W_hh DMA completion
        ],
        compiler_params=pltpu.CompilerParams(dimension_semantics=("arbitrary",)),
    )(x2d, w_in, b_in, whh_bf16, w_out, b_out)


# ----------------------------------- parameter setup ----------------------------------------
def init_params(key):
    ks = jax.random.split(key, 14)

    def uni(k, shape, fan_in):
        b = 1.0 / (fan_in ** 0.5)
        return jax.random.uniform(k, shape, jnp.float32, -b, b)

    raw = {
        'c1w': uni(ks[0], (BCC, 1, 2, 1), 2),                 'c1b': uni(ks[1], (BCC,), 2),
        'c2w': uni(ks[2], (2 * BCC, BCC, 2, 1), 2 * BCC),     'c2b': uni(ks[3], (2 * BCC,), 2 * BCC),
        'c3w': uni(ks[4], (4 * BCC, 2 * BCC, 2, 1), 4 * BCC), 'c3b': uni(ks[5], (4 * BCC,), 4 * BCC),
        'wih': uni(ks[6], (4 * HIDDEN, FEAT), HIDDEN),        'whh': uni(ks[7], (4 * HIDDEN, HIDDEN), HIDDEN),
        'bih': uni(ks[8], (4 * HIDDEN,), HIDDEN),             'bhh': uni(ks[9], (4 * HIDDEN,), HIDDEN),
        'fc1w': uni(ks[10], (BCC, HIDDEN), HIDDEN),           'fc1b': uni(ks[11], (BCC,), HIDDEN),
        'fc2w': uni(ks[12], (NUM_CLASSES, BCC), BCC),         'fc2b': uni(ks[13], (NUM_CLASSES,), BCC),
    }

    hp = jax.lax.Precision.HIGHEST

    # --- fold the (linear) conv stack into the LSTM input projection, host-side, once ---
    def conv(xn, w, b):
        return (jnp.einsum('nchw,oc->nohw', xn[:, :, :-1, :], w[:, :, 0, 0], precision=hp)
                + jnp.einsum('nchw,oc->nohw', xn[:, :, 1:, :], w[:, :, 1, 0], precision=hp)
                + b[None, :, None, None])

    def conv_stack(xn):
        return conv(conv(conv(xn, raw['c1w'], raw['c1b']),
                         raw['c2w'], raw['c2b']), raw['c3w'], raw['c3b'])

    zeros = jnp.zeros((1, NUM_CH, NUM_JOINTS, NUM_COORD), jnp.float32)
    basis = jnp.eye(IN_FLAT, dtype=jnp.float32).reshape(IN_FLAT, NUM_CH, NUM_JOINTS, NUM_COORD)
    conv_bias = conv_stack(zeros).reshape(FEAT)                                   # constant term
    conv_mat_t = conv_stack(basis).reshape(IN_FLAT, FEAT) - conv_bias[None, :]    # A^T (24, 240)

    wih_t = raw['wih'].T                                                          # (240, 1024)
    p = {
        # folded conv-stack + W_ih: x_flat(24) -> gate pre-activations (4*HIDDEN)
        'w_in': jnp.dot(conv_mat_t, wih_t, precision=hp),                         # (24, 1024) f32
        'b_in': (jnp.dot(conv_bias, wih_t, precision=hp)
                 + raw['bih'] + raw['bhh'])[None, :],                             # (1, 1024)  f32
        # recurrent weights stored bf16 (MXU operands); accumulation stays f32 in-kernel
        'whh_t': raw['whh'].T.astype(jnp.bfloat16),                               # (256, 1024) bf16
        # folded fc1 -> fc2 head
        'w_out': jnp.dot(raw['fc1w'].T, raw['fc2w'].T, precision=hp),             # (256, 10)  f32
        'b_out': (jnp.dot(raw['fc1b'], raw['fc2w'].T, precision=hp)
                  + raw['fc2b'])[None, :],                                        # (1, 10)    f32
    }
    return raw, p


# ----------------------------------- forward pass -------------------------------------------
def forward(x, p):
    B, T, C, H, W = x.shape
    # Pad batch to a full 8-row sublane group (zeros), lay rows out time-major
    # (row t*PAD_B + b <-> (t, b)); each row is the PyTorch (C,H,W)-order flatten of a frame,
    # which the folded conv+W_ih matrix consumes directly.
    xp = jnp.pad(x, ((0, PAD_B - B), (0, 0), (0, 0), (0, 0), (0, 0)))
    x2d = jnp.transpose(xp, (1, 0, 2, 3, 4)).reshape(T * PAD_B, C * H * W)
    out = convlstm_fused(x2d, p['w_in'], p['b_in'], p['whh_t'], p['w_out'], p['b_out'],
                         seq=T, pad_b=PAD_B)
    return out[:B]


# ----------------------------------- pure-JAX reference -------------------------------------
def ref_forward(x, raw):
    B, T, C, H, W = x.shape
    xf = x.reshape(B * T, C, H, W)

    def conv(xn, w, b):
        return (jnp.einsum('nchw,oc->nohw', xn[:, :, :-1, :], w[:, :, 0, 0], precision='highest')
                + jnp.einsum('nchw,oc->nohw', xn[:, :, 1:, :], w[:, :, 1, 0], precision='highest')
                + b[None, :, None, None])

    y = conv(conv(conv(xf, raw['c1w'], raw['c1b']), raw['c2w'], raw['c2b']), raw['c3w'], raw['c3b'])
    r_in = y.reshape(B, T, -1)
    h = jnp.zeros((B, HIDDEN), jnp.float32)
    c = jnp.zeros((B, HIDDEN), jnp.float32)
    hp = jax.lax.Precision.HIGHEST
    for t in range(T):
        g = (jnp.dot(r_in[:, t, :], raw['wih'].T, precision=hp)
             + jnp.dot(h, raw['whh'].T, precision=hp) + raw['bih'] + raw['bhh'])
        i, f, gg, o = jnp.split(g, 4, axis=1)
        c = jax.nn.sigmoid(f) * c + jax.nn.sigmoid(i) * jnp.tanh(gg)
        h = jax.nn.sigmoid(o) * jnp.tanh(c)
    z = jnp.dot(h, raw['fc1w'].T, precision=hp) + raw['fc1b']
    z = jnp.dot(z, raw['fc2w'].T, precision=hp) + raw['fc2b']
    return jax.nn.log_softmax(z, axis=1)


# -------------------------------------- main -------------------------------------------------
if __name__ == "__main__":
    key = jax.random.PRNGKey(0)
    raw, p = init_params(key)
    x = jax.random.normal(jax.random.fold_in(key, 123),
                          (BATCH, SEG, NUM_CH, NUM_JOINTS, NUM_COORD), jnp.float32)

    fwd = jax.jit(forward)
    out = jax.block_until_ready(fwd(x, p))
    assert out.shape == (BATCH, NUM_CLASSES), out.shape

    # Reference is full f32 HIGHEST; kernel uses bf16 operands (f32 accumulation) only for the
    # recurrent W_hh dot, so allow a slightly wider (still bug-catching) tolerance.
    ref = ref_forward(x, raw)
    assert bool(jnp.allclose(out, ref, atol=2e-3, rtol=2e-3)), (out, ref)

    print("KERNEL_OK")
</pallas_src>

<mosaic_0001>
module attributes {stable_mosaic.version = 11 : i64} {
  func.func @convlstm_kernel(%arg0: i32, %arg1: memref<64x24xf32, #tpu.memory_space<vmem>>, %arg2: memref<24x1024xf32, #tpu.memory_space<vmem>>, %arg3: memref<1x1024xf32, #tpu.memory_space<vmem>>, %arg4: memref<256x1024xbf16, #tpu.memory_space<any>>, %arg5: memref<256x10xf32, #tpu.memory_space<vmem>>, %arg6: memref<1x10xf32, #tpu.memory_space<vmem>>, %arg7: memref<8x10xf32, #tpu.memory_space<vmem>>, %arg8: memref<256x1024xbf16, #tpu.memory_space<vmem>>, %arg9: memref<64x1024xf32, #tpu.memory_space<vmem>>, %arg10: memref<!tpu.dma_semaphore, #tpu.memory_space<semaphore_mem>>) attributes {dimension_semantics = [#tpu.dimension_semantics<arbitrary>], iteration_bounds = array<i64: 1>, scalar_prefetch = 0 : i64, scratch_operands = 3 : i64, tpu.core_type = #tpu.core_type<tc>, window_params = [{pipeline_mode = #tpu.pipeline_mode<synchronous>, transform_indices = @transform_0, window_bounds = array<i64: 64, 24>}, {pipeline_mode = #tpu.pipeline_mode<synchronous>, transform_indices = @transform_1, window_bounds = array<i64: 24, 1024>}, {pipeline_mode = #tpu.pipeline_mode<synchronous>, transform_indices = @transform_2, window_bounds = array<i64: 1, 1024>}, {}, {pipeline_mode = #tpu.pipeline_mode<synchronous>, transform_indices = @transform_4, window_bounds = array<i64: 256, 10>}, {pipeline_mode = #tpu.pipeline_mode<synchronous>, transform_indices = @transform_5, window_bounds = array<i64: 1, 10>}, {pipeline_mode = #tpu.pipeline_mode<synchronous>, transform_indices = @transform_6, window_bounds = array<i64: 8, 10>}]} {
    tpu.enqueue_dma source(%arg4 : memref<256x1024xbf16, #tpu.memory_space<any>>) target(%arg8 : memref<256x1024xbf16, #tpu.memory_space<vmem>>) target_semaphore(%arg10 : memref<!tpu.dma_semaphore, #tpu.memory_space<semaphore_mem>>)
    %c0 = arith.constant 0 : index
    %c0_0 = arith.constant 0 : index
    %0 = vector.load %arg1[%c0, %c0_0] : memref<64x24xf32, #tpu.memory_space<vmem>>, vector<64x24xf32>
    %c0_1 = arith.constant 0 : index
    %c0_2 = arith.constant 0 : index
    %1 = vector.load %arg2[%c0_1, %c0_2] : memref<24x1024xf32, #tpu.memory_space<vmem>>, vector<24x1024xf32>
    %cst = arith.constant dense<0.000000e+00> : vector<64x1024xf32>
    %2 = tpu.matmul %0, %1, %cst {dimension_numbers = #tpu.dot_dimension_numbers<[1], [0], [0], [1], [0, 0, 1, 1], [], []>} : vector<64x24xf32>, vector<24x1024xf32>, vector<64x1024xf32> -> vector<64x1024xf32>
    %c0_3 = arith.constant 0 : index
    %c0_4 = arith.constant 0 : index
    %3 = vector.load %arg3[%c0_3, %c0_4] : memref<1x1024xf32, #tpu.memory_space<vmem>>, vector<1x1024xf32>
    %4 = vector.broadcast %3 : vector<1x1024xf32> to vector<64x1024xf32>
    %5 = arith.addf %2, %4 : vector<64x1024xf32>
    %c0_5 = arith.constant 0 : index
    %c0_6 = arith.constant 0 : index
    %6 = vector.load %arg9[%c0_5, %c0_6] : memref<64x1024xf32, #tpu.memory_space<vmem>>, vector<64x1024xf32>
    tpu.vector_store %arg9[%c0_5, %c0_6], %5 {strides = array<i32>} : memref<64x1024xf32, #tpu.memory_space<vmem>>, vector<64x1024xf32>,
    tpu.wait_dma2 semaphore(%arg10 : memref<!tpu.dma_semaphore, #tpu.memory_space<semaphore_mem>>) src(%arg4 : memref<256x1024xbf16, #tpu.memory_space<any>>) dst(%arg8 : memref<256x1024xbf16, #tpu.memory_space<vmem>>)
    %cst_7 = arith.constant 0.000000e+00 : f32
    %7 = vector.broadcast %cst_7 : f32 to vector<8x256xf32>
    %cst_8 = arith.constant 0.000000e+00 : f32
    %8 = vector.broadcast %cst_8 : f32 to vector<8x256xf32>
    %c0_9 = arith.constant 0 : index
    %c0_10 = arith.constant 0 : index
    %9 = vector.load %arg9[%c0_9, %c0_10] : memref<64x1024xf32, #tpu.memory_space<vmem>>, vector<8x1024xf32>
    %10 = arith.truncf %7 : vector<8x256xf32> to vector<8x256xbf16>
    %c0_11 = arith.constant 0 : index
    %c0_12 = arith.constant 0 : index
    %11 = vector.load %arg8[%c0_11, %c0_12] : memref<256x1024xbf16, #tpu.memory_space<vmem>>, vector<256x1024xbf16>
    %cst_13 = arith.constant dense<0.000000e+00> : vector<8x1024xf32>
    %12 = tpu.matmul %10, %11, %cst_13 {dimension_numbers = #tpu.dot_dimension_numbers<[1], [0], [0], [1], [0, 0, 1, 1], [], []>} : vector<8x256xbf16>, vector<256x1024xbf16>, vector<8x1024xf32> -> vector<8x1024xf32>
    %13 = arith.addf %9, %12 : vector<8x1024xf32>
    %14 = vector.extract_strided_slice %13 {offsets = [0, 0], sizes = [8, 256], strides = [1, 1]} : vector<8x1024xf32> to vector<8x256xf32>
    %15 = arith.negf %14 : vector<8x256xf32>
    %16 = math.exp %15 : vector<8x256xf32>
    %cst_14 = arith.constant 1.000000e+00 : f32
    %17 = vector.broadcast %cst_14 : f32 to vector<8x256xf32>
    %18 = arith.addf %17, %16 : vector<8x256xf32>
    %19 = arith.divf %17, %18 : vector<8x256xf32>
    %20 = vector.extract_strided_slice %13 {offsets = [0, 256], sizes = [8, 256], strides = [1, 1]} : vector<8x1024xf32> to vector<8x256xf32>
    %21 = arith.negf %20 : vector<8x256xf32>
    %22 = math.exp %21 : vector<8x256xf32>
    %cst_15 = arith.constant 1.000000e+00 : f32
    %23 = vector.broadcast %cst_15 : f32 to vector<8x256xf32>
    %24 = arith.addf %23, %22 : vector<8x256xf32>
    %25 = arith.divf %23, %24 : vector<8x256xf32>
    %26 = vector.extract_strided_slice %13 {offsets = [0, 512], sizes = [8, 256], strides = [1, 1]} : vector<8x1024xf32> to vector<8x256xf32>
    %27 = math.tanh %26 : vector<8x256xf32>
    %28 = vector.extract_strided_slice %13 {offsets = [0, 768], sizes = [8, 256], strides = [1, 1]} : vector<8x1024xf32> to vector<8x256xf32>
    %29 = arith.negf %28 : vector<8x256xf32>
    %30 = math.exp %29 : vector<8x256xf32>
    %cst_16 = arith.constant 1.000000e+00 : f32
    %31 = vector.broadcast %cst_16 : f32 to vector<8x256xf32>
    %32 = arith.addf %31, %30 : vector<8x256xf32>
    %33 = arith.divf %31, %32 : vector<8x256xf32>
    %34 = arith.mulf %25, %8 : vector<8x256xf32>
    %35 = arith.mulf %19, %27 : vector<8x256xf32>
    %36 = arith.addf %34, %35 : vector<8x256xf32>
    %37 = math.tanh %36 : vector<8x256xf32>
    %38 = arith.mulf %33, %37 : vector<8x256xf32>
    %c8 = arith.constant 8 : index
    %c0_17 = arith.constant 0 : index
    %39 = vector.load %arg9[%c8, %c0_17] : memref<64x1024xf32, #tpu.memory_space<vmem>>, vector<8x1024xf32>
    %40 = arith.truncf %38 : vector<8x256xf32> to vector<8x256xbf16>
    %c0_18 = arith.constant 0 : index
    %c0_19 = arith.constant 0 : index
    %41 = vector.load %arg8[%c0_18, %c0_19] : memref<256x1024xbf16, #tpu.memory_space<vmem>>, vector<256x1024xbf16>
    %cst_20 = arith.constant dense<0.000000e+00> : vector<8x1024xf32>
    %42 = tpu.matmul %40, %41, %cst_20 {dimension_numbers = #tpu.dot_dimension_numbers<[1], [0], [0], [1], [0, 0, 1, 1], [], []>} : vector<8x256xbf16>, vector<256x1024xbf16>, vector<8x1024xf32> -> vector<8x1024xf32>
    %43 = arith.addf %39, %42 : vector<8x1024xf32>
    %44 = vector.extract_strided_slice %43 {offsets = [0, 0], sizes = [8, 256], strides = [1, 1]} : vector<8x1024xf32> to vector<8x256xf32>
    %45 = arith.negf %44 : vector<8x256xf32>
    %46 = math.exp %45 : vector<8x256xf32>
    %cst_21 = arith.constant 1.000000e+00 : f32
    %47 = vector.broadcast %cst_21 : f32 to vector<8x256xf32>
    %48 = arith.addf %47, %46 : vector<8x256xf32>
    %49 = arith.divf %47, %48 : vector<8x256xf32>
    %50 = vector.extract_strided_slice %43 {offsets = [0, 256], sizes = [8, 256], strides = [1, 1]} : vector<8x1024xf32> to vector<8x256xf32>
    %51 = arith.negf %50 : vector<8x256xf32>
    %52 = math.exp %51 : vector<8x256xf32>
    %cst_22 = arith.constant 1.000000e+00 : f32
    %53 = vector.broadcast %cst_22 : f32 to vector<8x256xf32>
    %54 = arith.addf %53, %52 : vector<8x256xf32>
    %55 = arith.divf %53, %54 : vector<8x256xf32>
    %56 = vector.extract_strided_slice %43 {offsets = [0, 512], sizes = [8, 256], strides = [1, 1]} : vector<8x1024xf32> to vector<8x256xf32>
    %57 = math.tanh %56 : vector<8x256xf32>
    %58 = vector.extract_strided_slice %43 {offsets = [0, 768], sizes = [8, 256], strides = [1, 1]} : vector<8x1024xf32> to vector<8x256xf32>
    %59 = arith.negf %58 : vector<8x256xf32>
    %60 = math.exp %59 : vector<8x256xf32>
    %cst_23 = arith.constant 1.000000e+00 : f32
    %61 = vector.broadcast %cst_23 : f32 to vector<8x256xf32>
    %62 = arith.addf %61, %60 : vector<8x256xf32>
    %63 = arith.divf %61, %62 : vector<8x256xf32>
    %64 = arith.mulf %55, %36 : vector<8x256xf32>
    %65 = arith.mulf %49, %57 : vector<8x256xf32>
    %66 = arith.addf %64, %65 : vector<8x256xf32>
    %67 = math.tanh %66 : vector<8x256xf32>
    %68 = arith.mulf %63, %67 : vector<8x256xf32>
    %c16 = arith.constant 16 : index
    %c0_24 = arith.constant 0 : index
    %69 = vector.load %arg9[%c16, %c0_24] : memref<64x1024xf32, #tpu.memory_space<vmem>>, vector<8x1024xf32>
    %70 = arith.truncf %68 : vector<8x256xf32> to vector<8x256xbf16>
    %c0_25 = arith.constant 0 : index
    %c0_26 = arith.constant 0 : index
    %71 = vector.load %arg8[%c0_25, %c0_26] : memref<256x1024xbf16, #tpu.memory_space<vmem>>, vector<256x1024xbf16>
    %cst_27 = arith.constant dense<0.000000e+00> : vector<8x1024xf32>
    %72 = tpu.matmul %70, %71, %cst_27 {dimension_numbers = #tpu.dot_dimension_numbers<[1], [0], [0], [1], [0, 0, 1, 1], [], []>} : vector<8x256xbf16>, vector<256x1024xbf16>, vector<8x1024xf32> -> vector<8x1024xf32>
    %73 = arith.addf %69, %72 : vector<8x1024xf32>
    %74 = vector.extract_strided_slice %73 {offsets = [0, 0], sizes = [8, 256], strides = [1, 1]} : vector<8x1024xf32> to vector<8x256xf32>
    %75 = arith.negf %74 : vector<8x256xf32>
    %76 = math.exp %75 : vector<8x256xf32>
    %cst_28 = arith.constant 1.000000e+00 : f32
    %77 = vector.broadcast %cst_28 : f32 to vector<8x256xf32>
    %78 = arith.addf %77, %76 : vector<8x256xf32>
    %79 = arith.divf %77, %78 : vector<8x256xf32>
    %80 = vector.extract_strided_slice %73 {offsets = [0, 256], sizes = [8, 256], strides = [1, 1]} : vector<8x1024xf32> to vector<8x256xf32>
    %81 = arith.negf %80 : vector<8x256xf32>
    %82 = math.exp %81 : vector<8x256xf32>
    %cst_29 = arith.constant 1.000000e+00 : f32
    %83 = vector.broadcast %cst_29 : f32 to vector<8x256xf32>
    %84 = arith.addf %83, %82 : vector<8x256xf32>
    %85 = arith.divf %83, %84 : vector<8x256xf32>
    %86 = vector.extract_strided_slice %73 {offsets = [0, 512], sizes = [8, 256], strides = [1, 1]} : vector<8x1024xf32> to vector<8x256xf32>
    %87 = math.tanh %86 : vector<8x256xf32>
    %88 = vector.extract_strided_slice %73 {offsets = [0, 768], sizes = [8, 256], strides = [1, 1]} : vector<8x1024xf32> to vector<8x256xf32>
    %89 = arith.negf %88 : vector<8x256xf32>
    %90 = math.exp %89 : vector<8x256xf32>
    %cst_30 = arith.constant 1.000000e+00 : f32
    %91 = vector.broadcast %cst_30 : f32 to vector<8x256xf32>
    %92 = arith.addf %91, %90 : vector<8x256xf32>
    %93 = arith.divf %91, %92 : vector<8x256xf32>
    %94 = arith.mulf %85, %66 : vector<8x256xf32>
    %95 = arith.mulf %79, %87 : vector<8x256xf32>
    %96 = arith.addf %94, %95 : vector<8x256xf32>
    %97 = math.tanh %96 : vector<8x256xf32>
    %98 = arith.mulf %93, %97 : vector<8x256xf32>
    %c24 = arith.constant 24 : index
    %c0_31 = arith.constant 0 : index
    %99 = vector.load %arg9[%c24, %c0_31] : memref<64x1024xf32, #tpu.memory_space<vmem>>, vector<8x1024xf32>
    %100 = arith.truncf %98 : vector<8x256xf32> to vector<8x256xbf16>
    %c0_32 = arith.constant 0 : index
    %c0_33 = arith.constant 0 : index
    %101 = vector.load %arg8[%c0_32, %c0_33] : memref<256x1024xbf16, #tpu.memory_space<vmem>>, vector<256x1024xbf16>
    %cst_34 = arith.constant dense<0.000000e+00> : vector<8x1024xf32>
    %102 = tpu.matmul %100, %101, %cst_34 {dimension_numbers = #tpu.dot_dimension_numbers<[1], [0], [0], [1], [0, 0, 1, 1], [], []>} : vector<8x256xbf16>, vector<256x1024xbf16>, vector<8x1024xf32> -> vector<8x1024xf32>
    %103 = arith.addf %99, %102 : vector<8x1024xf32>
    %104 = vector.extract_strided_slice %103 {offsets = [0, 0], sizes = [8, 256], strides = [1, 1]} : vector<8x1024xf32> to vector<8x256xf32>
    %105 = arith.negf %104 : vector<8x256xf32>
    %106 = math.exp %105 : vector<8x256xf32>
    %cst_35 = arith.constant 1.000000e+00 : f32
    %107 = vector.broadcast %cst_35 : f32 to vector<8x256xf32>
    %108 = arith.addf %107, %106 : vector<8x256xf32>
    %109 = arith.divf %107, %108 : vector<8x256xf32>
    %110 = vector.extract_strided_slice %103 {offsets = [0, 256], sizes = [8, 256], strides = [1, 1]} : vector<8x1024xf32> to vector<8x256xf32>
    %111 = arith.negf %110 : vector<8x256xf32>
    %112 = math.exp %111 : vector<8x256xf32>
    %cst_36 = arith.constant 1.000000e+00 : f32
    %113 = vector.broadcast %cst_36 : f32 to vector<8x256xf32>
    %114 = arith.addf %113, %112 : vector<8x256xf32>
    %115 = arith.divf %113, %114 : vector<8x256xf32>
    %116 = vector.extract_strided_slice %103 {offsets = [0, 512], sizes = [8, 256], strides = [1, 1]} : vector<8x1024xf32> to vector<8x256xf32>
    %117 = math.tanh %116 : vector<8x256xf32>
    %118 = vector.extract_strided_slice %103 {offsets = [0, 768], sizes = [8, 256], strides = [1, 1]} : vector<8x1024xf32> to vector<8x256xf32>
    %119 = arith.negf %118 : vector<8x256xf32>
    %120 = math.exp %119 : vector<8x256xf32>
    %cst_37 = arith.constant 1.000000e+00 : f32
    %121 = vector.broadcast %cst_37 : f32 to vector<8x256xf32>
    %122 = arith.addf %121, %120 : vector<8x256xf32>
    %123 = arith.divf %121, %122 : vector<8x256xf32>
    %124 = arith.mulf %115, %96 : vector<8x256xf32>
    %125 = arith.mulf %109, %117 : vector<8x256xf32>
    %126 = arith.addf %124, %125 : vector<8x256xf32>
    %127 = math.tanh %126 : vector<8x256xf32>
    %128 = arith.mulf %123, %127 : vector<8x256xf32>
    %c32 = arith.constant 32 : index
    %c0_38 = arith.constant 0 : index
    %129 = vector.load %arg9[%c32, %c0_38] : memref<64x1024xf32, #tpu.memory_space<vmem>>, vector<8x1024xf32>
    %130 = arith.truncf %128 : vector<8x256xf32> to vector<8x256xbf16>
    %c0_39 = arith.constant 0 : index
    %c0_40 = arith.constant 0 : index
    %131 = vector.load %arg8[%c0_39, %c0_40] : memref<256x1024xbf16, #tpu.memory_space<vmem>>, vector<256x1024xbf16>
    %cst_41 = arith.constant dense<0.000000e+00> : vector<8x1024xf32>
    %132 = tpu.matmul %130, %131, %cst_41 {dimension_numbers = #tpu.dot_dimension_numbers<[1], [0], [0], [1], [0, 0, 1, 1], [], []>} : vector<8x256xbf16>, vector<256x1024xbf16>, vector<8x1024xf32> -> vector<8x1024xf32>
    %133 = arith.addf %129, %132 : vector<8x1024xf32>
    %134 = vector.extract_strided_slice %133 {offsets = [0, 0], sizes = [8, 256], strides = [1, 1]} : vector<8x1024xf32> to vector<8x256xf32>
    %135 = arith.negf %134 : vector<8x256xf32>
    %136 = math.exp %135 : vector<8x256xf32>
    %cst_42 = arith.constant 1.000000e+00 : f32
    %137 = vector.broadcast %cst_42 : f32 to vector<8x256xf32>
    %138 = arith.addf %137, %136 : vector<8x256xf32>
    %139 = arith.divf %137, %138 : vector<8x256xf32>
    %140 = vector.extract_strided_slice %133 {offsets = [0, 256], sizes = [8, 256], strides = [1, 1]} : vector<8x1024xf32> to vector<8x256xf32>
    %141 = arith.negf %140 : vector<8x256xf32>
    %142 = math.exp %141 : vector<8x256xf32>
    %cst_43 = arith.constant 1.000000e+00 : f32
    %143 = vector.broadcast %cst_43 : f32 to vector<8x256xf32>
    %144 = arith.addf %143, %142 : vector<8x256xf32>
    %145 = arith.divf %143, %144 : vector<8x256xf32>
    %146 = vector.extract_strided_slice %133 {offsets = [0, 512], sizes = [8, 256], strides = [1, 1]} : vector<8x1024xf32> to vector<8x256xf32>
    %147 = math.tanh %146 : vector<8x256xf32>
    %148 = vector.extract_strided_slice %133 {offsets = [0, 768], sizes = [8, 256], strides = [1, 1]} : vector<8x1024xf32> to vector<8x256xf32>
    %149 = arith.negf %148 : vector<8x256xf32>
    %150 = math.exp %149 : vector<8x256xf32>
    %cst_44 = arith.constant 1.000000e+00 : f32
    %151 = vector.broadcast %cst_44 : f32 to vector<8x256xf32>
    %152 = arith.addf %151, %150 : vector<8x256xf32>
    %153 = arith.divf %151, %152 : vector<8x256xf32>
    %154 = arith.mulf %145, %126 : vector<8x256xf32>
    %155 = arith.mulf %139, %147 : vector<8x256xf32>
    %156 = arith.addf %154, %155 : vector<8x256xf32>
    %157 = math.tanh %156 : vector<8x256xf32>
    %158 = arith.mulf %153, %157 : vector<8x256xf32>
    %c40 = arith.constant 40 : index
    %c0_45 = arith.constant 0 : index
    %159 = vector.load %arg9[%c40, %c0_45] : memref<64x1024xf32, #tpu.memory_space<vmem>>, vector<8x1024xf32>
    %160 = arith.truncf %158 : vector<8x256xf32> to vector<8x256xbf16>
    %c0_46 = arith.constant 0 : index
    %c0_47 = arith.constant 0 : index
    %161 = vector.load %arg8[%c0_46, %c0_47] : memref<256x1024xbf16, #tpu.memory_space<vmem>>, vector<256x1024xbf16>
    %cst_48 = arith.constant dense<0.000000e+00> : vector<8x1024xf32>
    %162 = tpu.matmul %160, %161, %cst_48 {dimension_numbers = #tpu.dot_dimension_numbers<[1], [0], [0], [1], [0, 0, 1, 1], [], []>} : vector<8x256xbf16>, vector<256x1024xbf16>, vector<8x1024xf32> -> vector<8x1024xf32>
    %163 = arith.addf %159, %162 : vector<8x1024xf32>
    %164 = vector.extract_strided_slice %163 {offsets = [0, 0], sizes = [8, 256], strides = [1, 1]} : vector<8x1024xf32> to vector<8x256xf32>
    %165 = arith.negf %164 : vector<8x256xf32>
    %166 = math.exp %165 : vector<8x256xf32>
    %cst_49 = arith.constant 1.000000e+00 : f32
    %167 = vector.broadcast %cst_49 : f32 to vector<8x256xf32>
    %168 = arith.addf %167, %166 : vector<8x256xf32>
    %169 = arith.divf %167, %168 : vector<8x256xf32>
    %170 = vector.extract_strided_slice %163 {offsets = [0, 256], sizes = [8, 256], strides = [1, 1]} : vector<8x1024xf32> to vector<8x256xf32>
    %171 = arith.negf %170 : vector<8x256xf32>
    %172 = math.exp %171 : vector<8x256xf32>
    %cst_50 = arith.constant 1.000000e+00 : f32
    %173 = vector.broadcast %cst_50 : f32 to vector<8x256xf32>
    %174 = arith.addf %173, %172 : vector<8x256xf32>
    %175 = arith.divf %173, %174 : vector<8x256xf32>
    %176 = vector.extract_strided_slice %163 {offsets = [0, 512], sizes = [8, 256], strides = [1, 1]} : vector<8x1024xf32> to vector<8x256xf32>
    %177 = math.tanh %176 : vector<8x256xf32>
    %178 = vector.extract_strided_slice %163 {offsets = [0, 768], sizes = [8, 256], strides = [1, 1]} : vector<8x1024xf32> to vector<8x256xf32>
    %179 = arith.negf %178 : vector<8x256xf32>
    %180 = math.exp %179 : vector<8x256xf32>
    %cst_51 = arith.constant 1.000000e+00 : f32
    %181 = vector.broadcast %cst_51 : f32 to vector<8x256xf32>
    %182 = arith.addf %181, %180 : vector<8x256xf32>
    %183 = arith.divf %181, %182 : vector<8x256xf32>
    %184 = arith.mulf %175, %156 : vector<8x256xf32>
    %185 = arith.mulf %169, %177 : vector<8x256xf32>
    %186 = arith.addf %184, %185 : vector<8x256xf32>
    %187 = math.tanh %186 : vector<8x256xf32>
    %188 = arith.mulf %183, %187 : vector<8x256xf32>
    %c48 = arith.constant 48 : index
    %c0_52 = arith.constant 0 : index
    %189 = vector.load %arg9[%c48, %c0_52] : memref<64x1024xf32, #tpu.memory_space<vmem>>, vector<8x1024xf32>
    %190 = arith.truncf %188 : vector<8x256xf32> to vector<8x256xbf16>
    %c0_53 = arith.constant 0 : index
    %c0_54 = arith.constant 0 : index
    %191 = vector.load %arg8[%c0_53, %c0_54] : memref<256x1024xbf16, #tpu.memory_space<vmem>>, vector<256x1024xbf16>
    %cst_55 = arith.constant dense<0.000000e+00> : vector<8x1024xf32>
    %192 = tpu.matmul %190, %191, %cst_55 {dimension_numbers = #tpu.dot_dimension_numbers<[1], [0], [0], [1], [0, 0, 1, 1], [], []>} : vector<8x256xbf16>, vector<256x1024xbf16>, vector<8x1024xf32> -> vector<8x1024xf32>
    %193 = arith.addf %189, %192 : vector<8x1024xf32>
    %194 = vector.extract_strided_slice %193 {offsets = [0, 0], sizes = [8, 256], strides = [1, 1]} : vector<8x1024xf32> to vector<8x256xf32>
    %195 = arith.negf %194 : vector<8x256xf32>
    %196 = math.exp %195 : vector<8x256xf32>
    %cst_56 = arith.constant 1.000000e+00 : f32
    %197 = vector.broadcast %cst_56 : f32 to vector<8x256xf32>
    %198 = arith.addf %197, %196 : vector<8x256xf32>
    %199 = arith.divf %197, %198 : vector<8x256xf32>
    %200 = vector.extract_strided_slice %193 {offsets = [0, 256], sizes = [8, 256], strides = [1, 1]} : vector<8x1024xf32> to vector<8x256xf32>
    %201 = arith.negf %200 : vector<8x256xf32>
    %202 = math.exp %201 : vector<8x256xf32>
    %cst_57 = arith.constant 1.000000e+00 : f32
    %203 = vector.broadcast %cst_57 : f32 to vector<8x256xf32>
    %204 = arith.addf %203, %202 : vector<8x256xf32>
    %205 = arith.divf %203, %204 : vector<8x256xf32>
    %206 = vector.extract_strided_slice %193 {offsets = [0, 512], sizes = [8, 256], strides = [1, 1]} : vector<8x1024xf32> to vector<8x256xf32>
    %207 = math.tanh %206 : vector<8x256xf32>
    %208 = vector.extract_strided_slice %193 {offsets = [0, 768], sizes = [8, 256], strides = [1, 1]} : vector<8x1024xf32> to vector<8x256xf32>
    %209 = arith.negf %208 : vector<8x256xf32>
    %210 = math.exp %209 : vector<8x256xf32>
    %cst_58 = arith.constant 1.000000e+00 : f32
    %211 = vector.broadcast %cst_58 : f32 to vector<8x256xf32>
    %212 = arith.addf %211, %210 : vector<8x256xf32>
    %213 = arith.divf %211, %212 : vector<8x256xf32>
    %214 = arith.mulf %205, %186 : vector<8x256xf32>
    %215 = arith.mulf %199, %207 : vector<8x256xf32>
    %216 = arith.addf %214, %215 : vector<8x256xf32>
    %217 = math.tanh %216 : vector<8x256xf32>
    %218 = arith.mulf %213, %217 : vector<8x256xf32>
    %c56 = arith.constant 56 : index
    %c0_59 = arith.constant 0 : index
    %219 = vector.load %arg9[%c56, %c0_59] : memref<64x1024xf32, #tpu.memory_space<vmem>>, vector<8x1024xf32>
    %220 = arith.truncf %218 : vector<8x256xf32> to vector<8x256xbf16>
    %c0_60 = arith.constant 0 : index
    %c0_61 = arith.constant 0 : index
    %221 = vector.load %arg8[%c0_60, %c0_61] : memref<256x1024xbf16, #tpu.memory_space<vmem>>, vector<256x1024xbf16>
    %cst_62 = arith.constant dense<0.000000e+00> : vector<8x1024xf32>
    %222 = tpu.matmul %220, %221, %cst_62 {dimension_numbers = #tpu.dot_dimension_numbers<[1], [0], [0], [1], [0, 0, 1, 1], [], []>} : vector<8x256xbf16>, vector<256x1024xbf16>, vector<8x1024xf32> -> vector<8x1024xf32>
    %223 = arith.addf %219, %222 : vector<8x1024xf32>
    %224 = vector.extract_strided_slice %223 {offsets = [0, 0], sizes = [8, 256], strides = [1, 1]} : vector<8x1024xf32> to vector<8x256xf32>
    %225 = arith.negf %224 : vector<8x256xf32>
    %226 = math.exp %225 : vector<8x256xf32>
    %cst_63 = arith.constant 1.000000e+00 : f32
    %227 = vector.broadcast %cst_63 : f32 to vector<8x256xf32>
    %228 = arith.addf %227, %226 : vector<8x256xf32>
    %229 = arith.divf %227, %228 : vector<8x256xf32>
    %230 = vector.extract_strided_slice %223 {offsets = [0, 256], sizes = [8, 256], strides = [1, 1]} : vector<8x1024xf32> to vector<8x256xf32>
    %231 = arith.negf %230 : vector<8x256xf32>
    %232 = math.exp %231 : vector<8x256xf32>
    %cst_64 = arith.constant 1.000000e+00 : f32
    %233 = vector.broadcast %cst_64 : f32 to vector<8x256xf32>
    %234 = arith.addf %233, %232 : vector<8x256xf32>
    %235 = arith.divf %233, %234 : vector<8x256xf32>
    %236 = vector.extract_strided_slice %223 {offsets = [0, 512], sizes = [8, 256], strides = [1, 1]} : vector<8x1024xf32> to vector<8x256xf32>
    %237 = math.tanh %236 : vector<8x256xf32>
    %238 = vector.extract_strided_slice %223 {offsets = [0, 768], sizes = [8, 256], strides = [1, 1]} : vector<8x1024xf32> to vector<8x256xf32>
    %239 = arith.negf %238 : vector<8x256xf32>
    %240 = math.exp %239 : vector<8x256xf32>
    %cst_65 = arith.constant 1.000000e+00 : f32
    %241 = vector.broadcast %cst_65 : f32 to vector<8x256xf32>
    %242 = arith.addf %241, %240 : vector<8x256xf32>
    %243 = arith.divf %241, %242 : vector<8x256xf32>
    %244 = arith.mulf %235, %216 : vector<8x256xf32>
    %245 = arith.mulf %229, %237 : vector<8x256xf32>
    %246 = arith.addf %244, %245 : vector<8x256xf32>
    %247 = math.tanh %246 : vector<8x256xf32>
    %248 = arith.mulf %243, %247 : vector<8x256xf32>
    %c0_66 = arith.constant 0 : index
    %c0_67 = arith.constant 0 : index
    %249 = vector.load %arg5[%c0_66, %c0_67] : memref<256x10xf32, #tpu.memory_space<vmem>>, vector<256x10xf32>
    %cst_68 = arith.constant dense<0.000000e+00> : vector<8x10xf32>
    %250 = tpu.matmul %248, %249, %cst_68 {dimension_numbers = #tpu.dot_dimension_numbers<[1], [0], [0], [1], [0, 0, 1, 1], [], []>} : vector<8x256xf32>, vector<256x10xf32>, vector<8x10xf32> -> vector<8x10xf32>
    %c0_69 = arith.constant 0 : index
    %c0_70 = arith.constant 0 : index
    %251 = vector.load %arg6[%c0_69, %c0_70] : memref<1x10xf32, #tpu.memory_space<vmem>>, vector<1x10xf32>
    %252 = vector.broadcast %251 : vector<1x10xf32> to vector<8x10xf32>
    %253 = arith.addf %250, %252 : vector<8x10xf32>
    %cst_71 = arith.constant dense<0xFF800000> : vector<8xf32>
    %254 = vector.multi_reduction <maximumf>, %253, %cst_71 [1] : vector<8x10xf32> to vector<8xf32>
    %255 = vector.shape_cast %254 : vector<8xf32> to vector<8x1xf32>
    %256 = vector.broadcast %255 : vector<8x1xf32> to vector<8x10xf32>
    %257 = arith.subf %253, %256 : vector<8x10xf32>
    %258 = math.exp %257 : vector<8x10xf32>
    %cst_72 = arith.constant dense<0.000000e+00> : vector<8xf32>
    %259 = vector.multi_reduction <add>, %258, %cst_72 [1] : vector<8x10xf32> to vector<8xf32>
    %260 = vector.shape_cast %259 : vector<8xf32> to vector<8x1xf32>
    %261 = math.log %260 : vector<8x1xf32>
    %262 = vector.broadcast %261 : vector<8x1xf32> to vector<8x10xf32>
    %263 = arith.subf %257, %262 : vector<8x10xf32>
    %c0_73 = arith.constant 0 : index
    %c0_74 = arith.constant 0 : index
    %264 = vector.load %arg7[%c0_73, %c0_74] : memref<8x10xf32, #tpu.memory_space<vmem>>, vector<8x10xf32>
    tpu.vector_store %arg7[%c0_73, %c0_74], %263 {strides = array<i32>} : memref<8x10xf32, #tpu.memory_space<vmem>>, vector<8x10xf32>,
    return
  }
  func.func @transform_0(%arg0: i32) -> (i32, i32) {
    %c0_i32 = arith.constant 0 : i32
    %c0_i32_0 = arith.constant 0 : i32
    %c0_i32_1 = arith.constant 0 : i32
    return %c0_i32, %c0_i32_0 : i32, i32
  }
  func.func @transform_1(%arg0: i32) -> (i32, i32) {
    %c0_i32 = arith.constant 0 : i32
    %c0_i32_0 = arith.constant 0 : i32
    %c0_i32_1 = arith.constant 0 : i32
    return %c0_i32, %c0_i32_0 : i32, i32
  }
  func.func @transform_2(%arg0: i32) -> (i32, i32) {
    %c0_i32 = arith.constant 0 : i32
    %c0_i32_0 = arith.constant 0 : i32
    %c0_i32_1 = arith.constant 0 : i32
    return %c0_i32, %c0_i32_0 : i32, i32
  }
  func.func @transform_4(%arg0: i32) -> (i32, i32) {
    %c0_i32 = arith.constant 0 : i32
    %c0_i32_0 = arith.constant 0 : i32
    %c0_i32_1 = arith.constant 0 : i32
    return %c0_i32, %c0_i32_0 : i32, i32
  }
  func.func @transform_5(%arg0: i32) -> (i32, i32) {
    %c0_i32 = arith.constant 0 : i32
    %c0_i32_0 = arith.constant 0 : i32
    %c0_i32_1 = arith.constant 0 : i32
    return %c0_i32, %c0_i32_0 : i32, i32
  }
  func.func @transform_6(%arg0: i32) -> (i32, i32) {
    %c0_i32 = arith.constant 0 : i32
    %c0_i32_0 = arith.constant 0 : i32
    %c0_i32_1 = arith.constant 0 : i32
    return %c0_i32, %c0_i32_0 : i32, i32
  }
}

</mosaic_0001>

<bundles_post_ra>
// kernel: forward.1
= control target key start
LH: loop header
LB: loop body
LE: loop exit
PB: predicated region body
PF: predicated region fallthrough
CT: control target
= control target key end

     0   :  { %vm85_vm0 = vcmask 195584   ;;  %s5236_s15 = smov [#allocation2]   ;;  %s7874_s1 = inlined_call_operand.vmem [shape: f32[24,1024], index: 1, kind: input, shape index: {}]   ;;  %s7875_s0 = inlined_call_operand.vmem [shape: f32[64,24], index: 0, kind: input, shape index: {}]   ;;  %s7876_s2 = inlined_call_operand.vmem [shape: f32[1,1024], index: 2, kind: input, shape index: {}]   ;;  %s7877_s3 = inlined_call_operand.hbm [shape: bf16[256,1024], index: 3, kind: input, shape index: {}]   ;;  %s7878_s4 = inlined_call_operand.vmem [shape: f32[256,10], index: 4, kind: input, shape index: {}]   ;;  %s7879_s5 = inlined_call_operand.vmem [shape: f32[1,10], index: 5, kind: input, shape index: {}]   ;;  %s7880_s6 = inlined_call_operand.vmem [shape: f32[8,10], index: 6, kind: output, shape index: {}]  }
   0x1   :  { %v59_v0 = vld [vmem:[%s7874_s1 + $0x80] sm:$0xff]  ;;  %v60_v1 = vld [vmem:[%s7874_s1 + $0x88] sm:$0xff]  ;;  %v5294_v6 = vld [vmem:[%s7875_s0 + $0x38] sm:$0xff]  ;;  %s29_s14 = sshll.u32 %s7877_s3, 4  ;;  %s31_s16 = sshll.u32 %s5236_s15, 4  ;;  %s30_s14 = int_to_ptr.hbm [resolvable:$true] %s29_s14  ;;  %s32_s16 = int_to_ptr.vmem [resolvable:$true] %s31_s16 }
   0x2   :  { %v51_v2 = vld [vmem:[%s7874_s1 + $0x40] sm:$0xff]  ;;  %4941 = vmatpush.msra.mxu2 %v59_v0  ;;  %4944 = vmatpush.msra.mxu3 %v60_v1  ;;  %v52_v3 = vld [vmem:[%s7874_s1 + $0x48] sm:$0xff]  ;;  %v61_v7 = vld [vmem:[%s7874_s1 + $0x90] sm:$0xff]  ;;  %34 = dma.hbm_to_vmem [thread:$0]  %s30_s14, 16384, %s32_s16, [#allocation4] }
   0x3   :  { %v43_v4 = vld [vmem:[%s7874_s1] sm:$0xff]  ;;  %v44_v5 = vld [vmem:[%s7874_s1 + $0x8] sm:$0xff]  ;;  %123 = vmatpush.msra.mxu0 %v59_v0  ;;  %164 = vmatpush.msra.mxu1 %v60_v1  ;;  %v62_v8 = vld [vmem:[%s7874_s1 + $0x98] sm:$0xff] }
   0x4   :  { %4942 = vmatpush.msra.mxu2 %v51_v2  ;;  %4945 = vmatpush.msra.mxu3 %v52_v3  ;;  %v53_v9 = vld [vmem:[%s7874_s1 + $0x50] sm:$0xff]  ;;  %v54_v10 = vld [vmem:[%s7874_s1 + $0x58] sm:$0xff]  ;;  %v5321_v13 = vld [vmem:[%s7875_s0] sm:$0xff] }
   0x5   :  { %124 = vmatpush.msra.mxu0 %v51_v2  ;;  %165 = vmatpush.msra.mxu1 %v52_v3  ;;  %v45_v11 = vld [vmem:[%s7874_s1 + $0x10] sm:$0xff]  ;;  %v46_v12 = vld [vmem:[%s7874_s1 + $0x18] sm:$0xff]  ;;  %v63_v16 = vld [vmem:[%s7874_s1 + $0xa0] sm:$0xff] }
   0x6   :  { %4943 = vmatpush.msra.mxu2 %v43_v4  ;;  %4946 = vmatpush.msra.mxu3 %v44_v5  ;;  %v65_v14 = vld [vmem:[%s7874_s1 + $0xb0] sm:$0xff]  ;;  %v66_v15 = vld [vmem:[%s7874_s1 + $0xb8] sm:$0xff]  ;;  %v64_v17 = vld [vmem:[%s7874_s1 + $0xa8] sm:$0xff] }
   0x7   :  { %4195 = vmatmul.msk.f32.vlgmr.msra.gmra.mxu2 %vm85_vm0, %v5294_v6  ;;  %4203 = vmatmul.msk.f32.vlgmr.msra.gmra.mxu3 %vm85_vm0, %v5294_v6  ;;  %v57_v18 = vld [vmem:[%s7874_s1 + $0x70] sm:$0xff]  ;;  %v58_v19 = vld [vmem:[%s7874_s1 + $0x78] sm:$0xff]  ;;  %v55_v20 = vld [vmem:[%s7874_s1 + $0x60] sm:$0xff] }
   0x8   :  { %205 = vmatpush.msrb.mxu2 %v61_v7  ;;  %246 = vmatpush.msrb.mxu3 %v62_v8  ;;  %v56_v21 = vld [vmem:[%s7874_s1 + $0x68] sm:$0xff]  ;;  %v49_v23 = vld [vmem:[%s7874_s1 + $0x30] sm:$0xff]  ;;  %v50_v24 = vld [vmem:[%s7874_s1 + $0x38] sm:$0xff] }
   0x9   :  { %125 = vmatpush.msra.mxu0 %v43_v4  ;;  %166 = vmatpush.msra.mxu1 %v44_v5  ;;  %v36_v22 = vld [vmem:[%s7875_s0 + $0x8] sm:$0xff]  ;;  %v37_v25 = vld [vmem:[%s7875_s0 + $0x10] sm:$0xff]  ;;  %v47_v26 = vld [vmem:[%s7874_s1 + $0x20] sm:$0xff] }
   0xa   :  { %206 = vmatpush.msrb.mxu2 %v53_v9  ;;  %247 = vmatpush.msrb.mxu3 %v54_v10  ;;  %v48_v27 = vld [vmem:[%s7874_s1 + $0x28] sm:$0xff]  ;;  %v38_v28 = vld [vmem:[%s7875_s0 + $0x18] sm:$0xff]  ;;  %v39_v29 = vld [vmem:[%s7875_s0 + $0x20] sm:$0xff] }
   0xb   :  { %4188 = vmatmul.msk.f32.vlgmr.msra.gmra.mxu0 %vm85_vm0, %v5321_v13  ;;  %4196 = vmatmul.msk.f32.vlgmr.msra.gmra.mxu1 %vm85_vm0, %v5321_v13  ;;  %v40_v30 = vld [vmem:[%s7875_s0 + $0x28] sm:$0xff]  ;;  %v41_v31 = vld [vmem:[%s7875_s0 + $0x30] sm:$0xff]  ;;  %v5452_v32 = vld [vmem:[%s7876_s2] sm:$0xff] }
   0xc   :  { %207 = vmatpush.msrb.mxu2 %v45_v11  ;;  %248 = vmatpush.msrb.mxu3 %v46_v12  ;;  %v5459_v33 = vperm.slane %v5452_v32, 0  ;;  %v5462_v34 = vperm.slane %v5452_v32, 1  ;;  %v5480_v43 = vperm.slane %v5452_v32, 2  ;;  %v5483_v44 = vperm.slane %v5452_v32, 3 }
   0xd   :  { %287 = vmatpush.msrb.mxu0 %v63_v16  ;;  %328 = vmatpush.msrb.mxu1 %v64_v17 }
   0xe   :  { %369 = vmatpush.msra.mxu2 %v65_v14  ;;  %410 = vmatpush.msra.mxu3 %v66_v15 }
   0xf   :  { %4204 = vmatmul.msk.f32.vlgmr.msrb.gmra.mxu2 %vm85_vm0, %v5321_v13  ;;  %4212 = vmatmul.msk.f32.vlgmr.msrb.gmra.mxu3 %vm85_vm0, %v5321_v13 }
  0x10   :  { %370 = vmatpush.msra.mxu2 %v57_v18  ;;  %411 = vmatpush.msra.mxu3 %v58_v19 }
  0x11   :  { %288 = vmatpush.msrb.mxu0 %v55_v20  ;;  %329 = vmatpush.msrb.mxu1 %v56_v21 }
  0x12   :  { %371 = vmatpush.msra.mxu2 %v49_v23  ;;  %412 = vmatpush.msra.mxu3 %v50_v24 }
  0x13   :  { %4189 = vmatmul.msk.f32.gmra.mxu0 %vm85_vm0, %v36_v22  ;;  %4197 = vmatmul.msk.f32.gmra.mxu1 %vm85_vm0, %v36_v22 }
  0x14   :  { %289 = vmatpush.msrb.mxu0 %v47_v26  ;;  %330 = vmatpush.msrb.mxu1 %v48_v27 }
  0x17   :  { %4205 = vmatmul.msk.f32.gmra.mxu2 %vm85_vm0, %v36_v22  ;;  %4213 = vmatmul.msk.f32.gmra.mxu3 %vm85_vm0, %v36_v22 }
  0x1b   :  { %4190 = vmatmul.msk.f32.gmra.mxu0 %vm85_vm0, %v37_v25  ;;  %4198 = vmatmul.msk.f32.gmra.mxu1 %vm85_vm0, %v37_v25 }
  0x1f   :  { %4206 = vmatmul.msk.f32.gmra.mxu2 %vm85_vm0, %v37_v25  ;;  %4214 = vmatmul.msk.f32.gmra.mxu3 %vm85_vm0, %v37_v25 }
  0x23   :  { %4191 = vmatmul.msk.f32.gmra.mxu0 %vm85_vm0, %v38_v28  ;;  %4199 = vmatmul.msk.f32.gmra.mxu1 %vm85_vm0, %v38_v28 }
  0x27   :  { %4207 = vmatmul.msk.f32.gmra.mxu2 %vm85_vm0, %v38_v28  ;;  %4215 = vmatmul.msk.f32.gmra.mxu3 %vm85_vm0, %v38_v28 }
  0x2b   :  { %4192 = vmatmul.msk.f32.gmra.mxu0 %vm85_vm0, %v39_v29  ;;  %4200 = vmatmul.msk.f32.gmra.mxu1 %vm85_vm0, %v39_v29 }
  0x2f   :  { %4208 = vmatmul.msk.f32.gmra.mxu2 %vm85_vm0, %v39_v29  ;;  %4216 = vmatmul.msk.f32.gmra.mxu3 %vm85_vm0, %v39_v29 }
  0x33   :  { %4193 = vmatmul.msk.f32.gmra.mxu0 %vm85_vm0, %v40_v30  ;;  %4201 = vmatmul.msk.f32.gmra.mxu1 %vm85_vm0, %v40_v30 }
  0x37   :  { %4209 = vmatmul.msk.f32.gmra.mxu2 %vm85_vm0, %v40_v30  ;;  %4217 = vmatmul.msk.f32.gmra.mxu3 %vm85_vm0, %v40_v30 }
  0x3b   :  { %4194 = vmatmul.msk.f32.gmra.mxu0 %vm85_vm0, %v41_v31  ;;  %4202 = vmatmul.msk.f32.gmra.mxu1 %vm85_vm0, %v41_v31 }
  0x3f   :  { %4210 = vmatmul.msk.f32.gmra.mxu2 %vm85_vm0, %v41_v31  ;;  %4218 = vmatmul.msk.f32.gmra.mxu3 %vm85_vm0, %v41_v31 }
  0x43   :  { %4220 = vmatmul.msk.f32.vlgmr.msrb.gmra.mxu0 %vm85_vm0, %v5321_v13  ;;  %4228 = vmatmul.msk.f32.vlgmr.msrb.gmra.mxu1 %vm85_vm0, %v5321_v13 }
  0x47   :  { %4211 = vmatmul.msk.f32.gmra.mxu2 %vm85_vm0, %v5294_v6  ;;  %4219 = vmatmul.msk.f32.gmra.mxu3 %vm85_vm0, %v5294_v6 }
  0x4b   :  { %4221 = vmatmul.msk.f32.gmra.mxu0 %vm85_vm0, %v36_v22  ;;  %4229 = vmatmul.msk.f32.gmra.mxu1 %vm85_vm0, %v36_v22 }
  0x4f   :  { %4236 = vmatmul.msk.f32.vlgmr.msra.gmra.mxu2 %vm85_vm0, %v5321_v13  ;;  %4244 = vmatmul.msk.f32.vlgmr.msra.gmra.mxu3 %vm85_vm0, %v5321_v13 }
  0x53   :  { %4222 = vmatmul.msk.f32.gmra.mxu0 %vm85_vm0, %v37_v25  ;;  %4230 = vmatmul.msk.f32.gmra.mxu1 %vm85_vm0, %v37_v25 }
  0x57   :  { %4237 = vmatmul.msk.f32.gmra.mxu2 %vm85_vm0, %v36_v22  ;;  %4245 = vmatmul.msk.f32.gmra.mxu3 %vm85_vm0, %v36_v22 }
  0x5b   :  { %4223 = vmatmul.msk.f32.gmra.mxu0 %vm85_vm0, %v38_v28  ;;  %4231 = vmatmul.msk.f32.gmra.mxu1 %vm85_vm0, %v38_v28 }
  0x5f   :  { %4238 = vmatmul.msk.f32.gmra.mxu2 %vm85_vm0, %v37_v25  ;;  %4246 = vmatmul.msk.f32.gmra.mxu3 %vm85_vm0, %v37_v25 }
  0x63   :  { %4224 = vmatmul.msk.f32.gmra.mxu0 %vm85_vm0, %v39_v29  ;;  %4232 = vmatmul.msk.f32.gmra.mxu1 %vm85_vm0, %v39_v29 }
  0x67   :  { %4239 = vmatmul.msk.f32.gmra.mxu2 %vm85_vm0, %v38_v28  ;;  %4247 = vmatmul.msk.f32.gmra.mxu3 %vm85_vm0, %v38_v28 }
  0x6b   :  { %4225 = vmatmul.msk.f32.gmra.mxu0 %vm85_vm0, %v40_v30  ;;  %4233 = vmatmul.msk.f32.gmra.mxu1 %vm85_vm0, %v40_v30 }
  0x6f   :  { %4240 = vmatmul.msk.f32.gmra.mxu2 %vm85_vm0, %v39_v29  ;;  %4248 = vmatmul.msk.f32.gmra.mxu3 %vm85_vm0, %v39_v29  ;;  %v73_v29 = vperm.slane %v5452_v32, 4 }
  0x73   :  { %4226 = vmatmul.msk.f32.gmra.mxu0 %vm85_vm0, %v41_v31  ;;  %4234 = vmatmul.msk.f32.gmra.mxu1 %vm85_vm0, %v41_v31 }
  0x77   :  { %4241 = vmatmul.msk.f32.gmra.mxu2 %vm85_vm0, %v40_v30  ;;  %4249 = vmatmul.msk.f32.gmra.mxu3 %vm85_vm0, %v40_v30  ;;  %v74_v30 = vperm.slane %v5452_v32, 5 }
  0x7b   :  { %4227 = vmatmul.msk.f32.gmra.mxu0 %vm85_vm0, %v5294_v6  ;;  %4235 = vmatmul.msk.f32.gmra.mxu1 %vm85_vm0, %v5294_v6 }
  0x7f   :  { %4242 = vmatmul.msk.f32.gmra.mxu2 %vm85_vm0, %v41_v31  ;;  %4250 = vmatmul.msk.f32.gmra.mxu3 %vm85_vm0, %v41_v31 }
  0x87   :  { %4243 = vmatmul.msk.f32.gmra.mxu2 %vm85_vm0, %v5294_v6  ;;  %4251 = vmatmul.msk.f32.gmra.mxu3 %vm85_vm0, %v5294_v6 }
  0x88   :  { %v127_v35 = vpop.f32.mrf.mxu0  ;;  %v168_v36 = vpop.f32.mrf.mxu1 }
  0x89   :  { %v5465_v37 = vadd.f32 %v127_v35, %v5459_v33  ;;  %v5468_v38 = vadd.f32 %v168_v36, %v5462_v34 }
  0x8a   :  { %v148_v39 = vpop.f32.mrf.mxu2  ;;  %v189_v40 = vpop.f32.mrf.mxu3 }
  0x8b   :  { %8147 = vst [vmem:[#allocation10_spill] sm:$0xff] %v5465_v37  ;;  %v5474_v41 = vadd.f32 %v148_v39, %v5459_v33  ;;  %v5477_v42 = vadd.f32 %v189_v40, %v5462_v34 }
  0x8c   :  { %8148 = vst [vmem:[#allocation11_spill] sm:$0xff] %v5468_v38 }
  0x8d   :  { %8149 = vst [vmem:[#allocation12_spill] sm:$0xff] %v5474_v41 }
  0x8e   :  { %8150 = vst [vmem:[#allocation13_spill] sm:$0xff] %v5477_v42 }
  0x90   :  { %v130_v45 = vpop.f32.mrf.mxu0  ;;  %v171_v46 = vpop.f32.mrf.mxu1 }
  0x91   :  { %v5486_v47 = vadd.f32 %v130_v45, %v5459_v33  ;;  %v5489_v48 = vadd.f32 %v171_v46, %v5462_v34 }
  0x92   :  { %v209_v49 = vpop.f32.mrf.mxu2  ;;  %v250_v50 = vpop.f32.mrf.mxu3 }
  0x93   :  { %8151 = vst [vmem:[#allocation14_spill] sm:$0xff] %v5486_v47  ;;  %v5492_v51 = vadd.f32 %v209_v49, %v5480_v43  ;;  %v5495_v52 = vadd.f32 %v250_v50, %v5483_v44 }
  0x94   :  { %8152 = vst [vmem:[#allocation15_spill] sm:$0xff] %v5489_v48 }
  0x95   :  { %8153 = vst [vmem:[#allocation16_spill] sm:$0xff] %v5492_v51 }
  0x96   :  { %8154 = vst [vmem:[#allocation17_spill] sm:$0xff] %v5495_v52 }
  0x98   :  { %v133_v53 = vpop.f32.mrf.mxu0  ;;  %v174_v54 = vpop.f32.mrf.mxu1 }
  0x99   :  { %v5498_v55 = vadd.f32 %v133_v53, %v5459_v33  ;;  %v5501_v56 = vadd.f32 %v174_v54, %v5462_v34 }
  0x9a   :  { %v212_v57 = vpop.f32.mrf.mxu2  ;;  %v253_v58 = vpop.f32.mrf.mxu3 }
  0x9b   :  { %8155 = vst [vmem:[#allocation18_spill] sm:$0xff] %v5498_v55  ;;  %v5504_v59 = vadd.f32 %v212_v57, %v5480_v43  ;;  %v5507_v60 = vadd.f32 %v253_v58, %v5483_v44 }
  0x9c   :  { %8156 = vst [vmem:[#allocation19_spill] sm:$0xff] %v5501_v56 }
  0x9d   :  { %8157 = vst [vmem:[#allocation20_spill] sm:$0xff] %v5504_v59 }
  0x9e   :  { %8158 = vst [vmem:[#allocation21_spill] sm:$0xff] %v5507_v60 }
  0xa0   :  { %v136_v61 = vpop.f32.mrf.mxu0  ;;  %v177_v62 = vpop.f32.mrf.mxu1 }
  0xa1   :  { %v5510_v63 = vadd.f32 %v136_v61, %v5459_v33  ;;  %v5513_v0 = vadd.f32 %v177_v62, %v5462_v34  ;;  %v75_v62 = vperm.slane %v5452_v32, 6 }
  0xa2   :  { %v215_v1 = vpop.f32.mrf.mxu2  ;;  %v256_v2 = vpop.f32.mrf.mxu3 }
  0xa3   :  { %8159 = vst [vmem:[#allocation22_spill] sm:$0xff] %v5510_v63  ;;  %v5516_v3 = vadd.f32 %v215_v1, %v5480_v43  ;;  %v5519_v4 = vadd.f32 %v256_v2, %v5483_v44  ;;  %v76_v1 = vperm.slane %v5452_v32, 7 }
  0xa4   :  { %8160 = vst [vmem:[#allocation23_spill] sm:$0xff] %v5513_v0 }
  0xa5   :  { %8161 = vst [vmem:[#allocation24_spill] sm:$0xff] %v5516_v3 }
  0xa6   :  { %8162 = vst [vmem:[#allocation25_spill] sm:$0xff] %v5519_v4 }
  0xa8   :  { %v139_v5 = vpop.f32.mrf.mxu0  ;;  %v180_v6 = vpop.f32.mrf.mxu1 }
  0xa9   :  { %v5522_v7 = vadd.f32 %v139_v5, %v5459_v33  ;;  %v5525_v8 = vadd.f32 %v180_v6, %v5462_v34 }
  0xaa   :  { %v218_v9 = vpop.f32.mrf.mxu2  ;;  %v259_v10 = vpop.f32.mrf.mxu3 }
  0xab   :  { %8163 = vst [vmem:[#allocation26_spill] sm:$0xff] %v5522_v7  ;;  %v5528_v11 = vadd.f32 %v218_v9, %v5480_v43  ;;  %v5531_v12 = vadd.f32 %v259_v10, %v5483_v44 }
  0xac   :  { %8164 = vst [vmem:[#allocation27_spill] sm:$0xff] %v5525_v8 }
  0xad   :  { %8165 = vst [vmem:[#allocation28_spill] sm:$0xff] %v5528_v11 }
  0xae   :  { %8166 = vst [vmem:[#allocation29_spill] sm:$0xff] %v5531_v12 }
  0xb0   :  { %v142_v13 = vpop.f32.mrf.mxu0  ;;  %v183_v14 = vpop.f32.mrf.mxu1 }
  0xb1   :  { %v5534_v15 = vadd.f32 %v142_v13, %v5459_v33  ;;  %v5537_v16 = vadd.f32 %v183_v14, %v5462_v34 }
  0xb2   :  { %v221_v17 = vpop.f32.mrf.mxu2  ;;  %v262_v18 = vpop.f32.mrf.mxu3 }
  0xb3   :  { %8167 = vst [vmem:[#allocation30_spill] sm:$0xff] %v5534_v15  ;;  %v5540_v19 = vadd.f32 %v221_v17, %v5480_v43  ;;  %v5543_v20 = vadd.f32 %v262_v18, %v5483_v44 }
  0xb4   :  { %8168 = vst [vmem:[#allocation31_spill] sm:$0xff] %v5537_v16 }
  0xb5   :  { %8169 = vst [vmem:[#allocation32_spill] sm:$0xff] %v5540_v19 }
  0xb6   :  { %8170 = vst [vmem:[#allocation33_spill] sm:$0xff] %v5543_v20 }
  0xb8   :  { %v145_v21 = vpop.f32.mrf.mxu0  ;;  %v186_v22 = vpop.f32.mrf.mxu1 }
  0xb9   :  { %v5546_v23 = vadd.f32 %v145_v21, %v5459_v33  ;;  %v5549_v24 = vadd.f32 %v186_v22, %v5462_v34 }
  0xba   :  { %v224_v25 = vpop.f32.mrf.mxu2  ;;  %v265_v26 = vpop.f32.mrf.mxu3 }
  0xbb   :  { %8171 = vst [vmem:[#allocation34_spill] sm:$0xff] %v5546_v23  ;;  %v5552_v27 = vadd.f32 %v224_v25, %v5480_v43  ;;  %v5555_v28 = vadd.f32 %v265_v26, %v5483_v44 }
  0xbc   :  { %8172 = vst [vmem:[#allocation35_spill] sm:$0xff] %v5549_v24 }
  0xbd   :  { %8173 = vst [vmem:[#allocation36_spill] sm:$0xff] %v5552_v27 }
  0xbe   :  { %8174 = vst [vmem:[#allocation37_spill] sm:$0xff] %v5555_v28 }
  0xc0   :  { %v291_v31 = vpop.f32.mrf.mxu0  ;;  %v332_v35 = vpop.f32.mrf.mxu1 }
  0xc1   :  { %v5559_v36 = vadd.f32 %v291_v31, %v73_v29  ;;  %v5561_v33 = vadd.f32 %v332_v35, %v74_v30 }
  0xc2   :  { %v227_v34 = vpop.f32.mrf.mxu2  ;;  %v268_v39 = vpop.f32.mrf.mxu3 }
  0xc3   :  { %8175 = vst [vmem:[#allocation38_spill] sm:$0xff] %v5559_v36  ;;  %v5564_v40 = vadd.f32 %v227_v34, %v5480_v43  ;;  %v5567_v45 = vadd.f32 %v268_v39, %v5483_v44 }
  0xc4   :  { %8176 = vst [vmem:[#allocation39_spill] sm:$0xff] %v5561_v33 }
  0xc5   :  { %8177 = vst [vmem:[#allocation40_spill] sm:$0xff] %v5564_v40 }
  0xc6   :  { %8178 = vst [vmem:[#allocation41_spill] sm:$0xff] %v5567_v45 }
  0xc8   :  { %v294_v46 = vpop.f32.mrf.mxu0  ;;  %v335_v49 = vpop.f32.mrf.mxu1 }
  0xc9   :  { %v5569_v50 = vadd.f32 %v294_v46, %v73_v29  ;;  %v5571_v53 = vadd.f32 %v335_v49, %v74_v30 }
  0xca   :  { %v230_v54 = vpop.f32.mrf.mxu2  ;;  %v271_v57 = vpop.f32.mrf.mxu3 }
  0xcb   :  { %8179 = vst [vmem:[#allocation42_spill] sm:$0xff] %v5569_v50  ;;  %v5574_v58 = vadd.f32 %v230_v54, %v5480_v43  ;;  %v5577_v61 = vadd.f32 %v271_v57, %v5483_v44 }
  0xcc   :  { %8180 = vst [vmem:[#allocation43_spill] sm:$0xff] %v5571_v53 }
  0xcd   :  { %8181 = vst [vmem:[#allocation44_spill] sm:$0xff] %v5574_v58 }
  0xce   :  { %8182 = vst [vmem:[#allocation45_spill] sm:$0xff] %v5577_v61 }
  0xd0   :  { %v297_v2 = vpop.f32.mrf.mxu0  ;;  %v338_v5 = vpop.f32.mrf.mxu1 }
  0xd1   :  { %v5581_v6 = vadd.f32 %v297_v2, %v73_v29  ;;  %v5583_v9 = vadd.f32 %v338_v5, %v74_v30 }
  0xd2   :  { %v373_v10 = vpop.f32.mrf.mxu2  ;;  %v414_v13 = vpop.f32.mrf.mxu3 }
  0xd3   :  { %8183 = vst [vmem:[#allocation46_spill] sm:$0xff] %v5581_v6  ;;  %v5585_v14 = vadd.f32 %v373_v10, %v75_v62  ;;  %v5587_v17 = vadd.f32 %v414_v13, %v76_v1 }
  0xd4   :  { %8184 = vst [vmem:[#allocation47_spill] sm:$0xff] %v5583_v9 }
  0xd5   :  { %8185 = vst [vmem:[#allocation48_spill] sm:$0xff] %v5585_v14 }
  0xd6   :  { %8186 = vst [vmem:[#allocation49_spill] sm:$0xff] %v5587_v17 }
  0xd8   :  { %v300_v43 = vpop.f32.mrf.mxu0  ;;  %v341_v18 = vpop.f32.mrf.mxu1 }
  0xd9   :  { %v5589_v44 = vadd.f32 %v300_v43, %v73_v29  ;;  %v5591_v21 = vadd.f32 %v341_v18, %v74_v30 }
  0xda   :  { %v376_v22 = vpop.f32.mrf.mxu2  ;;  %v417_v32 = vpop.f32.mrf.mxu3 }
  0xdb   :  { %8187 = vst [vmem:[#allocation50_spill] sm:$0xff] %v5589_v44  ;;  %v5593_v25 = vadd.f32 %v376_v22, %v75_v62  ;;  %v5595_v26 = vadd.f32 %v417_v32, %v76_v1 }
  0xdc   :  { %8188 = vst [vmem:[#allocation51_spill] sm:$0xff] %v5591_v21 }
  0xdd   :  { %8189 = vst [vmem:[#allocation52_spill] sm:$0xff] %v5593_v25 }
  0xde   :  { %8190 = vst [vmem:[#allocation53_spill] sm:$0xff] %v5595_v26 }
  0xe0   :  { %v303_v31 = vpop.f32.mrf.mxu0  ;;  %v344_v35 = vpop.f32.mrf.mxu1 }
  0xe1   :  { %v5597_v34 = vadd.f32 %v303_v31, %v73_v29  ;;  %v5599_v39 = vadd.f32 %v344_v35, %v74_v30 }
  0xe2   :  { %v379_v46 = vpop.f32.mrf.mxu2  ;;  %v420_v49 = vpop.f32.mrf.mxu3 }
  0xe3   :  { %8191 = vst [vmem:[#allocation54_spill] sm:$0xff] %v5597_v34  ;;  %v5601_v54 = vadd.f32 %v379_v46, %v75_v62  ;;  %v5603_v57 = vadd.f32 %v420_v49, %v76_v1 }
  0xe4   :  { %8192 = vst [vmem:[#allocation55_spill] sm:$0xff] %v5599_v39 }
  0xe5   :  { %8193 = vst [vmem:[#allocation56_spill] sm:$0xff] %v5601_v54 }
  0xe6   :  { %8194 = vst [vmem:[#allocation57_spill] sm:$0xff] %v5603_v57 }
  0xe8   :  { %v306_v2 = vpop.f32.mrf.mxu0  ;;  %v347_v5 = vpop.f32.mrf.mxu1 }
  0xe9   :  { %v5605_v10 = vadd.f32 %v306_v2, %v73_v29  ;;  %v5607_v13 = vadd.f32 %v347_v5, %v74_v30 }
  0xea   :  { %v382_v43 = vpop.f32.mrf.mxu2  ;;  %v423_v18 = vpop.f32.mrf.mxu3 }
  0xeb   :  { %8195 = vst [vmem:[#allocation58_spill] sm:$0xff] %v5605_v10  ;;  %v5609_v22 = vadd.f32 %v382_v43, %v75_v62  ;;  %v5611_v32 = vadd.f32 %v423_v18, %v76_v1 }
  0xec   :  { %8196 = vst [vmem:[#allocation59_spill] sm:$0xff] %v5607_v13 }
  0xed   :  { %8197 = vst [vmem:[#allocation60_spill] sm:$0xff] %v5609_v22 }
  0xee   :  { %8198 = vst [vmem:[#allocation61_spill] sm:$0xff] %v5611_v32 }
  0xf0   :  { %v309_v31 = vpop.f32.mrf.mxu0  ;;  %v350_v35 = vpop.f32.mrf.mxu1 }
  0xf1   :  { %v5613_v42 = vadd.f32 %v309_v31, %v73_v29  ;;  %v5615_v46 = vadd.f32 %v350_v35, %v74_v30 }
  0xf2   :  { %v385_v49 = vpop.f32.mrf.mxu2  ;;  %v426_v61 = vpop.f32.mrf.mxu3 }
  0xf3   :  { %8199 = vst [vmem:[#allocation62_spill] sm:$0xff] %v5613_v42  ;;  %v5617_v41 = vadd.f32 %v385_v49, %v75_v62  ;;  %v5619_v2 = vadd.f32 %v426_v61, %v76_v1 }
  0xf4   :  { %8200 = vst [vmem:[#allocation63_spill] sm:$0xff] %v5615_v46 }
  0xf5   :  { %8201 = vst [vmem:[#allocation64_spill] sm:$0xff] %v5617_v41 }
  0xf6   :  { %8202 = vst [vmem:[#allocation65_spill] sm:$0xff] %v5619_v2 }
  0xf8   :  { %v312_v5 = vpop.f32.mrf.mxu0  ;;  %v353_v58 = vpop.f32.mrf.mxu1 }
  0xf9   :  { %v5621_v24 = vadd.f32 %v312_v5, %v73_v29  ;;  %v5623_v43 = vadd.f32 %v353_v58, %v74_v30 }
  0xfa   :  { %v388_v18 = vpop.f32.mrf.mxu2  ;;  %v429_v45 = vpop.f32.mrf.mxu3 }
  0xfb   :  { %8203 = vst [vmem:[#allocation66_spill] sm:$0xff] %v5621_v24  ;;  %v5625_v23 = vadd.f32 %v388_v18, %v75_v62  ;;  %v5627_v31 = vadd.f32 %v429_v45, %v76_v1 }
  0xfc   :  { %8204 = vst [vmem:[#allocation67_spill] sm:$0xff] %v5623_v43 }
  0xfd   :  { %8205 = vst [vmem:[#allocation68_spill] sm:$0xff] %v5625_v23 }
  0xfe   :  { %8206 = vst [vmem:[#allocation69_spill] sm:$0xff] %v5627_v31 }
 0x102   :  { %v391_v35 = vpop.f32.mrf.mxu2  ;;  %v432_v46 = vpop.f32.mrf.mxu3 }
 0x103   :  { %v5629_v42 = vadd.f32 %v391_v35, %v75_v62  ;;  %v5631_v49 = vadd.f32 %v432_v46, %v76_v1 }
 0x105   :  { %8207 = vst [vmem:[#allocation70_spill] sm:$0xff] %v5629_v42 }
 0x106   :  { %8208 = vst [vmem:[#allocation71_spill] sm:$0xff] %v5631_v49 }
 0x10a   :  { %v394_v61 = vpop.f32.mrf.mxu2  ;;  %v435_v40 = vpop.f32.mrf.mxu3 }
 0x10b   :  { %v5633_v13 = vadd.f32 %v394_v61, %v75_v62  ;;  %v5635_v29 = vadd.f32 %v435_v40, %v76_v1 }
 0x10d   :  { %8209 = vst [vmem:[#allocation72_spill] sm:$0xff] %v5633_v13 }
 0x10e   :  { %8210 = vst [vmem:[#allocation73_spill] sm:$0xff] %v5635_v29 }
 0x10f   :  { %5234 = dma.done.wait [#allocation4], 16384 }
 0x110   :  { %5235 = vsyncadd [#allocation4], 4294950912  ;;  %v4478_v30 = vld [vmem:[#allocation2 + $0x1c0] sm:$0xf]  ;;  %v4869_v43 = vld [vmem:[#allocation2 + $0x1c4] sm:$0xf] }
 0x111   :  { %v4873_v58 = vld [vmem:[#allocation2 + $0x1dc] sm:$0xf0]  ;;  %v4480_v24 = vld [vmem:[#allocation2 + $0x1e0] sm:$0xf0]  ;;  %v4486_v6 = vld [vmem:[#allocation2 + $0x1c8] sm:$0xf] }
 0x112   :  { %v4734_v5 = vld [vmem:[#allocation2 + $0x3c0] sm:$0xf]  ;;  %v5637_v18 = vor.u32 %v4873_v58, %v4478_v30  ;;  %v5641_v46 = vor.u32 %v4869_v43, %v4480_v24  ;;  %v4933_v49 = vld [vmem:[#allocation2 + $0x3c4] sm:$0xf]  ;;  %v4874_v54 = vld [vmem:[#allocation2 + $0x1e4] sm:$0xf0] }
 0x113   :  { %v4937_v45 = vld [vmem:[#allocation2 + $0x3dc] sm:$0xf0]  ;;  %v4736_v42 = vld [vmem:[#allocation2 + $0x3e0] sm:$0xf0]  ;;  %v4742_v56 = vld [vmem:[#allocation2 + $0x3c8] sm:$0xf]  ;;  %v5729_v53 = vor.u32 %v4874_v54, %v4486_v6 }
 0x114   :  { %8211 = vst [vmem:[#allocation74_spill] sm:$0xff] %v5637_v18  ;;  %v5639_v35 = vor.u32 %v4937_v45, %v4734_v5  ;;  %v4446_v62 = vld [vmem:[#allocation2 + $0x180] sm:$0xf]  ;;  %1282 = vmatpush.bf16.msra.mxu0 %v5637_v18  ;;  %v5644_v40 = vor.u32 %v4933_v49, %v4736_v42  ;;  %1308 = vmatpush.bf16.msrb.mxu2 %v5641_v46  ;;  %v4861_v24 = vld [vmem:[#allocation2 + $0x184] sm:$0xf] }
 0x115   :  { %8213 = vst [vmem:[#allocation76_spill] sm:$0xff] %v5641_v46  ;;  %v4865_v1 = vld [vmem:[#allocation2 + $0x19c] sm:$0xf0]  ;;  %v4448_v43 = vld [vmem:[#allocation2 + $0x1a0] sm:$0xf0] }
 0x116   :  { %8212 = vst [vmem:[#allocation75_spill] sm:$0xff] %v5639_v35  ;;  %v4702_v61 = vld [vmem:[#allocation2 + $0x380] sm:$0xf]  ;;  %1295 = vmatpush.bf16.msra.mxu1 %v5639_v35  ;;  %v5648_v30 = vor.u32 %v4865_v1, %v4446_v62  ;;  %v4925_v5 = vld [vmem:[#allocation2 + $0x384] sm:$0xf]  ;;  %1321 = vmatpush.bf16.msrb.mxu3 %v5644_v40  ;;  %v5653_v45 = vor.u32 %v4861_v24, %v4448_v43 }
 0x117   :  { %8214 = vst [vmem:[#allocation77_spill] sm:$0xff] %v5644_v40  ;;  %v4929_v29 = vld [vmem:[#allocation2 + $0x39c] sm:$0xf0]  ;;  %v4704_v42 = vld [vmem:[#allocation2 + $0x3a0] sm:$0xf0] }
 0x118   :  { %8215 = vst [vmem:[#allocation78_spill] sm:$0xff] %v5648_v30  ;;  %v5650_v58 = vor.u32 %v4929_v29, %v4702_v61  ;;  %v4414_v49 = vld [vmem:[#allocation2 + $0x140] sm:$0xf]  ;;  %v5655_v31 = vor.u32 %v4925_v5, %v4704_v42  ;;  %v4853_v16 = vld [vmem:[#allocation2 + $0x144] sm:$0xf]  ;;  %1283 = vmatpush.bf16.msra.mxu0 %v5648_v30  ;;  %1309 = vmatpush.bf16.msrb.mxu2 %v5653_v45 }
 0x119   :  { %8217 = vst [vmem:[#allocation80_spill] sm:$0xff] %v5653_v45  ;;  %v4857_v13 = vld [vmem:[#allocation2 + $0x15c] sm:$0xf0]  ;;  %v4416_v29 = vld [vmem:[#allocation2 + $0x160] sm:$0xf0] }
 0x11a   :  { %8216 = vst [vmem:[#allocation79_spill] sm:$0xff] %v5650_v58  ;;  %v4670_v10 = vld [vmem:[#allocation2 + $0x340] sm:$0xf]  ;;  %v5658_v62 = vor.u32 %v4857_v13, %v4414_v49  ;;  %v4917_v1 = vld [vmem:[#allocation2 + $0x344] sm:$0xf]  ;;  %1296 = vmatpush.bf16.msra.mxu1 %v5650_v58  ;;  %v5664_v43 = vor.u32 %v4853_v16, %v4416_v29  ;;  %1322 = vmatpush.bf16.msrb.mxu3 %v5655_v31 }
 0x11b   :  { %8218 = vst [vmem:[#allocation81_spill] sm:$0xff] %v5655_v31  ;;  %v4921_v23 = vld [vmem:[#allocation2 + $0x35c] sm:$0xf0]  ;;  %v4672_v61 = vld [vmem:[#allocation2 + $0x360] sm:$0xf0] }
 0x11c   :  { %8219 = vst [vmem:[#allocation82_spill] sm:$0xff] %v5658_v62  ;;  %v5662_v24 = vor.u32 %v4921_v23, %v4670_v10  ;;  %v4382_v5 = vld [vmem:[#allocation2 + $0x100] sm:$0xf]  ;;  %v5667_v15 = vor.u32 %v4917_v1, %v4672_v61  ;;  %v4845_v49 = vld [vmem:[#allocation2 + $0x104] sm:$0xf]  ;;  %1284 = vmatpush.bf16.msra.mxu0 %v5658_v62  ;;  %1310 = vmatpush.bf16.msrb.mxu2 %v5664_v43 }
 0x11d   :  { %8221 = vst [vmem:[#allocation84_spill] sm:$0xff] %v5664_v43  ;;  %v4849_v42 = vld [vmem:[#allocation2 + $0x11c] sm:$0xf0]  ;;  %v4384_v27 = vld [vmem:[#allocation2 + $0x120] sm:$0xf0] }
 0x11e   :  { %8220 = vst [vmem:[#allocation83_spill] sm:$0xff] %v5662_v24  ;;  %v4638_v28 = vld [vmem:[#allocation2 + $0x300] sm:$0xf]  ;;  %v4909_v39 = vld [vmem:[#allocation2 + $0x304] sm:$0xf]  ;;  %v5670_v34 = vor.u32 %v4849_v42, %v4382_v5  ;;  %1297 = vmatpush.bf16.msra.mxu1 %v5662_v24  ;;  %v5676_v23 = vor.u32 %v4845_v49, %v4384_v27  ;;  %1323 = vmatpush.bf16.msrb.mxu3 %v5667_v15 }
 0x11f   :  { %8222 = vst [vmem:[#allocation85_spill] sm:$0xff] %v5667_v15  ;;  %v4913_v13 = vld [vmem:[#allocation2 + $0x31c] sm:$0xf0]  ;;  %v4640_v2 = vld [vmem:[#allocation2 + $0x320] sm:$0xf0] }
 0x120   :  { %8223 = vst [vmem:[#allocation86_spill] sm:$0xff] %v5670_v34  ;;  %v5674_v16 = vor.u32 %v4913_v13, %v4638_v28  ;;  %v4350_v10 = vld [vmem:[#allocation2 + $0xc0] sm:$0xf]  ;;  %v5679_v61 = vor.u32 %v4909_v39, %v4640_v2  ;;  %v4837_v8 = vld [vmem:[#allocation2 + $0xc4] sm:$0xf]  ;;  %1285 = vmatpush.bf16.msra.mxu0 %v5670_v34  ;;  %1311 = vmatpush.bf16.msrb.mxu2 %v5676_v23 }
 0x121   :  { %8225 = vst [vmem:[#allocation88_spill] sm:$0xff] %v5676_v23  ;;  %v4841_v29 = vld [vmem:[#allocation2 + $0xdc] sm:$0xf0]  ;;  %v4352_v20 = vld [vmem:[#allocation2 + $0xe0] sm:$0xf0] }
 0x122   :  { %8224 = vst [vmem:[#allocation87_spill] sm:$0xff] %v5674_v16  ;;  %v4606_v1 = vld [vmem:[#allocation2 + $0x2c0] sm:$0xf]  ;;  %v4901_v5 = vld [vmem:[#allocation2 + $0x2c4] sm:$0xf]  ;;  %v5682_v7 = vor.u32 %v4841_v29, %v4350_v10  ;;  %1298 = vmatpush.bf16.msra.mxu1 %v5674_v16  ;;  %v5688_v28 = vor.u32 %v4837_v8, %v4352_v20  ;;  %1324 = vmatpush.bf16.msrb.mxu3 %v5679_v61 }
 0x123   :  { %8226 = vst [vmem:[#allocation89_spill] sm:$0xff] %v5679_v61  ;;  %v4905_v41 = vld [vmem:[#allocation2 + $0x2dc] sm:$0xf0]  ;;  %v4608_v42 = vld [vmem:[#allocation2 + $0x2e0] sm:$0xf0] }
 0x124   :  { %8227 = vst [vmem:[#allocation90_spill] sm:$0xff] %v5682_v7  ;;  %v5686_v27 = vor.u32 %v4905_v41, %v4606_v1  ;;  %v4318_v13 = vld [vmem:[#allocation2 + $0x80] sm:$0xf]  ;;  %v5691_v49 = vor.u32 %v4901_v5, %v4608_v42  ;;  %v4829_v21 = vld [vmem:[#allocation2 + $0x84] sm:$0xf]  ;;  %1286 = vmatpush.bf16.msra.mxu0 %v5682_v7  ;;  %1312 = vmatpush.bf16.msrb.mxu2 %v5688_v28 }
 0x125   :  { %8229 = vst [vmem:[#allocation92_spill] sm:$0xff] %v5688_v28  ;;  %v4833_v39 = vld [vmem:[#allocation2 + $0x9c] sm:$0xf0]  ;;  %v4320_v32 = vld [vmem:[#allocation2 + $0xa0] sm:$0xf0] }
 0x126   :  { %8228 = vst [vmem:[#allocation91_spill] sm:$0xff] %v5686_v27  ;;  %v4574_v2 = vld [vmem:[#allocation2 + $0x280] sm:$0xf]  ;;  %v4893_v10 = vld [vmem:[#allocation2 + $0x284] sm:$0xf]  ;;  %v5694_v44 = vor.u32 %v4833_v39, %v4318_v13  ;;  %1299 = vmatpush.bf16.msra.mxu1 %v5686_v27  ;;  %v5700_v8 = vor.u32 %v4829_v21, %v4320_v32  ;;  %1325 = vmatpush.bf16.msrb.mxu3 %v5691_v49 }
 0x127   :  { %8230 = vst [vmem:[#allocation93_spill] sm:$0xff] %v5691_v49  ;;  %v4897_v19 = vld [vmem:[#allocation2 + $0x29c] sm:$0xf0]  ;;  %v4576_v29 = vld [vmem:[#allocation2 + $0x2a0] sm:$0xf0] }
 0x128   :  { %8231 = vst [vmem:[#allocation94_spill] sm:$0xff] %v5694_v44  ;;  %v5698_v41 = vor.u32 %v4897_v19, %v4574_v2  ;;  %v4286_v20 = vld [vmem:[#allocation2 + $0x40] sm:$0xf]  ;;  %v5703_v42 = vor.u32 %v4893_v10, %v4576_v29  ;;  %v4821_v0 = vld [vmem:[#allocation2 + $0x44] sm:$0xf]  ;;  %1287 = vmatpush.bf16.msra.mxu0 %v5694_v44  ;;  %1313 = vmatpush.bf16.msrb.mxu2 %v5700_v8 }
 0x129   :  { %8233 = vst [vmem:[#allocation96_spill] sm:$0xff] %v5700_v8  ;;  %v4825_v1 = vld [vmem:[#allocation2 + $0x5c] sm:$0xf0]  ;;  %v4288_v12 = vld [vmem:[#allocation2 + $0x60] sm:$0xf0] }
 0x12a   :  { %8232 = vst [vmem:[#allocation95_spill] sm:$0xff] %v5698_v41  ;;  %v4542_v5 = vld [vmem:[#allocation2 + $0x240] sm:$0xf]  ;;  %v4885_v13 = vld [vmem:[#allocation2 + $0x244] sm:$0xf]  ;;  %v5706_v63 = vor.u32 %v4825_v1, %v4286_v20  ;;  %1300 = vmatpush.bf16.msra.mxu1 %v5698_v41  ;;  %v5712_v32 = vor.u32 %v4821_v0, %v4288_v12  ;;  %1326 = vmatpush.bf16.msrb.mxu3 %v5703_v42 }
 0x12b   :  { %8234 = vst [vmem:[#allocation97_spill] sm:$0xff] %v5703_v42  ;;  %v4889_v22 = vld [vmem:[#allocation2 + $0x25c] sm:$0xf0]  ;;  %v4544_v39 = vld [vmem:[#allocation2 + $0x260] sm:$0xf0] }
 0x12c   :  { %8235 = vst [vmem:[#allocation98_spill] sm:$0xff] %v5706_v63  ;;  %v4254_v19 = vld [vmem:[#allocation2] sm:$0xf]  ;;  %v5710_v21 = vor.u32 %v4889_v22, %v4542_v5  ;;  %v4813_v11 = vld [vmem:[#allocation2 + $0x4] sm:$0xf]  ;;  %v5715_v9 = vor.u32 %v4885_v13, %v4544_v39  ;;  %1288 = vmatpush.bf16.msra.mxu0 %v5706_v63  ;;  %1314 = vmatpush.bf16.msrb.mxu2 %v5712_v32 }
 0x12d   :  { %v4817_v2 = vld [vmem:[#allocation2 + $0x1c] sm:$0xf0]  ;;  %8237 = vst [vmem:[#allocation100_spill] sm:$0xff] %v5712_v32  ;;  %v4256_v57 = vld [vmem:[#allocation2 + $0x20] sm:$0xf0] }
 0x12e   :  { %8236 = vst [vmem:[#allocation99_spill] sm:$0xff] %v5710_v21  ;;  %v4510_v10 = vld [vmem:[#allocation2 + $0x200] sm:$0xf]  ;;  %v4877_v20 = vld [vmem:[#allocation2 + $0x204] sm:$0xf]  ;;  %v5718_v4 = vor.u32 %v4817_v2, %v4254_v19  ;;  %1301 = vmatpush.bf16.msra.mxu1 %v5710_v21  ;;  %v5724_v13 = vor.u32 %v4813_v11, %v4256_v57  ;;  %1327 = vmatpush.bf16.msrb.mxu3 %v5715_v9 }
 0x12f   :  { %v4881_v29 = vld [vmem:[#allocation2 + $0x21c] sm:$0xf0]  ;;  %8238 = vst [vmem:[#allocation101_spill] sm:$0xff] %v5715_v9  ;;  %v4512_v1 = vld [vmem:[#allocation2 + $0x220] sm:$0xf0] }
 0x130   :  { %8239 = vst [vmem:[#allocation102_spill] sm:$0xff] %v5718_v4  ;;  %v4938_v22 = vld [vmem:[#allocation2 + $0x3e4] sm:$0xf0]  ;;  %v4870_v0 = vld [vmem:[#allocation2 + $0x1cc] sm:$0xf]  ;;  %v5722_v5 = vor.u32 %v4881_v29, %v4510_v10  ;;  %v5727_v3 = vor.u32 %v4877_v20, %v4512_v1  ;;  %1289 = vmatpush.bf16.msra.mxu0 %v5718_v4  ;;  %1315 = vmatpush.bf16.msrb.mxu2 %v5724_v13 }
 0x131   :  { %v4488_v12 = vld [vmem:[#allocation2 + $0x1e8] sm:$0xf0]  ;;  %8241 = vst [vmem:[#allocation104_spill] sm:$0xff] %v5724_v13  ;;  %v5731_v19 = vor.u32 %v4938_v22, %v4742_v56  ;;  %v4454_v26 = vld [vmem:[#allocation2 + $0x188] sm:$0xf] }
 0x132   :  { %8240 = vst [vmem:[#allocation103_spill] sm:$0xff] %v5722_v5  ;;  %v4934_v39 = vld [vmem:[#allocation2 + $0x3cc] sm:$0xf]  ;;  %v5733_v2 = vor.u32 %v4870_v0, %v4488_v12  ;;  %v4866_v50 = vld [vmem:[#allocation2 + $0x1a4] sm:$0xf0]  ;;  %1302 = vmatpush.bf16.msra.mxu1 %v5722_v5  ;;  %1328 = vmatpush.bf16.msrb.mxu3 %v5727_v3 }
 0x133   :  { %v4744_v55 = vld [vmem:[#allocation2 + $0x3e8] sm:$0xf0]  ;;  %8242 = vst [vmem:[#allocation105_spill] sm:$0xff] %v5727_v3  ;;  %v4710_v25 = vld [vmem:[#allocation2 + $0x388] sm:$0xf]  ;;  %v5742_v56 = vor.u32 %v4866_v50, %v4454_v26  ;;  %v7881_v50 = vmov 0  }
 0x134   :  { %8243 = vst [vmem:[#allocation106_spill] sm:$0xff] %v5729_v53  ;;  %v5736_v10 = vor.u32 %v4934_v39, %v4744_v55  ;;  %v4930_v11 = vld [vmem:[#allocation2 + $0x3a4] sm:$0xf0]  ;;  %v4862_v57 = vld [vmem:[#allocation2 + $0x18c] sm:$0xf]  ;;  %1334 = vmatpush.bf16.msrb.mxu0 %v5729_v53  ;;  %1360 = vmatpush.bf16.msra.mxu2 %v5733_v2 }
 0x135   :  { %8244 = vst [vmem:[#allocation107_spill] sm:$0xff] %v5731_v19  ;;  %v4456_v29 = vld [vmem:[#allocation2 + $0x1a8] sm:$0xf0]  ;;  %v5746_v55 = vor.u32 %v4930_v11, %v4710_v25  ;;  %v4422_v1 = vld [vmem:[#allocation2 + $0x148] sm:$0xf]  ;;  %1316 = vmatmul.bf16.vlgmr.msrb.gmra.mxu2 %v7881_v50  ;;  %1329 = vmatmul.bf16.vlgmr.msrb.gmra.mxu3 %v7881_v50 }
 0x136   :  { %8245 = vst [vmem:[#allocation108_spill] sm:$0xff] %v5733_v2  ;;  %v4926_v6 = vld [vmem:[#allocation2 + $0x38c] sm:$0xf]  ;;  %1347 = vmatpush.bf16.msrb.mxu1 %v5731_v19  ;;  %v5748_v20 = vor.u32 %v4862_v57, %v4456_v29  ;;  %v4858_v22 = vld [vmem:[#allocation2 + $0x164] sm:$0xf0]  ;;  %1373 = vmatpush.bf16.msra.mxu3 %v5736_v10 }
 0x137   :  { %8246 = vst [vmem:[#allocation109_spill] sm:$0xff] %v5736_v10  ;;  %v4712_v54 = vld [vmem:[#allocation2 + $0x3a8] sm:$0xf0]  ;;  %v4678_v0 = vld [vmem:[#allocation2 + $0x348] sm:$0xf]  ;;  %1290 = vmatmul.bf16.vlgmr.msra.gmra.mxu0 %v7881_v50  ;;  %v5757_v25 = vor.u32 %v4858_v22, %v4422_v1  ;;  %1303 = vmatmul.bf16.vlgmr.msra.gmra.mxu1 %v7881_v50 }
 0x138   :  { %8247 = vst [vmem:[#allocation110_spill] sm:$0xff] %v5742_v56  ;;  %v5751_v12 = vor.u32 %v4926_v6, %v4712_v54  ;;  %v4922_v39 = vld [vmem:[#allocation2 + $0x364] sm:$0xf0]  ;;  %v4854_v48 = vld [vmem:[#allocation2 + $0x14c] sm:$0xf]  ;;  %1335 = vmatpush.bf16.msrb.mxu0 %v5742_v56  ;;  %1361 = vmatpush.bf16.msra.mxu2 %v5748_v20 }
 0x139   :  { %8248 = vst [vmem:[#allocation111_spill] sm:$0xff] %v5746_v55  ;;  %v4424_v60 = vld [vmem:[#allocation2 + $0x168] sm:$0xf0]  ;;  %v5762_v11 = vor.u32 %v4922_v39, %v4678_v0  ;;  %v4390_v29 = vld [vmem:[#allocation2 + $0x108] sm:$0xf] }
 0x13a   :  { %8249 = vst [vmem:[#allocation112_spill] sm:$0xff] %v5748_v20  ;;  %v4918_v26 = vld [vmem:[#allocation2 + $0x34c] sm:$0xf]  ;;  %1348 = vmatpush.bf16.msrb.mxu1 %v5746_v55  ;;  %v5764_v57 = vor.u32 %v4854_v48, %v4424_v60  ;;  %v4850_v6 = vld [vmem:[#allocation2 + $0x124] sm:$0xf0]  ;;  %1374 = vmatpush.bf16.msra.mxu3 %v5751_v12 }
 0x13b   :  { %8250 = vst [vmem:[#allocation113_spill] sm:$0xff] %v5751_v12  ;;  %v4680_v47 = vld [vmem:[#allocation2 + $0x368] sm:$0xf0]  ;;  %v4646_v54 = vld [vmem:[#allocation2 + $0x308] sm:$0xf]  ;;  %v5770_v36 = vor.u32 %v4850_v6, %v4390_v29 }
 0x13c   :  { %8251 = vst [vmem:[#allocation114_spill] sm:$0xff] %v5757_v25  ;;  %v5767_v59 = vor.u32 %v4918_v26, %v4680_v47  ;;  %v4914_v33 = vld [vmem:[#allocation2 + $0x324] sm:$0xf0]  ;;  %v4846_v1 = vld [vmem:[#allocation2 + $0x10c] sm:$0xf]  ;;  %1336 = vmatpush.bf16.msrb.mxu0 %v5757_v25  ;;  %1362 = vmatpush.bf16.msra.mxu2 %v5764_v57 }
 0x13d   :  { %8252 = vst [vmem:[#allocation115_spill] sm:$0xff] %v5762_v11  ;;  %v4392_v22 = vld [vmem:[#allocation2 + $0x128] sm:$0xf0]  ;;  %v5774_v48 = vor.u32 %v4914_v33, %v4646_v54  ;;  %v4358_v0 = vld [vmem:[#allocation2 + $0xc8] sm:$0xf] }
 0x13e   :  { %8253 = vst [vmem:[#allocation116_spill] sm:$0xff] %v5764_v57  ;;  %v4910_v17 = vld [vmem:[#allocation2 + $0x30c] sm:$0xf]  ;;  %1349 = vmatpush.bf16.msrb.mxu1 %v5762_v11  ;;  %v5776_v60 = vor.u32 %v4846_v1, %v4392_v22  ;;  %v4842_v47 = vld [vmem:[#allocation2 + $0xe4] sm:$0xf0]  ;;  %1375 = vmatpush.bf16.msra.mxu3 %v5767_v59 }
 0x13f   :  { %8254 = vst [vmem:[#allocation117_spill] sm:$0xff] %v5767_v59  ;;  %v4648_v50 = vld [vmem:[#allocation2 + $0x328] sm:$0xf0]  ;;  %v4614_v39 = vld [vmem:[#allocation2 + $0x2c8] sm:$0xf]  ;;  %v5782_v37 = vor.u32 %v4842_v47, %v4358_v0 }
 0x140   :  { %8255 = vst [vmem:[#allocation118_spill] sm:$0xff] %v5770_v36  ;;  %v5779_v26 = vor.u32 %v4910_v17, %v4648_v50  ;;  %v4906_v14 = vld [vmem:[#allocation2 + $0x2e4] sm:$0xf0]  ;;  %v4838_v38 = vld [vmem:[#allocation2 + $0xcc] sm:$0xf]  ;;  %1337 = vmatpush.bf16.msrb.mxu0 %v5770_v36  ;;  %1363 = vmatpush.bf16.msra.mxu2 %v5776_v60 }
 0x141   :  { %8256 = vst [vmem:[#allocation119_spill] sm:$0xff] %v5774_v48  ;;  %v4360_v52 = vld [vmem:[#allocation2 + $0xe8] sm:$0xf0]  ;;  %v5786_v33 = vor.u32 %v4906_v14, %v4614_v39  ;;  %v4326_v1 = vld [vmem:[#allocation2 + $0x88] sm:$0xf] }
 0x142   :  { %8257 = vst [vmem:[#allocation120_spill] sm:$0xff] %v5776_v60  ;;  %v4902_v29 = vld [vmem:[#allocation2 + $0x2cc] sm:$0xf]  ;;  %1350 = vmatpush.bf16.msrb.mxu1 %v5774_v48  ;;  %v5788_v54 = vor.u32 %v4838_v38, %v4360_v52  ;;  %v4834_v17 = vld [vmem:[#allocation2 + $0xa4] sm:$0xf0]  ;;  %1376 = vmatpush.bf16.msra.mxu3 %v5779_v26 }
 0x143   :  { %8258 = vst [vmem:[#allocation121_spill] sm:$0xff] %v5779_v26  ;;  %v4616_v6 = vld [vmem:[#allocation2 + $0x2e8] sm:$0xf0]  ;;  %v4582_v50 = vld [vmem:[#allocation2 + $0x288] sm:$0xf]  ;;  %v5794_v48 = vor.u32 %v4834_v17, %v4326_v1 }
 0x144   :  { %8259 = vst [vmem:[#allocation122_spill] sm:$0xff] %v5782_v37  ;;  %v5791_v22 = vor.u32 %v4902_v29, %v4616_v6  ;;  %v4898_v51 = vld [vmem:[#allocation2 + $0x2a4] sm:$0xf0]  ;;  %v4830_v59 = vld [vmem:[#allocation2 + $0x8c] sm:$0xf]  ;;  %1338 = vmatpush.bf16.msrb.mxu0 %v5782_v37  ;;  %1364 = vmatpush.bf16.msra.mxu2 %v5788_v54 }
 0x145   :  { %8260 = vst [vmem:[#allocation123_spill] sm:$0xff] %v5786_v33  ;;  %v4328_v36 = vld [vmem:[#allocation2 + $0xa8] sm:$0xf0]  ;;  %v5798_v38 = vor.u32 %v4898_v51, %v4582_v50  ;;  %v4294_v14 = vld [vmem:[#allocation2 + $0x48] sm:$0xf] }
 0x146   :  { %8261 = vst [vmem:[#allocation124_spill] sm:$0xff] %v5788_v54  ;;  %v4894_v0 = vld [vmem:[#allocation2 + $0x28c] sm:$0xf]  ;;  %1351 = vmatpush.bf16.msrb.mxu1 %v5786_v33  ;;  %v5800_v52 = vor.u32 %v4830_v59, %v4328_v36  ;;  %v4826_v39 = vld [vmem:[#allocation2 + $0x64] sm:$0xf0]  ;;  %1377 = vmatpush.bf16.msra.mxu3 %v5791_v22 }
 0x147   :  { %8262 = vst [vmem:[#allocation125_spill] sm:$0xff] %v5791_v22  ;;  %v4584_v47 = vld [vmem:[#allocation2 + $0x2a8] sm:$0xf0]  ;;  %v4550_v29 = vld [vmem:[#allocation2 + $0x248] sm:$0xf]  ;;  %v5806_v33 = vor.u32 %v4826_v39, %v4294_v14 }
 0x148   :  { %8263 = vst [vmem:[#allocation126_spill] sm:$0xff] %v5794_v48  ;;  %v5803_v6 = vor.u32 %v4894_v0, %v4584_v47  ;;  %v4890_v26 = vld [vmem:[#allocation2 + $0x264] sm:$0xf0]  ;;  %v4822_v60 = vld [vmem:[#allocation2 + $0x4c] sm:$0xf]  ;;  %1339 = vmatpush.bf16.msrb.mxu0 %v5794_v48  ;;  %1365 = vmatpush.bf16.msra.mxu2 %v5800_v52 }
 0x149   :  { %8264 = vst [vmem:[#allocation127_spill] sm:$0xff] %v5798_v38  ;;  %v4296_v37 = vld [vmem:[#allocation2 + $0x68] sm:$0xf0]  ;;  %v4262_v51 = vld [vmem:[#allocation2 + $0x8] sm:$0xf]  ;;  %v5810_v59 = vor.u32 %v4890_v26, %v4550_v29 }
 0x14a   :  { %8265 = vst [vmem:[#allocation128_spill] sm:$0xff] %v5800_v52  ;;  %v4886_v1 = vld [vmem:[#allocation2 + $0x24c] sm:$0xf]  ;;  %v4818_v50 = vld [vmem:[#allocation2 + $0x24] sm:$0xf0]  ;;  %1352 = vmatpush.bf16.msrb.mxu1 %v5798_v38  ;;  %v5812_v36 = vor.u32 %v4822_v60, %v4296_v37  ;;  %1378 = vmatpush.bf16.msra.mxu3 %v5803_v6 }
 0x14b   :  { %8266 = vst [vmem:[#allocation129_spill] sm:$0xff] %v5803_v6  ;;  %v4552_v17 = vld [vmem:[#allocation2 + $0x268] sm:$0xf0]  ;;  %v4518_v0 = vld [vmem:[#allocation2 + $0x208] sm:$0xf]  ;;  %v5818_v38 = vor.u32 %v4818_v50, %v4262_v51 }
 0x14c   :  { %8267 = vst [vmem:[#allocation130_spill] sm:$0xff] %v5806_v33  ;;  %v4882_v47 = vld [vmem:[#allocation2 + $0x224] sm:$0xf0]  ;;  %v4814_v22 = vld [vmem:[#allocation2 + $0xc] sm:$0xf]  ;;  %v5815_v54 = vor.u32 %v4886_v1, %v4552_v17  ;;  %1340 = vmatpush.bf16.msrb.mxu0 %v5806_v33  ;;  %1366 = vmatpush.bf16.msra.mxu2 %v5812_v36 }
 0x14d   :  { %8268 = vst [vmem:[#allocation131_spill] sm:$0xff] %v5810_v59  ;;  %v4264_v48 = vld [vmem:[#allocation2 + $0x28] sm:$0xf0]  ;;  %v4494_v11 = vld [vmem:[#allocation2 + $0x1d0] sm:$0xf]  ;;  %v5822_v29 = vor.u32 %v4882_v47, %v4518_v0 }
 0x14e   :  { %8269 = vst [vmem:[#allocation132_spill] sm:$0xff] %v5812_v36  ;;  %v4878_v14 = vld [vmem:[#allocation2 + $0x20c] sm:$0xf]  ;;  %v4875_v57 = vld [vmem:[#allocation2 + $0x1ec] sm:$0xf0]  ;;  %1353 = vmatpush.bf16.msrb.mxu1 %v5810_v59  ;;  %v5824_v1 = vor.u32 %v4814_v22, %v4264_v48  ;;  %1379 = vmatpush.bf16.msra.mxu3 %v5815_v54 }
 0x14f   :  { %8270 = vst [vmem:[#allocation133_spill] sm:$0xff] %v5815_v54  ;;  %v4520_v39 = vld [vmem:[#allocation2 + $0x228] sm:$0xf0]  ;;  %v4750_v12 = vld [vmem:[#allocation2 + $0x3d0] sm:$0xf]  ;;  %v5829_v33 = vor.u32 %v4875_v57, %v4494_v11 }
 0x150   :  { %8271 = vst [vmem:[#allocation134_spill] sm:$0xff] %v5818_v38  ;;  %v4939_v26 = vld [vmem:[#allocation2 + $0x3ec] sm:$0xf0]  ;;  %v4871_v37 = vld [vmem:[#allocation2 + $0x1d4] sm:$0xf]  ;;  %v5827_v52 = vor.u32 %v4878_v14, %v4520_v39  ;;  %1341 = vmatpush.bf16.msrb.mxu0 %v5818_v38  ;;  %1367 = vmatpush.bf16.msra.mxu2 %v5824_v1 }
 0x151   :  { %v4496_v60 = vld [vmem:[#allocation2 + $0x1f0] sm:$0xf0]  ;;  %8272 = vst [vmem:[#allocation135_spill] sm:$0xff] %v5822_v29  ;;  %v5831_v51 = vor.u32 %v4939_v26, %v4750_v12  ;;  %v4462_v25 = vld [vmem:[#allocation2 + $0x190] sm:$0xf] }
 0x152   :  { %8273 = vst [vmem:[#allocation136_spill] sm:$0xff] %v5824_v1  ;;  %v4935_v17 = vld [vmem:[#allocation2 + $0x3d4] sm:$0xf]  ;;  %v5833_v50 = vor.u32 %v4871_v37, %v4496_v60  ;;  %v4867_v59 = vld [vmem:[#allocation2 + $0x1ac] sm:$0xf0]  ;;  %1354 = vmatpush.bf16.msrb.mxu1 %v5822_v29  ;;  %1380 = vmatpush.bf16.msra.mxu3 %v5827_v52 }
 0x153   :  { %v4752_v6 = vld [vmem:[#allocation2 + $0x3f0] sm:$0xf0]  ;;  %8274 = vst [vmem:[#allocation137_spill] sm:$0xff] %v5827_v52  ;;  %v4718_v55 = vld [vmem:[#allocation2 + $0x390] sm:$0xf]  ;;  %v5842_v12 = vor.u32 %v4867_v59, %v4462_v25  ;;  %v8283_v25 = vmov 0  }
 0x154   :  { %8275 = vst [vmem:[#allocation138_spill] sm:$0xff] %v5829_v33  ;;  %v5836_v0 = vor.u32 %v4935_v17, %v4752_v6  ;;  %v4931_v48 = vld [vmem:[#allocation2 + $0x3ac] sm:$0xf0]  ;;  %v4863_v22 = vld [vmem:[#allocation2 + $0x194] sm:$0xf]  ;;  %1386 = vmatpush.bf16.msra.mxu0 %v5829_v33  ;;  %1412 = vmatpush.bf16.msrb.mxu2 %v5833_v50 }
 0x155   :  { %8276 = vst [vmem:[#allocation139_spill] sm:$0xff] %v5831_v51  ;;  %v4464_v47 = vld [vmem:[#allocation2 + $0x1b0] sm:$0xf0]  ;;  %v5846_v6 = vor.u32 %v4931_v48, %v4718_v55  ;;  %v4430_v39 = vld [vmem:[#allocation2 + $0x150] sm:$0xf]  ;;  %1342 = vmatmul.bf16.vlgmr.msrb.gmra.mxu0 %v8283_v25  ;;  %1355 = vmatmul.bf16.vlgmr.msrb.gmra.mxu1 %v8283_v25 }
 0x156   :  { %8277 = vst [vmem:[#allocation140_spill] sm:$0xff] %v5833_v50  ;;  %v4927_v11 = vld [vmem:[#allocation2 + $0x394] sm:$0xf]  ;;  %1399 = vmatpush.bf16.msra.mxu1 %v5831_v51  ;;  %v5848_v14 = vor.u32 %v4863_v22, %v4464_v47  ;;  %v4859_v26 = vld [vmem:[#allocation2 + $0x16c] sm:$0xf0]  ;;  %1425 = vmatpush.bf16.msrb.mxu3 %v5836_v0 }
 0x157   :  { %8278 = vst [vmem:[#allocation141_spill] sm:$0xff] %v5836_v0  ;;  %v4720_v57 = vld [vmem:[#allocation2 + $0x3b0] sm:$0xf0]  ;;  %v4686_v37 = vld [vmem:[#allocation2 + $0x350] sm:$0xf]  ;;  %1368 = vmatmul.bf16.vlgmr.msra.gmra.mxu2 %v8283_v25  ;;  %v5857_v55 = vor.u32 %v4859_v26, %v4430_v39  ;;  %1381 = vmatmul.bf16.vlgmr.msra.gmra.mxu3 %v8283_v25 }
 0x158   :  { %8279 = vst [vmem:[#allocation142_spill] sm:$0xff] %v5842_v12  ;;  %v5851_v60 = vor.u32 %v4927_v11, %v4720_v57  ;;  %v4923_v17 = vld [vmem:[#allocation2 + $0x36c] sm:$0xf0]  ;;  %v4855_v52 = vld [vmem:[#allocation2 + $0x154] sm:$0xf]  ;;  %1387 = vmatpush.bf16.msra.mxu0 %v5842_v12  ;;  %1413 = vmatpush.bf16.msrb.mxu2 %v5848_v14 }
 0x159   :  { %8280 = vst [vmem:[#allocation143_spill] sm:$0xff] %v5846_v6  ;;  %v4432_v33 = vld [vmem:[#allocation2 + $0x170] sm:$0xf0]  ;;  %v5862_v48 = vor.u32 %v4923_v17, %v4686_v37  ;;  %v4398_v47 = vld [vmem:[#allocation2 + $0x110] sm:$0xf] }
 0x15a   :  { %8281 = vst [vmem:[#allocation144_spill] sm:$0xff] %v5848_v14  ;;  %v4919_v59 = vld [vmem:[#allocation2 + $0x354] sm:$0xf]  ;;  %1400 = vmatpush.bf16.msra.mxu1 %v5846_v6  ;;  %v5864_v22 = vor.u32 %v4855_v52, %v4432_v33  ;;  %v4851_v11 = vld [vmem:[#allocation2 + $0x12c] sm:$0xf0]  ;;  %1426 = vmatpush.bf16.msrb.mxu3 %v5851_v60 }
 0x15b   :  { %8282 = vst [vmem:[#allocation145_spill] sm:$0xff] %v5851_v60  ;;  %v4688_v51 = vld [vmem:[#allocation2 + $0x370] sm:$0xf0]  ;;  %v4654_v57 = vld [vmem:[#allocation2 + $0x310] sm:$0xf]  ;;  %v5870_v6 = vor.u32 %v4851_v11, %v4398_v47 }
 0x15c   :  { %8284 = vst [vmem:[#allocation146_spill] sm:$0xff] %v5857_v55  ;;  %v5867_v0 = vor.u32 %v4919_v59, %v4688_v51  ;;  %v4915_v12 = vld [vmem:[#allocation2 + $0x32c] sm:$0xf0]  ;;  %v4847_v39 = vld [vmem:[#allocation2 + $0x114] sm:$0xf]  ;;  %1388 = vmatpush.bf16.msra.mxu0 %v5857_v55  ;;  %1414 = vmatpush.bf16.msrb.mxu2 %v5864_v22 }
 0x15d   :  { %8285 = vst [vmem:[#allocation147_spill] sm:$0xff] %v5862_v48  ;;  %v4400_v26 = vld [vmem:[#allocation2 + $0x130] sm:$0xf0]  ;;  %v5874_v33 = vor.u32 %v4915_v12, %v4654_v57  ;;  %v4366_v37 = vld [vmem:[#allocation2 + $0xd0] sm:$0xf] }
 0x15e   :  { %8286 = vst [vmem:[#allocation148_spill] sm:$0xff] %v5864_v22  ;;  %v4911_v50 = vld [vmem:[#allocation2 + $0x314] sm:$0xf]  ;;  %1401 = vmatpush.bf16.msra.mxu1 %v5862_v48  ;;  %v5876_v52 = vor.u32 %v4847_v39, %v4400_v26  ;;  %v4843_v51 = vld [vmem:[#allocation2 + $0xec] sm:$0xf0]  ;;  %1427 = vmatpush.bf16.msrb.mxu3 %v5867_v0 }
 0x15f   :  { %8287 = vst [vmem:[#allocation149_spill] sm:$0xff] %v5867_v0  ;;  %v4656_v29 = vld [vmem:[#allocation2 + $0x330] sm:$0xf0]  ;;  %v4622_v17 = vld [vmem:[#allocation2 + $0x2d0] sm:$0xf]  ;;  %v5882_v48 = vor.u32 %v4843_v51, %v4366_v37 }
 0x160   :  { %8288 = vst [vmem:[#allocation150_spill] sm:$0xff] %v5870_v6  ;;  %v5879_v59 = vor.u32 %v4911_v50, %v4656_v29  ;;  %v4907_v60 = vld [vmem:[#allocation2 + $0x2ec] sm:$0xf0]  ;;  %v4839_v14 = vld [vmem:[#allocation2 + $0xd4] sm:$0xf]  ;;  %1389 = vmatpush.bf16.msra.mxu0 %v5870_v6  ;;  %1415 = vmatpush.bf16.msrb.mxu2 %v5876_v52 }
 0x161   :  { %8289 = vst [vmem:[#allocation151_spill] sm:$0xff] %v5874_v33  ;;  %v4368_v55 = vld [vmem:[#allocation2 + $0xf0] sm:$0xf0]  ;;  %v5886_v12 = vor.u32 %v4907_v60, %v4622_v17  ;;  %v4334_v39 = vld [vmem:[#allocation2 + $0x90] sm:$0xf] }
 0x162   :  { %8290 = vst [vmem:[#allocation152_spill] sm:$0xff] %v5876_v52  ;;  %v4903_v47 = vld [vmem:[#allocation2 + $0x2d4] sm:$0xf]  ;;  %1402 = vmatpush.bf16.msra.mxu1 %v5874_v33  ;;  %v5888_v57 = vor.u32 %v4839_v14, %v4368_v55  ;;  %v4835_v29 = vld [vmem:[#allocation2 + $0xac] sm:$0xf0]  ;;  %1428 = vmatpush.bf16.msrb.mxu3 %v5879_v59 }
 0x163   :  { %8291 = vst [vmem:[#allocation153_spill] sm:$0xff] %v5879_v59  ;;  %v4624_v11 = vld [vmem:[#allocation2 + $0x2f0] sm:$0xf0]  ;;  %v4590_v50 = vld [vmem:[#allocation2 + $0x290] sm:$0xf]  ;;  %v5894_v33 = vor.u32 %v4835_v29, %v4334_v39 }
 0x164   :  { %8292 = vst [vmem:[#allocation154_spill] sm:$0xff] %v5882_v48  ;;  %v5891_v26 = vor.u32 %v4903_v47, %v4624_v11  ;;  %v4899_v0 = vld [vmem:[#allocation2 + $0x2ac] sm:$0xf0]  ;;  %v4831_v22 = vld [vmem:[#allocation2 + $0x94] sm:$0xf]  ;;  %1390 = vmatpush.bf16.msra.mxu0 %v5882_v48  ;;  %1416 = vmatpush.bf16.msrb.mxu2 %v5888_v57 }
 0x165   :  { %8293 = vst [vmem:[#allocation155_spill] sm:$0xff] %v5886_v12  ;;  %v4336_v6 = vld [vmem:[#allocation2 + $0xb0] sm:$0xf0]  ;;  %v5898_v14 = vor.u32 %v4899_v0, %v4590_v50  ;;  %v4302_v55 = vld [vmem:[#allocation2 + $0x50] sm:$0xf] }
 0x166   :  { %8294 = vst [vmem:[#allocation156_spill] sm:$0xff] %v5888_v57  ;;  %v4895_v37 = vld [vmem:[#allocation2 + $0x294] sm:$0xf]  ;;  %1403 = vmatpush.bf16.msra.mxu1 %v5886_v12  ;;  %v5900_v60 = vor.u32 %v4831_v22, %v4336_v6  ;;  %v4827_v17 = vld [vmem:[#allocation2 + $0x6c] sm:$0xf0]  ;;  %1429 = vmatpush.bf16.msrb.mxu3 %v5891_v26 }
 0x167   :  { %8295 = vst [vmem:[#allocation157_spill] sm:$0xff] %v5891_v26  ;;  %v4592_v51 = vld [vmem:[#allocation2 + $0x2b0] sm:$0xf0]  ;;  %v4558_v47 = vld [vmem:[#allocation2 + $0x250] sm:$0xf]  ;;  %v5906_v12 = vor.u32 %v4827_v17, %v4302_v55 }
 0x168   :  { %8296 = vst [vmem:[#allocation158_spill] sm:$0xff] %v5894_v33  ;;  %v5903_v11 = vor.u32 %v4895_v37, %v4592_v51  ;;  %v4891_v59 = vld [vmem:[#allocation2 + $0x26c] sm:$0xf0]  ;;  %v4823_v52 = vld [vmem:[#allocation2 + $0x54] sm:$0xf]  ;;  %1391 = vmatpush.bf16.msra.mxu0 %v5894_v33  ;;  %1417 = vmatpush.bf16.msrb.mxu2 %v5900_v60 }
 0x169   :  { %8297 = vst [vmem:[#allocation159_spill] sm:$0xff] %v5898_v14  ;;  %v4304_v48 = vld [vmem:[#allocation2 + $0x70] sm:$0xf0]  ;;  %v4270_v0 = vld [vmem:[#allocation2 + $0x10] sm:$0xf]  ;;  %v5910_v6 = vor.u32 %v4891_v59, %v4558_v47 }
 0x16a   :  { %8298 = vst [vmem:[#allocation160_spill] sm:$0xff] %v5900_v60  ;;  %v4887_v39 = vld [vmem:[#allocation2 + $0x254] sm:$0xf]  ;;  %v4819_v50 = vld [vmem:[#allocation2 + $0x2c] sm:$0xf0]  ;;  %1404 = vmatpush.bf16.msra.mxu1 %v5898_v14  ;;  %v5912_v22 = vor.u32 %v4823_v52, %v4304_v48  ;;  %1430 = vmatpush.bf16.msrb.mxu3 %v5903_v11 }
 0x16b   :  { %8299 = vst [vmem:[#allocation161_spill] sm:$0xff] %v5903_v11  ;;  %v4560_v29 = vld [vmem:[#allocation2 + $0x270] sm:$0xf0]  ;;  %v4526_v37 = vld [vmem:[#allocation2 + $0x210] sm:$0xf]  ;;  %v5918_v14 = vor.u32 %v4819_v50, %v4270_v0 }
 0x16c   :  { %8300 = vst [vmem:[#allocation162_spill] sm:$0xff] %v5906_v12  ;;  %v4883_v51 = vld [vmem:[#allocation2 + $0x22c] sm:$0xf0]  ;;  %v4815_v26 = vld [vmem:[#allocation2 + $0x14] sm:$0xf]  ;;  %v5915_v57 = vor.u32 %v4887_v39, %v4560_v29  ;;  %1392 = vmatpush.bf16.msra.mxu0 %v5906_v12  ;;  %1418 = vmatpush.bf16.msrb.mxu2 %v5912_v22 }
 0x16d   :  { %8301 = vst [vmem:[#allocation163_spill] sm:$0xff] %v5910_v6  ;;  %v4272_v33 = vld [vmem:[#allocation2 + $0x30] sm:$0xf0]  ;;  %v4502_v1 = vld [vmem:[#allocation2 + $0x1d8] sm:$0xf]  ;;  %v5922_v47 = vor.u32 %v4883_v51, %v4526_v37 }
 0x16e   :  { %8302 = vst [vmem:[#allocation164_spill] sm:$0xff] %v5912_v22  ;;  %v4879_v55 = vld [vmem:[#allocation2 + $0x214] sm:$0xf]  ;;  %v4876_v54 = vld [vmem:[#allocation2 + $0x1f4] sm:$0xf0]  ;;  %1405 = vmatpush.bf16.msra.mxu1 %v5910_v6  ;;  %v5924_v39 = vor.u32 %v4815_v26, %v4272_v33  ;;  %1431 = vmatpush.bf16.msrb.mxu3 %v5915_v57 }
 0x16f   :  { %8303 = vst [vmem:[#allocation165_spill] sm:$0xff] %v5915_v57  ;;  %v4528_v17 = vld [vmem:[#allocation2 + $0x230] sm:$0xf0]  ;;  %v4758_v38 = vld [vmem:[#allocation2 + $0x3d8] sm:$0xf]  ;;  %v5929_v12 = vor.u32 %v4876_v54, %v4502_v1 }
 0x170   :  { %8304 = vst [vmem:[#allocation166_spill] sm:$0xff] %v5918_v14  ;;  %v4940_v59 = vld [vmem:[#allocation2 + $0x3f4] sm:$0xf0]  ;;  %v4872_v48 = vld [vmem:[#allocation2 + $0x1dc] sm:$0xf]  ;;  %v5927_v60 = vor.u32 %v4879_v55, %v4528_v17  ;;  %1393 = vmatpush.bf16.msra.mxu0 %v5918_v14  ;;  %1419 = vmatpush.bf16.msrb.mxu2 %v5924_v39 }
 0x171   :  { %v4504_v52 = vld [vmem:[#allocation2 + $0x1f8] sm:$0xf0]  ;;  %8305 = vst [vmem:[#allocation167_spill] sm:$0xff] %v5922_v47  ;;  %v5931_v0 = vor.u32 %v4940_v59, %v4758_v38  ;;  %v4470_v36 = vld [vmem:[#allocation2 + $0x198] sm:$0xf] }
 0x172   :  { %8306 = vst [vmem:[#allocation168_spill] sm:$0xff] %v5924_v39  ;;  %v4936_v29 = vld [vmem:[#allocation2 + $0x3dc] sm:$0xf]  ;;  %v5933_v50 = vor.u32 %v4872_v48, %v4504_v52  ;;  %v4868_v6 = vld [vmem:[#allocation2 + $0x1b4] sm:$0xf0]  ;;  %1406 = vmatpush.bf16.msra.mxu1 %v5922_v47  ;;  %1432 = vmatpush.bf16.msrb.mxu3 %v5927_v60 }
 0x173   :  { %v4760_v11 = vld [vmem:[#allocation2 + $0x3f8] sm:$0xf0]  ;;  %8307 = vst [vmem:[#allocation169_spill] sm:$0xff] %v5927_v60  ;;  %v4726_v20 = vld [vmem:[#allocation2 + $0x398] sm:$0xf]  ;;  %v5942_v38 = vor.u32 %v4868_v6, %v4470_v36  ;;  %1394 = vmatmul.bf16.vlgmr.msra.gmra.mxu0 %v8283_v25  ;;  %1420 = vmatmul.bf16.vlgmr.msrb.gmra.mxu2 %v8283_v25 }
 0x174   :  { %8308 = vst [vmem:[#allocation170_spill] sm:$0xff] %v5929_v12  ;;  %v5936_v37 = vor.u32 %v4936_v29, %v4760_v11  ;;  %v4932_v33 = vld [vmem:[#allocation2 + $0x3b4] sm:$0xf0]  ;;  %v4864_v26 = vld [vmem:[#allocation2 + $0x19c] sm:$0xf]  ;;  %1438 = vmatpush.bf16.msrb.mxu0 %v5929_v12  ;;  %1464 = vmatpush.bf16.msra.mxu2 %v5933_v50 }
 0x175   :  { %8309 = vst [vmem:[#allocation171_spill] sm:$0xff] %v5931_v0  ;;  %v4472_v51 = vld [vmem:[#allocation2 + $0x1b8] sm:$0xf0]  ;;  %v5946_v11 = vor.u32 %v4932_v33, %v4726_v20  ;;  %v4438_v17 = vld [vmem:[#allocation2 + $0x158] sm:$0xf]  ;;  %1407 = vmatmul.bf16.vlgmr.msra.gmra.mxu1 %v8283_v25  ;;  %1433 = vmatmul.bf16.vlgmr.msrb.gmra.mxu3 %v8283_v25 }
 0x176   :  { %8310 = vst [vmem:[#allocation172_spill] sm:$0xff] %v5933_v50  ;;  %v4928_v54 = vld [vmem:[#allocation2 + $0x39c] sm:$0xf]  ;;  %1451 = vmatpush.bf16.msrb.mxu1 %v5931_v0  ;;  %v5948_v55 = vor.u32 %v4864_v26, %v4472_v51  ;;  %v4860_v59 = vld [vmem:[#allocation2 + $0x174] sm:$0xf0]  ;;  %1477 = vmatpush.bf16.msra.mxu3 %v5936_v37 }
 0x177   :  { %8311 = vst [vmem:[#allocation173_spill] sm:$0xff] %v5936_v37  ;;  %v4728_v1 = vld [vmem:[#allocation2 + $0x3b8] sm:$0xf0]  ;;  %v4694_v48 = vld [vmem:[#allocation2 + $0x358] sm:$0xf]  ;;  %v5958_v26 = vor.u32 %v4860_v59, %v4438_v17 }
 0x178   :  { %8312 = vst [vmem:[#allocation174_spill] sm:$0xff] %v5942_v38  ;;  %v5952_v52 = vor.u32 %v4928_v54, %v4728_v1  ;;  %v4924_v29 = vld [vmem:[#allocation2 + $0x374] sm:$0xf0]  ;;  %v4856_v36 = vld [vmem:[#allocation2 + $0x15c] sm:$0xf]  ;;  %1439 = vmatpush.bf16.msrb.mxu0 %v5942_v38  ;;  %1465 = vmatpush.bf16.msra.mxu2 %v5948_v55 }
 0x179   :  { %8313 = vst [vmem:[#allocation175_spill] sm:$0xff] %v5946_v11  ;;  %v4440_v6 = vld [vmem:[#allocation2 + $0x178] sm:$0xf0]  ;;  %v5962_v51 = vor.u32 %v4924_v29, %v4694_v48  ;;  %v4406_v1 = vld [vmem:[#allocation2 + $0x118] sm:$0xf] }
 0x17a   :  { %8314 = vst [vmem:[#allocation176_spill] sm:$0xff] %v5948_v55  ;;  %v4920_v20 = vld [vmem:[#allocation2 + $0x35c] sm:$0xf]  ;;  %1452 = vmatpush.bf16.msrb.mxu1 %v5946_v11  ;;  %v5964_v54 = vor.u32 %v4856_v36, %v4440_v6  ;;  %v4852_v37 = vld [vmem:[#allocation2 + $0x134] sm:$0xf0]  ;;  %1478 = vmatpush.bf16.msra.mxu3 %v5952_v52 }
 0x17b   :  { %8315 = vst [vmem:[#allocation177_spill] sm:$0xff] %v5952_v52  ;;  %v4696_v33 = vld [vmem:[#allocation2 + $0x378] sm:$0xf0]  ;;  %v4662_v0 = vld [vmem:[#allocation2 + $0x318] sm:$0xf]  ;;  %v5970_v11 = vor.u32 %v4852_v37, %v4406_v1 }
 0x17c   :  { %8316 = vst [vmem:[#allocation178_spill] sm:$0xff] %v5958_v26  ;;  %v5967_v60 = vor.u32 %v4920_v20, %v4696_v33  ;;  %v4916_v47 = vld [vmem:[#allocation2 + $0x334] sm:$0xf0]  ;;  %v4848_v57 = vld [vmem:[#allocation2 + $0x11c] sm:$0xf]  ;;  %1440 = vmatpush.bf16.msrb.mxu0 %v5958_v26  ;;  %1466 = vmatpush.bf16.msra.mxu2 %v5964_v54 }
 0x17d   :  { %8317 = vst [vmem:[#allocation179_spill] sm:$0xff] %v5962_v51  ;;  %v4408_v38 = vld [vmem:[#allocation2 + $0x138] sm:$0xf0]  ;;  %v5974_v48 = vor.u32 %v4916_v47, %v4662_v0  ;;  %v4374_v36 = vld [vmem:[#allocation2 + $0xd8] sm:$0xf] }
 0x17e   :  { %8318 = vst [vmem:[#allocation180_spill] sm:$0xff] %v5964_v54  ;;  %v4912_v17 = vld [vmem:[#allocation2 + $0x31c] sm:$0xf]  ;;  %1453 = vmatpush.bf16.msrb.mxu1 %v5962_v51  ;;  %v5976_v29 = vor.u32 %v4848_v57, %v4408_v38  ;;  %v4844_v6 = vld [vmem:[#allocation2 + $0xf4] sm:$0xf0]  ;;  %1479 = vmatpush.bf16.msra.mxu3 %v5967_v60 }
 0x17f   :  { %8319 = vst [vmem:[#allocation181_spill] sm:$0xff] %v5967_v60  ;;  %v4664_v59 = vld [vmem:[#allocation2 + $0x338] sm:$0xf0]  ;;  %v4630_v20 = vld [vmem:[#allocation2 + $0x2d8] sm:$0xf]  ;;  %v5982_v51 = vor.u32 %v4844_v6, %v4374_v36 }
 0x180   :  { %8320 = vst [vmem:[#allocation182_spill] sm:$0xff] %v5970_v11  ;;  %v5979_v33 = vor.u32 %v4912_v17, %v4664_v59  ;;  %v4908_v52 = vld [vmem:[#allocation2 + $0x2f4] sm:$0xf0]  ;;  %v4840_v55 = vld [vmem:[#allocation2 + $0xdc] sm:$0xf]  ;;  %1441 = vmatpush.bf16.msrb.mxu0 %v5970_v11  ;;  %1467 = vmatpush.bf16.msra.mxu2 %v5976_v29 }
 0x181   :  { %8321 = vst [vmem:[#allocation183_spill] sm:$0xff] %v5974_v48  ;;  %v4376_v26 = vld [vmem:[#allocation2 + $0xf8] sm:$0xf0]  ;;  %v5986_v57 = vor.u32 %v4908_v52, %v4630_v20  ;;  %v4342_v0 = vld [vmem:[#allocation2 + $0x98] sm:$0xf] }
 0x182   :  { %8322 = vst [vmem:[#allocation184_spill] sm:$0xff] %v5976_v29  ;;  %v4904_v37 = vld [vmem:[#allocation2 + $0x2dc] sm:$0xf]  ;;  %1454 = vmatpush.bf16.msrb.mxu1 %v5974_v48  ;;  %v5988_v47 = vor.u32 %v4840_v55, %v4376_v26  ;;  %v4836_v38 = vld [vmem:[#allocation2 + $0xb4] sm:$0xf0]  ;;  %1480 = vmatpush.bf16.msra.mxu3 %v5979_v33 }
 0x183   :  { %8323 = vst [vmem:[#allocation185_spill] sm:$0xff] %v5979_v33  ;;  %v4632_v1 = vld [vmem:[#allocation2 + $0x2f8] sm:$0xf0]  ;;  %v4598_v17 = vld [vmem:[#allocation2 + $0x298] sm:$0xf]  ;;  %v5994_v48 = vor.u32 %v4836_v38, %v4342_v0 }
 0x184   :  { %8324 = vst [vmem:[#allocation186_spill] sm:$0xff] %v5982_v51  ;;  %v5991_v59 = vor.u32 %v4904_v37, %v4632_v1  ;;  %v4900_v60 = vld [vmem:[#allocation2 + $0x2b4] sm:$0xf0]  ;;  %v4832_v54 = vld [vmem:[#allocation2 + $0x9c] sm:$0xf]  ;;  %1442 = vmatpush.bf16.msrb.mxu0 %v5982_v51  ;;  %1468 = vmatpush.bf16.msra.mxu2 %v5988_v47 }
 0x185   :  { %8325 = vst [vmem:[#allocation187_spill] sm:$0xff] %v5986_v57  ;;  %v4344_v11 = vld [vmem:[#allocation2 + $0xb8] sm:$0xf0]  ;;  %v5998_v55 = vor.u32 %v4900_v60, %v4598_v17  ;;  %v4310_v26 = vld [vmem:[#allocation2 + $0x58] sm:$0xf] }
 0x186   :  { %8326 = vst [vmem:[#allocation188_spill] sm:$0xff] %v5988_v47  ;;  %v4896_v36 = vld [vmem:[#allocation2 + $0x29c] sm:$0xf]  ;;  %1455 = vmatpush.bf16.msrb.mxu1 %v5986_v57  ;;  %v6000_v52 = vor.u32 %v4832_v54, %v4344_v11  ;;  %v4828_v20 = vld [vmem:[#allocation2 + $0x74] sm:$0xf0]  ;;  %1481 = vmatpush.bf16.msra.mxu3 %v5991_v59 }
 0x187   :  { %8327 = vst [vmem:[#allocation189_spill] sm:$0xff] %v5991_v59  ;;  %v4600_v6 = vld [vmem:[#allocation2 + $0x2b8] sm:$0xf0]  ;;  %v4566_v37 = vld [vmem:[#allocation2 + $0x258] sm:$0xf]  ;;  %v6006_v57 = vor.u32 %v4828_v20, %v4310_v26 }
 0x188   :  { %8328 = vst [vmem:[#allocation190_spill] sm:$0xff] %v5994_v48  ;;  %v6003_v1 = vor.u32 %v4896_v36, %v4600_v6  ;;  %v4892_v33 = vld [vmem:[#allocation2 + $0x274] sm:$0xf0]  ;;  %v4824_v29 = vld [vmem:[#allocation2 + $0x5c] sm:$0xf]  ;;  %1443 = vmatpush.bf16.msrb.mxu0 %v5994_v48  ;;  %1469 = vmatpush.bf16.msra.mxu2 %v6000_v52 }
 0x189   :  { %8329 = vst [vmem:[#allocation191_spill] sm:$0xff] %v5998_v55  ;;  %v4312_v51 = vld [vmem:[#allocation2 + $0x78] sm:$0xf0]  ;;  %v6010_v60 = vor.u32 %v4892_v33, %v4566_v37  ;;  %v4278_v54 = vld [vmem:[#allocation2 + $0x18] sm:$0xf] }
 0x18a   :  { %8330 = vst [vmem:[#allocation192_spill] sm:$0xff] %v6000_v52  ;;  %v4888_v0 = vld [vmem:[#allocation2 + $0x25c] sm:$0xf]  ;;  %1456 = vmatpush.bf16.msrb.mxu1 %v5998_v55  ;;  %v6012_v11 = vor.u32 %v4824_v29, %v4312_v51  ;;  %v4820_v17 = vld [vmem:[#allocation2 + $0x34] sm:$0xf0]  ;;  %1482 = vmatpush.bf16.msra.mxu3 %v6003_v1 }
 0x18b   :  { %8331 = vst [vmem:[#allocation193_spill] sm:$0xff] %v6003_v1  ;;  %v4568_v38 = vld [vmem:[#allocation2 + $0x278] sm:$0xf0]  ;;  %v4534_v36 = vld [vmem:[#allocation2 + $0x218] sm:$0xf]  ;;  %v6018_v55 = vor.u32 %v4820_v17, %v4278_v54  ;;  %v8345_v17 = vld [vmem:[#allocation115_spill] sm:$0xff] }
 0x18c   :  { %8332 = vst [vmem:[#allocation194_spill] sm:$0xff] %v6006_v57  ;;  %v6015_v6 = vor.u32 %v4888_v0, %v4568_v38  ;;  %v4884_v59 = vld [vmem:[#allocation2 + $0x234] sm:$0xf0]  ;;  %v4816_v47 = vld [vmem:[#allocation2 + $0x1c] sm:$0xf]  ;;  %1444 = vmatpush.bf16.msrb.mxu0 %v6006_v57  ;;  %1470 = vmatpush.bf16.msra.mxu2 %v6012_v11  ;;  %v8344_v0 = vld [vmem:[#allocation116_spill] sm:$0xff] }
 0x18d   :  { %8333 = vst [vmem:[#allocation195_spill] sm:$0xff] %v6010_v60  ;;  %v4280_v48 = vld [vmem:[#allocation2 + $0x38] sm:$0xf0]  ;;  %v6022_v51 = vor.u32 %v4884_v59, %v4534_v36  ;;  %v8346_v36 = vld [vmem:[#allocation118_spill] sm:$0xff] }
 0x18e   :  { %8334 = vst [vmem:[#allocation196_spill] sm:$0xff] %v6012_v11  ;;  %v4880_v26 = vld [vmem:[#allocation2 + $0x21c] sm:$0xf]  ;;  %1457 = vmatpush.bf16.msrb.mxu1 %v6010_v60  ;;  %v6024_v29 = vor.u32 %v4816_v47, %v4280_v48  ;;  %1483 = vmatpush.bf16.msra.mxu3 %v6015_v6  ;;  %v8341_v48 = vld [vmem:[#allocation111_spill] sm:$0xff]  ;;  %v8342_v47 = vld [vmem:[#allocation114_spill] sm:$0xff] }
 0x18f   :  { %8335 = vst [vmem:[#allocation197_spill] sm:$0xff] %v6015_v6  ;;  %v4536_v20 = vld [vmem:[#allocation2 + $0x238] sm:$0xf0] }
 0x190   :  { %8336 = vst [vmem:[#allocation198_spill] sm:$0xff] %v6018_v55  ;;  %v6027_v33 = vor.u32 %v4880_v26, %v4536_v20  ;;  %1445 = vmatpush.bf16.msrb.mxu0 %v6018_v55  ;;  %1471 = vmatpush.bf16.msra.mxu2 %v6024_v29  ;;  %v8343_v59 = vld [vmem:[#allocation113_spill] sm:$0xff]  ;;  %v8348_v20 = vld [vmem:[#allocation120_spill] sm:$0xff] }
 0x191   :  { %8337 = vst [vmem:[#allocation199_spill] sm:$0xff] %v6022_v51  ;;  %v8347_v26 = vld [vmem:[#allocation117_spill] sm:$0xff] }
 0x192   :  { %8338 = vst [vmem:[#allocation200_spill] sm:$0xff] %v6024_v29  ;;  %1458 = vmatpush.bf16.msrb.mxu1 %v6022_v51  ;;  %1484 = vmatpush.bf16.msra.mxu3 %v6027_v33 }
 0x193   :  { %8339 = vst [vmem:[#allocation201_spill] sm:$0xff] %v6027_v33  ;;  %1446 = vmatmul.bf16.vlgmr.msrb.gmra.mxu0 %v8283_v25  ;;  %1472 = vmatmul.bf16.vlgmr.msra.gmra.mxu2 %v8283_v25 }
 0x194   :  { %1634 = vmatpush.bf16.msra.mxu0 %v5637_v18  ;;  %1660 = vmatpush.bf16.msrb.mxu2 %v5641_v46 }
 0x195   :  { %1459 = vmatmul.bf16.vlgmr.msrb.gmra.mxu1 %v8283_v25  ;;  %1485 = vmatmul.bf16.vlgmr.msra.gmra.mxu3 %v8283_v25  ;;  %v8340_v25 = vld [vmem:[#allocation112_spill] sm:$0xff] }
 0x196   :  { %1647 = vmatpush.bf16.msra.mxu1 %v5639_v35  ;;  %1673 = vmatpush.bf16.msrb.mxu3 %v5644_v40 }
 0x198   :  { %1635 = vmatpush.bf16.msra.mxu0 %v5648_v30  ;;  %1661 = vmatpush.bf16.msrb.mxu2 %v5653_v45 }
 0x19a   :  { %1648 = vmatpush.bf16.msra.mxu1 %v5650_v58  ;;  %1674 = vmatpush.bf16.msrb.mxu3 %v5655_v31 }
 0x19c   :  { %1636 = vmatpush.bf16.msra.mxu0 %v5658_v62  ;;  %1662 = vmatpush.bf16.msrb.mxu2 %v5664_v43 }
 0x19e   :  { %1649 = vmatpush.bf16.msra.mxu1 %v5662_v24  ;;  %1675 = vmatpush.bf16.msrb.mxu3 %v5667_v15 }
 0x1a0   :  { %1637 = vmatpush.bf16.msra.mxu0 %v5670_v34  ;;  %1663 = vmatpush.bf16.msrb.mxu2 %v5676_v23 }
 0x1a2   :  { %1650 = vmatpush.bf16.msra.mxu1 %v5674_v16  ;;  %1676 = vmatpush.bf16.msrb.mxu3 %v5679_v61 }
 0x1a4   :  { %1638 = vmatpush.bf16.msra.mxu0 %v5682_v7  ;;  %1664 = vmatpush.bf16.msrb.mxu2 %v5688_v28 }
 0x1a6   :  { %1651 = vmatpush.bf16.msra.mxu1 %v5686_v27  ;;  %1677 = vmatpush.bf16.msrb.mxu3 %v5691_v49 }
 0x1a8   :  { %1639 = vmatpush.bf16.msra.mxu0 %v5694_v44  ;;  %1665 = vmatpush.bf16.msrb.mxu2 %v5700_v8 }
 0x1aa   :  { %1652 = vmatpush.bf16.msra.mxu1 %v5698_v41  ;;  %1678 = vmatpush.bf16.msrb.mxu3 %v5703_v42 }
 0x1ac   :  { %1640 = vmatpush.bf16.msra.mxu0 %v5706_v63  ;;  %1666 = vmatpush.bf16.msrb.mxu2 %v5712_v32  ;;  %v8372_v63 = vld [vmem:[#allocation38_spill] sm:$0xff] }
 0x1ae   :  { %1653 = vmatpush.bf16.msra.mxu1 %v5710_v21  ;;  %1679 = vmatpush.bf16.msrb.mxu3 %v5715_v9 }
 0x1b0   :  { %1641 = vmatpush.bf16.msra.mxu0 %v5718_v4  ;;  %1667 = vmatpush.bf16.msrb.mxu2 %v5724_v13  ;;  %v8369_v13 = vld [vmem:[#allocation17_spill] sm:$0xff]  ;;  %v8370_v4 = vld [vmem:[#allocation11_spill] sm:$0xff] }
 0x1b2   :  { %1654 = vmatpush.bf16.msra.mxu1 %v5722_v5  ;;  %1680 = vmatpush.bf16.msrb.mxu3 %v5727_v3  ;;  %v8350_v3 = vld [vmem:[#allocation122_spill] sm:$0xff]  ;;  %v8352_v5 = vld [vmem:[#allocation124_spill] sm:$0xff] }
 0x1b4   :  { %1686 = vmatpush.bf16.msrb.mxu0 %v5729_v53  ;;  %1712 = vmatpush.bf16.msra.mxu2 %v5733_v2  ;;  %v1291_v37 = vpop.f32.mrf.mxu0  ;;  %v1304_v38 = vpop.f32.mrf.mxu1 }
 0x1b5   :  { %v1305_v54 = vadd.f32 %v1304_v38, %v1291_v37  ;;  %v8353_v38 = vld [vmem:[#allocation123_spill] sm:$0xff] }
 0x1b6   :  { %1699 = vmatpush.bf16.msrb.mxu1 %v5731_v19  ;;  %1725 = vmatpush.bf16.msra.mxu3 %v5736_v10 }
 0x1b8   :  { %1687 = vmatpush.bf16.msrb.mxu0 %v5742_v56  ;;  %1713 = vmatpush.bf16.msra.mxu2 %v8340_v25  ;;  %v1317_v10 = vpop.f32.mrf.mxu2  ;;  %v1330_v19 = vpop.f32.mrf.mxu3 }
 0x1ba   :  { %1700 = vmatpush.bf16.msrb.mxu1 %v8341_v48  ;;  %1726 = vmatpush.bf16.msra.mxu3 %v8343_v59  ;;  %v8349_v48 = vld [vmem:[#allocation119_spill] sm:$0xff]  ;;  %v8351_v59 = vld [vmem:[#allocation121_spill] sm:$0xff] }
 0x1bc   :  { %1688 = vmatpush.bf16.msrb.mxu0 %v8342_v47  ;;  %1714 = vmatpush.bf16.msra.mxu2 %v8344_v0  ;;  %v1331_v47 = vadd.f32 %v1330_v19, %v1317_v10  ;;  %v1293_v0 = vpop.f32.mrf.mxu0  ;;  %v1306_v37 = vpop.f32.mrf.mxu1  ;;  %v8358_v19 = vld [vmem:[#allocation130_spill] sm:$0xff]  ;;  %v8359_v10 = vld [vmem:[#allocation129_spill] sm:$0xff] }
 0x1bd   :  { %v8360_v0 = vld [vmem:[#allocation132_spill] sm:$0xff]  ;;  %v8362_v37 = vld [vmem:[#allocation134_spill] sm:$0xff] }
 0x1be   :  { %1701 = vmatpush.bf16.msrb.mxu1 %v8345_v17  ;;  %1727 = vmatpush.bf16.msra.mxu3 %v8347_v26  ;;  %v8354_v17 = vld [vmem:[#allocation126_spill] sm:$0xff]  ;;  %v8355_v26 = vld [vmem:[#allocation125_spill] sm:$0xff]  ;;  %v1491_v42 = vadd.f32 %v1331_v47, %v8370_v4 }
 0x1c0   :  { %1689 = vmatpush.bf16.msrb.mxu0 %v8346_v36  ;;  %1715 = vmatpush.bf16.msra.mxu2 %v8348_v20  ;;  %v8356_v20 = vld [vmem:[#allocation128_spill] sm:$0xff]  ;;  %v1319_v36 = vpop.f32.mrf.mxu2  ;;  %v1332_v25 = vpop.f32.mrf.mxu3 }
 0x1c1   :  { %v8366_v36 = vld [vmem:[#allocation137_spill] sm:$0xff] }
 0x1c2   :  { %1702 = vmatpush.bf16.msrb.mxu1 %v8349_v48  ;;  %1728 = vmatpush.bf16.msra.mxu3 %v8351_v59  ;;  %v8357_v48 = vld [vmem:[#allocation127_spill] sm:$0xff] }
 0x1c3   :  { %v8361_v59 = vld [vmem:[#allocation131_spill] sm:$0xff] }
 0x1c4   :  { %1690 = vmatpush.bf16.msrb.mxu0 %v8350_v3  ;;  %1716 = vmatpush.bf16.msra.mxu2 %v8352_v5 }
 0x1c6   :  { %1703 = vmatpush.bf16.msrb.mxu1 %v8353_v38  ;;  %1729 = vmatpush.bf16.msra.mxu3 %v8355_v26  ;;  %v8363_v38 = vld [vmem:[#allocation133_spill] sm:$0xff]  ;;  %v8365_v26 = vld [vmem:[#allocation135_spill] sm:$0xff] }
 0x1c8   :  { %1691 = vmatpush.bf16.msrb.mxu0 %v8354_v17  ;;  %1717 = vmatpush.bf16.msra.mxu2 %v8356_v20  ;;  %v8364_v17 = vld [vmem:[#allocation136_spill] sm:$0xff] }
 0x1ca   :  { %1704 = vmatpush.bf16.msrb.mxu1 %v8357_v48  ;;  %1730 = vmatpush.bf16.msra.mxu3 %v8359_v10 }
 0x1cc   :  { %1692 = vmatpush.bf16.msrb.mxu0 %v8358_v19  ;;  %1718 = vmatpush.bf16.msra.mxu2 %v8360_v0 }
 0x1ce   :  { %1705 = vmatpush.bf16.msrb.mxu1 %v8361_v59  ;;  %1731 = vmatpush.bf16.msra.mxu3 %v8363_v38  ;;  %v8367_v59 = vld [vmem:[#allocation16_spill] sm:$0xff] }
 0x1d0   :  { %1693 = vmatpush.bf16.msrb.mxu0 %v8362_v37  ;;  %1719 = vmatpush.bf16.msra.mxu2 %v8364_v17  ;;  %v8368_v37 = vld [vmem:[#allocation10_spill] sm:$0xff] }
 0x1d1   :  { %v1490_v21 = vadd.f32 %v1305_v54, %v8368_v37 }
 0x1d2   :  { %1706 = vmatpush.bf16.msrb.mxu1 %v8365_v26  ;;  %1732 = vmatpush.bf16.msra.mxu3 %v8366_v36  ;;  %v1343_v25 = vpop.f32.mrf.mxu0  ;;  %v1356_v48 = vpop.f32.mrf.mxu1 }
 0x1d3   :  { %v1357_v56 = vadd.f32 %v1356_v48, %v1343_v25  ;;  %v4764_v26 = vmul.f32 -1.442695, %v1490_v21  ;;  %v4765_v48 = vmul.f32 -1.442695, %v1491_v42 }
 0x1d5   :  { %v1492_v9 = vadd.f32 %v1357_v56, %v8367_v59 }
 0x1d7   :  { %v4766_v2 = vmul.f32 -1.442695, %v1492_v9 }
 0x1d9   :  { %4950 = vpow2.f32 %v4766_v2 }
 0x1da   :  { %v1369_v20 = vpop.f32.mrf.mxu2  ;;  %v1382_v19 = vpop.f32.mrf.mxu3  ;;  %4952 = vpow2.f32 %v4764_v26 }
 0x1db   :  { %v1345_v5 = vpop.f32.mrf.mxu0  ;;  %v1358_v10 = vpop.f32.mrf.mxu1  ;;  %v1383_v38 = vadd.f32 %v1382_v19, %v1369_v20 }
 0x1dd   :  { %v1493_v36 = vadd.f32 %v1383_v38, %v8369_v13 }
 0x1df   :  { %v4767_v5 = vmul.f32 -1.442695, %v1493_v36  ;;  %v4951_v56 = vpop.eup %4950 }
 0x1e0   :  { %v4953_v59 = vpop.eup %4952  ;;  %v1542_v9 = vadd.f32 1.0, %v4951_v56 }
 0x1e1   :  { %4954 = vpow2.f32 %v4767_v5  ;;  %v1504_v54 = vadd.f32 1.0, %v4953_v59 }
 0x1e2   :  { %v1371_v3 = vpop.f32.mrf.mxu2  ;;  %v1384_v0 = vpop.f32.mrf.mxu3  ;;  %4956 = vpow2.f32 %v4765_v48  ;;  %vm1549_vm2 = vweird.f32 %v1542_v9 }
 0x1e3   :  { %4958 = vrcp.f32 %v1542_v9  ;;  %v1517_v41 = vand.u32 2147483648, %v1504_v54  ;;  %vm1511_vm1 = vweird.f32 %v1504_v54 }
 0x1e4   :  { %4960 = vrcp.f32 %v1504_v54 }
 0x1e7   :  { %v4955_v19 = vpop.eup %4954 }
 0x1e8   :  { %v4957_v13 = vpop.eup %4956  ;;  %v6105_v4 = vadd.f32 1.0, %v4955_v19 }
 0x1e9   :  { %v6107_v2 = vadd.f32 1.0, %v4957_v13  ;;  %v6109_v47 = vpop.eup %4958 }
 0x1ea   :  { %4962 = vrcp.f32 %v6105_v4  ;;  %v6112_v42 = vpop.eup %4960  ;;  %v1545_v26 = vmul.f32 %v6109_v47, %v1542_v9  ;;  %vm1550_vm3 = vweird.f32 %v6109_v47  ;;  %vm1564_vm10 = vweird.f32 %v6105_v4 }
 0x1eb   :  { %4964 = vrcp.f32 %v6107_v2  ;;  %v1507_v38 = vmul.f32 %v6112_v42, %v1504_v54  ;;  %vm1512_vm4 = vweird.f32 %v6112_v42  ;;  %vm6133_vm5 = vmor %vm1549_vm2, %vm1550_vm3  ;;  %vm1526_vm9 = vweird.f32 %v6107_v2 }
 0x1ec   :  { %v1546_v5 = vsub.f32 1.0, %v1545_v26  ;;  %vm6141_vm6 = vmor %vm1511_vm1, %vm1512_vm4 }
 0x1ed   :  { %v1508_v59 = vsub.f32 1.0, %v1507_v38 }
 0x1ee   :  { %v1547_v13 = vmul.f32 %v6109_v47, %v1546_v5 }
 0x1f0   :  { %v1395_v17 = vpop.f32.mrf.mxu0  ;;  %v6117_v36 = vpop.eup %4962  ;;  %v1548_v27 = vadd.f32 %v6109_v47, %v1547_v13 }
 0x1f1   :  { %v6119_v56 = vpop.eup %4964  ;;  %vm1565_vm12 = vweird.f32 %v6117_v36 }
 0x1f2   :  { %v1408_v53 = vpop.f32.mrf.mxu1  ;;  %v1522_v32 = vmul.f32 %v6119_v56, %v6107_v2  ;;  %vm1527_vm11 = vweird.f32 %v6119_v56  ;;  %vm6167_vm13 = vmor %vm1564_vm10, %vm1565_vm12 }
 0x1f3   :  { %v1409_v48 = vadd.f32 %v1408_v53, %v1395_v17  ;;  %v1509_v53 = vmul.f32 %v6112_v42, %v1508_v59  ;;  %v1515_v17 = vand.u32 2147483647, %v1504_v54  ;;  %vm1528_vm14 = vmor %vm1526_vm9, %vm1527_vm11 }
 0x1f4   :  { %v1523_v8 = vsub.f32 1.0, %v1522_v32 }
 0x1f5   :  { %v1494_v49 = vadd.f32 %v1409_v48, %v8372_v63  ;;  %v1553_v63 = vand.u32 2147483647, %v1542_v9  ;;  %vm6145_vm7 = vcmp.eq.f32.partialorder %v1515_v17, 8.507059e+37  ;;  %v1570_v17 = vand.u32 2147483648, %v6105_v4 }
 0x1f6   :  { %v1421_v10 = vpop.f32.mrf.mxu2  ;;  %v1524_v54 = vmul.f32 %v6119_v56, %v1523_v8 }
 0x1f7   :  { %vm1554_vm8 = vcmp.eq.f32.partialorder %v1553_v63, 8.507059e+37  ;;  %v1568_v63 = vand.u32 2147483647, %v6105_v4 }
 0x1f8   :  { %v1434_v3 = vpop.f32.mrf.mxu3  ;;  %v1397_v0 = vpop.f32.mrf.mxu0  ;;  %v1525_v59 = vadd.f32 %v6119_v56, %v1524_v54 }
 0x1f9   :  { %vm1569_vm15 = vcmp.eq.f32.partialorder %v1568_v63, 8.507059e+37 }
 0x1fa   :  { %v1410_v25 = vpop.f32.mrf.mxu1  ;;  %v1529_v32 = vsel %vm1528_vm14, %v6119_v56, %v1525_v59 }
 0x1fe   :  { %v1423_v20 = vpop.f32.mrf.mxu2 }
 0x1ff   :  { %v1560_v20 = vmul.f32 %v6117_v36, %v6105_v4 }
 0x200   :  { %v1436_v21 = vpop.f32.mrf.mxu3 }
 0x201   :  { %v8371_v21 = vld [vmem:[#allocation48_spill] sm:$0xff] }
 0x210   :  { %v1447_v37 = vpop.f32.mrf.mxu0 }
 0x212   :  { %v1460_v0 = vpop.f32.mrf.mxu1 }
 0x213   :  { %v1461_v25 = vadd.f32 %v1460_v0, %v1447_v37  ;;  %v1555_v37 = vand.u32 2147483648, %v1542_v9  ;;  %v1561_v0 = vsub.f32 1.0, %v1560_v20  ;;  %v1510_v20 = vadd.f32 %v6112_v42, %v1509_v53  ;;  %v8380_v9 = vld [vmem:[#allocation39_spill] sm:$0xff] }
 0x215   :  { %v1496_v19 = vadd.f32 %v1461_v25, %v8371_v21  ;;  %v1435_v25 = vadd.f32 %v1434_v3, %v1421_v10  ;;  %v1518_v10 = vor.u32 1.1754944e-38, %v1517_v41  ;;  %v8375_v3 = vld [vmem:[#allocation49_spill] sm:$0xff]  ;;  %v1562_v44 = vmul.f32 %v6117_v36, %v1561_v0 }
 0x216   :  { %v1473_v38 = vpop.f32.mrf.mxu2 }
 0x217   :  { %v4768_v26 = vmul.f32 -1.442695, %v1496_v19 }
 0x218   :  { %v1486_v5 = vpop.f32.mrf.mxu3  ;;  %v1449_v21 = vpop.f32.mrf.mxu0 }
 0x219   :  { %4966 = vpow2.f32 %v4768_v26  ;;  %v1487_v48 = vadd.f32 %v1486_v5, %v1473_v38  ;;  %v1556_v21 = vor.u32 1.1754944e-38, %v1555_v37  ;;  %v1495_v38 = vadd.f32 %v1435_v25, %v8380_v9 }
 0x21a   :  { %v1462_v19 = vpop.f32.mrf.mxu1  ;;  %4968 = vtanh.f32 %v1494_v49  ;;  %v1552_v49 = vsel %vm6133_vm5, %v6109_v47, %v1548_v27  ;;  %v1514_v37 = vsel %vm6141_vm6, %v6112_v42, %v1510_v20  ;;  %v1563_v5 = vadd.f32 %v6117_v36, %v1562_v44 }
 0x21b   :  { %v1497_v26 = vadd.f32 %v1487_v48, %v8375_v3  ;;  %v1557_v25 = vsel %vm1554_vm8, %v1556_v21, %v1552_v49  ;;  %v1532_v48 = vand.u32 2147483648, %v6107_v2  ;;  %v1519_v42 = vsel %vm6145_vm7, %v1518_v10, %v1514_v37 }
 0x21c   :  { %v1530_v44 = vand.u32 2147483647, %v6107_v2  ;;  %v1571_v20 = vor.u32 1.1754944e-38, %v1570_v17  ;;  %v1614_v3 = vmul.f32 0.0, %v1557_v25  ;;  %v1567_v4 = vsel %vm6167_vm13, %v6117_v36, %v1563_v5 }
 0x21d   :  { %v4769_v41 = vmul.f32 -1.442695, %v1497_v26  ;;  %v1533_v13 = vor.u32 1.1754944e-38, %v1532_v48 }
 0x21e   :  { %v1475_v47 = vpop.f32.mrf.mxu2  ;;  %vm1531_vm0 = vcmp.eq.f32.partialorder %v1530_v44, 8.507059e+37 }
 0x21f   :  { %v4967_v53 = vpop.eup %4966  ;;  %4970 = vpow2.f32 %v4769_v41  ;;  %v1572_v41 = vsel %vm1569_vm15, %v1571_v20, %v1567_v4  ;;  %v1534_v2 = vsel %vm1531_vm0, %v1533_v13, %v1529_v32  ;;  %v8384_v32 = vld [vmem:[#allocation140_spill] sm:$0xff] }
 0x220   :  { %v1582_v27 = vadd.f32 1.0, %v4967_v53  ;;  %v4969_v0 = vpop.eup %4968  ;;  %4972 = vtanh.f32 %v1495_v38  ;;  %v1488_v8 = vpop.f32.mrf.mxu3  ;;  %v1615_v54 = vmul.f32 0.0, %v1572_v41 }
 0x221   :  { %v1616_v26 = vmul.f32 %v4969_v0, %v1519_v42 }
 0x222   :  { %4974 = vrcp.f32 %v1582_v27  ;;  %v1595_v36 = vand.u32 2147483648, %v1582_v27  ;;  %vm1589_vm1 = vweird.f32 %v1582_v27  ;;  %v1593_v0 = vand.u32 2147483647, %v1582_v27 }
 0x223   :  { %v6183_v49 = vadd.f32 %v1616_v26, %v1614_v3 }
 0x224   :  { %v1596_v63 = vor.u32 1.1754944e-38, %v1595_v36  ;;  %vm1594_vm4 = vcmp.eq.f32.partialorder %v1593_v0, 8.507059e+37  ;;  %v8389_v36 = vld [vmem:[#allocation146_spill] sm:$0xff]  ;;  %v8391_v0 = vld [vmem:[#allocation143_spill] sm:$0xff] }
 0x225   :  { %v4971_v21 = vpop.eup %4970 }
 0x226   :  { %v4973_v10 = vpop.eup %4972  ;;  %v1583_v9 = vadd.f32 1.0, %v4971_v21 }
 0x227   :  { %v1617_v17 = vmul.f32 %v4973_v10, %v1534_v2  ;;  %v8383_v10 = vld [vmem:[#allocation138_spill] sm:$0xff] }
 0x228   :  { %v4975_v38 = vpop.eup %4974  ;;  %4976 = vrcp.f32 %v1583_v9  ;;  %v1610_v20 = vand.u32 2147483648, %v1583_v9  ;;  %v1608_v26 = vand.u32 2147483647, %v1583_v9  ;;  %vm1604_vm6 = vweird.f32 %v1583_v9 }
 0x229   :  { %v1585_v53 = vmul.f32 %v4975_v38, %v1582_v27  ;;  %4978 = vtanh.f32 %v6183_v49  ;;  %vm1590_vm2 = vweird.f32 %v4975_v38  ;;  %v6186_v25 = vadd.f32 %v1617_v17, %v1615_v54  ;;  %v8385_v54 = vld [vmem:[#allocation142_spill] sm:$0xff]  ;;  %v8387_v17 = vld [vmem:[#allocation139_spill] sm:$0xff] }
 0x22a   :  { %vm1591_vm3 = vmor %vm1589_vm1, %vm1590_vm2  ;;  %v1611_v21 = vor.u32 1.1754944e-38, %v1610_v20  ;;  %vm1609_vm8 = vcmp.eq.f32.partialorder %v1608_v26, 8.507059e+37  ;;  %v8401_v20 = vld [vmem:[#allocation158_spill] sm:$0xff]  ;;  %v8403_v26 = vld [vmem:[#allocation155_spill] sm:$0xff] }
 0x22b   :  { %v1586_v37 = vsub.f32 1.0, %v1585_v53  ;;  %4980 = vtanh.f32 %v6186_v25 }
 0x22d   :  { %v1587_v47 = vmul.f32 %v4975_v38, %v1586_v37  ;;  %v8388_v37 = vld [vmem:[#allocation141_spill] sm:$0xff] }
 0x22e   :  { %v4977_v56 = vpop.eup %4976 }
 0x22f   :  { %v1588_v5 = vadd.f32 %v4975_v38, %v1587_v47  ;;  %v1600_v8 = vmul.f32 %v4977_v56, %v1583_v9  ;;  %v4979_v19 = vpop.eup %4978  ;;  %vm1605_vm5 = vweird.f32 %v4977_v56  ;;  %v8386_v9 = vld [vmem:[#allocation144_spill] sm:$0xff] }
 0x230   :  { %vm1606_vm7 = vmor %vm1604_vm6, %vm1605_vm5  ;;  %v8390_v47 = vld [vmem:[#allocation148_spill] sm:$0xff] }
 0x231   :  { %v1592_v48 = vsel %vm1591_vm3, %v4975_v38, %v1588_v5  ;;  %v1601_v59 = vsub.f32 1.0, %v1600_v8  ;;  %v4981_v38 = vpop.eup %4980  ;;  %v8393_v5 = vld [vmem:[#allocation150_spill] sm:$0xff]  ;;  %v8395_v8 = vld [vmem:[#allocation147_spill] sm:$0xff] }
 0x232   :  { %v1597_v42 = vsel %vm1594_vm4, %v1596_v63, %v1592_v48  ;;  %v8394_v63 = vld [vmem:[#allocation152_spill] sm:$0xff]  ;;  %v8396_v48 = vld [vmem:[#allocation149_spill] sm:$0xff] }
 0x233   :  { %v1622_v44 = vmul.f32 %v4979_v19, %v1597_v42  ;;  %v1602_v3 = vmul.f32 %v4977_v56, %v1601_v59  ;;  %v8397_v19 = vld [vmem:[#allocation154_spill] sm:$0xff]  ;;  %v8398_v42 = vld [vmem:[#allocation156_spill] sm:$0xff]  ;;  %v8399_v59 = vld [vmem:[#allocation151_spill] sm:$0xff] }
 0x235   :  { %v6189_v27 = vpack.c.bf16 %v1622_v44, %v1622_v44  ;;  %v1603_v4 = vadd.f32 %v4977_v56, %v1602_v3  ;;  %v8400_v44 = vld [vmem:[#allocation153_spill] sm:$0xff]  ;;  %v8402_v3 = vld [vmem:[#allocation160_spill] sm:$0xff] }
 0x237   :  { %1642 = vmatmul.bf16.vlgmr.msra.gmra.mxu0 %v6189_v27  ;;  %1668 = vmatmul.bf16.vlgmr.msrb.gmra.mxu2 %v6189_v27  ;;  %v1607_v13 = vsel %vm1606_vm7, %v4977_v56, %v1603_v4  ;;  %v8392_v56 = vld [vmem:[#allocation145_spill] sm:$0xff] }
 0x238   :  { %1738 = vmatpush.bf16.msra.mxu0 %v8383_v10  ;;  %1764 = vmatpush.bf16.msrb.mxu2 %v8384_v32  ;;  %v1612_v41 = vsel %vm1609_vm8, %v1611_v21, %v1607_v13  ;;  %v8404_v4 = vld [vmem:[#allocation157_spill] sm:$0xff]  ;;  %v8405_v21 = vld [vmem:[#allocation162_spill] sm:$0xff]  ;;  %v8406_v13 = vld [vmem:[#allocation159_spill] sm:$0xff] }
 0x239   :  { %v1623_v53 = vmul.f32 %v4981_v38, %v1612_v41  ;;  %v8407_v38 = vld [vmem:[#allocation161_spill] sm:$0xff]  ;;  %v8408_v41 = vld [vmem:[#allocation163_spill] sm:$0xff] }
 0x23b   :  { %v6195_v2 = vpack.c.bf16 %v1623_v53, %v1623_v53  ;;  %v8409_v53 = vld [vmem:[#allocation165_spill] sm:$0xff] }
 0x23c   :  { %1739 = vmatpush.bf16.msra.mxu0 %v8385_v54  ;;  %1765 = vmatpush.bf16.msrb.mxu2 %v8386_v9 }
 0x23d   :  { %1655 = vmatmul.bf16.vlgmr.msra.gmra.mxu1 %v6195_v2  ;;  %1681 = vmatmul.bf16.vlgmr.msrb.gmra.mxu3 %v6195_v2 }
 0x23e   :  { %1751 = vmatpush.bf16.msra.mxu1 %v8387_v17  ;;  %1777 = vmatpush.bf16.msrb.mxu3 %v8388_v37 }
 0x240   :  { %1740 = vmatpush.bf16.msra.mxu0 %v8389_v36  ;;  %1766 = vmatpush.bf16.msrb.mxu2 %v8390_v47 }
 0x242   :  { %1752 = vmatpush.bf16.msra.mxu1 %v8391_v0  ;;  %1778 = vmatpush.bf16.msrb.mxu3 %v8392_v56 }
 0x244   :  { %1741 = vmatpush.bf16.msra.mxu0 %v8393_v5  ;;  %1767 = vmatpush.bf16.msrb.mxu2 %v8394_v63 }
 0x246   :  { %1753 = vmatpush.bf16.msra.mxu1 %v8395_v8  ;;  %1779 = vmatpush.bf16.msrb.mxu3 %v8396_v48 }
 0x247   :  { %1694 = vmatmul.bf16.vlgmr.msrb.gmra.mxu0 %v6189_v27  ;;  %1720 = vmatmul.bf16.vlgmr.msra.gmra.mxu2 %v6189_v27 }
 0x248   :  { %1742 = vmatpush.bf16.msra.mxu0 %v8397_v19  ;;  %1768 = vmatpush.bf16.msrb.mxu2 %v8398_v42 }
 0x24a   :  { %1754 = vmatpush.bf16.msra.mxu1 %v8399_v59  ;;  %1780 = vmatpush.bf16.msrb.mxu3 %v8400_v44 }
 0x24c   :  { %1743 = vmatpush.bf16.msra.mxu0 %v8401_v20  ;;  %1769 = vmatpush.bf16.msrb.mxu2 %v8402_v3 }
 0x24d   :  { %1707 = vmatmul.bf16.vlgmr.msrb.gmra.mxu1 %v6195_v2  ;;  %1733 = vmatmul.bf16.vlgmr.msra.gmra.mxu3 %v6195_v2 }
 0x24e   :  { %1755 = vmatpush.bf16.msra.mxu1 %v8403_v26  ;;  %1781 = vmatpush.bf16.msrb.mxu3 %v8404_v4  ;;  %v8428_v4 = vld [vmem:[#allocation190_spill] sm:$0xff] }
 0x250   :  { %1744 = vmatpush.bf16.msra.mxu0 %v8405_v21  ;;  %1770 = vmatpush.bf16.msrb.mxu2 %v5912_v22  ;;  %v8410_v22 = vld [vmem:[#allocation174_spill] sm:$0xff]  ;;  %v8427_v21 = vld [vmem:[#allocation185_spill] sm:$0xff] }
 0x252   :  { %1756 = vmatpush.bf16.msra.mxu1 %v8406_v13  ;;  %1782 = vmatpush.bf16.msrb.mxu3 %v8407_v38  ;;  %v8411_v13 = vld [vmem:[#allocation176_spill] sm:$0xff]  ;;  %v8412_v38 = vld [vmem:[#allocation167_spill] sm:$0xff] }
 0x254   :  { %1745 = vmatpush.bf16.msra.mxu0 %v5918_v14  ;;  %1771 = vmatpush.bf16.msrb.mxu2 %v5924_v39  ;;  %v8413_v14 = vld [vmem:[#allocation169_spill] sm:$0xff]  ;;  %v8414_v39 = vld [vmem:[#allocation171_spill] sm:$0xff] }
 0x256   :  { %1757 = vmatpush.bf16.msra.mxu1 %v8408_v41  ;;  %1783 = vmatpush.bf16.msrb.mxu3 %v8409_v53  ;;  %v8417_v41 = vld [vmem:[#allocation180_spill] sm:$0xff]  ;;  %v8418_v53 = vld [vmem:[#allocation175_spill] sm:$0xff] }
 0x257   :  { %1746 = vmatmul.bf16.vlgmr.msra.gmra.mxu0 %v6189_v27  ;;  %1772 = vmatmul.bf16.vlgmr.msrb.gmra.mxu2 %v6189_v27 }
 0x258   :  { %1790 = vmatpush.bf16.msrb.mxu0 %v5929_v12  ;;  %1816 = vmatpush.bf16.msra.mxu2 %v5933_v50  ;;  %v8415_v12 = vld [vmem:[#allocation173_spill] sm:$0xff]  ;;  %v8416_v50 = vld [vmem:[#allocation178_spill] sm:$0xff] }
 0x25a   :  { %1758 = vmatpush.bf16.msra.mxu1 %v8412_v38  ;;  %1784 = vmatpush.bf16.msrb.mxu3 %v8413_v14  ;;  %v8421_v38 = vld [vmem:[#allocation184_spill] sm:$0xff]  ;;  %v8422_v14 = vld [vmem:[#allocation179_spill] sm:$0xff] }
 0x25c   :  { %1791 = vmatpush.bf16.msrb.mxu0 %v8410_v22  ;;  %1817 = vmatpush.bf16.msra.mxu2 %v8411_v13  ;;  %v8419_v22 = vld [vmem:[#allocation177_spill] sm:$0xff]  ;;  %v8420_v13 = vld [vmem:[#allocation182_spill] sm:$0xff] }
 0x25d   :  { %1759 = vmatmul.bf16.vlgmr.msra.gmra.mxu1 %v6195_v2  ;;  %1785 = vmatmul.bf16.vlgmr.msrb.gmra.mxu3 %v6195_v2 }
 0x25e   :  { %1803 = vmatpush.bf16.msrb.mxu1 %v8414_v39  ;;  %1829 = vmatpush.bf16.msra.mxu3 %v8415_v12  ;;  %v8423_v39 = vld [vmem:[#allocation181_spill] sm:$0xff]  ;;  %v8424_v12 = vld [vmem:[#allocation186_spill] sm:$0xff] }
 0x260   :  { %1792 = vmatpush.bf16.msrb.mxu0 %v8416_v50  ;;  %1818 = vmatpush.bf16.msra.mxu2 %v8417_v41  ;;  %v8425_v50 = vld [vmem:[#allocation188_spill] sm:$0xff]  ;;  %v8426_v41 = vld [vmem:[#allocation183_spill] sm:$0xff] }
 0x262   :  { %1804 = vmatpush.bf16.msrb.mxu1 %v8418_v53  ;;  %1830 = vmatpush.bf16.msra.mxu3 %v8419_v22  ;;  %v8429_v22 = vld [vmem:[#allocation187_spill] sm:$0xff] }
 0x264   :  { %1793 = vmatpush.bf16.msrb.mxu0 %v8420_v13  ;;  %1819 = vmatpush.bf16.msra.mxu2 %v8421_v38  ;;  %v8430_v13 = vld [vmem:[#allocation189_spill] sm:$0xff] }
 0x266   :  { %1805 = vmatpush.bf16.msrb.mxu1 %v8422_v14  ;;  %1831 = vmatpush.bf16.msra.mxu3 %v8423_v39  ;;  %v8431_v39 = vld [vmem:[#allocation191_spill] sm:$0xff] }
 0x268   :  { %1794 = vmatpush.bf16.msrb.mxu0 %v8424_v12  ;;  %1820 = vmatpush.bf16.msra.mxu2 %v8425_v50 }
 0x26a   :  { %1806 = vmatpush.bf16.msrb.mxu1 %v8426_v41  ;;  %1832 = vmatpush.bf16.msra.mxu3 %v8427_v21 }
 0x26c   :  { %1795 = vmatpush.bf16.msrb.mxu0 %v8428_v4  ;;  %1821 = vmatpush.bf16.msra.mxu2 %v6000_v52 }
 0x26e   :  { %1807 = vmatpush.bf16.msrb.mxu1 %v8429_v22  ;;  %1833 = vmatpush.bf16.msra.mxu3 %v8430_v13 }
 0x270   :  { %1796 = vmatpush.bf16.msrb.mxu0 %v6006_v57  ;;  %1822 = vmatpush.bf16.msra.mxu2 %v6012_v11  ;;  %v8483_v57 = vld [vmem:[#allocation42_spill] sm:$0xff] }
 0x272   :  { %1808 = vmatpush.bf16.msrb.mxu1 %v8431_v39  ;;  %1834 = vmatpush.bf16.msra.mxu3 %v6003_v1 }
 0x274   :  { %1797 = vmatpush.bf16.msrb.mxu0 %v6018_v55  ;;  %1823 = vmatpush.bf16.msra.mxu2 %v6024_v29  ;;  %v8480_v29 = vld [vmem:[#allocation21_spill] sm:$0xff] }
 0x276   :  { %1809 = vmatpush.bf16.msrb.mxu1 %v6010_v60  ;;  %1835 = vmatpush.bf16.msra.mxu3 %v6015_v6 }
 0x277   :  { %1798 = vmatmul.bf16.vlgmr.msrb.gmra.mxu0 %v6189_v27  ;;  %1824 = vmatmul.bf16.vlgmr.msra.gmra.mxu2 %v6189_v27  ;;  %v8432_v27 = vld [vmem:[#allocation94_spill] sm:$0xff] }
 0x278   :  { %1986 = vmatpush.bf16.msra.mxu0 %v5637_v18  ;;  %2012 = vmatpush.bf16.msrb.mxu2 %v5641_v46  ;;  %v8479_v46 = vld [vmem:[#allocation14_spill] sm:$0xff] }
 0x27a   :  { %1810 = vmatpush.bf16.msrb.mxu1 %v6022_v51  ;;  %1836 = vmatpush.bf16.msra.mxu3 %v6027_v33 }
 0x27c   :  { %1987 = vmatpush.bf16.msra.mxu0 %v5648_v30  ;;  %2013 = vmatpush.bf16.msrb.mxu2 %v5653_v45  ;;  %v8478_v30 = vld [vmem:[#allocation20_spill] sm:$0xff] }
 0x27d   :  { %1811 = vmatmul.bf16.vlgmr.msrb.gmra.mxu1 %v6195_v2  ;;  %1837 = vmatmul.bf16.vlgmr.msra.gmra.mxu3 %v6195_v2  ;;  %v8433_v2 = vld [vmem:[#allocation96_spill] sm:$0xff] }
 0x27e   :  { %1999 = vmatpush.bf16.msra.mxu1 %v5639_v35  ;;  %2025 = vmatpush.bf16.msrb.mxu3 %v5644_v40 }
 0x280   :  { %1988 = vmatpush.bf16.msra.mxu0 %v5658_v62  ;;  %2014 = vmatpush.bf16.msrb.mxu2 %v5664_v43 }
 0x282   :  { %2000 = vmatpush.bf16.msra.mxu1 %v5650_v58  ;;  %2026 = vmatpush.bf16.msrb.mxu3 %v5655_v31  ;;  %v8434_v31 = vld [vmem:[#allocation91_spill] sm:$0xff] }
 0x284   :  { %1989 = vmatpush.bf16.msra.mxu0 %v5670_v34  ;;  %2015 = vmatpush.bf16.msrb.mxu2 %v5676_v23  ;;  %v8435_v34 = vld [vmem:[#allocation93_spill] sm:$0xff]  ;;  %v8436_v23 = vld [vmem:[#allocation98_spill] sm:$0xff] }
 0x286   :  { %2001 = vmatpush.bf16.msra.mxu1 %v5662_v24  ;;  %2027 = vmatpush.bf16.msrb.mxu3 %v5667_v15  ;;  %v8437_v24 = vld [vmem:[#allocation100_spill] sm:$0xff]  ;;  %v8438_v15 = vld [vmem:[#allocation95_spill] sm:$0xff] }
 0x288   :  { %1990 = vmatpush.bf16.msra.mxu0 %v5682_v7  ;;  %2016 = vmatpush.bf16.msrb.mxu2 %v5688_v28  ;;  %v8439_v7 = vld [vmem:[#allocation97_spill] sm:$0xff]  ;;  %v8440_v28 = vld [vmem:[#allocation102_spill] sm:$0xff] }
 0x28a   :  { %2002 = vmatpush.bf16.msra.mxu1 %v5674_v16  ;;  %2028 = vmatpush.bf16.msrb.mxu3 %v5679_v61  ;;  %v8441_v16 = vld [vmem:[#allocation104_spill] sm:$0xff]  ;;  %v8442_v61 = vld [vmem:[#allocation106_spill] sm:$0xff] }
 0x28c   :  { %1991 = vmatpush.bf16.msra.mxu0 %v8432_v27  ;;  %2017 = vmatpush.bf16.msrb.mxu2 %v8433_v2  ;;  %v8443_v27 = vld [vmem:[#allocation108_spill] sm:$0xff]  ;;  %v8444_v2 = vld [vmem:[#allocation99_spill] sm:$0xff] }
 0x28e   :  { %2003 = vmatpush.bf16.msra.mxu1 %v8434_v31  ;;  %2029 = vmatpush.bf16.msrb.mxu3 %v8435_v34  ;;  %v8445_v31 = vld [vmem:[#allocation101_spill] sm:$0xff]  ;;  %v8446_v34 = vld [vmem:[#allocation110_spill] sm:$0xff] }
 0x290   :  { %1992 = vmatpush.bf16.msra.mxu0 %v8436_v23  ;;  %2018 = vmatpush.bf16.msrb.mxu2 %v8437_v24  ;;  %v8447_v23 = vld [vmem:[#allocation112_spill] sm:$0xff]  ;;  %v8448_v24 = vld [vmem:[#allocation103_spill] sm:$0xff] }
 0x292   :  { %2004 = vmatpush.bf16.msra.mxu1 %v8438_v15  ;;  %2030 = vmatpush.bf16.msrb.mxu3 %v8439_v7  ;;  %v8449_v15 = vld [vmem:[#allocation105_spill] sm:$0xff]  ;;  %v8450_v7 = vld [vmem:[#allocation107_spill] sm:$0xff] }
 0x294   :  { %1993 = vmatpush.bf16.msra.mxu0 %v8440_v28  ;;  %2019 = vmatpush.bf16.msrb.mxu2 %v8441_v16  ;;  %v8451_v28 = vld [vmem:[#allocation109_spill] sm:$0xff]  ;;  %v8452_v16 = vld [vmem:[#allocation114_spill] sm:$0xff] }
 0x296   :  { %2005 = vmatpush.bf16.msra.mxu1 %v8444_v2  ;;  %2031 = vmatpush.bf16.msrb.mxu3 %v8445_v31  ;;  %v8455_v2 = vld [vmem:[#allocation113_spill] sm:$0xff]  ;;  %v8456_v31 = vld [vmem:[#allocation118_spill] sm:$0xff] }
 0x298   :  { %2038 = vmatpush.bf16.msrb.mxu0 %v8442_v61  ;;  %2064 = vmatpush.bf16.msra.mxu2 %v8443_v27  ;;  %v8453_v61 = vld [vmem:[#allocation116_spill] sm:$0xff]  ;;  %v8454_v27 = vld [vmem:[#allocation111_spill] sm:$0xff] }
 0x29a   :  { %2006 = vmatpush.bf16.msra.mxu1 %v8448_v24  ;;  %2032 = vmatpush.bf16.msrb.mxu3 %v8449_v15  ;;  %v8459_v24 = vld [vmem:[#allocation117_spill] sm:$0xff]  ;;  %v8460_v15 = vld [vmem:[#allocation122_spill] sm:$0xff] }
 0x29c   :  { %2039 = vmatpush.bf16.msrb.mxu0 %v8446_v34  ;;  %2065 = vmatpush.bf16.msra.mxu2 %v8447_v23  ;;  %v8457_v34 = vld [vmem:[#allocation120_spill] sm:$0xff]  ;;  %v8458_v23 = vld [vmem:[#allocation115_spill] sm:$0xff] }
 0x29e   :  { %2051 = vmatpush.bf16.msrb.mxu1 %v8450_v7  ;;  %2077 = vmatpush.bf16.msra.mxu3 %v8451_v28  ;;  %v8461_v7 = vld [vmem:[#allocation124_spill] sm:$0xff]  ;;  %v8462_v28 = vld [vmem:[#allocation119_spill] sm:$0xff] }
 0x2a0   :  { %2040 = vmatpush.bf16.msrb.mxu0 %v8452_v16  ;;  %2066 = vmatpush.bf16.msra.mxu2 %v8453_v61  ;;  %v8463_v16 = vld [vmem:[#allocation121_spill] sm:$0xff]  ;;  %v8464_v61 = vld [vmem:[#allocation126_spill] sm:$0xff] }
 0x2a2   :  { %2052 = vmatpush.bf16.msrb.mxu1 %v8454_v27  ;;  %2078 = vmatpush.bf16.msra.mxu3 %v8455_v2  ;;  %v8465_v27 = vld [vmem:[#allocation128_spill] sm:$0xff]  ;;  %v8466_v2 = vld [vmem:[#allocation123_spill] sm:$0xff] }
 0x2a4   :  { %2041 = vmatpush.bf16.msrb.mxu0 %v8456_v31  ;;  %2067 = vmatpush.bf16.msra.mxu2 %v8457_v34  ;;  %v8467_v31 = vld [vmem:[#allocation125_spill] sm:$0xff]  ;;  %v8468_v34 = vld [vmem:[#allocation130_spill] sm:$0xff] }
 0x2a6   :  { %2053 = vmatpush.bf16.msrb.mxu1 %v8458_v23  ;;  %2079 = vmatpush.bf16.msra.mxu3 %v8459_v24  ;;  %v8469_v23 = vld [vmem:[#allocation132_spill] sm:$0xff]  ;;  %v8470_v24 = vld [vmem:[#allocation127_spill] sm:$0xff] }
 0x2a8   :  { %2042 = vmatpush.bf16.msrb.mxu0 %v8460_v15  ;;  %2068 = vmatpush.bf16.msra.mxu2 %v8461_v7  ;;  %v8471_v15 = vld [vmem:[#allocation129_spill] sm:$0xff]  ;;  %v8472_v7 = vld [vmem:[#allocation134_spill] sm:$0xff] }
 0x2aa   :  { %2054 = vmatpush.bf16.msrb.mxu1 %v8462_v28  ;;  %2080 = vmatpush.bf16.msra.mxu3 %v8463_v16  ;;  %v8473_v28 = vld [vmem:[#allocation136_spill] sm:$0xff]  ;;  %v8474_v16 = vld [vmem:[#allocation131_spill] sm:$0xff] }
 0x2ac   :  { %2043 = vmatpush.bf16.msrb.mxu0 %v8464_v61  ;;  %2069 = vmatpush.bf16.msra.mxu2 %v8465_v27  ;;  %v8475_v61 = vld [vmem:[#allocation133_spill] sm:$0xff]  ;;  %v8476_v27 = vld [vmem:[#allocation135_spill] sm:$0xff] }
 0x2ae   :  { %2055 = vmatpush.bf16.msrb.mxu1 %v8466_v2  ;;  %2081 = vmatpush.bf16.msra.mxu3 %v8467_v31  ;;  %v8477_v2 = vld [vmem:[#allocation137_spill] sm:$0xff] }
 0x2b0   :  { %2044 = vmatpush.bf16.msrb.mxu0 %v8468_v34  ;;  %2070 = vmatpush.bf16.msra.mxu2 %v8469_v23 }
 0x2b2   :  { %2056 = vmatpush.bf16.msrb.mxu1 %v8470_v24  ;;  %2082 = vmatpush.bf16.msra.mxu3 %v8471_v15 }
 0x2b4   :  { %2045 = vmatpush.bf16.msrb.mxu0 %v8472_v7  ;;  %2071 = vmatpush.bf16.msra.mxu2 %v8473_v28  ;;  %v1643_v31 = vpop.f32.mrf.mxu0 }
 0x2b6   :  { %2057 = vmatpush.bf16.msrb.mxu1 %v8474_v16  ;;  %2083 = vmatpush.bf16.msra.mxu3 %v8475_v61 }
 0x2ba   :  { %2058 = vmatpush.bf16.msrb.mxu1 %v8476_v27  ;;  %2084 = vmatpush.bf16.msra.mxu3 %v8477_v2  ;;  %v1669_v34 = vpop.f32.mrf.mxu2  ;;  %v1656_v58 = vpop.f32.mrf.mxu1 }
 0x2bb   :  { %v1657_v27 = vadd.f32 %v1656_v58, %v1643_v31 }
 0x2bc   :  { %v1645_v23 = vpop.f32.mrf.mxu0 }
 0x2bd   :  { %v1842_v23 = vadd.f32 %v1657_v27, %v8479_v46 }
 0x2c0   :  { %v1682_v43 = vpop.f32.mrf.mxu3 }
 0x2c2   :  { %v1671_v24 = vpop.f32.mrf.mxu2  ;;  %v1658_v62 = vpop.f32.mrf.mxu1 }
 0x2c3   :  { %v1683_v24 = vadd.f32 %v1682_v43, %v1669_v34 }
 0x2c4   :  { %v1695_v15 = vpop.f32.mrf.mxu0 }
 0x2c8   :  { %v1684_v40 = vpop.f32.mrf.mxu3 }
 0x2ca   :  { %v1708_v7 = vpop.f32.mrf.mxu1  ;;  %v1721_v35 = vpop.f32.mrf.mxu2 }
 0x2cb   :  { %v1709_v16 = vadd.f32 %v1708_v7, %v1695_v15  ;;  %v8481_v7 = vld [vmem:[#allocation15_spill] sm:$0xff] }
 0x2cc   :  { %v1697_v28 = vpop.f32.mrf.mxu0  ;;  %v1843_v15 = vadd.f32 %v1683_v24, %v8481_v7 }
 0x2cd   :  { %v1844_v2 = vadd.f32 %v1709_v16, %v8478_v30  ;;  %v4770_v28 = vmul.f32 -1.442695, %v1842_v23 }
 0x2ce   :  { %v4771_v58 = vmul.f32 -1.442695, %v1843_v15 }
 0x2cf   :  { %v4772_v18 = vmul.f32 -1.442695, %v1844_v2 }
 0x2d0   :  { %v1734_v33 = vpop.f32.mrf.mxu3 }
 0x2d1   :  { %v1735_v6 = vadd.f32 %v1734_v33, %v1721_v35  ;;  %4982 = vpow2.f32 %v4772_v18 }
 0x2d2   :  { %v1710_v51 = vpop.f32.mrf.mxu1  ;;  %v1723_v61 = vpop.f32.mrf.mxu2  ;;  %4984 = vpow2.f32 %v4770_v28 }
 0x2d3   :  { %v1845_v40 = vadd.f32 %v1735_v6, %v8480_v29 }
 0x2d4   :  { %v1747_v45 = vpop.f32.mrf.mxu0 }
 0x2d5   :  { %v4773_v61 = vmul.f32 -1.442695, %v1845_v40 }
 0x2d7   :  { %v4983_v35 = vpop.eup %4982  ;;  %4986 = vpow2.f32 %v4773_v61 }
 0x2d8   :  { %v1736_v60 = vpop.f32.mrf.mxu3  ;;  %4988 = vpow2.f32 %v4771_v58  ;;  %v6341_v46 = vadd.f32 1.0, %v4983_v35  ;;  %v4985_v34 = vpop.eup %4984 }
 0x2d9   :  { %v6343_v6 = vadd.f32 1.0, %v4985_v34 }
 0x2da   :  { %v1773_v62 = vpop.f32.mrf.mxu2  ;;  %v1760_v55 = vpop.f32.mrf.mxu1  ;;  %4990 = vrcp.f32 %v6341_v46  ;;  %vm1901_vm10 = vweird.f32 %v6341_v46 }
 0x2db   :  { %4992 = vrcp.f32 %v6343_v6  ;;  %v1761_v35 = vadd.f32 %v1760_v55, %v1747_v45  ;;  %vm1863_vm12 = vweird.f32 %v6343_v6 }
 0x2dc   :  { %v1749_v1 = vpop.f32.mrf.mxu0 }
 0x2dd   :  { %v4987_v43 = vpop.eup %4986  ;;  %v1846_v13 = vadd.f32 %v1761_v35, %v8483_v57  ;;  %v1905_v57 = vand.u32 2147483647, %v6341_v46 }
 0x2de   :  { %v4989_v18 = vpop.eup %4988  ;;  %v6346_v1 = vadd.f32 1.0, %v4987_v43 }
 0x2df   :  { %v6349_v51 = vadd.f32 1.0, %v4989_v18  ;;  %vm1906_vm15 = vcmp.eq.f32.partialorder %v1905_v57, 8.507059e+37 }
 0x2e0   :  { %v1786_v31 = vpop.f32.mrf.mxu3  ;;  %v4991_v29 = vpop.eup %4990  ;;  %4994 = vrcp.f32 %v6346_v1  ;;  %vm1916_vm1 = vweird.f32 %v6346_v1 }
 0x2e1   :  { %4996 = vrcp.f32 %v6349_v51  ;;  %v1897_v27 = vmul.f32 %v4991_v29, %v6341_v46  ;;  %v6354_v2 = vpop.eup %4992  ;;  %vm1902_vm9 = vweird.f32 %v4991_v29  ;;  %vm1878_vm5 = vweird.f32 %v6349_v51 }
 0x2e2   :  { %v1775_v30 = vpop.f32.mrf.mxu2  ;;  %v1762_v16 = vpop.f32.mrf.mxu1  ;;  %v1859_v24 = vmul.f32 %v6354_v2, %v6343_v6  ;;  %vm6374_vm11 = vmor %vm1901_vm10, %vm1902_vm9  ;;  %vm1864_vm13 = vweird.f32 %v6354_v2  ;;  %v1884_v57 = vand.u32 2147483648, %v6349_v51 }
 0x2e3   :  { %v1898_v40 = vsub.f32 1.0, %v1897_v27  ;;  %v8482_v16 = vld [vmem:[#allocation52_spill] sm:$0xff]  ;;  %vm6392_vm0 = vmor %vm1863_vm12, %vm1864_vm13 }
 0x2e4   :  { %v1860_v43 = vsub.f32 1.0, %v1859_v24  ;;  %v1907_v24 = vand.u32 2147483648, %v6341_v46 }
 0x2e6   :  { %v6356_v23 = vpop.eup %4994 }
 0x2e7   :  { %v6360_v61 = vpop.eup %4996  ;;  %v1912_v58 = vmul.f32 %v6356_v23, %v6346_v1  ;;  %vm1917_vm14 = vweird.f32 %v6356_v23 }
 0x2e8   :  { %v1788_v60 = vpop.f32.mrf.mxu3  ;;  %v1874_v18 = vmul.f32 %v6360_v61, %v6349_v51  ;;  %vm6401_vm2 = vmor %vm1916_vm1, %vm1917_vm14  ;;  %vm1879_vm4 = vweird.f32 %v6360_v61 }
 0x2e9   :  { %v1899_v60 = vmul.f32 %v4991_v29, %v1898_v40  ;;  %v1913_v11 = vsub.f32 1.0, %v1912_v58  ;;  %v1787_v40 = vadd.f32 %v1786_v31, %v1773_v62  ;;  %v1869_v31 = vand.u32 2147483648, %v6343_v6  ;;  %vm1880_vm7 = vmor %vm1878_vm5, %vm1879_vm4 }
 0x2ea   :  { %v1875_v55 = vsub.f32 1.0, %v1874_v18 }
 0x2eb   :  { %v1900_v22 = vadd.f32 %v4991_v29, %v1899_v60  ;;  %v1914_v58 = vmul.f32 %v6356_v23, %v1913_v11 }
 0x2ec   :  { %v1876_v18 = vmul.f32 %v6360_v61, %v1875_v55 }
 0x2ed   :  { %v1904_v11 = vsel %vm6374_vm11, %v4991_v29, %v1900_v22 }
 0x2f4   :  { %v1799_v33 = vpop.f32.mrf.mxu0 }
 0x2fa   :  { %v1812_v28 = vpop.f32.mrf.mxu1  ;;  %v1825_v7 = vpop.f32.mrf.mxu2 }
 0x2fb   :  { %v1813_v15 = vadd.f32 %v1812_v28, %v1799_v33  ;;  %v1861_v28 = vmul.f32 %v6354_v2, %v1860_v43  ;;  %v8487_v43 = vld [vmem:[#allocation43_spill] sm:$0xff] }
 0x2fc   :  { %v1801_v30 = vpop.f32.mrf.mxu0  ;;  %v1847_v60 = vadd.f32 %v1787_v40, %v8487_v43 }
 0x2fd   :  { %v1848_v34 = vadd.f32 %v1813_v15, %v8482_v16  ;;  %v8484_v15 = vld [vmem:[#allocation53_spill] sm:$0xff]  ;;  %v1862_v62 = vadd.f32 %v6354_v2, %v1861_v28  ;;  %v1922_v28 = vand.u32 2147483648, %v6346_v1 }
 0x2ff   :  { %v4774_v39 = vmul.f32 -1.442695, %v1848_v34  ;;  %v1908_v34 = vor.u32 1.1754944e-38, %v1907_v24 }
 0x300   :  { %v1838_v27 = vpop.f32.mrf.mxu3 }
 0x301   :  { %4998 = vpow2.f32 %v4774_v39  ;;  %v1839_v33 = vadd.f32 %v1838_v27, %v1825_v7  ;;  %v1867_v7 = vand.u32 2147483647, %v6343_v6  ;;  %v1909_v29 = vsel %vm1906_vm15, %v1908_v34, %v1904_v11 }
 0x302   :  { %v1814_v30 = vpop.f32.mrf.mxu1  ;;  %v1827_v45 = vpop.f32.mrf.mxu2  ;;  %5000 = vtanh.f32 %v1846_v13  ;;  %v1915_v13 = vadd.f32 %v6356_v23, %v1914_v58  ;;  %v1870_v6 = vor.u32 1.1754944e-38, %v1869_v31  ;;  %v1966_v40 = vmul.f32 %v1909_v29, %v6183_v49 }
 0x303   :  { %v1849_v16 = vadd.f32 %v1839_v33, %v8484_v15  ;;  %v1866_v30 = vsel %vm6392_vm0, %v6354_v2, %v1862_v62  ;;  %v1920_v45 = vand.u32 2147483647, %v6346_v1  ;;  %vm1868_vm3 = vcmp.eq.f32.partialorder %v1867_v7, 8.507059e+37 }
 0x304   :  { %v1877_v15 = vadd.f32 %v6360_v61, %v1876_v18  ;;  %v1919_v2 = vsel %vm6401_vm2, %v6356_v23, %v1915_v13  ;;  %v1871_v58 = vsel %vm1868_vm3, %v1870_v6, %v1866_v30  ;;  %v1882_v7 = vand.u32 2147483647, %v6349_v51 }
 0x305   :  { %v4775_v35 = vmul.f32 -1.442695, %v1849_v16  ;;  %v1923_v16 = vor.u32 1.1754944e-38, %v1922_v28  ;;  %vm1921_vm6 = vcmp.eq.f32.partialorder %v1920_v45, 8.507059e+37 }
 0x306   :  { %v1881_v11 = vsel %vm1880_vm7, %v6360_v61, %v1877_v15  ;;  %vm1883_vm8 = vcmp.eq.f32.partialorder %v1882_v7, 8.507059e+37 }
 0x307   :  { %v4999_v46 = vpop.eup %4998  ;;  %5002 = vpow2.f32 %v4775_v35  ;;  %v1924_v35 = vsel %vm1921_vm6, %v1923_v16, %v1919_v2 }
 0x308   :  { %v1934_v27 = vadd.f32 1.0, %v4999_v46  ;;  %v1840_v33 = vpop.f32.mrf.mxu3  ;;  %v5001_v55 = vpop.eup %5000  ;;  %v1885_v46 = vor.u32 1.1754944e-38, %v1884_v57  ;;  %v1967_v43 = vmul.f32 %v1924_v35, %v6186_v25 }
 0x309   :  { %v1968_v39 = vmul.f32 %v5001_v55, %v1871_v58 }
 0x30a   :  { %5004 = vrcp.f32 %v1934_v27  ;;  %v1947_v13 = vand.u32 2147483648, %v1934_v27  ;;  %v1945_v28 = vand.u32 2147483647, %v1934_v27  ;;  %vm1941_vm10 = vweird.f32 %v1934_v27 }
 0x30b   :  { %5006 = vtanh.f32 %v1847_v60  ;;  %v6414_v31 = vadd.f32 %v1968_v39, %v1966_v40  ;;  %v1886_v60 = vsel %vm1883_vm8, %v1885_v46, %v1881_v11  ;;  %v8493_v11 = vld [vmem:[#allocation162_spill] sm:$0xff]  ;;  %v8495_v46 = vld [vmem:[#allocation159_spill] sm:$0xff] }
 0x30c   :  { %v1948_v45 = vor.u32 1.1754944e-38, %v1947_v13  ;;  %vm1946_vm12 = vcmp.eq.f32.partialorder %v1945_v28, 8.507059e+37  ;;  %v8501_v13 = vld [vmem:[#allocation163_spill] sm:$0xff]  ;;  %v8503_v28 = vld [vmem:[#allocation174_spill] sm:$0xff] }
 0x30d   :  { %v5003_v1 = vpop.eup %5002 }
 0x30e   :  { %v1935_v49 = vadd.f32 1.0, %v5003_v1 }
 0x310   :  { %v5005_v62 = vpop.eup %5004  ;;  %5008 = vrcp.f32 %v1935_v49  ;;  %v1962_v40 = vand.u32 2147483648, %v1935_v49  ;;  %v1960_v1 = vand.u32 2147483647, %v1935_v49  ;;  %vm1956_vm14 = vweird.f32 %v1935_v49 }
 0x311   :  { %v5007_v23 = vpop.eup %5006  ;;  %v1937_v34 = vmul.f32 %v5005_v62, %v1934_v27  ;;  %5010 = vtanh.f32 %v6414_v31  ;;  %vm1942_vm9 = vweird.f32 %v5005_v62 }
 0x312   :  { %v1969_v51 = vmul.f32 %v5007_v23, %v1886_v60  ;;  %vm1943_vm11 = vmor %vm1941_vm10, %vm1942_vm9  ;;  %v1963_v27 = vor.u32 1.1754944e-38, %v1962_v40  ;;  %vm1961_vm0 = vcmp.eq.f32.partialorder %v1960_v1, 8.507059e+37  ;;  %v8494_v23 = vld [vmem:[#allocation164_spill] sm:$0xff]  ;;  %v8512_v40 = vld [vmem:[#allocation182_spill] sm:$0xff] }
 0x313   :  { %v1938_v18 = vsub.f32 1.0, %v1937_v34  ;;  %v8496_v34 = vld [vmem:[#allocation161_spill] sm:$0xff]  ;;  %v8498_v60 = vld [vmem:[#allocation168_spill] sm:$0xff] }
 0x314   :  { %v6419_v29 = vadd.f32 %v1969_v51, %v1967_v43  ;;  %v8497_v43 = vld [vmem:[#allocation166_spill] sm:$0xff]  ;;  %v8500_v51 = vld [vmem:[#allocation172_spill] sm:$0xff]  ;;  %v8515_v1 = vld [vmem:[#allocation189_spill] sm:$0xff] }
 0x315   :  { %v1939_v33 = vmul.f32 %v5005_v62, %v1938_v18  ;;  %v8499_v18 = vld [vmem:[#allocation170_spill] sm:$0xff] }
 0x316   :  { %v5009_v22 = vpop.eup %5008  ;;  %5012 = vtanh.f32 %v6419_v29 }
 0x317   :  { %v1940_v61 = vadd.f32 %v5005_v62, %v1939_v33  ;;  %v1952_v30 = vmul.f32 %v5009_v22, %v1935_v49  ;;  %v5011_v24 = vpop.eup %5010  ;;  %vm1957_vm13 = vweird.f32 %v5009_v22  ;;  %v8492_v49 = vld [vmem:[#allocation157_spill] sm:$0xff] }
 0x318   :  { %vm1958_vm15 = vmor %vm1956_vm14, %vm1957_vm13  ;;  %v8502_v33 = vld [vmem:[#allocation165_spill] sm:$0xff] }
 0x319   :  { %v1944_v55 = vsel %vm1943_vm11, %v5005_v62, %v1940_v61  ;;  %v1953_v25 = vsub.f32 1.0, %v1952_v30  ;;  %v8505_v61 = vld [vmem:[#allocation167_spill] sm:$0xff]  ;;  %v8506_v30 = vld [vmem:[#allocation169_spill] sm:$0xff] }
 0x31a   :  { %v1949_v6 = vsel %vm1946_vm12, %v1948_v45, %v1944_v55  ;;  %v8507_v45 = vld [vmem:[#allocation171_spill] sm:$0xff]  ;;  %v8508_v55 = vld [vmem:[#allocation173_spill] sm:$0xff] }
 0x31b   :  { %v1974_v15 = vmul.f32 %v5011_v24, %v1949_v6  ;;  %v1954_v2 = vmul.f32 %v5009_v22, %v1953_v25  ;;  %v8509_v25 = vld [vmem:[#allocation178_spill] sm:$0xff]  ;;  %v8510_v24 = vld [vmem:[#allocation180_spill] sm:$0xff]  ;;  %v8511_v6 = vld [vmem:[#allocation177_spill] sm:$0xff] }
 0x31c   :  { %v5013_v39 = vpop.eup %5012 }
 0x31d   :  { %v6422_v16 = vpack.c.bf16 %v1974_v15, %v1974_v15  ;;  %v1955_v58 = vadd.f32 %v5009_v22, %v1954_v2  ;;  %v8513_v15 = vld [vmem:[#allocation181_spill] sm:$0xff]  ;;  %v8514_v2 = vld [vmem:[#allocation187_spill] sm:$0xff] }
 0x31f   :  { %v1959_v57 = vsel %vm1958_vm15, %v5009_v22, %v1955_v58  ;;  %1994 = vmatmul.bf16.vlgmr.msra.gmra.mxu0 %v6422_v16  ;;  %2020 = vmatmul.bf16.vlgmr.msrb.gmra.mxu2 %v6422_v16  ;;  %v8504_v22 = vld [vmem:[#allocation176_spill] sm:$0xff]  ;;  %v8516_v58 = vld [vmem:[#allocation194_spill] sm:$0xff] }
 0x320   :  { %v1964_v7 = vsel %vm1961_vm0, %v1963_v27, %v1959_v57  ;;  %2090 = vmatpush.bf16.msra.mxu0 %v8383_v10  ;;  %2116 = vmatpush.bf16.msrb.mxu2 %v8384_v32  ;;  %v8517_v27 = vld [vmem:[#allocation196_spill] sm:$0xff]  ;;  %v8518_v57 = vld [vmem:[#allocation191_spill] sm:$0xff] }
 0x321   :  { %v1975_v35 = vmul.f32 %v5013_v39, %v1964_v7  ;;  %v8519_v39 = vld [vmem:[#allocation193_spill] sm:$0xff]  ;;  %v8520_v7 = vld [vmem:[#allocation198_spill] sm:$0xff] }
 0x323   :  { %v6428_v62 = vpack.c.bf16 %v1975_v35, %v1975_v35  ;;  %v8521_v35 = vld [vmem:[#allocation200_spill] sm:$0xff] }
 0x324   :  { %2091 = vmatpush.bf16.msra.mxu0 %v8385_v54  ;;  %2117 = vmatpush.bf16.msrb.mxu2 %v8386_v9 }
 0x325   :  { %2007 = vmatmul.bf16.vlgmr.msra.gmra.mxu1 %v6428_v62  ;;  %2033 = vmatmul.bf16.vlgmr.msrb.gmra.mxu3 %v6428_v62 }
 0x326   :  { %2103 = vmatpush.bf16.msra.mxu1 %v8387_v17  ;;  %2129 = vmatpush.bf16.msrb.mxu3 %v8388_v37 }
 0x328   :  { %2092 = vmatpush.bf16.msra.mxu0 %v8389_v36  ;;  %2118 = vmatpush.bf16.msrb.mxu2 %v8390_v47 }
 0x32a   :  { %2104 = vmatpush.bf16.msra.mxu1 %v8391_v0  ;;  %2130 = vmatpush.bf16.msrb.mxu3 %v8392_v56 }
 0x32c   :  { %2093 = vmatpush.bf16.msra.mxu0 %v8393_v5  ;;  %2119 = vmatpush.bf16.msrb.mxu2 %v8394_v63 }
 0x32e   :  { %2105 = vmatpush.bf16.msra.mxu1 %v8395_v8  ;;  %2131 = vmatpush.bf16.msrb.mxu3 %v8396_v48 }
 0x32f   :  { %2046 = vmatmul.bf16.vlgmr.msrb.gmra.mxu0 %v6422_v16  ;;  %2072 = vmatmul.bf16.vlgmr.msra.gmra.mxu2 %v6422_v16 }
 0x330   :  { %2094 = vmatpush.bf16.msra.mxu0 %v8397_v19  ;;  %2120 = vmatpush.bf16.msrb.mxu2 %v8398_v42 }
 0x332   :  { %2106 = vmatpush.bf16.msra.mxu1 %v8399_v59  ;;  %2132 = vmatpush.bf16.msrb.mxu3 %v8400_v44 }
 0x334   :  { %2095 = vmatpush.bf16.msra.mxu0 %v8401_v20  ;;  %2121 = vmatpush.bf16.msrb.mxu2 %v8402_v3 }
 0x335   :  { %2059 = vmatmul.bf16.vlgmr.msrb.gmra.mxu1 %v6428_v62  ;;  %2085 = vmatmul.bf16.vlgmr.msra.gmra.mxu3 %v6428_v62 }
 0x336   :  { %2107 = vmatpush.bf16.msra.mxu1 %v8403_v26  ;;  %2133 = vmatpush.bf16.msrb.mxu3 %v8492_v49 }
 0x338   :  { %2096 = vmatpush.bf16.msra.mxu0 %v8493_v11  ;;  %2122 = vmatpush.bf16.msrb.mxu2 %v8494_v23 }
 0x33a   :  { %2108 = vmatpush.bf16.msra.mxu1 %v8495_v46  ;;  %2134 = vmatpush.bf16.msrb.mxu3 %v8496_v34 }
 0x33c   :  { %2097 = vmatpush.bf16.msra.mxu0 %v8497_v43  ;;  %2123 = vmatpush.bf16.msrb.mxu2 %v8498_v60 }
 0x33e   :  { %2109 = vmatpush.bf16.msra.mxu1 %v8501_v13  ;;  %2135 = vmatpush.bf16.msrb.mxu3 %v8502_v33 }
 0x33f   :  { %2098 = vmatmul.bf16.vlgmr.msra.gmra.mxu0 %v6422_v16  ;;  %2124 = vmatmul.bf16.vlgmr.msrb.gmra.mxu2 %v6422_v16 }
 0x340   :  { %2142 = vmatpush.bf16.msrb.mxu0 %v8499_v18  ;;  %2168 = vmatpush.bf16.msra.mxu2 %v8500_v51 }
 0x342   :  { %2110 = vmatpush.bf16.msra.mxu1 %v8505_v61  ;;  %2136 = vmatpush.bf16.msrb.mxu3 %v8506_v30 }
 0x344   :  { %2143 = vmatpush.bf16.msrb.mxu0 %v8503_v28  ;;  %2169 = vmatpush.bf16.msra.mxu2 %v8504_v22  ;;  %v8595_v28 = vld [vmem:[#allocation46_spill] sm:$0xff] }
 0x345   :  { %2111 = vmatmul.bf16.vlgmr.msra.gmra.mxu1 %v6428_v62  ;;  %2137 = vmatmul.bf16.vlgmr.msrb.gmra.mxu3 %v6428_v62 }
 0x346   :  { %2155 = vmatpush.bf16.msrb.mxu1 %v8507_v45  ;;  %2181 = vmatpush.bf16.msra.mxu3 %v8508_v55  ;;  %v8592_v55 = vld [vmem:[#allocation25_spill] sm:$0xff] }
 0x348   :  { %2144 = vmatpush.bf16.msrb.mxu0 %v8509_v25  ;;  %2170 = vmatpush.bf16.msra.mxu2 %v8510_v24  ;;  %v8591_v24 = vld [vmem:[#allocation18_spill] sm:$0xff] }
 0x34a   :  { %2156 = vmatpush.bf16.msrb.mxu1 %v8418_v53  ;;  %2182 = vmatpush.bf16.msra.mxu3 %v8511_v6 }
 0x34c   :  { %2145 = vmatpush.bf16.msrb.mxu0 %v8512_v40  ;;  %2171 = vmatpush.bf16.msra.mxu2 %v8421_v38  ;;  %v8590_v40 = vld [vmem:[#allocation24_spill] sm:$0xff] }
 0x34e   :  { %2157 = vmatpush.bf16.msrb.mxu1 %v8422_v14  ;;  %2183 = vmatpush.bf16.msra.mxu3 %v8513_v15 }
 0x350   :  { %2146 = vmatpush.bf16.msrb.mxu0 %v8424_v12  ;;  %2172 = vmatpush.bf16.msra.mxu2 %v8425_v50 }
 0x352   :  { %2158 = vmatpush.bf16.msrb.mxu1 %v8426_v41  ;;  %2184 = vmatpush.bf16.msra.mxu3 %v8427_v21  ;;  %v8522_v21 = vld [vmem:[#allocation74_spill] sm:$0xff] }
 0x354   :  { %2147 = vmatpush.bf16.msrb.mxu0 %v8428_v4  ;;  %2173 = vmatpush.bf16.msra.mxu2 %v6000_v52  ;;  %v8523_v4 = vld [vmem:[#allocation76_spill] sm:$0xff]  ;;  %v8524_v52 = vld [vmem:[#allocation195_spill] sm:$0xff] }
 0x356   :  { %2159 = vmatpush.bf16.msrb.mxu1 %v8514_v2  ;;  %2185 = vmatpush.bf16.msra.mxu3 %v8515_v1  ;;  %v8525_v2 = vld [vmem:[#allocation197_spill] sm:$0xff] }
 0x358   :  { %2148 = vmatpush.bf16.msrb.mxu0 %v8516_v58  ;;  %2174 = vmatpush.bf16.msra.mxu2 %v8517_v27  ;;  %v8526_v27 = vld [vmem:[#allocation78_spill] sm:$0xff] }
 0x35a   :  { %2160 = vmatpush.bf16.msrb.mxu1 %v8518_v57  ;;  %2186 = vmatpush.bf16.msra.mxu3 %v8519_v39  ;;  %v8527_v57 = vld [vmem:[#allocation80_spill] sm:$0xff]  ;;  %v8528_v39 = vld [vmem:[#allocation199_spill] sm:$0xff] }
 0x35c   :  { %2149 = vmatpush.bf16.msrb.mxu0 %v8520_v7  ;;  %2175 = vmatpush.bf16.msra.mxu2 %v8521_v35  ;;  %v8529_v7 = vld [vmem:[#allocation201_spill] sm:$0xff]  ;;  %v8530_v35 = vld [vmem:[#allocation75_spill] sm:$0xff] }
 0x35e   :  { %2161 = vmatpush.bf16.msrb.mxu1 %v8524_v52  ;;  %2187 = vmatpush.bf16.msra.mxu3 %v8525_v2  ;;  %v8532_v2 = vld [vmem:[#allocation82_spill] sm:$0xff]  ;;  %v8533_v52 = vld [vmem:[#allocation84_spill] sm:$0xff] }
 0x35f   :  { %2150 = vmatmul.bf16.vlgmr.msrb.gmra.mxu0 %v6422_v16  ;;  %2176 = vmatmul.bf16.vlgmr.msra.gmra.mxu2 %v6422_v16  ;;  %v8534_v16 = vld [vmem:[#allocation79_spill] sm:$0xff] }
 0x360   :  { %2338 = vmatpush.bf16.msra.mxu0 %v8522_v21  ;;  %2364 = vmatpush.bf16.msrb.mxu2 %v8523_v4  ;;  %v8531_v21 = vld [vmem:[#allocation77_spill] sm:$0xff]  ;;  %v8541_v4 = vld [vmem:[#allocation92_spill] sm:$0xff] }
 0x362   :  { %2162 = vmatpush.bf16.msrb.mxu1 %v8528_v39  ;;  %2188 = vmatpush.bf16.msra.mxu3 %v8529_v7  ;;  %v8537_v39 = vld [vmem:[#allocation88_spill] sm:$0xff]  ;;  %v8538_v7 = vld [vmem:[#allocation83_spill] sm:$0xff] }
 0x364   :  { %2339 = vmatpush.bf16.msra.mxu0 %v8526_v27  ;;  %2365 = vmatpush.bf16.msrb.mxu2 %v8527_v57  ;;  %v8535_v27 = vld [vmem:[#allocation81_spill] sm:$0xff]  ;;  %v8536_v57 = vld [vmem:[#allocation86_spill] sm:$0xff] }
 0x365   :  { %2163 = vmatmul.bf16.vlgmr.msrb.gmra.mxu1 %v6428_v62  ;;  %2189 = vmatmul.bf16.vlgmr.msra.gmra.mxu3 %v6428_v62  ;;  %v8542_v62 = vld [vmem:[#allocation87_spill] sm:$0xff] }
 0x366   :  { %2351 = vmatpush.bf16.msra.mxu1 %v8530_v35  ;;  %2377 = vmatpush.bf16.msrb.mxu3 %v8531_v21  ;;  %v8539_v35 = vld [vmem:[#allocation85_spill] sm:$0xff]  ;;  %v8540_v21 = vld [vmem:[#allocation90_spill] sm:$0xff] }
 0x368   :  { %2340 = vmatpush.bf16.msra.mxu0 %v8532_v2  ;;  %2366 = vmatpush.bf16.msrb.mxu2 %v8533_v52  ;;  %v8543_v2 = vld [vmem:[#allocation89_spill] sm:$0xff]  ;;  %v8544_v52 = vld [vmem:[#allocation94_spill] sm:$0xff] }
 0x36a   :  { %2352 = vmatpush.bf16.msra.mxu1 %v8534_v16  ;;  %2378 = vmatpush.bf16.msrb.mxu3 %v8535_v27  ;;  %v8545_v16 = vld [vmem:[#allocation96_spill] sm:$0xff]  ;;  %v8546_v27 = vld [vmem:[#allocation91_spill] sm:$0xff] }
 0x36c   :  { %2341 = vmatpush.bf16.msra.mxu0 %v8536_v57  ;;  %2367 = vmatpush.bf16.msrb.mxu2 %v8537_v39  ;;  %v8547_v57 = vld [vmem:[#allocation93_spill] sm:$0xff]  ;;  %v8548_v39 = vld [vmem:[#allocation98_spill] sm:$0xff] }
 0x36e   :  { %2353 = vmatpush.bf16.msra.mxu1 %v8538_v7  ;;  %2379 = vmatpush.bf16.msrb.mxu3 %v8539_v35  ;;  %v8549_v7 = vld [vmem:[#allocation100_spill] sm:$0xff]  ;;  %v8550_v35 = vld [vmem:[#allocation95_spill] sm:$0xff] }
 0x370   :  { %2342 = vmatpush.bf16.msra.mxu0 %v8540_v21  ;;  %2368 = vmatpush.bf16.msrb.mxu2 %v8541_v4  ;;  %v8551_v21 = vld [vmem:[#allocation97_spill] sm:$0xff]  ;;  %v8552_v4 = vld [vmem:[#allocation102_spill] sm:$0xff] }
 0x372   :  { %2354 = vmatpush.bf16.msra.mxu1 %v8542_v62  ;;  %2380 = vmatpush.bf16.msrb.mxu3 %v8543_v2  ;;  %v8553_v62 = vld [vmem:[#allocation104_spill] sm:$0xff]  ;;  %v8554_v2 = vld [vmem:[#allocation106_spill] sm:$0xff] }
 0x374   :  { %2343 = vmatpush.bf16.msra.mxu0 %v8544_v52  ;;  %2369 = vmatpush.bf16.msrb.mxu2 %v8545_v16  ;;  %v8555_v52 = vld [vmem:[#allocation108_spill] sm:$0xff]  ;;  %v8556_v16 = vld [vmem:[#allocation99_spill] sm:$0xff] }
 0x376   :  { %2355 = vmatpush.bf16.msra.mxu1 %v8546_v27  ;;  %2381 = vmatpush.bf16.msrb.mxu3 %v8547_v57  ;;  %v8557_v27 = vld [vmem:[#allocation101_spill] sm:$0xff]  ;;  %v8558_v57 = vld [vmem:[#allocation110_spill] sm:$0xff] }
 0x378   :  { %2344 = vmatpush.bf16.msra.mxu0 %v8548_v39  ;;  %2370 = vmatpush.bf16.msrb.mxu2 %v8549_v7  ;;  %v8559_v39 = vld [vmem:[#allocation112_spill] sm:$0xff]  ;;  %v8560_v7 = vld [vmem:[#allocation103_spill] sm:$0xff] }
 0x37a   :  { %2356 = vmatpush.bf16.msra.mxu1 %v8550_v35  ;;  %2382 = vmatpush.bf16.msrb.mxu3 %v8551_v21  ;;  %v8561_v35 = vld [vmem:[#allocation105_spill] sm:$0xff]  ;;  %v8562_v21 = vld [vmem:[#allocation107_spill] sm:$0xff] }
 0x37c   :  { %2345 = vmatpush.bf16.msra.mxu0 %v8552_v4  ;;  %2371 = vmatpush.bf16.msrb.mxu2 %v8553_v62  ;;  %v8563_v4 = vld [vmem:[#allocation109_spill] sm:$0xff]  ;;  %v8564_v62 = vld [vmem:[#allocation114_spill] sm:$0xff] }
 0x37e   :  { %2357 = vmatpush.bf16.msra.mxu1 %v8556_v16  ;;  %2383 = vmatpush.bf16.msrb.mxu3 %v8557_v27  ;;  %v8567_v16 = vld [vmem:[#allocation113_spill] sm:$0xff]  ;;  %v8568_v27 = vld [vmem:[#allocation118_spill] sm:$0xff] }
 0x380   :  { %2390 = vmatpush.bf16.msrb.mxu0 %v8554_v2  ;;  %2416 = vmatpush.bf16.msra.mxu2 %v8555_v52  ;;  %v8565_v2 = vld [vmem:[#allocation116_spill] sm:$0xff]  ;;  %v8566_v52 = vld [vmem:[#allocation111_spill] sm:$0xff] }
 0x382   :  { %2358 = vmatpush.bf16.msra.mxu1 %v8560_v7  ;;  %2384 = vmatpush.bf16.msrb.mxu3 %v8561_v35  ;;  %v8571_v7 = vld [vmem:[#allocation117_spill] sm:$0xff]  ;;  %v8572_v35 = vld [vmem:[#allocation122_spill] sm:$0xff] }
 0x384   :  { %2391 = vmatpush.bf16.msrb.mxu0 %v8558_v57  ;;  %2417 = vmatpush.bf16.msra.mxu2 %v8559_v39  ;;  %v8569_v57 = vld [vmem:[#allocation120_spill] sm:$0xff]  ;;  %v8570_v39 = vld [vmem:[#allocation115_spill] sm:$0xff] }
 0x386   :  { %2403 = vmatpush.bf16.msrb.mxu1 %v8562_v21  ;;  %2429 = vmatpush.bf16.msra.mxu3 %v8563_v4  ;;  %v8573_v21 = vld [vmem:[#allocation124_spill] sm:$0xff]  ;;  %v8574_v4 = vld [vmem:[#allocation119_spill] sm:$0xff] }
 0x388   :  { %2392 = vmatpush.bf16.msrb.mxu0 %v8564_v62  ;;  %2418 = vmatpush.bf16.msra.mxu2 %v8565_v2  ;;  %v8575_v62 = vld [vmem:[#allocation121_spill] sm:$0xff]  ;;  %v8576_v2 = vld [vmem:[#allocation126_spill] sm:$0xff] }
 0x38a   :  { %2404 = vmatpush.bf16.msrb.mxu1 %v8566_v52  ;;  %2430 = vmatpush.bf16.msra.mxu3 %v8567_v16  ;;  %v8577_v52 = vld [vmem:[#allocation128_spill] sm:$0xff]  ;;  %v8578_v16 = vld [vmem:[#allocation123_spill] sm:$0xff] }
 0x38c   :  { %2393 = vmatpush.bf16.msrb.mxu0 %v8568_v27  ;;  %2419 = vmatpush.bf16.msra.mxu2 %v8569_v57  ;;  %v8579_v27 = vld [vmem:[#allocation125_spill] sm:$0xff]  ;;  %v8580_v57 = vld [vmem:[#allocation130_spill] sm:$0xff] }
 0x38e   :  { %2405 = vmatpush.bf16.msrb.mxu1 %v8570_v39  ;;  %2431 = vmatpush.bf16.msra.mxu3 %v8571_v7  ;;  %v8581_v39 = vld [vmem:[#allocation132_spill] sm:$0xff]  ;;  %v8582_v7 = vld [vmem:[#allocation127_spill] sm:$0xff] }
 0x390   :  { %2394 = vmatpush.bf16.msrb.mxu0 %v8572_v35  ;;  %2420 = vmatpush.bf16.msra.mxu2 %v8573_v21  ;;  %v8583_v35 = vld [vmem:[#allocation129_spill] sm:$0xff]  ;;  %v8584_v21 = vld [vmem:[#allocation134_spill] sm:$0xff] }
 0x392   :  { %2406 = vmatpush.bf16.msrb.mxu1 %v8574_v4  ;;  %2432 = vmatpush.bf16.msra.mxu3 %v8575_v62  ;;  %v8585_v4 = vld [vmem:[#allocation136_spill] sm:$0xff]  ;;  %v8586_v62 = vld [vmem:[#allocation131_spill] sm:$0xff] }
 0x394   :  { %2395 = vmatpush.bf16.msrb.mxu0 %v8576_v2  ;;  %2421 = vmatpush.bf16.msra.mxu2 %v8577_v52  ;;  %v8587_v2 = vld [vmem:[#allocation133_spill] sm:$0xff]  ;;  %v8588_v52 = vld [vmem:[#allocation135_spill] sm:$0xff] }
 0x396   :  { %2407 = vmatpush.bf16.msrb.mxu1 %v8578_v16  ;;  %2433 = vmatpush.bf16.msra.mxu3 %v8579_v27  ;;  %v8589_v16 = vld [vmem:[#allocation137_spill] sm:$0xff] }
 0x398   :  { %2396 = vmatpush.bf16.msrb.mxu0 %v8580_v57  ;;  %2422 = vmatpush.bf16.msra.mxu2 %v8581_v39 }
 0x39a   :  { %2408 = vmatpush.bf16.msrb.mxu1 %v8582_v7  ;;  %2434 = vmatpush.bf16.msra.mxu3 %v8583_v35 }
 0x39c   :  { %2397 = vmatpush.bf16.msrb.mxu0 %v8584_v21  ;;  %2423 = vmatpush.bf16.msra.mxu2 %v8585_v4  ;;  %v1995_v27 = vpop.f32.mrf.mxu0 }
 0x39e   :  { %2409 = vmatpush.bf16.msrb.mxu1 %v8586_v62  ;;  %2435 = vmatpush.bf16.msra.mxu3 %v8587_v2 }
 0x3a2   :  { %2410 = vmatpush.bf16.msrb.mxu1 %v8588_v52  ;;  %2436 = vmatpush.bf16.msra.mxu3 %v8589_v16  ;;  %v2008_v57 = vpop.f32.mrf.mxu1  ;;  %v2021_v58 = vpop.f32.mrf.mxu2 }
 0x3a3   :  { %v2009_v52 = vadd.f32 %v2008_v57, %v1995_v27 }
 0x3a4   :  { %v1997_v39 = vpop.f32.mrf.mxu0 }
 0x3a5   :  { %v2194_v39 = vadd.f32 %v2009_v52, %v8591_v24 }
 0x3a8   :  { %v2034_v1 = vpop.f32.mrf.mxu3 }
 0x3aa   :  { %v2010_v7 = vpop.f32.mrf.mxu1  ;;  %v2023_v41 = vpop.f32.mrf.mxu2 }
 0x3ab   :  { %v2035_v7 = vadd.f32 %v2034_v1, %v2021_v58 }
 0x3ac   :  { %v2047_v35 = vpop.f32.mrf.mxu0 }
 0x3b0   :  { %v2036_v50 = vpop.f32.mrf.mxu3 }
 0x3b2   :  { %v2060_v21 = vpop.f32.mrf.mxu1  ;;  %v2073_v12 = vpop.f32.mrf.mxu2 }
 0x3b3   :  { %v2061_v62 = vadd.f32 %v2060_v21, %v2047_v35  ;;  %v8593_v21 = vld [vmem:[#allocation19_spill] sm:$0xff] }
 0x3b4   :  { %v2049_v4 = vpop.f32.mrf.mxu0 }
 0x3b5   :  { %v2196_v16 = vadd.f32 %v2061_v62, %v8590_v40  ;;  %v4776_v4 = vmul.f32 -1.442695, %v2194_v39 }
 0x3b7   :  { %v4778_v25 = vmul.f32 -1.442695, %v2196_v16 }
 0x3b8   :  { %v2086_v15 = vpop.f32.mrf.mxu3 }
 0x3b9   :  { %v2087_v6 = vadd.f32 %v2086_v15, %v2073_v12  ;;  %5014 = vpow2.f32 %v4778_v25 }
 0x3ba   :  { %v2062_v14 = vpop.f32.mrf.mxu1  ;;  %v2075_v2 = vpop.f32.mrf.mxu2  ;;  %5016 = vpow2.f32 %v4776_v4 }
 0x3bb   :  { %v2197_v50 = vadd.f32 %v2087_v6, %v8592_v55  ;;  %v2195_v14 = vadd.f32 %v2035_v7, %v8593_v21 }
 0x3bc   :  { %v2099_v38 = vpop.f32.mrf.mxu0 }
 0x3bd   :  { %v4779_v2 = vmul.f32 -1.442695, %v2197_v50  ;;  %v4777_v57 = vmul.f32 -1.442695, %v2195_v14 }
 0x3bf   :  { %v5015_v12 = vpop.eup %5014  ;;  %5018 = vpow2.f32 %v4779_v2 }
 0x3c0   :  { %v2088_v53 = vpop.f32.mrf.mxu3  ;;  %5020 = vpow2.f32 %v4777_v57  ;;  %v6574_v52 = vadd.f32 1.0, %v5015_v12  ;;  %v5017_v24 = vpop.eup %5016 }
 0x3c1   :  { %v6576_v6 = vadd.f32 1.0, %v5017_v24 }
 0x3c2   :  { %v2125_v41 = vpop.f32.mrf.mxu2  ;;  %v2112_v45 = vpop.f32.mrf.mxu1  ;;  %5022 = vrcp.f32 %v6574_v52  ;;  %vm2253_vm2 = vweird.f32 %v6574_v52 }
 0x3c3   :  { %5024 = vrcp.f32 %v6576_v6  ;;  %v2113_v12 = vadd.f32 %v2112_v45, %v2099_v38  ;;  %vm2215_vm4 = vweird.f32 %v6576_v6 }
 0x3c4   :  { %v2101_v30 = vpop.f32.mrf.mxu0 }
 0x3c5   :  { %v5019_v15 = vpop.eup %5018  ;;  %v2198_v33 = vadd.f32 %v2113_v12, %v8595_v28  ;;  %v2257_v28 = vand.u32 2147483647, %v6574_v52 }
 0x3c6   :  { %v5021_v30 = vpop.eup %5020  ;;  %v6579_v25 = vadd.f32 1.0, %v5019_v15 }
 0x3c7   :  { %v6582_v1 = vadd.f32 1.0, %v5021_v30  ;;  %vm2258_vm7 = vcmp.eq.f32.partialorder %v2257_v28, 8.507059e+37 }
 0x3c8   :  { %v2138_v27 = vpop.f32.mrf.mxu3  ;;  %v5023_v58 = vpop.eup %5022  ;;  %5026 = vrcp.f32 %v6579_v25  ;;  %vm2268_vm9 = vweird.f32 %v6579_v25 }
 0x3c9   :  { %5028 = vrcp.f32 %v6582_v1  ;;  %v2249_v16 = vmul.f32 %v5023_v58, %v6574_v52  ;;  %v6587_v62 = vpop.eup %5024  ;;  %vm2254_vm1 = vweird.f32 %v5023_v58  ;;  %vm2230_vm13 = vweird.f32 %v6582_v1 }
 0x3ca   :  { %v2127_v40 = vpop.f32.mrf.mxu2  ;;  %v2114_v53 = vpop.f32.mrf.mxu1  ;;  %v2211_v7 = vmul.f32 %v6587_v62, %v6576_v6  ;;  %vm6607_vm3 = vmor %vm2253_vm2, %vm2254_vm1  ;;  %vm2216_vm5 = vweird.f32 %v6587_v62  ;;  %v2236_v28 = vand.u32 2147483648, %v6582_v1 }
 0x3cb   :  { %v2250_v50 = vsub.f32 1.0, %v2249_v16  ;;  %v8594_v53 = vld [vmem:[#allocation56_spill] sm:$0xff]  ;;  %vm6625_vm8 = vmor %vm2215_vm4, %vm2216_vm5 }
 0x3cc   :  { %v2212_v15 = vsub.f32 1.0, %v2211_v7  ;;  %v2259_v7 = vand.u32 2147483648, %v6574_v52 }
 0x3ce   :  { %v6589_v39 = vpop.eup %5026 }
 0x3cf   :  { %v6593_v2 = vpop.eup %5028  ;;  %v2264_v57 = vmul.f32 %v6589_v39, %v6579_v25  ;;  %vm2269_vm6 = vweird.f32 %v6589_v39 }
 0x3d0   :  { %v2140_v55 = vpop.f32.mrf.mxu3  ;;  %v2226_v30 = vmul.f32 %v6593_v2, %v6582_v1  ;;  %vm6634_vm10 = vmor %vm2268_vm9, %vm2269_vm6  ;;  %vm2231_vm12 = vweird.f32 %v6593_v2 }
 0x3d1   :  { %v2251_v55 = vmul.f32 %v5023_v58, %v2250_v50  ;;  %v2265_v22 = vsub.f32 1.0, %v2264_v57  ;;  %v2139_v50 = vadd.f32 %v2138_v27, %v2125_v41  ;;  %v2221_v27 = vand.u32 2147483648, %v6576_v6  ;;  %vm2232_vm15 = vmor %vm2230_vm13, %vm2231_vm12 }
 0x3d2   :  { %v2227_v45 = vsub.f32 1.0, %v2226_v30 }
 0x3d3   :  { %v2252_v13 = vadd.f32 %v5023_v58, %v2251_v55  ;;  %v2266_v57 = vmul.f32 %v6589_v39, %v2265_v22 }
 0x3d4   :  { %v2228_v30 = vmul.f32 %v6593_v2, %v2227_v45 }
 0x3d5   :  { %v2256_v22 = vsel %vm6607_vm3, %v5023_v58, %v2252_v13 }
 0x3dc   :  { %v2151_v35 = vpop.f32.mrf.mxu0 }
 0x3e2   :  { %v2164_v4 = vpop.f32.mrf.mxu1  ;;  %v2177_v21 = vpop.f32.mrf.mxu2 }
 0x3e3   :  { %v2165_v14 = vadd.f32 %v2164_v4, %v2151_v35  ;;  %v2213_v4 = vmul.f32 %v6587_v62, %v2212_v15  ;;  %v8599_v15 = vld [vmem:[#allocation47_spill] sm:$0xff] }
 0x3e4   :  { %v2153_v40 = vpop.f32.mrf.mxu0  ;;  %v2199_v55 = vadd.f32 %v2139_v50, %v8599_v15 }
 0x3e5   :  { %v2200_v24 = vadd.f32 %v2165_v14, %v8594_v53  ;;  %v8596_v14 = vld [vmem:[#allocation57_spill] sm:$0xff]  ;;  %v2214_v41 = vadd.f32 %v6587_v62, %v2213_v4  ;;  %v2274_v4 = vand.u32 2147483648, %v6579_v25 }
 0x3e7   :  { %v4780_v61 = vmul.f32 -1.442695, %v2200_v24  ;;  %v2260_v24 = vor.u32 1.1754944e-38, %v2259_v7 }
 0x3e8   :  { %v2190_v16 = vpop.f32.mrf.mxu3 }
 0x3e9   :  { %5030 = vpow2.f32 %v4780_v61  ;;  %v2191_v35 = vadd.f32 %v2190_v16, %v2177_v21  ;;  %v2219_v21 = vand.u32 2147483647, %v6576_v6  ;;  %v2261_v58 = vsel %vm2258_vm7, %v2260_v24, %v2256_v22 }
 0x3ea   :  { %v2166_v40 = vpop.f32.mrf.mxu1  ;;  %v2179_v38 = vpop.f32.mrf.mxu2  ;;  %5032 = vtanh.f32 %v2198_v33  ;;  %v2267_v33 = vadd.f32 %v6589_v39, %v2266_v57  ;;  %v2222_v6 = vor.u32 1.1754944e-38, %v2221_v27  ;;  %v2318_v50 = vmul.f32 %v2261_v58, %v6414_v31 }
 0x3eb   :  { %v2201_v53 = vadd.f32 %v2191_v35, %v8596_v14  ;;  %v2218_v40 = vsel %vm6625_vm8, %v6587_v62, %v2214_v41  ;;  %v2272_v38 = vand.u32 2147483647, %v6579_v25  ;;  %vm2220_vm11 = vcmp.eq.f32.partialorder %v2219_v21, 8.507059e+37 }
 0x3ec   :  { %v2229_v14 = vadd.f32 %v6593_v2, %v2228_v30  ;;  %v2271_v62 = vsel %vm6634_vm10, %v6589_v39, %v2267_v33  ;;  %v2223_v57 = vsel %vm2220_vm11, %v2222_v6, %v2218_v40  ;;  %v2234_v21 = vand.u32 2147483647, %v6582_v1 }
 0x3ed   :  { %v4781_v12 = vmul.f32 -1.442695, %v2201_v53  ;;  %v2275_v53 = vor.u32 1.1754944e-38, %v2274_v4  ;;  %vm2273_vm14 = vcmp.eq.f32.partialorder %v2272_v38, 8.507059e+37 }
 0x3ee   :  { %v2233_v22 = vsel %vm2232_vm15, %v6593_v2, %v2229_v14  ;;  %vm2235_vm0 = vcmp.eq.f32.partialorder %v2234_v21, 8.507059e+37 }
 0x3ef   :  { %v5031_v52 = vpop.eup %5030  ;;  %5034 = vpow2.f32 %v4781_v12  ;;  %v2276_v12 = vsel %vm2273_vm14, %v2275_v53, %v2271_v62 }
 0x3f0   :  { %v2286_v16 = vadd.f32 1.0, %v5031_v52  ;;  %v2192_v35 = vpop.f32.mrf.mxu3  ;;  %v5033_v45 = vpop.eup %5032  ;;  %v2237_v52 = vor.u32 1.1754944e-38, %v2236_v28  ;;  %v2319_v15 = vmul.f32 %v2276_v12, %v6419_v29 }
 0x3f1   :  { %v2320_v61 = vmul.f32 %v5033_v45, %v2223_v57 }
 0x3f2   :  { %5036 = vrcp.f32 %v2286_v16  ;;  %v2299_v33 = vand.u32 2147483648, %v2286_v16  ;;  %v2297_v4 = vand.u32 2147483647, %v2286_v16  ;;  %vm2293_vm2 = vweird.f32 %v2286_v16 }
 0x3f3   :  { %5038 = vtanh.f32 %v2199_v55  ;;  %v6647_v27 = vadd.f32 %v2320_v61, %v2318_v50  ;;  %v2238_v55 = vsel %vm2235_vm0, %v2237_v52, %v2233_v22  ;;  %v8605_v22 = vld [vmem:[#allocation165_spill] sm:$0xff]  ;;  %v8607_v52 = vld [vmem:[#allocation176_spill] sm:$0xff] }
 0x3f4   :  { %v2300_v38 = vor.u32 1.1754944e-38, %v2299_v33  ;;  %vm2298_vm4 = vcmp.eq.f32.partialorder %v2297_v4, 8.507059e+37  ;;  %v8613_v33 = vld [vmem:[#allocation180_spill] sm:$0xff]  ;;  %v8615_v4 = vld [vmem:[#allocation177_spill] sm:$0xff] }
 0x3f5   :  { %v5035_v25 = vpop.eup %5034 }
 0x3f6   :  { %v2287_v31 = vadd.f32 1.0, %v5035_v25 }
 0x3f8   :  { %v5037_v41 = vpop.eup %5036  ;;  %5040 = vrcp.f32 %v2287_v31  ;;  %v2314_v50 = vand.u32 2147483648, %v2287_v31  ;;  %v2312_v25 = vand.u32 2147483647, %v2287_v31  ;;  %vm2308_vm6 = vweird.f32 %v2287_v31 }
 0x3f9   :  { %v5039_v39 = vpop.eup %5038  ;;  %v2289_v24 = vmul.f32 %v5037_v41, %v2286_v16  ;;  %5042 = vtanh.f32 %v6647_v27  ;;  %vm2294_vm1 = vweird.f32 %v5037_v41 }
 0x3fa   :  { %v2321_v1 = vmul.f32 %v5039_v39, %v2238_v55  ;;  %vm2295_vm3 = vmor %vm2293_vm2, %vm2294_vm1  ;;  %v2315_v16 = vor.u32 1.1754944e-38, %v2314_v50  ;;  %vm2313_vm8 = vcmp.eq.f32.partialorder %v2312_v25, 8.507059e+37  ;;  %v8606_v39 = vld [vmem:[#allocation174_spill] sm:$0xff]  ;;  %v8610_v55 = vld [vmem:[#allocation171_spill] sm:$0xff] }
 0x3fb   :  { %v2290_v30 = vsub.f32 1.0, %v2289_v24  ;;  %v8608_v24 = vld [vmem:[#allocation167_spill] sm:$0xff]  ;;  %v8624_v50 = vld [vmem:[#allocation190_spill] sm:$0xff]  ;;  %v8627_v25 = vld [vmem:[#allocation189_spill] sm:$0xff] }
 0x3fc   :  { %v6652_v58 = vadd.f32 %v2321_v1, %v2319_v15  ;;  %v8609_v15 = vld [vmem:[#allocation169_spill] sm:$0xff]  ;;  %v8612_v1 = vld [vmem:[#allocation178_spill] sm:$0xff] }
 0x3fd   :  { %v2291_v35 = vmul.f32 %v5037_v41, %v2290_v30  ;;  %v8611_v30 = vld [vmem:[#allocation173_spill] sm:$0xff] }
 0x3fe   :  { %v5041_v13 = vpop.eup %5040  ;;  %5044 = vtanh.f32 %v6652_v58 }
 0x3ff   :  { %v2292_v2 = vadd.f32 %v5037_v41, %v2291_v35  ;;  %v2304_v40 = vmul.f32 %v5041_v13, %v2287_v31  ;;  %v5043_v7 = vpop.eup %5042  ;;  %vm2309_vm5 = vweird.f32 %v5041_v13  ;;  %v8604_v31 = vld [vmem:[#allocation163_spill] sm:$0xff] }
 0x400   :  { %vm2310_vm7 = vmor %vm2308_vm6, %vm2309_vm5  ;;  %v8614_v35 = vld [vmem:[#allocation175_spill] sm:$0xff] }
 0x401   :  { %v2296_v45 = vsel %vm2295_vm3, %v5037_v41, %v2292_v2  ;;  %v2305_v29 = vsub.f32 1.0, %v2304_v40  ;;  %v8617_v2 = vld [vmem:[#allocation184_spill] sm:$0xff]  ;;  %v8618_v40 = vld [vmem:[#allocation179_spill] sm:$0xff] }
 0x402   :  { %v2301_v6 = vsel %vm2298_vm4, %v2300_v38, %v2296_v45  ;;  %v8619_v38 = vld [vmem:[#allocation181_spill] sm:$0xff]  ;;  %v8620_v45 = vld [vmem:[#allocation186_spill] sm:$0xff] }
 0x403   :  { %v2326_v14 = vmul.f32 %v5043_v7, %v2301_v6  ;;  %v2306_v62 = vmul.f32 %v5041_v13, %v2305_v29  ;;  %v8621_v29 = vld [vmem:[#allocation188_spill] sm:$0xff]  ;;  %v8622_v7 = vld [vmem:[#allocation183_spill] sm:$0xff]  ;;  %v8623_v6 = vld [vmem:[#allocation185_spill] sm:$0xff] }
 0x404   :  { %v5045_v61 = vpop.eup %5044 }
 0x405   :  { %v6655_v53 = vpack.c.bf16 %v2326_v14, %v2326_v14  ;;  %v2307_v57 = vadd.f32 %v5041_v13, %v2306_v62  ;;  %v8625_v14 = vld [vmem:[#allocation192_spill] sm:$0xff]  ;;  %v8626_v62 = vld [vmem:[#allocation187_spill] sm:$0xff] }
 0x407   :  { %v2311_v28 = vsel %vm2310_vm7, %v5041_v13, %v2307_v57  ;;  %2346 = vmatmul.bf16.vlgmr.msra.gmra.mxu0 %v6655_v53  ;;  %2372 = vmatmul.bf16.vlgmr.msrb.gmra.mxu2 %v6655_v53  ;;  %v8616_v13 = vld [vmem:[#allocation182_spill] sm:$0xff] }
 0x408   :  { %v2316_v21 = vsel %vm2313_vm8, %v2315_v16, %v2311_v28  ;;  %2442 = vmatpush.bf16.msra.mxu0 %v8383_v10  ;;  %2468 = vmatpush.bf16.msrb.mxu2 %v8384_v32  ;;  %v8628_v57 = vld [vmem:[#allocation194_spill] sm:$0xff]  ;;  %v8629_v16 = vld [vmem:[#allocation196_spill] sm:$0xff]  ;;  %v8630_v28 = vld [vmem:[#allocation191_spill] sm:$0xff] }
 0x409   :  { %v2327_v12 = vmul.f32 %v5045_v61, %v2316_v21  ;;  %v8631_v61 = vld [vmem:[#allocation193_spill] sm:$0xff]  ;;  %v8632_v21 = vld [vmem:[#allocation198_spill] sm:$0xff] }
 0x40b   :  { %v6661_v41 = vpack.c.bf16 %v2327_v12, %v2327_v12  ;;  %v8633_v12 = vld [vmem:[#allocation200_spill] sm:$0xff] }
 0x40c   :  { %2443 = vmatpush.bf16.msra.mxu0 %v8385_v54  ;;  %2469 = vmatpush.bf16.msrb.mxu2 %v8386_v9 }
 0x40d   :  { %2359 = vmatmul.bf16.vlgmr.msra.gmra.mxu1 %v6661_v41  ;;  %2385 = vmatmul.bf16.vlgmr.msrb.gmra.mxu3 %v6661_v41 }
 0x40e   :  { %2455 = vmatpush.bf16.msra.mxu1 %v8387_v17  ;;  %2481 = vmatpush.bf16.msrb.mxu3 %v8388_v37 }
 0x410   :  { %2444 = vmatpush.bf16.msra.mxu0 %v8389_v36  ;;  %2470 = vmatpush.bf16.msrb.mxu2 %v8390_v47 }
 0x412   :  { %2456 = vmatpush.bf16.msra.mxu1 %v8391_v0  ;;  %2482 = vmatpush.bf16.msrb.mxu3 %v8392_v56 }
 0x414   :  { %2445 = vmatpush.bf16.msra.mxu0 %v8393_v5  ;;  %2471 = vmatpush.bf16.msrb.mxu2 %v8394_v63 }
 0x416   :  { %2457 = vmatpush.bf16.msra.mxu1 %v8395_v8  ;;  %2483 = vmatpush.bf16.msrb.mxu3 %v8396_v48 }
 0x417   :  { %2398 = vmatmul.bf16.vlgmr.msrb.gmra.mxu0 %v6655_v53  ;;  %2424 = vmatmul.bf16.vlgmr.msra.gmra.mxu2 %v6655_v53 }
 0x418   :  { %2446 = vmatpush.bf16.msra.mxu0 %v8397_v19  ;;  %2472 = vmatpush.bf16.msrb.mxu2 %v8398_v42 }
 0x41a   :  { %2458 = vmatpush.bf16.msra.mxu1 %v8399_v59  ;;  %2484 = vmatpush.bf16.msrb.mxu3 %v8400_v44 }
 0x41c   :  { %2447 = vmatpush.bf16.msra.mxu0 %v8401_v20  ;;  %2473 = vmatpush.bf16.msrb.mxu2 %v8402_v3 }
 0x41d   :  { %2411 = vmatmul.bf16.vlgmr.msrb.gmra.mxu1 %v6661_v41  ;;  %2437 = vmatmul.bf16.vlgmr.msra.gmra.mxu3 %v6661_v41 }
 0x41e   :  { %2459 = vmatpush.bf16.msra.mxu1 %v8403_v26  ;;  %2485 = vmatpush.bf16.msrb.mxu3 %v8492_v49 }
 0x420   :  { %2448 = vmatpush.bf16.msra.mxu0 %v8493_v11  ;;  %2474 = vmatpush.bf16.msrb.mxu2 %v8494_v23 }
 0x422   :  { %2460 = vmatpush.bf16.msra.mxu1 %v8495_v46  ;;  %2486 = vmatpush.bf16.msrb.mxu3 %v8496_v34 }
 0x424   :  { %2449 = vmatpush.bf16.msra.mxu0 %v8497_v43  ;;  %2475 = vmatpush.bf16.msrb.mxu2 %v8498_v60 }
 0x426   :  { %2461 = vmatpush.bf16.msra.mxu1 %v8604_v31  ;;  %2487 = vmatpush.bf16.msrb.mxu3 %v8605_v22 }
 0x427   :  { %2450 = vmatmul.bf16.vlgmr.msra.gmra.mxu0 %v6655_v53  ;;  %2476 = vmatmul.bf16.vlgmr.msrb.gmra.mxu2 %v6655_v53 }
 0x428   :  { %2494 = vmatpush.bf16.msrb.mxu0 %v8499_v18  ;;  %2520 = vmatpush.bf16.msra.mxu2 %v8500_v51 }
 0x42a   :  { %2462 = vmatpush.bf16.msra.mxu1 %v8608_v24  ;;  %2488 = vmatpush.bf16.msrb.mxu3 %v8609_v15 }
 0x42c   :  { %2495 = vmatpush.bf16.msrb.mxu0 %v8606_v39  ;;  %2521 = vmatpush.bf16.msra.mxu2 %v8607_v52  ;;  %v8707_v39 = vld [vmem:[#allocation50_spill] sm:$0xff] }
 0x42d   :  { %2463 = vmatmul.bf16.vlgmr.msra.gmra.mxu1 %v6661_v41  ;;  %2489 = vmatmul.bf16.vlgmr.msrb.gmra.mxu3 %v6661_v41 }
 0x42e   :  { %2507 = vmatpush.bf16.msrb.mxu1 %v8610_v55  ;;  %2533 = vmatpush.bf16.msra.mxu3 %v8611_v30  ;;  %v8704_v30 = vld [vmem:[#allocation29_spill] sm:$0xff] }
 0x430   :  { %2496 = vmatpush.bf16.msrb.mxu0 %v8612_v1  ;;  %2522 = vmatpush.bf16.msra.mxu2 %v8613_v33  ;;  %v8703_v33 = vld [vmem:[#allocation22_spill] sm:$0xff] }
 0x432   :  { %2508 = vmatpush.bf16.msrb.mxu1 %v8614_v35  ;;  %2534 = vmatpush.bf16.msra.mxu3 %v8615_v4 }
 0x434   :  { %2497 = vmatpush.bf16.msrb.mxu0 %v8616_v13  ;;  %2523 = vmatpush.bf16.msra.mxu2 %v8617_v2  ;;  %v8702_v13 = vld [vmem:[#allocation28_spill] sm:$0xff] }
 0x436   :  { %2509 = vmatpush.bf16.msrb.mxu1 %v8618_v40  ;;  %2535 = vmatpush.bf16.msra.mxu3 %v8619_v38 }
 0x438   :  { %2498 = vmatpush.bf16.msrb.mxu0 %v8620_v45  ;;  %2524 = vmatpush.bf16.msra.mxu2 %v8621_v29 }
 0x43a   :  { %2510 = vmatpush.bf16.msrb.mxu1 %v8622_v7  ;;  %2536 = vmatpush.bf16.msra.mxu3 %v8623_v6  ;;  %v8634_v6 = vld [vmem:[#allocation74_spill] sm:$0xff] }
 0x43c   :  { %2499 = vmatpush.bf16.msrb.mxu0 %v8624_v50  ;;  %2525 = vmatpush.bf16.msra.mxu2 %v8625_v14  ;;  %v8635_v50 = vld [vmem:[#allocation76_spill] sm:$0xff]  ;;  %v8636_v14 = vld [vmem:[#allocation195_spill] sm:$0xff] }
 0x43e   :  { %2511 = vmatpush.bf16.msrb.mxu1 %v8626_v62  ;;  %2537 = vmatpush.bf16.msra.mxu3 %v8627_v25  ;;  %v8637_v62 = vld [vmem:[#allocation197_spill] sm:$0xff] }
 0x440   :  { %2500 = vmatpush.bf16.msrb.mxu0 %v8628_v57  ;;  %2526 = vmatpush.bf16.msra.mxu2 %v8629_v16  ;;  %v8638_v16 = vld [vmem:[#allocation78_spill] sm:$0xff] }
 0x442   :  { %2512 = vmatpush.bf16.msrb.mxu1 %v8630_v28  ;;  %2538 = vmatpush.bf16.msra.mxu3 %v8631_v61  ;;  %v8639_v28 = vld [vmem:[#allocation80_spill] sm:$0xff]  ;;  %v8640_v61 = vld [vmem:[#allocation199_spill] sm:$0xff] }
 0x444   :  { %2501 = vmatpush.bf16.msrb.mxu0 %v8632_v21  ;;  %2527 = vmatpush.bf16.msra.mxu2 %v8633_v12  ;;  %v8641_v21 = vld [vmem:[#allocation201_spill] sm:$0xff]  ;;  %v8642_v12 = vld [vmem:[#allocation75_spill] sm:$0xff] }
 0x446   :  { %2513 = vmatpush.bf16.msrb.mxu1 %v8636_v14  ;;  %2539 = vmatpush.bf16.msra.mxu3 %v8637_v62  ;;  %v8644_v62 = vld [vmem:[#allocation82_spill] sm:$0xff]  ;;  %v8645_v14 = vld [vmem:[#allocation84_spill] sm:$0xff] }
 0x447   :  { %2502 = vmatmul.bf16.vlgmr.msrb.gmra.mxu0 %v6655_v53  ;;  %2528 = vmatmul.bf16.vlgmr.msra.gmra.mxu2 %v6655_v53  ;;  %v8646_v53 = vld [vmem:[#allocation79_spill] sm:$0xff] }
 0x448   :  { %2690 = vmatpush.bf16.msra.mxu0 %v8634_v6  ;;  %2716 = vmatpush.bf16.msrb.mxu2 %v8635_v50  ;;  %v8643_v6 = vld [vmem:[#allocation77_spill] sm:$0xff]  ;;  %v8653_v50 = vld [vmem:[#allocation92_spill] sm:$0xff] }
 0x44a   :  { %2514 = vmatpush.bf16.msrb.mxu1 %v8640_v61  ;;  %2540 = vmatpush.bf16.msra.mxu3 %v8641_v21  ;;  %v8649_v61 = vld [vmem:[#allocation88_spill] sm:$0xff]  ;;  %v8650_v21 = vld [vmem:[#allocation83_spill] sm:$0xff] }
 0x44c   :  { %2691 = vmatpush.bf16.msra.mxu0 %v8638_v16  ;;  %2717 = vmatpush.bf16.msrb.mxu2 %v8639_v28  ;;  %v8647_v16 = vld [vmem:[#allocation81_spill] sm:$0xff]  ;;  %v8648_v28 = vld [vmem:[#allocation86_spill] sm:$0xff] }
 0x44d   :  { %2515 = vmatmul.bf16.vlgmr.msrb.gmra.mxu1 %v6661_v41  ;;  %2541 = vmatmul.bf16.vlgmr.msra.gmra.mxu3 %v6661_v41  ;;  %v8654_v41 = vld [vmem:[#allocation87_spill] sm:$0xff] }
 0x44e   :  { %2703 = vmatpush.bf16.msra.mxu1 %v8642_v12  ;;  %2729 = vmatpush.bf16.msrb.mxu3 %v8643_v6  ;;  %v8651_v12 = vld [vmem:[#allocation85_spill] sm:$0xff]  ;;  %v8652_v6 = vld [vmem:[#allocation90_spill] sm:$0xff] }
 0x450   :  { %2692 = vmatpush.bf16.msra.mxu0 %v8644_v62  ;;  %2718 = vmatpush.bf16.msrb.mxu2 %v8645_v14  ;;  %v8655_v62 = vld [vmem:[#allocation89_spill] sm:$0xff]  ;;  %v8656_v14 = vld [vmem:[#allocation94_spill] sm:$0xff] }
 0x452   :  { %2704 = vmatpush.bf16.msra.mxu1 %v8646_v53  ;;  %2730 = vmatpush.bf16.msrb.mxu3 %v8647_v16  ;;  %v8657_v53 = vld [vmem:[#allocation96_spill] sm:$0xff]  ;;  %v8658_v16 = vld [vmem:[#allocation91_spill] sm:$0xff] }
 0x454   :  { %2693 = vmatpush.bf16.msra.mxu0 %v8648_v28  ;;  %2719 = vmatpush.bf16.msrb.mxu2 %v8649_v61  ;;  %v8659_v28 = vld [vmem:[#allocation93_spill] sm:$0xff]  ;;  %v8660_v61 = vld [vmem:[#allocation98_spill] sm:$0xff] }
 0x456   :  { %2705 = vmatpush.bf16.msra.mxu1 %v8650_v21  ;;  %2731 = vmatpush.bf16.msrb.mxu3 %v8651_v12  ;;  %v8661_v21 = vld [vmem:[#allocation100_spill] sm:$0xff]  ;;  %v8662_v12 = vld [vmem:[#allocation95_spill] sm:$0xff] }
 0x458   :  { %2694 = vmatpush.bf16.msra.mxu0 %v8652_v6  ;;  %2720 = vmatpush.bf16.msrb.mxu2 %v8653_v50  ;;  %v8663_v6 = vld [vmem:[#allocation97_spill] sm:$0xff]  ;;  %v8664_v50 = vld [vmem:[#allocation102_spill] sm:$0xff] }
 0x45a   :  { %2706 = vmatpush.bf16.msra.mxu1 %v8654_v41  ;;  %2732 = vmatpush.bf16.msrb.mxu3 %v8655_v62  ;;  %v8665_v41 = vld [vmem:[#allocation104_spill] sm:$0xff]  ;;  %v8666_v62 = vld [vmem:[#allocation106_spill] sm:$0xff] }
 0x45c   :  { %2695 = vmatpush.bf16.msra.mxu0 %v8656_v14  ;;  %2721 = vmatpush.bf16.msrb.mxu2 %v8657_v53  ;;  %v8667_v14 = vld [vmem:[#allocation108_spill] sm:$0xff]  ;;  %v8668_v53 = vld [vmem:[#allocation99_spill] sm:$0xff] }
 0x45e   :  { %2707 = vmatpush.bf16.msra.mxu1 %v8658_v16  ;;  %2733 = vmatpush.bf16.msrb.mxu3 %v8659_v28  ;;  %v8669_v16 = vld [vmem:[#allocation101_spill] sm:$0xff]  ;;  %v8670_v28 = vld [vmem:[#allocation110_spill] sm:$0xff] }
 0x460   :  { %2696 = vmatpush.bf16.msra.mxu0 %v8660_v61  ;;  %2722 = vmatpush.bf16.msrb.mxu2 %v8661_v21  ;;  %v8671_v61 = vld [vmem:[#allocation112_spill] sm:$0xff]  ;;  %v8672_v21 = vld [vmem:[#allocation103_spill] sm:$0xff] }
 0x462   :  { %2708 = vmatpush.bf16.msra.mxu1 %v8662_v12  ;;  %2734 = vmatpush.bf16.msrb.mxu3 %v8663_v6  ;;  %v8673_v12 = vld [vmem:[#allocation105_spill] sm:$0xff]  ;;  %v8674_v6 = vld [vmem:[#allocation107_spill] sm:$0xff] }
 0x464   :  { %2697 = vmatpush.bf16.msra.mxu0 %v8664_v50  ;;  %2723 = vmatpush.bf16.msrb.mxu2 %v8665_v41  ;;  %v8675_v50 = vld [vmem:[#allocation109_spill] sm:$0xff]  ;;  %v8676_v41 = vld [vmem:[#allocation114_spill] sm:$0xff] }
 0x466   :  { %2709 = vmatpush.bf16.msra.mxu1 %v8668_v53  ;;  %2735 = vmatpush.bf16.msrb.mxu3 %v8669_v16  ;;  %v8679_v53 = vld [vmem:[#allocation113_spill] sm:$0xff]  ;;  %v8680_v16 = vld [vmem:[#allocation118_spill] sm:$0xff] }
 0x468   :  { %2742 = vmatpush.bf16.msrb.mxu0 %v8666_v62  ;;  %2768 = vmatpush.bf16.msra.mxu2 %v8667_v14  ;;  %v8677_v62 = vld [vmem:[#allocation116_spill] sm:$0xff]  ;;  %v8678_v14 = vld [vmem:[#allocation111_spill] sm:$0xff] }
 0x46a   :  { %2710 = vmatpush.bf16.msra.mxu1 %v8672_v21  ;;  %2736 = vmatpush.bf16.msrb.mxu3 %v8673_v12  ;;  %v8683_v21 = vld [vmem:[#allocation117_spill] sm:$0xff]  ;;  %v8684_v12 = vld [vmem:[#allocation122_spill] sm:$0xff] }
 0x46c   :  { %2743 = vmatpush.bf16.msrb.mxu0 %v8670_v28  ;;  %2769 = vmatpush.bf16.msra.mxu2 %v8671_v61  ;;  %v8681_v28 = vld [vmem:[#allocation120_spill] sm:$0xff]  ;;  %v8682_v61 = vld [vmem:[#allocation115_spill] sm:$0xff] }
 0x46e   :  { %2755 = vmatpush.bf16.msrb.mxu1 %v8674_v6  ;;  %2781 = vmatpush.bf16.msra.mxu3 %v8675_v50  ;;  %v8685_v6 = vld [vmem:[#allocation124_spill] sm:$0xff]  ;;  %v8686_v50 = vld [vmem:[#allocation119_spill] sm:$0xff] }
 0x470   :  { %2744 = vmatpush.bf16.msrb.mxu0 %v8676_v41  ;;  %2770 = vmatpush.bf16.msra.mxu2 %v8677_v62  ;;  %v8687_v41 = vld [vmem:[#allocation121_spill] sm:$0xff]  ;;  %v8688_v62 = vld [vmem:[#allocation126_spill] sm:$0xff] }
 0x472   :  { %2756 = vmatpush.bf16.msrb.mxu1 %v8678_v14  ;;  %2782 = vmatpush.bf16.msra.mxu3 %v8679_v53  ;;  %v8689_v14 = vld [vmem:[#allocation128_spill] sm:$0xff]  ;;  %v8690_v53 = vld [vmem:[#allocation123_spill] sm:$0xff] }
 0x474   :  { %2745 = vmatpush.bf16.msrb.mxu0 %v8680_v16  ;;  %2771 = vmatpush.bf16.msra.mxu2 %v8681_v28  ;;  %v8691_v16 = vld [vmem:[#allocation125_spill] sm:$0xff]  ;;  %v8692_v28 = vld [vmem:[#allocation130_spill] sm:$0xff] }
 0x476   :  { %2757 = vmatpush.bf16.msrb.mxu1 %v8682_v61  ;;  %2783 = vmatpush.bf16.msra.mxu3 %v8683_v21  ;;  %v8693_v61 = vld [vmem:[#allocation132_spill] sm:$0xff]  ;;  %v8694_v21 = vld [vmem:[#allocation127_spill] sm:$0xff] }
 0x478   :  { %2746 = vmatpush.bf16.msrb.mxu0 %v8684_v12  ;;  %2772 = vmatpush.bf16.msra.mxu2 %v8685_v6  ;;  %v8695_v12 = vld [vmem:[#allocation129_spill] sm:$0xff]  ;;  %v8696_v6 = vld [vmem:[#allocation134_spill] sm:$0xff] }
 0x47a   :  { %2758 = vmatpush.bf16.msrb.mxu1 %v8686_v50  ;;  %2784 = vmatpush.bf16.msra.mxu3 %v8687_v41  ;;  %v8697_v50 = vld [vmem:[#allocation136_spill] sm:$0xff]  ;;  %v8698_v41 = vld [vmem:[#allocation131_spill] sm:$0xff] }
 0x47c   :  { %2747 = vmatpush.bf16.msrb.mxu0 %v8688_v62  ;;  %2773 = vmatpush.bf16.msra.mxu2 %v8689_v14  ;;  %v8699_v62 = vld [vmem:[#allocation133_spill] sm:$0xff]  ;;  %v8700_v14 = vld [vmem:[#allocation135_spill] sm:$0xff] }
 0x47e   :  { %2759 = vmatpush.bf16.msrb.mxu1 %v8690_v53  ;;  %2785 = vmatpush.bf16.msra.mxu3 %v8691_v16  ;;  %v8701_v53 = vld [vmem:[#allocation137_spill] sm:$0xff] }
 0x480   :  { %2748 = vmatpush.bf16.msrb.mxu0 %v8692_v28  ;;  %2774 = vmatpush.bf16.msra.mxu2 %v8693_v61 }
 0x482   :  { %2760 = vmatpush.bf16.msrb.mxu1 %v8694_v21  ;;  %2786 = vmatpush.bf16.msra.mxu3 %v8695_v12 }
 0x484   :  { %2749 = vmatpush.bf16.msrb.mxu0 %v8696_v6  ;;  %2775 = vmatpush.bf16.msra.mxu2 %v8697_v50  ;;  %v2347_v16 = vpop.f32.mrf.mxu0 }
 0x486   :  { %2761 = vmatpush.bf16.msrb.mxu1 %v8698_v41  ;;  %2787 = vmatpush.bf16.msra.mxu3 %v8699_v62 }
 0x48a   :  { %2762 = vmatpush.bf16.msrb.mxu1 %v8700_v14  ;;  %2788 = vmatpush.bf16.msra.mxu3 %v8701_v53  ;;  %v2360_v28 = vpop.f32.mrf.mxu1  ;;  %v2373_v57 = vpop.f32.mrf.mxu2 }
 0x48b   :  { %v2361_v14 = vadd.f32 %v2360_v28, %v2347_v16 }
 0x48c   :  { %v2349_v61 = vpop.f32.mrf.mxu0 }
 0x48d   :  { %v2546_v61 = vadd.f32 %v2361_v14, %v8703_v33 }
 0x490   :  { %v2386_v25 = vpop.f32.mrf.mxu3 }
 0x492   :  { %v2362_v21 = vpop.f32.mrf.mxu1  ;;  %v2375_v7 = vpop.f32.mrf.mxu2 }
 0x493   :  { %v2387_v21 = vadd.f32 %v2386_v25, %v2373_v57 }
 0x494   :  { %v2399_v12 = vpop.f32.mrf.mxu0 }
 0x498   :  { %v2388_v29 = vpop.f32.mrf.mxu3 }
 0x49a   :  { %v2412_v6 = vpop.f32.mrf.mxu1  ;;  %v2425_v45 = vpop.f32.mrf.mxu2 }
 0x49b   :  { %v2413_v41 = vadd.f32 %v2412_v6, %v2399_v12  ;;  %v8705_v6 = vld [vmem:[#allocation23_spill] sm:$0xff] }
 0x49c   :  { %v2401_v50 = vpop.f32.mrf.mxu0 }
 0x49d   :  { %v2548_v53 = vadd.f32 %v2413_v41, %v8702_v13  ;;  %v4782_v50 = vmul.f32 -1.442695, %v2546_v61 }
 0x49f   :  { %v4784_v1 = vmul.f32 -1.442695, %v2548_v53 }
 0x4a0   :  { %v2438_v38 = vpop.f32.mrf.mxu3 }
 0x4a1   :  { %v2439_v4 = vadd.f32 %v2438_v38, %v2425_v45  ;;  %5046 = vpow2.f32 %v4784_v1 }
 0x4a2   :  { %v2414_v40 = vpop.f32.mrf.mxu1  ;;  %v2427_v62 = vpop.f32.mrf.mxu2  ;;  %5048 = vpow2.f32 %v4782_v50 }
 0x4a3   :  { %v2549_v29 = vadd.f32 %v2439_v4, %v8704_v30  ;;  %v2547_v40 = vadd.f32 %v2387_v21, %v8705_v6 }
 0x4a4   :  { %v2451_v2 = vpop.f32.mrf.mxu0 }
 0x4a5   :  { %v4785_v62 = vmul.f32 -1.442695, %v2549_v29  ;;  %v4783_v28 = vmul.f32 -1.442695, %v2547_v40 }
 0x4a7   :  { %v5047_v38 = vpop.eup %5046  ;;  %5050 = vpow2.f32 %v4785_v62 }
 0x4a8   :  { %v2440_v35 = vpop.f32.mrf.mxu3  ;;  %5052 = vpow2.f32 %v4783_v28  ;;  %v6807_v33 = vadd.f32 1.0, %v5047_v38  ;;  %v5049_v45 = vpop.eup %5048 }
 0x4a9   :  { %v6809_v4 = vadd.f32 1.0, %v5049_v45 }
 0x4aa   :  { %v2477_v7 = vpop.f32.mrf.mxu2  ;;  %v2464_v55 = vpop.f32.mrf.mxu1  ;;  %5054 = vrcp.f32 %v6807_v33  ;;  %vm2605_vm10 = vweird.f32 %v6807_v33 }
 0x4ab   :  { %5056 = vrcp.f32 %v6809_v4  ;;  %v2465_v38 = vadd.f32 %v2464_v55, %v2451_v2  ;;  %vm2567_vm12 = vweird.f32 %v6809_v4 }
 0x4ac   :  { %v2453_v15 = vpop.f32.mrf.mxu0 }
 0x4ad   :  { %v5051_v14 = vpop.eup %5050  ;;  %v2550_v22 = vadd.f32 %v2465_v38, %v8707_v39  ;;  %v2609_v39 = vand.u32 2147483647, %v6807_v33 }
 0x4ae   :  { %v5053_v15 = vpop.eup %5052  ;;  %v6812_v1 = vadd.f32 1.0, %v5051_v14 }
 0x4af   :  { %v6815_v25 = vadd.f32 1.0, %v5053_v15  ;;  %vm2610_vm15 = vcmp.eq.f32.partialorder %v2609_v39, 8.507059e+37 }
 0x4b0   :  { %v2490_v16 = vpop.f32.mrf.mxu3  ;;  %v5055_v57 = vpop.eup %5054  ;;  %5058 = vrcp.f32 %v6812_v1  ;;  %vm2620_vm1 = vweird.f32 %v6812_v1 }
 0x4b1   :  { %5060 = vrcp.f32 %v6815_v25  ;;  %v2601_v53 = vmul.f32 %v5055_v57, %v6807_v33  ;;  %v6820_v41 = vpop.eup %5056  ;;  %vm2606_vm9 = vweird.f32 %v5055_v57  ;;  %vm2582_vm5 = vweird.f32 %v6815_v25 }
 0x4b2   :  { %v2479_v13 = vpop.f32.mrf.mxu2  ;;  %v2466_v35 = vpop.f32.mrf.mxu1  ;;  %v2563_v21 = vmul.f32 %v6820_v41, %v6809_v4  ;;  %vm6840_vm11 = vmor %vm2605_vm10, %vm2606_vm9  ;;  %vm2568_vm13 = vweird.f32 %v6820_v41  ;;  %v2588_v39 = vand.u32 2147483648, %v6815_v25 }
 0x4b3   :  { %v2602_v29 = vsub.f32 1.0, %v2601_v53  ;;  %v8706_v35 = vld [vmem:[#allocation60_spill] sm:$0xff]  ;;  %vm6858_vm0 = vmor %vm2567_vm12, %vm2568_vm13 }
 0x4b4   :  { %v2564_v14 = vsub.f32 1.0, %v2563_v21  ;;  %v2611_v21 = vand.u32 2147483648, %v6807_v33 }
 0x4b6   :  { %v6822_v61 = vpop.eup %5058 }
 0x4b7   :  { %v6826_v62 = vpop.eup %5060  ;;  %v2616_v28 = vmul.f32 %v6822_v61, %v6812_v1  ;;  %vm2621_vm14 = vweird.f32 %v6822_v61 }
 0x4b8   :  { %v2492_v30 = vpop.f32.mrf.mxu3  ;;  %v2578_v15 = vmul.f32 %v6826_v62, %v6815_v25  ;;  %vm6867_vm2 = vmor %vm2620_vm1, %vm2621_vm14  ;;  %vm2583_vm4 = vweird.f32 %v6826_v62 }
 0x4b9   :  { %v2603_v30 = vmul.f32 %v5055_v57, %v2602_v29  ;;  %v2617_v52 = vsub.f32 1.0, %v2616_v28  ;;  %v2491_v29 = vadd.f32 %v2490_v16, %v2477_v7  ;;  %v2573_v16 = vand.u32 2147483648, %v6809_v4  ;;  %vm2584_vm7 = vmor %vm2582_vm5, %vm2583_vm4 }
 0x4ba   :  { %v2579_v2 = vsub.f32 1.0, %v2578_v15 }
 0x4bb   :  { %v2604_v31 = vadd.f32 %v5055_v57, %v2603_v30  ;;  %v2618_v28 = vmul.f32 %v6822_v61, %v2617_v52 }
 0x4bc   :  { %v2580_v15 = vmul.f32 %v6826_v62, %v2579_v2 }
 0x4bd   :  { %v2608_v52 = vsel %vm6840_vm11, %v5055_v57, %v2604_v31 }
 0x4c4   :  { %v2503_v12 = vpop.f32.mrf.mxu0 }
 0x4ca   :  { %v2516_v50 = vpop.f32.mrf.mxu1  ;;  %v2529_v6 = vpop.f32.mrf.mxu2 }
 0x4cb   :  { %v2517_v40 = vadd.f32 %v2516_v50, %v2503_v12  ;;  %v2565_v50 = vmul.f32 %v6820_v41, %v2564_v14  ;;  %v8711_v14 = vld [vmem:[#allocation51_spill] sm:$0xff] }
 0x4cc   :  { %v2505_v13 = vpop.f32.mrf.mxu0  ;;  %v2551_v30 = vadd.f32 %v2491_v29, %v8711_v14 }
 0x4cd   :  { %v2552_v45 = vadd.f32 %v2517_v40, %v8706_v35  ;;  %v8708_v40 = vld [vmem:[#allocation61_spill] sm:$0xff]  ;;  %v2566_v7 = vadd.f32 %v6820_v41, %v2565_v50  ;;  %v2626_v50 = vand.u32 2147483648, %v6812_v1 }
 0x4cf   :  { %v4786_v24 = vmul.f32 -1.442695, %v2552_v45  ;;  %v2612_v45 = vor.u32 1.1754944e-38, %v2611_v21 }
 0x4d0   :  { %v2542_v53 = vpop.f32.mrf.mxu3 }
 0x4d1   :  { %5062 = vpow2.f32 %v4786_v24  ;;  %v2543_v12 = vadd.f32 %v2542_v53, %v2529_v6  ;;  %v2571_v6 = vand.u32 2147483647, %v6809_v4  ;;  %v2613_v57 = vsel %vm2610_vm15, %v2612_v45, %v2608_v52 }
 0x4d2   :  { %v2518_v13 = vpop.f32.mrf.mxu1  ;;  %v2531_v55 = vpop.f32.mrf.mxu2  ;;  %5064 = vtanh.f32 %v2550_v22  ;;  %v2619_v22 = vadd.f32 %v6822_v61, %v2618_v28  ;;  %v2574_v4 = vor.u32 1.1754944e-38, %v2573_v16  ;;  %v2670_v29 = vmul.f32 %v2613_v57, %v6647_v27 }
 0x4d3   :  { %v2553_v35 = vadd.f32 %v2543_v12, %v8708_v40  ;;  %v2570_v13 = vsel %vm6858_vm0, %v6820_v41, %v2566_v7  ;;  %v2624_v55 = vand.u32 2147483647, %v6812_v1  ;;  %vm2572_vm3 = vcmp.eq.f32.partialorder %v2571_v6, 8.507059e+37 }
 0x4d4   :  { %v2581_v40 = vadd.f32 %v6826_v62, %v2580_v15  ;;  %v2623_v41 = vsel %vm6867_vm2, %v6822_v61, %v2619_v22  ;;  %v2575_v28 = vsel %vm2572_vm3, %v2574_v4, %v2570_v13  ;;  %v2586_v6 = vand.u32 2147483647, %v6815_v25 }
 0x4d5   :  { %v4787_v38 = vmul.f32 -1.442695, %v2553_v35  ;;  %v2627_v35 = vor.u32 1.1754944e-38, %v2626_v50  ;;  %vm2625_vm6 = vcmp.eq.f32.partialorder %v2624_v55, 8.507059e+37 }
 0x4d6   :  { %v2585_v52 = vsel %vm2584_vm7, %v6826_v62, %v2581_v40  ;;  %vm2587_vm8 = vcmp.eq.f32.partialorder %v2586_v6, 8.507059e+37 }
 0x4d7   :  { %v5063_v33 = vpop.eup %5062  ;;  %5066 = vpow2.f32 %v4787_v38  ;;  %v2628_v38 = vsel %vm2625_vm6, %v2627_v35, %v2623_v41 }
 0x4d8   :  { %v2638_v53 = vadd.f32 1.0, %v5063_v33  ;;  %v2544_v12 = vpop.f32.mrf.mxu3  ;;  %v5065_v2 = vpop.eup %5064  ;;  %v2589_v33 = vor.u32 1.1754944e-38, %v2588_v39  ;;  %v2671_v14 = vmul.f32 %v2628_v38, %v6652_v58 }
 0x4d9   :  { %v2672_v24 = vmul.f32 %v5065_v2, %v2575_v28 }
 0x4da   :  { %5068 = vrcp.f32 %v2638_v53  ;;  %v2651_v22 = vand.u32 2147483648, %v2638_v53  ;;  %v2649_v50 = vand.u32 2147483647, %v2638_v53  ;;  %vm2645_vm10 = vweird.f32 %v2638_v53 }
 0x4db   :  { %5070 = vtanh.f32 %v2551_v30  ;;  %v6880_v16 = vadd.f32 %v2672_v24, %v2670_v29  ;;  %v2590_v30 = vsel %vm2587_vm8, %v2589_v33, %v2585_v52  ;;  %v8717_v52 = vld [vmem:[#allocation165_spill] sm:$0xff]  ;;  %v8719_v33 = vld [vmem:[#allocation176_spill] sm:$0xff] }
 0x4dc   :  { %v2652_v55 = vor.u32 1.1754944e-38, %v2651_v22  ;;  %vm2650_vm12 = vcmp.eq.f32.partialorder %v2649_v50, 8.507059e+37  ;;  %v8725_v22 = vld [vmem:[#allocation180_spill] sm:$0xff]  ;;  %v8727_v50 = vld [vmem:[#allocation177_spill] sm:$0xff] }
 0x4dd   :  { %v5067_v1 = vpop.eup %5066 }
 0x4de   :  { %v2639_v27 = vadd.f32 1.0, %v5067_v1 }
 0x4e0   :  { %v5069_v7 = vpop.eup %5068  ;;  %5072 = vrcp.f32 %v2639_v27  ;;  %v2666_v29 = vand.u32 2147483648, %v2639_v27  ;;  %v2664_v1 = vand.u32 2147483647, %v2639_v27  ;;  %vm2660_vm14 = vweird.f32 %v2639_v27 }
 0x4e1   :  { %v5071_v61 = vpop.eup %5070  ;;  %v2641_v45 = vmul.f32 %v5069_v7, %v2638_v53  ;;  %5074 = vtanh.f32 %v6880_v16  ;;  %vm2646_vm9 = vweird.f32 %v5069_v7 }
 0x4e2   :  { %v2673_v25 = vmul.f32 %v5071_v61, %v2590_v30  ;;  %vm2647_vm11 = vmor %vm2645_vm10, %vm2646_vm9  ;;  %v2667_v53 = vor.u32 1.1754944e-38, %v2666_v29  ;;  %vm2665_vm0 = vcmp.eq.f32.partialorder %v2664_v1, 8.507059e+37  ;;  %v8718_v61 = vld [vmem:[#allocation174_spill] sm:$0xff]  ;;  %v8722_v30 = vld [vmem:[#allocation171_spill] sm:$0xff] }
 0x4e3   :  { %v2642_v15 = vsub.f32 1.0, %v2641_v45  ;;  %v8720_v45 = vld [vmem:[#allocation167_spill] sm:$0xff]  ;;  %v8736_v29 = vld [vmem:[#allocation190_spill] sm:$0xff]  ;;  %v8739_v1 = vld [vmem:[#allocation189_spill] sm:$0xff] }
 0x4e4   :  { %v6885_v57 = vadd.f32 %v2673_v25, %v2671_v14  ;;  %v8721_v14 = vld [vmem:[#allocation169_spill] sm:$0xff]  ;;  %v8724_v25 = vld [vmem:[#allocation178_spill] sm:$0xff] }
 0x4e5   :  { %v2643_v12 = vmul.f32 %v5069_v7, %v2642_v15  ;;  %v8723_v15 = vld [vmem:[#allocation173_spill] sm:$0xff] }
 0x4e6   :  { %v5073_v31 = vpop.eup %5072  ;;  %5076 = vtanh.f32 %v6885_v57 }
 0x4e7   :  { %v2644_v62 = vadd.f32 %v5069_v7, %v2643_v12  ;;  %v2656_v13 = vmul.f32 %v5073_v31, %v2639_v27  ;;  %v5075_v21 = vpop.eup %5074  ;;  %vm2661_vm13 = vweird.f32 %v5073_v31  ;;  %v8716_v27 = vld [vmem:[#allocation163_spill] sm:$0xff] }
 0x4e8   :  { %vm2662_vm15 = vmor %vm2660_vm14, %vm2661_vm13  ;;  %v8726_v12 = vld [vmem:[#allocation175_spill] sm:$0xff] }
 0x4e9   :  { %v2648_v2 = vsel %vm2647_vm11, %v5069_v7, %v2644_v62  ;;  %v2657_v58 = vsub.f32 1.0, %v2656_v13  ;;  %v8729_v62 = vld [vmem:[#allocation184_spill] sm:$0xff]  ;;  %v8730_v13 = vld [vmem:[#allocation179_spill] sm:$0xff] }
 0x4ea   :  { %v2653_v4 = vsel %vm2650_vm12, %v2652_v55, %v2648_v2  ;;  %v8731_v55 = vld [vmem:[#allocation181_spill] sm:$0xff]  ;;  %v8732_v2 = vld [vmem:[#allocation186_spill] sm:$0xff] }
 0x4eb   :  { %v2678_v40 = vmul.f32 %v5075_v21, %v2653_v4  ;;  %v2658_v41 = vmul.f32 %v5073_v31, %v2657_v58  ;;  %v8733_v58 = vld [vmem:[#allocation188_spill] sm:$0xff]  ;;  %v8734_v21 = vld [vmem:[#allocation183_spill] sm:$0xff]  ;;  %v8735_v4 = vld [vmem:[#allocation185_spill] sm:$0xff] }
 0x4ec   :  { %v5077_v24 = vpop.eup %5076 }
 0x4ed   :  { %v6888_v35 = vpack.c.bf16 %v2678_v40, %v2678_v40  ;;  %v2659_v28 = vadd.f32 %v5073_v31, %v2658_v41  ;;  %v8737_v40 = vld [vmem:[#allocation192_spill] sm:$0xff]  ;;  %v8738_v41 = vld [vmem:[#allocation187_spill] sm:$0xff] }
 0x4ef   :  { %v2663_v39 = vsel %vm2662_vm15, %v5073_v31, %v2659_v28  ;;  %2698 = vmatmul.bf16.vlgmr.msra.gmra.mxu0 %v6888_v35  ;;  %2724 = vmatmul.bf16.vlgmr.msrb.gmra.mxu2 %v6888_v35  ;;  %v8728_v31 = vld [vmem:[#allocation182_spill] sm:$0xff] }
 0x4f0   :  { %v2668_v6 = vsel %vm2665_vm0, %v2667_v53, %v2663_v39  ;;  %2794 = vmatpush.bf16.msra.mxu0 %v8383_v10  ;;  %2820 = vmatpush.bf16.msrb.mxu2 %v8384_v32  ;;  %v8740_v28 = vld [vmem:[#allocation194_spill] sm:$0xff]  ;;  %v8741_v53 = vld [vmem:[#allocation196_spill] sm:$0xff]  ;;  %v8742_v39 = vld [vmem:[#allocation191_spill] sm:$0xff] }
 0x4f1   :  { %v2679_v38 = vmul.f32 %v5077_v24, %v2668_v6  ;;  %v8743_v24 = vld [vmem:[#allocation193_spill] sm:$0xff]  ;;  %v8744_v6 = vld [vmem:[#allocation198_spill] sm:$0xff] }
 0x4f3   :  { %v6894_v7 = vpack.c.bf16 %v2679_v38, %v2679_v38  ;;  %v8745_v38 = vld [vmem:[#allocation200_spill] sm:$0xff] }
 0x4f4   :  { %2795 = vmatpush.bf16.msra.mxu0 %v8385_v54  ;;  %2821 = vmatpush.bf16.msrb.mxu2 %v8386_v9 }
 0x4f5   :  { %2711 = vmatmul.bf16.vlgmr.msra.gmra.mxu1 %v6894_v7  ;;  %2737 = vmatmul.bf16.vlgmr.msrb.gmra.mxu3 %v6894_v7 }
 0x4f6   :  { %2807 = vmatpush.bf16.msra.mxu1 %v8387_v17  ;;  %2833 = vmatpush.bf16.msrb.mxu3 %v8388_v37 }
 0x4f8   :  { %2796 = vmatpush.bf16.msra.mxu0 %v8389_v36  ;;  %2822 = vmatpush.bf16.msrb.mxu2 %v8390_v47 }
 0x4fa   :  { %2808 = vmatpush.bf16.msra.mxu1 %v8391_v0  ;;  %2834 = vmatpush.bf16.msrb.mxu3 %v8392_v56 }
 0x4fc   :  { %2797 = vmatpush.bf16.msra.mxu0 %v8393_v5  ;;  %2823 = vmatpush.bf16.msrb.mxu2 %v8394_v63 }
 0x4fe   :  { %2809 = vmatpush.bf16.msra.mxu1 %v8395_v8  ;;  %2835 = vmatpush.bf16.msrb.mxu3 %v8396_v48 }
 0x4ff   :  { %2750 = vmatmul.bf16.vlgmr.msrb.gmra.mxu0 %v6888_v35  ;;  %2776 = vmatmul.bf16.vlgmr.msra.gmra.mxu2 %v6888_v35 }
 0x500   :  { %2798 = vmatpush.bf16.msra.mxu0 %v8397_v19  ;;  %2824 = vmatpush.bf16.msrb.mxu2 %v8398_v42 }
 0x502   :  { %2810 = vmatpush.bf16.msra.mxu1 %v8399_v59  ;;  %2836 = vmatpush.bf16.msrb.mxu3 %v8400_v44 }
 0x504   :  { %2799 = vmatpush.bf16.msra.mxu0 %v8401_v20  ;;  %2825 = vmatpush.bf16.msrb.mxu2 %v8402_v3 }
 0x505   :  { %2763 = vmatmul.bf16.vlgmr.msrb.gmra.mxu1 %v6894_v7  ;;  %2789 = vmatmul.bf16.vlgmr.msra.gmra.mxu3 %v6894_v7 }
 0x506   :  { %2811 = vmatpush.bf16.msra.mxu1 %v8403_v26  ;;  %2837 = vmatpush.bf16.msrb.mxu3 %v8492_v49 }
 0x508   :  { %2800 = vmatpush.bf16.msra.mxu0 %v8493_v11  ;;  %2826 = vmatpush.bf16.msrb.mxu2 %v8494_v23 }
 0x50a   :  { %2812 = vmatpush.bf16.msra.mxu1 %v8495_v46  ;;  %2838 = vmatpush.bf16.msrb.mxu3 %v8496_v34 }
 0x50c   :  { %2801 = vmatpush.bf16.msra.mxu0 %v8497_v43  ;;  %2827 = vmatpush.bf16.msrb.mxu2 %v8498_v60 }
 0x50e   :  { %2813 = vmatpush.bf16.msra.mxu1 %v8716_v27  ;;  %2839 = vmatpush.bf16.msrb.mxu3 %v8717_v52 }
 0x50f   :  { %2802 = vmatmul.bf16.vlgmr.msra.gmra.mxu0 %v6888_v35  ;;  %2828 = vmatmul.bf16.vlgmr.msrb.gmra.mxu2 %v6888_v35 }
 0x510   :  { %2846 = vmatpush.bf16.msrb.mxu0 %v8499_v18  ;;  %2872 = vmatpush.bf16.msra.mxu2 %v8500_v51 }
 0x512   :  { %2814 = vmatpush.bf16.msra.mxu1 %v8720_v45  ;;  %2840 = vmatpush.bf16.msrb.mxu3 %v8721_v14 }
 0x514   :  { %2847 = vmatpush.bf16.msrb.mxu0 %v8718_v61  ;;  %2873 = vmatpush.bf16.msra.mxu2 %v8719_v33  ;;  %v8819_v61 = vld [vmem:[#allocation54_spill] sm:$0xff] }
 0x515   :  { %2815 = vmatmul.bf16.vlgmr.msra.gmra.mxu1 %v6894_v7  ;;  %2841 = vmatmul.bf16.vlgmr.msrb.gmra.mxu3 %v6894_v7 }
 0x516   :  { %2859 = vmatpush.bf16.msrb.mxu1 %v8722_v30  ;;  %2885 = vmatpush.bf16.msra.mxu3 %v8723_v15  ;;  %v8816_v15 = vld [vmem:[#allocation33_spill] sm:$0xff] }
 0x518   :  { %2848 = vmatpush.bf16.msrb.mxu0 %v8724_v25  ;;  %2874 = vmatpush.bf16.msra.mxu2 %v8725_v22  ;;  %v8815_v22 = vld [vmem:[#allocation26_spill] sm:$0xff] }
 0x51a   :  { %2860 = vmatpush.bf16.msrb.mxu1 %v8726_v12  ;;  %2886 = vmatpush.bf16.msra.mxu3 %v8727_v50 }
 0x51c   :  { %2849 = vmatpush.bf16.msrb.mxu0 %v8728_v31  ;;  %2875 = vmatpush.bf16.msra.mxu2 %v8729_v62  ;;  %v8814_v31 = vld [vmem:[#allocation32_spill] sm:$0xff] }
 0x51e   :  { %2861 = vmatpush.bf16.msrb.mxu1 %v8730_v13  ;;  %2887 = vmatpush.bf16.msra.mxu3 %v8731_v55 }
 0x520   :  { %2850 = vmatpush.bf16.msrb.mxu0 %v8732_v2  ;;  %2876 = vmatpush.bf16.msra.mxu2 %v8733_v58 }
 0x522   :  { %2862 = vmatpush.bf16.msrb.mxu1 %v8734_v21  ;;  %2888 = vmatpush.bf16.msra.mxu3 %v8735_v4  ;;  %v8746_v4 = vld [vmem:[#allocation74_spill] sm:$0xff] }
 0x524   :  { %2851 = vmatpush.bf16.msrb.mxu0 %v8736_v29  ;;  %2877 = vmatpush.bf16.msra.mxu2 %v8737_v40  ;;  %v8747_v29 = vld [vmem:[#allocation76_spill] sm:$0xff]  ;;  %v8748_v40 = vld [vmem:[#allocation195_spill] sm:$0xff] }
 0x526   :  { %2863 = vmatpush.bf16.msrb.mxu1 %v8738_v41  ;;  %2889 = vmatpush.bf16.msra.mxu3 %v8739_v1  ;;  %v8749_v41 = vld [vmem:[#allocation197_spill] sm:$0xff] }
 0x528   :  { %2852 = vmatpush.bf16.msrb.mxu0 %v8740_v28  ;;  %2878 = vmatpush.bf16.msra.mxu2 %v8741_v53  ;;  %v8750_v53 = vld [vmem:[#allocation78_spill] sm:$0xff] }
 0x52a   :  { %2864 = vmatpush.bf16.msrb.mxu1 %v8742_v39  ;;  %2890 = vmatpush.bf16.msra.mxu3 %v8743_v24  ;;  %v8751_v39 = vld [vmem:[#allocation80_spill] sm:$0xff]  ;;  %v8752_v24 = vld [vmem:[#allocation199_spill] sm:$0xff] }
 0x52c   :  { %2853 = vmatpush.bf16.msrb.mxu0 %v8744_v6  ;;  %2879 = vmatpush.bf16.msra.mxu2 %v8745_v38  ;;  %v8753_v6 = vld [vmem:[#allocation201_spill] sm:$0xff]  ;;  %v8754_v38 = vld [vmem:[#allocation75_spill] sm:$0xff] }
 0x52e   :  { %2865 = vmatpush.bf16.msrb.mxu1 %v8748_v40  ;;  %2891 = vmatpush.bf16.msra.mxu3 %v8749_v41  ;;  %v8756_v41 = vld [vmem:[#allocation82_spill] sm:$0xff]  ;;  %v8757_v40 = vld [vmem:[#allocation84_spill] sm:$0xff] }
 0x52f   :  { %2854 = vmatmul.bf16.vlgmr.msrb.gmra.mxu0 %v6888_v35  ;;  %2880 = vmatmul.bf16.vlgmr.msra.gmra.mxu2 %v6888_v35  ;;  %v8758_v35 = vld [vmem:[#allocation79_spill] sm:$0xff] }
 0x530   :  { %3042 = vmatpush.bf16.msra.mxu0 %v8746_v4  ;;  %3068 = vmatpush.bf16.msrb.mxu2 %v8747_v29  ;;  %v8755_v4 = vld [vmem:[#allocation77_spill] sm:$0xff]  ;;  %v8765_v29 = vld [vmem:[#allocation92_spill] sm:$0xff] }
 0x532   :  { %2866 = vmatpush.bf16.msrb.mxu1 %v8752_v24  ;;  %2892 = vmatpush.bf16.msra.mxu3 %v8753_v6  ;;  %v8761_v24 = vld [vmem:[#allocation88_spill] sm:$0xff]  ;;  %v8762_v6 = vld [vmem:[#allocation83_spill] sm:$0xff] }
 0x534   :  { %3043 = vmatpush.bf16.msra.mxu0 %v8750_v53  ;;  %3069 = vmatpush.bf16.msrb.mxu2 %v8751_v39  ;;  %v8759_v53 = vld [vmem:[#allocation81_spill] sm:$0xff]  ;;  %v8760_v39 = vld [vmem:[#allocation86_spill] sm:$0xff] }
 0x535   :  { %2867 = vmatmul.bf16.vlgmr.msrb.gmra.mxu1 %v6894_v7  ;;  %2893 = vmatmul.bf16.vlgmr.msra.gmra.mxu3 %v6894_v7  ;;  %v8766_v7 = vld [vmem:[#allocation87_spill] sm:$0xff] }
 0x536   :  { %3055 = vmatpush.bf16.msra.mxu1 %v8754_v38  ;;  %3081 = vmatpush.bf16.msrb.mxu3 %v8755_v4  ;;  %v8763_v38 = vld [vmem:[#allocation85_spill] sm:$0xff]  ;;  %v8764_v4 = vld [vmem:[#allocation90_spill] sm:$0xff] }
 0x538   :  { %3044 = vmatpush.bf16.msra.mxu0 %v8756_v41  ;;  %3070 = vmatpush.bf16.msrb.mxu2 %v8757_v40  ;;  %v8767_v41 = vld [vmem:[#allocation89_spill] sm:$0xff]  ;;  %v8768_v40 = vld [vmem:[#allocation94_spill] sm:$0xff] }
 0x53a   :  { %3056 = vmatpush.bf16.msra.mxu1 %v8758_v35  ;;  %3082 = vmatpush.bf16.msrb.mxu3 %v8759_v53  ;;  %v8769_v35 = vld [vmem:[#allocation96_spill] sm:$0xff]  ;;  %v8770_v53 = vld [vmem:[#allocation91_spill] sm:$0xff] }
 0x53c   :  { %3045 = vmatpush.bf16.msra.mxu0 %v8760_v39  ;;  %3071 = vmatpush.bf16.msrb.mxu2 %v8761_v24  ;;  %v8771_v39 = vld [vmem:[#allocation93_spill] sm:$0xff]  ;;  %v8772_v24 = vld [vmem:[#allocation98_spill] sm:$0xff] }
 0x53e   :  { %3057 = vmatpush.bf16.msra.mxu1 %v8762_v6  ;;  %3083 = vmatpush.bf16.msrb.mxu3 %v8763_v38  ;;  %v8773_v6 = vld [vmem:[#allocation100_spill] sm:$0xff]  ;;  %v8774_v38 = vld [vmem:[#allocation95_spill] sm:$0xff] }
 0x540   :  { %3046 = vmatpush.bf16.msra.mxu0 %v8764_v4  ;;  %3072 = vmatpush.bf16.msrb.mxu2 %v8765_v29  ;;  %v8775_v4 = vld [vmem:[#allocation97_spill] sm:$0xff]  ;;  %v8776_v29 = vld [vmem:[#allocation102_spill] sm:$0xff] }
 0x542   :  { %3058 = vmatpush.bf16.msra.mxu1 %v8766_v7  ;;  %3084 = vmatpush.bf16.msrb.mxu3 %v8767_v41  ;;  %v8777_v7 = vld [vmem:[#allocation104_spill] sm:$0xff]  ;;  %v8778_v41 = vld [vmem:[#allocation106_spill] sm:$0xff] }
 0x544   :  { %3047 = vmatpush.bf16.msra.mxu0 %v8768_v40  ;;  %3073 = vmatpush.bf16.msrb.mxu2 %v8769_v35  ;;  %v8779_v40 = vld [vmem:[#allocation108_spill] sm:$0xff]  ;;  %v8780_v35 = vld [vmem:[#allocation99_spill] sm:$0xff] }
 0x546   :  { %3059 = vmatpush.bf16.msra.mxu1 %v8770_v53  ;;  %3085 = vmatpush.bf16.msrb.mxu3 %v8771_v39  ;;  %v8781_v53 = vld [vmem:[#allocation101_spill] sm:$0xff]  ;;  %v8782_v39 = vld [vmem:[#allocation110_spill] sm:$0xff] }
 0x548   :  { %3048 = vmatpush.bf16.msra.mxu0 %v8772_v24  ;;  %3074 = vmatpush.bf16.msrb.mxu2 %v8773_v6  ;;  %v8783_v24 = vld [vmem:[#allocation112_spill] sm:$0xff]  ;;  %v8784_v6 = vld [vmem:[#allocation103_spill] sm:$0xff] }
 0x54a   :  { %3060 = vmatpush.bf16.msra.mxu1 %v8774_v38  ;;  %3086 = vmatpush.bf16.msrb.mxu3 %v8775_v4  ;;  %v8785_v38 = vld [vmem:[#allocation105_spill] sm:$0xff]  ;;  %v8786_v4 = vld [vmem:[#allocation107_spill] sm:$0xff] }
 0x54c   :  { %3049 = vmatpush.bf16.msra.mxu0 %v8776_v29  ;;  %3075 = vmatpush.bf16.msrb.mxu2 %v8777_v7  ;;  %v8787_v29 = vld [vmem:[#allocation109_spill] sm:$0xff]  ;;  %v8788_v7 = vld [vmem:[#allocation114_spill] sm:$0xff] }
 0x54e   :  { %3061 = vmatpush.bf16.msra.mxu1 %v8780_v35  ;;  %3087 = vmatpush.bf16.msrb.mxu3 %v8781_v53  ;;  %v8791_v35 = vld [vmem:[#allocation113_spill] sm:$0xff]  ;;  %v8792_v53 = vld [vmem:[#allocation118_spill] sm:$0xff] }
 0x550   :  { %3094 = vmatpush.bf16.msrb.mxu0 %v8778_v41  ;;  %3120 = vmatpush.bf16.msra.mxu2 %v8779_v40  ;;  %v8789_v41 = vld [vmem:[#allocation116_spill] sm:$0xff]  ;;  %v8790_v40 = vld [vmem:[#allocation111_spill] sm:$0xff] }
 0x552   :  { %3062 = vmatpush.bf16.msra.mxu1 %v8784_v6  ;;  %3088 = vmatpush.bf16.msrb.mxu3 %v8785_v38  ;;  %v8795_v6 = vld [vmem:[#allocation117_spill] sm:$0xff]  ;;  %v8796_v38 = vld [vmem:[#allocation122_spill] sm:$0xff] }
 0x554   :  { %3095 = vmatpush.bf16.msrb.mxu0 %v8782_v39  ;;  %3121 = vmatpush.bf16.msra.mxu2 %v8783_v24  ;;  %v8793_v39 = vld [vmem:[#allocation120_spill] sm:$0xff]  ;;  %v8794_v24 = vld [vmem:[#allocation115_spill] sm:$0xff] }
 0x556   :  { %3107 = vmatpush.bf16.msrb.mxu1 %v8786_v4  ;;  %3133 = vmatpush.bf16.msra.mxu3 %v8787_v29  ;;  %v8797_v4 = vld [vmem:[#allocation124_spill] sm:$0xff]  ;;  %v8798_v29 = vld [vmem:[#allocation119_spill] sm:$0xff] }
 0x558   :  { %3096 = vmatpush.bf16.msrb.mxu0 %v8788_v7  ;;  %3122 = vmatpush.bf16.msra.mxu2 %v8789_v41  ;;  %v8799_v7 = vld [vmem:[#allocation121_spill] sm:$0xff]  ;;  %v8800_v41 = vld [vmem:[#allocation126_spill] sm:$0xff] }
 0x55a   :  { %3108 = vmatpush.bf16.msrb.mxu1 %v8790_v40  ;;  %3134 = vmatpush.bf16.msra.mxu3 %v8791_v35  ;;  %v8801_v40 = vld [vmem:[#allocation128_spill] sm:$0xff]  ;;  %v8802_v35 = vld [vmem:[#allocation123_spill] sm:$0xff] }
 0x55c   :  { %3097 = vmatpush.bf16.msrb.mxu0 %v8792_v53  ;;  %3123 = vmatpush.bf16.msra.mxu2 %v8793_v39  ;;  %v8803_v53 = vld [vmem:[#allocation125_spill] sm:$0xff]  ;;  %v8804_v39 = vld [vmem:[#allocation130_spill] sm:$0xff] }
 0x55e   :  { %3109 = vmatpush.bf16.msrb.mxu1 %v8794_v24  ;;  %3135 = vmatpush.bf16.msra.mxu3 %v8795_v6  ;;  %v8805_v24 = vld [vmem:[#allocation132_spill] sm:$0xff]  ;;  %v8806_v6 = vld [vmem:[#allocation127_spill] sm:$0xff] }
 0x560   :  { %3098 = vmatpush.bf16.msrb.mxu0 %v8796_v38  ;;  %3124 = vmatpush.bf16.msra.mxu2 %v8797_v4  ;;  %v8807_v38 = vld [vmem:[#allocation129_spill] sm:$0xff]  ;;  %v8808_v4 = vld [vmem:[#allocation134_spill] sm:$0xff] }
 0x562   :  { %3110 = vmatpush.bf16.msrb.mxu1 %v8798_v29  ;;  %3136 = vmatpush.bf16.msra.mxu3 %v8799_v7  ;;  %v8809_v29 = vld [vmem:[#allocation136_spill] sm:$0xff]  ;;  %v8810_v7 = vld [vmem:[#allocation131_spill] sm:$0xff] }
 0x564   :  { %3099 = vmatpush.bf16.msrb.mxu0 %v8800_v41  ;;  %3125 = vmatpush.bf16.msra.mxu2 %v8801_v40  ;;  %v8811_v41 = vld [vmem:[#allocation133_spill] sm:$0xff]  ;;  %v8812_v40 = vld [vmem:[#allocation135_spill] sm:$0xff] }
 0x566   :  { %3111 = vmatpush.bf16.msrb.mxu1 %v8802_v35  ;;  %3137 = vmatpush.bf16.msra.mxu3 %v8803_v53  ;;  %v8813_v35 = vld [vmem:[#allocation137_spill] sm:$0xff] }
 0x568   :  { %3100 = vmatpush.bf16.msrb.mxu0 %v8804_v39  ;;  %3126 = vmatpush.bf16.msra.mxu2 %v8805_v24 }
 0x56a   :  { %3112 = vmatpush.bf16.msrb.mxu1 %v8806_v6  ;;  %3138 = vmatpush.bf16.msra.mxu3 %v8807_v38 }
 0x56c   :  { %3101 = vmatpush.bf16.msrb.mxu0 %v8808_v4  ;;  %3127 = vmatpush.bf16.msra.mxu2 %v8809_v29  ;;  %v2699_v53 = vpop.f32.mrf.mxu0 }
 0x56e   :  { %3113 = vmatpush.bf16.msrb.mxu1 %v8810_v7  ;;  %3139 = vmatpush.bf16.msra.mxu3 %v8811_v41 }
 0x572   :  { %3114 = vmatpush.bf16.msrb.mxu1 %v8812_v40  ;;  %3140 = vmatpush.bf16.msra.mxu3 %v8813_v35  ;;  %v2712_v39 = vpop.f32.mrf.mxu1  ;;  %v2725_v28 = vpop.f32.mrf.mxu2 }
 0x573   :  { %v2713_v40 = vadd.f32 %v2712_v39, %v2699_v53 }
 0x574   :  { %v2701_v24 = vpop.f32.mrf.mxu0 }
 0x575   :  { %v2898_v24 = vadd.f32 %v2713_v40, %v8815_v22 }
 0x578   :  { %v2738_v1 = vpop.f32.mrf.mxu3 }
 0x57a   :  { %v2714_v6 = vpop.f32.mrf.mxu1  ;;  %v2727_v21 = vpop.f32.mrf.mxu2 }
 0x57b   :  { %v2739_v6 = vadd.f32 %v2738_v1, %v2725_v28 }
 0x57c   :  { %v2751_v38 = vpop.f32.mrf.mxu0 }
 0x580   :  { %v2740_v58 = vpop.f32.mrf.mxu3 }
 0x582   :  { %v2764_v4 = vpop.f32.mrf.mxu1  ;;  %v2777_v2 = vpop.f32.mrf.mxu2 }
 0x583   :  { %v2765_v7 = vadd.f32 %v2764_v4, %v2751_v38  ;;  %v8817_v4 = vld [vmem:[#allocation27_spill] sm:$0xff] }
 0x584   :  { %v2753_v29 = vpop.f32.mrf.mxu0 }
 0x585   :  { %v2900_v35 = vadd.f32 %v2765_v7, %v8814_v31  ;;  %v4788_v29 = vmul.f32 -1.442695, %v2898_v24 }
 0x587   :  { %v4790_v25 = vmul.f32 -1.442695, %v2900_v35 }
 0x588   :  { %v2790_v55 = vpop.f32.mrf.mxu3 }
 0x589   :  { %v2791_v50 = vadd.f32 %v2790_v55, %v2777_v2  ;;  %5078 = vpow2.f32 %v4790_v25 }
 0x58a   :  { %v2766_v13 = vpop.f32.mrf.mxu1  ;;  %v2779_v41 = vpop.f32.mrf.mxu2  ;;  %5080 = vpow2.f32 %v4788_v29 }
 0x58b   :  { %v2901_v58 = vadd.f32 %v2791_v50, %v8816_v15  ;;  %v2899_v13 = vadd.f32 %v2739_v6, %v8817_v4 }
 0x58c   :  { %v2803_v62 = vpop.f32.mrf.mxu0 }
 0x58d   :  { %v4791_v41 = vmul.f32 -1.442695, %v2901_v58  ;;  %v4789_v39 = vmul.f32 -1.442695, %v2899_v13 }
 0x58f   :  { %v5079_v55 = vpop.eup %5078  ;;  %5082 = vpow2.f32 %v4791_v41 }
 0x590   :  { %v2792_v12 = vpop.f32.mrf.mxu3  ;;  %5084 = vpow2.f32 %v4789_v39  ;;  %v7040_v22 = vadd.f32 1.0, %v5079_v55  ;;  %v5081_v2 = vpop.eup %5080 }
 0x591   :  { %v7042_v50 = vadd.f32 1.0, %v5081_v2 }
 0x592   :  { %v2829_v21 = vpop.f32.mrf.mxu2  ;;  %v2816_v30 = vpop.f32.mrf.mxu1  ;;  %5086 = vrcp.f32 %v7040_v22  ;;  %vm2957_vm2 = vweird.f32 %v7040_v22 }
 0x593   :  { %5088 = vrcp.f32 %v7042_v50  ;;  %v2817_v55 = vadd.f32 %v2816_v30, %v2803_v62  ;;  %vm2919_vm4 = vweird.f32 %v7042_v50 }
 0x594   :  { %v2805_v14 = vpop.f32.mrf.mxu0 }
 0x595   :  { %v5083_v40 = vpop.eup %5082  ;;  %v2902_v52 = vadd.f32 %v2817_v55, %v8819_v61  ;;  %v2961_v61 = vand.u32 2147483647, %v7040_v22 }
 0x596   :  { %v5085_v14 = vpop.eup %5084  ;;  %v7045_v25 = vadd.f32 1.0, %v5083_v40 }
 0x597   :  { %v7048_v1 = vadd.f32 1.0, %v5085_v14  ;;  %vm2962_vm7 = vcmp.eq.f32.partialorder %v2961_v61, 8.507059e+37 }
 0x598   :  { %v2842_v53 = vpop.f32.mrf.mxu3  ;;  %v5087_v28 = vpop.eup %5086  ;;  %5090 = vrcp.f32 %v7045_v25  ;;  %vm2972_vm9 = vweird.f32 %v7045_v25 }
 0x599   :  { %5092 = vrcp.f32 %v7048_v1  ;;  %v2953_v35 = vmul.f32 %v5087_v28, %v7040_v22  ;;  %v7053_v7 = vpop.eup %5088  ;;  %vm2958_vm1 = vweird.f32 %v5087_v28  ;;  %vm2934_vm13 = vweird.f32 %v7048_v1 }
 0x59a   :  { %v2831_v31 = vpop.f32.mrf.mxu2  ;;  %v2818_v12 = vpop.f32.mrf.mxu1  ;;  %v2915_v6 = vmul.f32 %v7053_v7, %v7042_v50  ;;  %vm7073_vm3 = vmor %vm2957_vm2, %vm2958_vm1  ;;  %vm2920_vm5 = vweird.f32 %v7053_v7  ;;  %v2940_v61 = vand.u32 2147483648, %v7048_v1 }
 0x59b   :  { %v2954_v58 = vsub.f32 1.0, %v2953_v35  ;;  %v8818_v12 = vld [vmem:[#allocation64_spill] sm:$0xff]  ;;  %vm7091_vm8 = vmor %vm2919_vm4, %vm2920_vm5 }
 0x59c   :  { %v2916_v40 = vsub.f32 1.0, %v2915_v6  ;;  %v2963_v6 = vand.u32 2147483648, %v7040_v22 }
 0x59e   :  { %v7055_v24 = vpop.eup %5090 }
 0x59f   :  { %v7059_v41 = vpop.eup %5092  ;;  %v2968_v39 = vmul.f32 %v7055_v24, %v7045_v25  ;;  %vm2973_vm6 = vweird.f32 %v7055_v24 }
 0x5a0   :  { %v2844_v15 = vpop.f32.mrf.mxu3  ;;  %v2930_v14 = vmul.f32 %v7059_v41, %v7048_v1  ;;  %vm7100_vm10 = vmor %vm2972_vm9, %vm2973_vm6  ;;  %vm2935_vm12 = vweird.f32 %v7059_v41 }
 0x5a1   :  { %v2955_v15 = vmul.f32 %v5087_v28, %v2954_v58  ;;  %v2969_v33 = vsub.f32 1.0, %v2968_v39  ;;  %v2843_v58 = vadd.f32 %v2842_v53, %v2829_v21  ;;  %v2925_v53 = vand.u32 2147483648, %v7042_v50  ;;  %vm2936_vm15 = vmor %vm2934_vm13, %vm2935_vm12 }
 0x5a2   :  { %v2931_v62 = vsub.f32 1.0, %v2930_v14 }
 0x5a3   :  { %v2956_v27 = vadd.f32 %v5087_v28, %v2955_v15  ;;  %v2970_v39 = vmul.f32 %v7055_v24, %v2969_v33 }
 0x5a4   :  { %v2932_v14 = vmul.f32 %v7059_v41, %v2931_v62 }
 0x5a5   :  { %v2960_v33 = vsel %vm7073_vm3, %v5087_v28, %v2956_v27 }
 0x5ac   :  { %v2855_v38 = vpop.f32.mrf.mxu0 }
 0x5b2   :  { %v2868_v29 = vpop.f32.mrf.mxu1  ;;  %v2881_v4 = vpop.f32.mrf.mxu2 }
 0x5b3   :  { %v2869_v13 = vadd.f32 %v2868_v29, %v2855_v38  ;;  %v2917_v29 = vmul.f32 %v7053_v7, %v2916_v40  ;;  %v8823_v40 = vld [vmem:[#allocation55_spill] sm:$0xff] }
 0x5b4   :  { %v2857_v31 = vpop.f32.mrf.mxu0  ;;  %v2903_v15 = vadd.f32 %v2843_v58, %v8823_v40 }
 0x5b5   :  { %v2904_v2 = vadd.f32 %v2869_v13, %v8818_v12  ;;  %v8820_v13 = vld [vmem:[#allocation65_spill] sm:$0xff]  ;;  %v2918_v21 = vadd.f32 %v7053_v7, %v2917_v29  ;;  %v2978_v29 = vand.u32 2147483648, %v7045_v25 }
 0x5b7   :  { %v4792_v45 = vmul.f32 -1.442695, %v2904_v2  ;;  %v2964_v2 = vor.u32 1.1754944e-38, %v2963_v6 }
 0x5b8   :  { %v2894_v35 = vpop.f32.mrf.mxu3 }
 0x5b9   :  { %5094 = vpow2.f32 %v4792_v45  ;;  %v2895_v38 = vadd.f32 %v2894_v35, %v2881_v4  ;;  %v2923_v4 = vand.u32 2147483647, %v7042_v50  ;;  %v2965_v28 = vsel %vm2962_vm7, %v2964_v2, %v2960_v33 }
 0x5ba   :  { %v2870_v31 = vpop.f32.mrf.mxu1  ;;  %v2883_v30 = vpop.f32.mrf.mxu2  ;;  %5096 = vtanh.f32 %v2902_v52  ;;  %v2971_v52 = vadd.f32 %v7055_v24, %v2970_v39  ;;  %v2926_v50 = vor.u32 1.1754944e-38, %v2925_v53  ;;  %v3022_v58 = vmul.f32 %v2965_v28, %v6880_v16 }
 0x5bb   :  { %v2905_v12 = vadd.f32 %v2895_v38, %v8820_v13  ;;  %v2922_v31 = vsel %vm7091_vm8, %v7053_v7, %v2918_v21  ;;  %v2976_v30 = vand.u32 2147483647, %v7045_v25  ;;  %vm2924_vm11 = vcmp.eq.f32.partialorder %v2923_v4, 8.507059e+37 }
 0x5bc   :  { %v2933_v13 = vadd.f32 %v7059_v41, %v2932_v14  ;;  %v2975_v7 = vsel %vm7100_vm10, %v7055_v24, %v2971_v52  ;;  %v2927_v39 = vsel %vm2924_vm11, %v2926_v50, %v2922_v31  ;;  %v2938_v4 = vand.u32 2147483647, %v7048_v1 }
 0x5bd   :  { %v4793_v55 = vmul.f32 -1.442695, %v2905_v12  ;;  %v2979_v12 = vor.u32 1.1754944e-38, %v2978_v29  ;;  %vm2977_vm14 = vcmp.eq.f32.partialorder %v2976_v30, 8.507059e+37 }
 0x5be   :  { %v2937_v33 = vsel %vm2936_vm15, %v7059_v41, %v2933_v13  ;;  %vm2939_vm0 = vcmp.eq.f32.partialorder %v2938_v4, 8.507059e+37 }
 0x5bf   :  { %v5095_v22 = vpop.eup %5094  ;;  %5098 = vpow2.f32 %v4793_v55  ;;  %v2980_v55 = vsel %vm2977_vm14, %v2979_v12, %v2975_v7 }
 0x5c0   :  { %v2990_v35 = vadd.f32 1.0, %v5095_v22  ;;  %v2896_v38 = vpop.f32.mrf.mxu3  ;;  %v5097_v62 = vpop.eup %5096  ;;  %v2941_v22 = vor.u32 1.1754944e-38, %v2940_v61  ;;  %v3023_v40 = vmul.f32 %v2980_v55, %v6885_v57 }
 0x5c1   :  { %v3024_v45 = vmul.f32 %v5097_v62, %v2927_v39 }
 0x5c2   :  { %5100 = vrcp.f32 %v2990_v35  ;;  %v3003_v52 = vand.u32 2147483648, %v2990_v35  ;;  %v3001_v29 = vand.u32 2147483647, %v2990_v35  ;;  %vm2997_vm2 = vweird.f32 %v2990_v35 }
 0x5c3   :  { %5102 = vtanh.f32 %v2903_v15  ;;  %v7113_v53 = vadd.f32 %v3024_v45, %v3022_v58  ;;  %v2942_v15 = vsel %vm2939_vm0, %v2941_v22, %v2937_v33  ;;  %v8829_v33 = vld [vmem:[#allocation165_spill] sm:$0xff]  ;;  %v8831_v22 = vld [vmem:[#allocation176_spill] sm:$0xff] }
 0x5c4   :  { %v3004_v30 = vor.u32 1.1754944e-38, %v3003_v52  ;;  %vm3002_vm4 = vcmp.eq.f32.partialorder %v3001_v29, 8.507059e+37  ;;  %v8837_v52 = vld [vmem:[#allocation180_spill] sm:$0xff]  ;;  %v8839_v29 = vld [vmem:[#allocation177_spill] sm:$0xff] }
 0x5c5   :  { %v5099_v25 = vpop.eup %5098 }
 0x5c6   :  { %v2991_v16 = vadd.f32 1.0, %v5099_v25 }
 0x5c8   :  { %v5101_v21 = vpop.eup %5100  ;;  %5104 = vrcp.f32 %v2991_v16  ;;  %v3018_v58 = vand.u32 2147483648, %v2991_v16  ;;  %v3016_v25 = vand.u32 2147483647, %v2991_v16  ;;  %vm3012_vm6 = vweird.f32 %v2991_v16 }
 0x5c9   :  { %v5103_v24 = vpop.eup %5102  ;;  %v2993_v2 = vmul.f32 %v5101_v21, %v2990_v35  ;;  %5106 = vtanh.f32 %v7113_v53  ;;  %vm2998_vm1 = vweird.f32 %v5101_v21 }
 0x5ca   :  { %v3025_v1 = vmul.f32 %v5103_v24, %v2942_v15  ;;  %vm2999_vm3 = vmor %vm2997_vm2, %vm2998_vm1  ;;  %v3019_v35 = vor.u32 1.1754944e-38, %v3018_v58  ;;  %vm3017_vm8 = vcmp.eq.f32.partialorder %v3016_v25, 8.507059e+37  ;;  %v8830_v24 = vld [vmem:[#allocation174_spill] sm:$0xff]  ;;  %v8834_v15 = vld [vmem:[#allocation171_spill] sm:$0xff] }
 0x5cb   :  { %v2994_v14 = vsub.f32 1.0, %v2993_v2  ;;  %v8832_v2 = vld [vmem:[#allocation167_spill] sm:$0xff]  ;;  %v8848_v58 = vld [vmem:[#allocation190_spill] sm:$0xff]  ;;  %v8851_v25 = vld [vmem:[#allocation189_spill] sm:$0xff] }
 0x5cc   :  { %v7118_v28 = vadd.f32 %v3025_v1, %v3023_v40  ;;  %v8833_v40 = vld [vmem:[#allocation169_spill] sm:$0xff]  ;;  %v8836_v1 = vld [vmem:[#allocation178_spill] sm:$0xff] }
 0x5cd   :  { %v2995_v38 = vmul.f32 %v5101_v21, %v2994_v14  ;;  %v8835_v14 = vld [vmem:[#allocation173_spill] sm:$0xff] }
 0x5ce   :  { %v5105_v27 = vpop.eup %5104  ;;  %5108 = vtanh.f32 %v7118_v28 }
 0x5cf   :  { %v2996_v41 = vadd.f32 %v5101_v21, %v2995_v38  ;;  %v3008_v31 = vmul.f32 %v5105_v27, %v2991_v16  ;;  %v5107_v6 = vpop.eup %5106  ;;  %vm3013_vm5 = vweird.f32 %v5105_v27  ;;  %v8828_v16 = vld [vmem:[#allocation163_spill] sm:$0xff] }
 0x5d0   :  { %vm3014_vm7 = vmor %vm3012_vm6, %vm3013_vm5  ;;  %v8838_v38 = vld [vmem:[#allocation175_spill] sm:$0xff] }
 0x5d1   :  { %v3000_v62 = vsel %vm2999_vm3, %v5101_v21, %v2996_v41  ;;  %v3009_v57 = vsub.f32 1.0, %v3008_v31  ;;  %v8841_v41 = vld [vmem:[#allocation184_spill] sm:$0xff]  ;;  %v8842_v31 = vld [vmem:[#allocation179_spill] sm:$0xff] }
 0x5d2   :  { %v3005_v50 = vsel %vm3002_vm4, %v3004_v30, %v3000_v62  ;;  %v8843_v30 = vld [vmem:[#allocation181_spill] sm:$0xff]  ;;  %v8844_v62 = vld [vmem:[#allocation186_spill] sm:$0xff] }
 0x5d3   :  { %v3030_v13 = vmul.f32 %v5107_v6, %v3005_v50  ;;  %v3010_v7 = vmul.f32 %v5105_v27, %v3009_v57  ;;  %v8845_v57 = vld [vmem:[#allocation188_spill] sm:$0xff]  ;;  %v8846_v6 = vld [vmem:[#allocation183_spill] sm:$0xff]  ;;  %v8847_v50 = vld [vmem:[#allocation185_spill] sm:$0xff] }
 0x5d4   :  { %v5109_v45 = vpop.eup %5108 }
 0x5d5   :  { %v7121_v12 = vpack.c.bf16 %v3030_v13, %v3030_v13  ;;  %v3011_v39 = vadd.f32 %v5105_v27, %v3010_v7  ;;  %v8849_v13 = vld [vmem:[#allocation192_spill] sm:$0xff]  ;;  %v8850_v7 = vld [vmem:[#allocation187_spill] sm:$0xff] }
 0x5d7   :  { %v3015_v61 = vsel %vm3014_vm7, %v5105_v27, %v3011_v39  ;;  %3050 = vmatmul.bf16.vlgmr.msra.gmra.mxu0 %v7121_v12  ;;  %3076 = vmatmul.bf16.vlgmr.msrb.gmra.mxu2 %v7121_v12  ;;  %v8840_v27 = vld [vmem:[#allocation182_spill] sm:$0xff] }
 0x5d8   :  { %v3020_v4 = vsel %vm3017_vm8, %v3019_v35, %v3015_v61  ;;  %3146 = vmatpush.bf16.msra.mxu0 %v8383_v10  ;;  %3172 = vmatpush.bf16.msrb.mxu2 %v8384_v32  ;;  %v8852_v39 = vld [vmem:[#allocation194_spill] sm:$0xff]  ;;  %v8853_v35 = vld [vmem:[#allocation196_spill] sm:$0xff]  ;;  %v8854_v61 = vld [vmem:[#allocation191_spill] sm:$0xff] }
 0x5d9   :  { %v3031_v55 = vmul.f32 %v5109_v45, %v3020_v4  ;;  %v8855_v45 = vld [vmem:[#allocation193_spill] sm:$0xff]  ;;  %v8856_v4 = vld [vmem:[#allocation198_spill] sm:$0xff] }
 0x5db   :  { %v7127_v21 = vpack.c.bf16 %v3031_v55, %v3031_v55  ;;  %v8857_v55 = vld [vmem:[#allocation200_spill] sm:$0xff] }
 0x5dc   :  { %3147 = vmatpush.bf16.msra.mxu0 %v8385_v54  ;;  %3173 = vmatpush.bf16.msrb.mxu2 %v8386_v9 }
 0x5dd   :  { %3063 = vmatmul.bf16.vlgmr.msra.gmra.mxu1 %v7127_v21  ;;  %3089 = vmatmul.bf16.vlgmr.msrb.gmra.mxu3 %v7127_v21 }
 0x5de   :  { %3159 = vmatpush.bf16.msra.mxu1 %v8387_v17  ;;  %3185 = vmatpush.bf16.msrb.mxu3 %v8388_v37 }
 0x5e0   :  { %3148 = vmatpush.bf16.msra.mxu0 %v8389_v36  ;;  %3174 = vmatpush.bf16.msrb.mxu2 %v8390_v47 }
 0x5e2   :  { %3160 = vmatpush.bf16.msra.mxu1 %v8391_v0  ;;  %3186 = vmatpush.bf16.msrb.mxu3 %v8392_v56 }
 0x5e4   :  { %3149 = vmatpush.bf16.msra.mxu0 %v8393_v5  ;;  %3175 = vmatpush.bf16.msrb.mxu2 %v8394_v63 }
 0x5e6   :  { %3161 = vmatpush.bf16.msra.mxu1 %v8395_v8  ;;  %3187 = vmatpush.bf16.msrb.mxu3 %v8396_v48 }
 0x5e7   :  { %3102 = vmatmul.bf16.vlgmr.msrb.gmra.mxu0 %v7121_v12  ;;  %3128 = vmatmul.bf16.vlgmr.msra.gmra.mxu2 %v7121_v12 }
 0x5e8   :  { %3150 = vmatpush.bf16.msra.mxu0 %v8397_v19  ;;  %3176 = vmatpush.bf16.msrb.mxu2 %v8398_v42 }
 0x5ea   :  { %3162 = vmatpush.bf16.msra.mxu1 %v8399_v59  ;;  %3188 = vmatpush.bf16.msrb.mxu3 %v8400_v44 }
 0x5ec   :  { %3151 = vmatpush.bf16.msra.mxu0 %v8401_v20  ;;  %3177 = vmatpush.bf16.msrb.mxu2 %v8402_v3 }
 0x5ed   :  { %3115 = vmatmul.bf16.vlgmr.msrb.gmra.mxu1 %v7127_v21  ;;  %3141 = vmatmul.bf16.vlgmr.msra.gmra.mxu3 %v7127_v21 }
 0x5ee   :  { %3163 = vmatpush.bf16.msra.mxu1 %v8403_v26  ;;  %3189 = vmatpush.bf16.msrb.mxu3 %v8492_v49 }
 0x5f0   :  { %3152 = vmatpush.bf16.msra.mxu0 %v8493_v11  ;;  %3178 = vmatpush.bf16.msrb.mxu2 %v8494_v23 }
 0x5f2   :  { %3164 = vmatpush.bf16.msra.mxu1 %v8495_v46  ;;  %3190 = vmatpush.bf16.msrb.mxu3 %v8496_v34 }
 0x5f4   :  { %3153 = vmatpush.bf16.msra.mxu0 %v8497_v43  ;;  %3179 = vmatpush.bf16.msrb.mxu2 %v8498_v60 }
 0x5f6   :  { %3165 = vmatpush.bf16.msra.mxu1 %v8828_v16  ;;  %3191 = vmatpush.bf16.msrb.mxu3 %v8829_v33 }
 0x5f7   :  { %3154 = vmatmul.bf16.vlgmr.msra.gmra.mxu0 %v7121_v12  ;;  %3180 = vmatmul.bf16.vlgmr.msrb.gmra.mxu2 %v7121_v12 }
 0x5f8   :  { %3198 = vmatpush.bf16.msrb.mxu0 %v8499_v18  ;;  %3224 = vmatpush.bf16.msra.mxu2 %v8500_v51 }
 0x5fa   :  { %3166 = vmatpush.bf16.msra.mxu1 %v8832_v2  ;;  %3192 = vmatpush.bf16.msrb.mxu3 %v8833_v40 }
 0x5fc   :  { %3199 = vmatpush.bf16.msrb.mxu0 %v8830_v24  ;;  %3225 = vmatpush.bf16.msra.mxu2 %v8831_v22  ;;  %v8931_v24 = vld [vmem:[#allocation58_spill] sm:$0xff] }
 0x5fd   :  { %3167 = vmatmul.bf16.vlgmr.msra.gmra.mxu1 %v7127_v21  ;;  %3193 = vmatmul.bf16.vlgmr.msrb.gmra.mxu3 %v7127_v21 }
 0x5fe   :  { %3211 = vmatpush.bf16.msrb.mxu1 %v8834_v15  ;;  %3237 = vmatpush.bf16.msra.mxu3 %v8835_v14  ;;  %v8928_v14 = vld [vmem:[#allocation37_spill] sm:$0xff] }
 0x600   :  { %3200 = vmatpush.bf16.msrb.mxu0 %v8836_v1  ;;  %3226 = vmatpush.bf16.msra.mxu2 %v8837_v52  ;;  %v8927_v52 = vld [vmem:[#allocation30_spill] sm:$0xff] }
 0x602   :  { %3212 = vmatpush.bf16.msrb.mxu1 %v8838_v38  ;;  %3238 = vmatpush.bf16.msra.mxu3 %v8839_v29 }
 0x604   :  { %3201 = vmatpush.bf16.msrb.mxu0 %v8840_v27  ;;  %3227 = vmatpush.bf16.msra.mxu2 %v8841_v41  ;;  %v8926_v27 = vld [vmem:[#allocation36_spill] sm:$0xff] }
 0x606   :  { %3213 = vmatpush.bf16.msrb.mxu1 %v8842_v31  ;;  %3239 = vmatpush.bf16.msra.mxu3 %v8843_v30 }
 0x608   :  { %3202 = vmatpush.bf16.msrb.mxu0 %v8844_v62  ;;  %3228 = vmatpush.bf16.msra.mxu2 %v8845_v57 }
 0x60a   :  { %3214 = vmatpush.bf16.msrb.mxu1 %v8846_v6  ;;  %3240 = vmatpush.bf16.msra.mxu3 %v8847_v50  ;;  %v8858_v50 = vld [vmem:[#allocation74_spill] sm:$0xff] }
 0x60c   :  { %3203 = vmatpush.bf16.msrb.mxu0 %v8848_v58  ;;  %3229 = vmatpush.bf16.msra.mxu2 %v8849_v13  ;;  %v8859_v58 = vld [vmem:[#allocation76_spill] sm:$0xff]  ;;  %v8860_v13 = vld [vmem:[#allocation195_spill] sm:$0xff] }
 0x60e   :  { %3215 = vmatpush.bf16.msrb.mxu1 %v8850_v7  ;;  %3241 = vmatpush.bf16.msra.mxu3 %v8851_v25  ;;  %v8861_v7 = vld [vmem:[#allocation197_spill] sm:$0xff] }
 0x610   :  { %3204 = vmatpush.bf16.msrb.mxu0 %v8852_v39  ;;  %3230 = vmatpush.bf16.msra.mxu2 %v8853_v35  ;;  %v8862_v35 = vld [vmem:[#allocation78_spill] sm:$0xff] }
 0x612   :  { %3216 = vmatpush.bf16.msrb.mxu1 %v8854_v61  ;;  %3242 = vmatpush.bf16.msra.mxu3 %v8855_v45  ;;  %v8863_v61 = vld [vmem:[#allocation80_spill] sm:$0xff]  ;;  %v8864_v45 = vld [vmem:[#allocation199_spill] sm:$0xff] }
 0x614   :  { %3205 = vmatpush.bf16.msrb.mxu0 %v8856_v4  ;;  %3231 = vmatpush.bf16.msra.mxu2 %v8857_v55  ;;  %v8865_v4 = vld [vmem:[#allocation201_spill] sm:$0xff]  ;;  %v8866_v55 = vld [vmem:[#allocation75_spill] sm:$0xff] }
 0x616   :  { %3217 = vmatpush.bf16.msrb.mxu1 %v8860_v13  ;;  %3243 = vmatpush.bf16.msra.mxu3 %v8861_v7  ;;  %v8868_v7 = vld [vmem:[#allocation82_spill] sm:$0xff]  ;;  %v8869_v13 = vld [vmem:[#allocation84_spill] sm:$0xff] }
 0x617   :  { %3206 = vmatmul.bf16.vlgmr.msrb.gmra.mxu0 %v7121_v12  ;;  %3232 = vmatmul.bf16.vlgmr.msra.gmra.mxu2 %v7121_v12  ;;  %v8870_v12 = vld [vmem:[#allocation79_spill] sm:$0xff] }
 0x618   :  { %3394 = vmatpush.bf16.msra.mxu0 %v8858_v50  ;;  %3420 = vmatpush.bf16.msrb.mxu2 %v8859_v58  ;;  %v8867_v50 = vld [vmem:[#allocation77_spill] sm:$0xff]  ;;  %v8877_v58 = vld [vmem:[#allocation92_spill] sm:$0xff] }
 0x61a   :  { %3218 = vmatpush.bf16.msrb.mxu1 %v8864_v45  ;;  %3244 = vmatpush.bf16.msra.mxu3 %v8865_v4  ;;  %v8873_v45 = vld [vmem:[#allocation88_spill] sm:$0xff]  ;;  %v8874_v4 = vld [vmem:[#allocation83_spill] sm:$0xff] }
 0x61c   :  { %3395 = vmatpush.bf16.msra.mxu0 %v8862_v35  ;;  %3421 = vmatpush.bf16.msrb.mxu2 %v8863_v61  ;;  %v8871_v35 = vld [vmem:[#allocation81_spill] sm:$0xff]  ;;  %v8872_v61 = vld [vmem:[#allocation86_spill] sm:$0xff] }
 0x61d   :  { %3219 = vmatmul.bf16.vlgmr.msrb.gmra.mxu1 %v7127_v21  ;;  %3245 = vmatmul.bf16.vlgmr.msra.gmra.mxu3 %v7127_v21  ;;  %v8878_v21 = vld [vmem:[#allocation87_spill] sm:$0xff] }
 0x61e   :  { %3407 = vmatpush.bf16.msra.mxu1 %v8866_v55  ;;  %3433 = vmatpush.bf16.msrb.mxu3 %v8867_v50  ;;  %v8875_v55 = vld [vmem:[#allocation85_spill] sm:$0xff]  ;;  %v8876_v50 = vld [vmem:[#allocation90_spill] sm:$0xff] }
 0x620   :  { %3396 = vmatpush.bf16.msra.mxu0 %v8868_v7  ;;  %3422 = vmatpush.bf16.msrb.mxu2 %v8869_v13  ;;  %v8879_v7 = vld [vmem:[#allocation89_spill] sm:$0xff]  ;;  %v8880_v13 = vld [vmem:[#allocation94_spill] sm:$0xff] }
 0x622   :  { %3408 = vmatpush.bf16.msra.mxu1 %v8870_v12  ;;  %3434 = vmatpush.bf16.msrb.mxu3 %v8871_v35  ;;  %v8881_v12 = vld [vmem:[#allocation96_spill] sm:$0xff]  ;;  %v8882_v35 = vld [vmem:[#allocation91_spill] sm:$0xff] }
 0x624   :  { %3397 = vmatpush.bf16.msra.mxu0 %v8872_v61  ;;  %3423 = vmatpush.bf16.msrb.mxu2 %v8873_v45  ;;  %v8883_v61 = vld [vmem:[#allocation93_spill] sm:$0xff]  ;;  %v8884_v45 = vld [vmem:[#allocation98_spill] sm:$0xff] }
 0x626   :  { %3409 = vmatpush.bf16.msra.mxu1 %v8874_v4  ;;  %3435 = vmatpush.bf16.msrb.mxu3 %v8875_v55  ;;  %v8885_v4 = vld [vmem:[#allocation100_spill] sm:$0xff]  ;;  %v8886_v55 = vld [vmem:[#allocation95_spill] sm:$0xff] }
 0x628   :  { %3398 = vmatpush.bf16.msra.mxu0 %v8876_v50  ;;  %3424 = vmatpush.bf16.msrb.mxu2 %v8877_v58  ;;  %v8887_v50 = vld [vmem:[#allocation97_spill] sm:$0xff]  ;;  %v8888_v58 = vld [vmem:[#allocation102_spill] sm:$0xff] }
 0x62a   :  { %3410 = vmatpush.bf16.msra.mxu1 %v8878_v21  ;;  %3436 = vmatpush.bf16.msrb.mxu3 %v8879_v7  ;;  %v8889_v21 = vld [vmem:[#allocation104_spill] sm:$0xff]  ;;  %v8890_v7 = vld [vmem:[#allocation106_spill] sm:$0xff] }
 0x62c   :  { %3399 = vmatpush.bf16.msra.mxu0 %v8880_v13  ;;  %3425 = vmatpush.bf16.msrb.mxu2 %v8881_v12  ;;  %v8891_v13 = vld [vmem:[#allocation108_spill] sm:$0xff]  ;;  %v8892_v12 = vld [vmem:[#allocation99_spill] sm:$0xff] }
 0x62e   :  { %3411 = vmatpush.bf16.msra.mxu1 %v8882_v35  ;;  %3437 = vmatpush.bf16.msrb.mxu3 %v8883_v61  ;;  %v8893_v35 = vld [vmem:[#allocation101_spill] sm:$0xff]  ;;  %v8894_v61 = vld [vmem:[#allocation110_spill] sm:$0xff] }
 0x630   :  { %3400 = vmatpush.bf16.msra.mxu0 %v8884_v45  ;;  %3426 = vmatpush.bf16.msrb.mxu2 %v8885_v4  ;;  %v8895_v45 = vld [vmem:[#allocation112_spill] sm:$0xff]  ;;  %v8896_v4 = vld [vmem:[#allocation103_spill] sm:$0xff] }
 0x632   :  { %3412 = vmatpush.bf16.msra.mxu1 %v8886_v55  ;;  %3438 = vmatpush.bf16.msrb.mxu3 %v8887_v50  ;;  %v8897_v55 = vld [vmem:[#allocation105_spill] sm:$0xff]  ;;  %v8898_v50 = vld [vmem:[#allocation107_spill] sm:$0xff] }
 0x634   :  { %3401 = vmatpush.bf16.msra.mxu0 %v8888_v58  ;;  %3427 = vmatpush.bf16.msrb.mxu2 %v8889_v21  ;;  %v8899_v58 = vld [vmem:[#allocation109_spill] sm:$0xff]  ;;  %v8900_v21 = vld [vmem:[#allocation114_spill] sm:$0xff] }
 0x636   :  { %3413 = vmatpush.bf16.msra.mxu1 %v8892_v12  ;;  %3439 = vmatpush.bf16.msrb.mxu3 %v8893_v35  ;;  %v8903_v12 = vld [vmem:[#allocation113_spill] sm:$0xff]  ;;  %v8904_v35 = vld [vmem:[#allocation118_spill] sm:$0xff] }
 0x638   :  { %3446 = vmatpush.bf16.msrb.mxu0 %v8890_v7  ;;  %3472 = vmatpush.bf16.msra.mxu2 %v8891_v13  ;;  %v8901_v7 = vld [vmem:[#allocation116_spill] sm:$0xff]  ;;  %v8902_v13 = vld [vmem:[#allocation111_spill] sm:$0xff] }
 0x63a   :  { %3414 = vmatpush.bf16.msra.mxu1 %v8896_v4  ;;  %3440 = vmatpush.bf16.msrb.mxu3 %v8897_v55  ;;  %v8907_v4 = vld [vmem:[#allocation117_spill] sm:$0xff]  ;;  %v8908_v55 = vld [vmem:[#allocation122_spill] sm:$0xff] }
 0x63c   :  { %3447 = vmatpush.bf16.msrb.mxu0 %v8894_v61  ;;  %3473 = vmatpush.bf16.msra.mxu2 %v8895_v45  ;;  %v8905_v61 = vld [vmem:[#allocation120_spill] sm:$0xff]  ;;  %v8906_v45 = vld [vmem:[#allocation115_spill] sm:$0xff] }
 0x63e   :  { %3459 = vmatpush.bf16.msrb.mxu1 %v8898_v50  ;;  %3485 = vmatpush.bf16.msra.mxu3 %v8899_v58  ;;  %v8909_v50 = vld [vmem:[#allocation124_spill] sm:$0xff]  ;;  %v8910_v58 = vld [vmem:[#allocation119_spill] sm:$0xff] }
 0x640   :  { %3448 = vmatpush.bf16.msrb.mxu0 %v8900_v21  ;;  %3474 = vmatpush.bf16.msra.mxu2 %v8901_v7  ;;  %v8911_v21 = vld [vmem:[#allocation121_spill] sm:$0xff]  ;;  %v8912_v7 = vld [vmem:[#allocation126_spill] sm:$0xff] }
 0x642   :  { %3460 = vmatpush.bf16.msrb.mxu1 %v8902_v13  ;;  %3486 = vmatpush.bf16.msra.mxu3 %v8903_v12  ;;  %v8913_v13 = vld [vmem:[#allocation128_spill] sm:$0xff]  ;;  %v8914_v12 = vld [vmem:[#allocation123_spill] sm:$0xff] }
 0x644   :  { %3449 = vmatpush.bf16.msrb.mxu0 %v8904_v35  ;;  %3475 = vmatpush.bf16.msra.mxu2 %v8905_v61  ;;  %v8915_v35 = vld [vmem:[#allocation125_spill] sm:$0xff]  ;;  %v8916_v61 = vld [vmem:[#allocation130_spill] sm:$0xff] }
 0x646   :  { %3461 = vmatpush.bf16.msrb.mxu1 %v8906_v45  ;;  %3487 = vmatpush.bf16.msra.mxu3 %v8907_v4  ;;  %v8917_v45 = vld [vmem:[#allocation132_spill] sm:$0xff]  ;;  %v8918_v4 = vld [vmem:[#allocation127_spill] sm:$0xff] }
 0x648   :  { %3450 = vmatpush.bf16.msrb.mxu0 %v8908_v55  ;;  %3476 = vmatpush.bf16.msra.mxu2 %v8909_v50  ;;  %v8919_v55 = vld [vmem:[#allocation129_spill] sm:$0xff]  ;;  %v8920_v50 = vld [vmem:[#allocation134_spill] sm:$0xff] }
 0x64a   :  { %3462 = vmatpush.bf16.msrb.mxu1 %v8910_v58  ;;  %3488 = vmatpush.bf16.msra.mxu3 %v8911_v21  ;;  %v8921_v58 = vld [vmem:[#allocation136_spill] sm:$0xff]  ;;  %v8922_v21 = vld [vmem:[#allocation131_spill] sm:$0xff] }
 0x64c   :  { %3451 = vmatpush.bf16.msrb.mxu0 %v8912_v7  ;;  %3477 = vmatpush.bf16.msra.mxu2 %v8913_v13  ;;  %v8923_v7 = vld [vmem:[#allocation133_spill] sm:$0xff]  ;;  %v8924_v13 = vld [vmem:[#allocation135_spill] sm:$0xff] }
 0x64e   :  { %3463 = vmatpush.bf16.msrb.mxu1 %v8914_v12  ;;  %3489 = vmatpush.bf16.msra.mxu3 %v8915_v35  ;;  %v8925_v12 = vld [vmem:[#allocation137_spill] sm:$0xff] }
 0x650   :  { %3452 = vmatpush.bf16.msrb.mxu0 %v8916_v61  ;;  %3478 = vmatpush.bf16.msra.mxu2 %v8917_v45 }
 0x652   :  { %3464 = vmatpush.bf16.msrb.mxu1 %v8918_v4  ;;  %3490 = vmatpush.bf16.msra.mxu3 %v8919_v55 }
 0x654   :  { %3453 = vmatpush.bf16.msrb.mxu0 %v8920_v50  ;;  %3479 = vmatpush.bf16.msra.mxu2 %v8921_v58  ;;  %v3051_v35 = vpop.f32.mrf.mxu0 }
 0x656   :  { %3465 = vmatpush.bf16.msrb.mxu1 %v8922_v21  ;;  %3491 = vmatpush.bf16.msra.mxu3 %v8923_v7 }
 0x65a   :  { %3466 = vmatpush.bf16.msrb.mxu1 %v8924_v13  ;;  %3492 = vmatpush.bf16.msra.mxu3 %v8925_v12  ;;  %v3064_v61 = vpop.f32.mrf.mxu1  ;;  %v3077_v39 = vpop.f32.mrf.mxu2 }
 0x65b   :  { %v3065_v13 = vadd.f32 %v3064_v61, %v3051_v35 }
 0x65c   :  { %v3053_v45 = vpop.f32.mrf.mxu0 }
 0x65d   :  { %v3250_v45 = vadd.f32 %v3065_v13, %v8927_v52 }
 0x660   :  { %v3090_v25 = vpop.f32.mrf.mxu3 }
 0x662   :  { %v3066_v4 = vpop.f32.mrf.mxu1  ;;  %v3079_v6 = vpop.f32.mrf.mxu2 }
 0x663   :  { %v3091_v4 = vadd.f32 %v3090_v25, %v3077_v39 }
 0x664   :  { %v3103_v55 = vpop.f32.mrf.mxu0 }
 0x668   :  { %v3092_v57 = vpop.f32.mrf.mxu3 }
 0x66a   :  { %v3116_v50 = vpop.f32.mrf.mxu1  ;;  %v3129_v62 = vpop.f32.mrf.mxu2 }
 0x66b   :  { %v3117_v21 = vadd.f32 %v3116_v50, %v3103_v55  ;;  %v8929_v50 = vld [vmem:[#allocation31_spill] sm:$0xff] }
 0x66c   :  { %v3105_v58 = vpop.f32.mrf.mxu0 }
 0x66d   :  { %v3252_v12 = vadd.f32 %v3117_v21, %v8926_v27  ;;  %v4794_v58 = vmul.f32 -1.442695, %v3250_v45 }
 0x66f   :  { %v4796_v1 = vmul.f32 -1.442695, %v3252_v12 }
 0x670   :  { %v3142_v30 = vpop.f32.mrf.mxu3 }
 0x671   :  { %v3143_v29 = vadd.f32 %v3142_v30, %v3129_v62  ;;  %5110 = vpow2.f32 %v4796_v1 }
 0x672   :  { %v3118_v31 = vpop.f32.mrf.mxu1  ;;  %v3131_v7 = vpop.f32.mrf.mxu2  ;;  %5112 = vpow2.f32 %v4794_v58 }
 0x673   :  { %v3253_v57 = vadd.f32 %v3143_v29, %v8928_v14  ;;  %v3251_v31 = vadd.f32 %v3091_v4, %v8929_v50 }
 0x674   :  { %v3155_v41 = vpop.f32.mrf.mxu0 }
 0x675   :  { %v4797_v7 = vmul.f32 -1.442695, %v3253_v57  ;;  %v4795_v61 = vmul.f32 -1.442695, %v3251_v31 }
 0x677   :  { %v5111_v30 = vpop.eup %5110  ;;  %5114 = vpow2.f32 %v4797_v7 }
 0x678   :  { %v3144_v38 = vpop.f32.mrf.mxu3  ;;  %5116 = vpow2.f32 %v4795_v61  ;;  %v7273_v52 = vadd.f32 1.0, %v5111_v30  ;;  %v5113_v62 = vpop.eup %5112 }
 0x679   :  { %v7275_v29 = vadd.f32 1.0, %v5113_v62 }
 0x67a   :  { %v3181_v6 = vpop.f32.mrf.mxu2  ;;  %v3168_v15 = vpop.f32.mrf.mxu1  ;;  %5118 = vrcp.f32 %v7273_v52  ;;  %vm3309_vm10 = vweird.f32 %v7273_v52 }
 0x67b   :  { %5120 = vrcp.f32 %v7275_v29  ;;  %v3169_v30 = vadd.f32 %v3168_v15, %v3155_v41  ;;  %vm3271_vm12 = vweird.f32 %v7275_v29 }
 0x67c   :  { %v3157_v40 = vpop.f32.mrf.mxu0 }
 0x67d   :  { %v5115_v13 = vpop.eup %5114  ;;  %v3254_v33 = vadd.f32 %v3169_v30, %v8931_v24  ;;  %v3313_v24 = vand.u32 2147483647, %v7273_v52 }
 0x67e   :  { %v5117_v40 = vpop.eup %5116  ;;  %v7278_v1 = vadd.f32 1.0, %v5115_v13 }
 0x67f   :  { %v7281_v25 = vadd.f32 1.0, %v5117_v40  ;;  %vm3314_vm15 = vcmp.eq.f32.partialorder %v3313_v24, 8.507059e+37 }
 0x680   :  { %v3194_v35 = vpop.f32.mrf.mxu3  ;;  %v5119_v39 = vpop.eup %5118  ;;  %5122 = vrcp.f32 %v7278_v1  ;;  %vm3324_vm1 = vweird.f32 %v7278_v1 }
 0x681   :  { %5124 = vrcp.f32 %v7281_v25  ;;  %v3305_v12 = vmul.f32 %v5119_v39, %v7273_v52  ;;  %v7286_v21 = vpop.eup %5120  ;;  %vm3310_vm9 = vweird.f32 %v5119_v39  ;;  %vm3286_vm5 = vweird.f32 %v7281_v25 }
 0x682   :  { %v3183_v27 = vpop.f32.mrf.mxu2  ;;  %v3170_v38 = vpop.f32.mrf.mxu1  ;;  %v3267_v4 = vmul.f32 %v7286_v21, %v7275_v29  ;;  %vm7306_vm11 = vmor %vm3309_vm10, %vm3310_vm9  ;;  %vm3272_vm13 = vweird.f32 %v7286_v21  ;;  %v3292_v24 = vand.u32 2147483648, %v7281_v25 }
 0x683   :  { %v3306_v57 = vsub.f32 1.0, %v3305_v12  ;;  %v8930_v38 = vld [vmem:[#allocation68_spill] sm:$0xff]  ;;  %vm7324_vm0 = vmor %vm3271_vm12, %vm3272_vm13 }
 0x684   :  { %v3268_v13 = vsub.f32 1.0, %v3267_v4  ;;  %v3315_v4 = vand.u32 2147483648, %v7273_v52 }
 0x686   :  { %v7288_v45 = vpop.eup %5122 }
 0x687   :  { %v7292_v7 = vpop.eup %5124  ;;  %v3320_v61 = vmul.f32 %v7288_v45, %v7278_v1  ;;  %vm3325_vm14 = vweird.f32 %v7288_v45 }
 0x688   :  { %v3196_v14 = vpop.f32.mrf.mxu3  ;;  %v3282_v40 = vmul.f32 %v7292_v7, %v7281_v25  ;;  %vm7333_vm2 = vmor %vm3324_vm1, %vm3325_vm14  ;;  %vm3287_vm4 = vweird.f32 %v7292_v7 }
 0x689   :  { %v3307_v14 = vmul.f32 %v5119_v39, %v3306_v57  ;;  %v3321_v22 = vsub.f32 1.0, %v3320_v61  ;;  %v3195_v57 = vadd.f32 %v3194_v35, %v3181_v6  ;;  %v3277_v35 = vand.u32 2147483648, %v7275_v29  ;;  %vm3288_vm7 = vmor %vm3286_vm5, %vm3287_vm4 }
 0x68a   :  { %v3283_v41 = vsub.f32 1.0, %v3282_v40 }
 0x68b   :  { %v3308_v16 = vadd.f32 %v5119_v39, %v3307_v14  ;;  %v3322_v61 = vmul.f32 %v7288_v45, %v3321_v22 }
 0x68c   :  { %v3284_v40 = vmul.f32 %v7292_v7, %v3283_v41 }
 0x68d   :  { %v3312_v22 = vsel %vm7306_vm11, %v5119_v39, %v3308_v16 }
 0x694   :  { %v3207_v55 = vpop.f32.mrf.mxu0 }
 0x69a   :  { %v3220_v58 = vpop.f32.mrf.mxu1  ;;  %v3233_v50 = vpop.f32.mrf.mxu2 }
 0x69b   :  { %v3221_v31 = vadd.f32 %v3220_v58, %v3207_v55  ;;  %v3269_v58 = vmul.f32 %v7286_v21, %v3268_v13  ;;  %v8935_v13 = vld [vmem:[#allocation59_spill] sm:$0xff] }
 0x69c   :  { %v3209_v27 = vpop.f32.mrf.mxu0  ;;  %v3255_v14 = vadd.f32 %v3195_v57, %v8935_v13 }
 0x69d   :  { %v3256_v62 = vadd.f32 %v3221_v31, %v8930_v38  ;;  %v8932_v31 = vld [vmem:[#allocation69_spill] sm:$0xff]  ;;  %v3270_v6 = vadd.f32 %v7286_v21, %v3269_v58  ;;  %v3330_v58 = vand.u32 2147483648, %v7278_v1 }
 0x69f   :  { %v4798_v2 = vmul.f32 -1.442695, %v3256_v62  ;;  %v3316_v62 = vor.u32 1.1754944e-38, %v3315_v4 }
 0x6a0   :  { %v3246_v12 = vpop.f32.mrf.mxu3 }
 0x6a1   :  { %5126 = vpow2.f32 %v4798_v2  ;;  %v3247_v55 = vadd.f32 %v3246_v12, %v3233_v50  ;;  %v3275_v50 = vand.u32 2147483647, %v7275_v29  ;;  %v3317_v39 = vsel %vm3314_vm15, %v3316_v62, %v3312_v22 }
 0x6a2   :  { %v3222_v27 = vpop.f32.mrf.mxu1  ;;  %v3235_v15 = vpop.f32.mrf.mxu2  ;;  %5128 = vtanh.f32 %v3254_v33  ;;  %v3323_v33 = vadd.f32 %v7288_v45, %v3322_v61  ;;  %v3278_v29 = vor.u32 1.1754944e-38, %v3277_v35  ;;  %v3374_v57 = vmul.f32 %v3317_v39, %v7113_v53 }
 0x6a3   :  { %v3257_v38 = vadd.f32 %v3247_v55, %v8932_v31  ;;  %v3274_v27 = vsel %vm7324_vm0, %v7286_v21, %v3270_v6  ;;  %v3328_v15 = vand.u32 2147483647, %v7278_v1  ;;  %vm3276_vm3 = vcmp.eq.f32.partialorder %v3275_v50, 8.507059e+37 }
 0x6a4   :  { %v3285_v31 = vadd.f32 %v7292_v7, %v3284_v40  ;;  %v3327_v21 = vsel %vm7333_vm2, %v7288_v45, %v3323_v33  ;;  %v3279_v61 = vsel %vm3276_vm3, %v3278_v29, %v3274_v27  ;;  %v3290_v50 = vand.u32 2147483647, %v7281_v25 }
 0x6a5   :  { %v4799_v30 = vmul.f32 -1.442695, %v3257_v38  ;;  %v3331_v38 = vor.u32 1.1754944e-38, %v3330_v58  ;;  %vm3329_vm6 = vcmp.eq.f32.partialorder %v3328_v15, 8.507059e+37 }
 0x6a6   :  { %v3289_v22 = vsel %vm3288_vm7, %v7292_v7, %v3285_v31  ;;  %vm3291_vm8 = vcmp.eq.f32.partialorder %v3290_v50, 8.507059e+37 }
 0x6a7   :  { %v5127_v52 = vpop.eup %5126  ;;  %5130 = vpow2.f32 %v4799_v30  ;;  %v3332_v30 = vsel %vm3329_vm6, %v3331_v38, %v3327_v21 }
 0x6a8   :  { %v3342_v12 = vadd.f32 1.0, %v5127_v52  ;;  %v3248_v55 = vpop.f32.mrf.mxu3  ;;  %v5129_v41 = vpop.eup %5128  ;;  %v3293_v52 = vor.u32 1.1754944e-38, %v3292_v24  ;;  %v3375_v13 = vmul.f32 %v3332_v30, %v7118_v28 }
 0x6a9   :  { %v3376_v2 = vmul.f32 %v5129_v41, %v3279_v61 }
 0x6aa   :  { %5132 = vrcp.f32 %v3342_v12  ;;  %v3355_v33 = vand.u32 2147483648, %v3342_v12  ;;  %v3353_v58 = vand.u32 2147483647, %v3342_v12  ;;  %vm3349_vm10 = vweird.f32 %v3342_v12 }
 0x6ab   :  { %5134 = vtanh.f32 %v3255_v14  ;;  %v7346_v35 = vadd.f32 %v3376_v2, %v3374_v57  ;;  %v3294_v14 = vsel %vm3291_vm8, %v3293_v52, %v3289_v22  ;;  %v8941_v22 = vld [vmem:[#allocation165_spill] sm:$0xff]  ;;  %v8943_v52 = vld [vmem:[#allocation176_spill] sm:$0xff] }
 0x6ac   :  { %v3356_v15 = vor.u32 1.1754944e-38, %v3355_v33  ;;  %vm3354_vm12 = vcmp.eq.f32.partialorder %v3353_v58, 8.507059e+37  ;;  %v8949_v33 = vld [vmem:[#allocation180_spill] sm:$0xff]  ;;  %v8951_v58 = vld [vmem:[#allocation177_spill] sm:$0xff] }
 0x6ad   :  { %v5131_v1 = vpop.eup %5130 }
 0x6ae   :  { %v3343_v53 = vadd.f32 1.0, %v5131_v1 }
 0x6b0   :  { %v5133_v6 = vpop.eup %5132  ;;  %5136 = vrcp.f32 %v3343_v53  ;;  %v3370_v57 = vand.u32 2147483648, %v3343_v53  ;;  %v3368_v1 = vand.u32 2147483647, %v3343_v53  ;;  %vm3364_vm14 = vweird.f32 %v3343_v53 }
 0x6b1   :  { %v5135_v45 = vpop.eup %5134  ;;  %v3345_v62 = vmul.f32 %v5133_v6, %v3342_v12  ;;  %5138 = vtanh.f32 %v7346_v35  ;;  %vm3350_vm9 = vweird.f32 %v5133_v6 }
 0x6b2   :  { %v3377_v25 = vmul.f32 %v5135_v45, %v3294_v14  ;;  %vm3351_vm11 = vmor %vm3349_vm10, %vm3350_vm9  ;;  %v3371_v12 = vor.u32 1.1754944e-38, %v3370_v57  ;;  %vm3369_vm0 = vcmp.eq.f32.partialorder %v3368_v1, 8.507059e+37  ;;  %v8942_v45 = vld [vmem:[#allocation174_spill] sm:$0xff]  ;;  %v8946_v14 = vld [vmem:[#allocation171_spill] sm:$0xff] }
 0x6b3   :  { %v3346_v40 = vsub.f32 1.0, %v3345_v62  ;;  %v8944_v62 = vld [vmem:[#allocation167_spill] sm:$0xff]  ;;  %v8960_v57 = vld [vmem:[#allocation190_spill] sm:$0xff]  ;;  %v8963_v1 = vld [vmem:[#allocation189_spill] sm:$0xff] }
 0x6b4   :  { %v7351_v39 = vadd.f32 %v3377_v25, %v3375_v13  ;;  %v8945_v13 = vld [vmem:[#allocation169_spill] sm:$0xff]  ;;  %v8948_v25 = vld [vmem:[#allocation178_spill] sm:$0xff] }
 0x6b5   :  { %v3347_v55 = vmul.f32 %v5133_v6, %v3346_v40  ;;  %v8947_v40 = vld [vmem:[#allocation173_spill] sm:$0xff] }
 0x6b6   :  { %v5137_v16 = vpop.eup %5136  ;;  %5140 = vtanh.f32 %v7351_v39 }
 0x6b7   :  { %v3348_v7 = vadd.f32 %v5133_v6, %v3347_v55  ;;  %v3360_v27 = vmul.f32 %v5137_v16, %v3343_v53  ;;  %v5139_v4 = vpop.eup %5138  ;;  %vm3365_vm13 = vweird.f32 %v5137_v16  ;;  %v8940_v53 = vld [vmem:[#allocation163_spill] sm:$0xff] }
 0x6b8   :  { %vm3366_vm15 = vmor %vm3364_vm14, %vm3365_vm13  ;;  %v8950_v55 = vld [vmem:[#allocation175_spill] sm:$0xff] }
 0x6b9   :  { %v3352_v41 = vsel %vm3351_vm11, %v5133_v6, %v3348_v7  ;;  %v3361_v28 = vsub.f32 1.0, %v3360_v27  ;;  %v8953_v7 = vld [vmem:[#allocation184_spill] sm:$0xff]  ;;  %v8954_v27 = vld [vmem:[#allocation179_spill] sm:$0xff] }
 0x6ba   :  { %v3357_v29 = vsel %vm3354_vm12, %v3356_v15, %v3352_v41  ;;  %v8955_v15 = vld [vmem:[#allocation181_spill] sm:$0xff]  ;;  %v8956_v41 = vld [vmem:[#allocation186_spill] sm:$0xff] }
 0x6bb   :  { %v3382_v31 = vmul.f32 %v5139_v4, %v3357_v29  ;;  %v3362_v21 = vmul.f32 %v5137_v16, %v3361_v28  ;;  %v8957_v28 = vld [vmem:[#allocation188_spill] sm:$0xff]  ;;  %v8958_v4 = vld [vmem:[#allocation183_spill] sm:$0xff]  ;;  %v8959_v29 = vld [vmem:[#allocation185_spill] sm:$0xff] }
 0x6bc   :  { %v5141_v2 = vpop.eup %5140 }
 0x6bd   :  { %v7354_v38 = vpack.c.bf16 %v3382_v31, %v3382_v31  ;;  %v3363_v61 = vadd.f32 %v5137_v16, %v3362_v21  ;;  %v8961_v31 = vld [vmem:[#allocation192_spill] sm:$0xff]  ;;  %v8962_v21 = vld [vmem:[#allocation187_spill] sm:$0xff] }
 0x6bf   :  { %v3367_v24 = vsel %vm3366_vm15, %v5137_v16, %v3363_v61  ;;  %3402 = vmatmul.bf16.vlgmr.msra.gmra.mxu0 %v7354_v38  ;;  %3428 = vmatmul.bf16.vlgmr.msrb.gmra.mxu2 %v7354_v38  ;;  %v8952_v16 = vld [vmem:[#allocation182_spill] sm:$0xff] }
 0x6c0   :  { %v3372_v50 = vsel %vm3369_vm0, %v3371_v12, %v3367_v24  ;;  %3498 = vmatpush.bf16.msra.mxu0 %v8383_v10  ;;  %3524 = vmatpush.bf16.msrb.mxu2 %v8384_v32  ;;  %v8964_v61 = vld [vmem:[#allocation194_spill] sm:$0xff]  ;;  %v8965_v12 = vld [vmem:[#allocation196_spill] sm:$0xff]  ;;  %v8966_v24 = vld [vmem:[#allocation191_spill] sm:$0xff] }
 0x6c1   :  { %v3383_v30 = vmul.f32 %v5141_v2, %v3372_v50  ;;  %v8967_v2 = vld [vmem:[#allocation193_spill] sm:$0xff]  ;;  %v8968_v50 = vld [vmem:[#allocation198_spill] sm:$0xff] }
 0x6c3   :  { %v7360_v6 = vpack.c.bf16 %v3383_v30, %v3383_v30  ;;  %v8969_v30 = vld [vmem:[#allocation200_spill] sm:$0xff] }
 0x6c4   :  { %3499 = vmatpush.bf16.msra.mxu0 %v8385_v54  ;;  %3525 = vmatpush.bf16.msrb.mxu2 %v8386_v9 }
 0x6c5   :  { %3415 = vmatmul.bf16.vlgmr.msra.gmra.mxu1 %v7360_v6  ;;  %3441 = vmatmul.bf16.vlgmr.msrb.gmra.mxu3 %v7360_v6 }
 0x6c6   :  { %3511 = vmatpush.bf16.msra.mxu1 %v8387_v17  ;;  %3537 = vmatpush.bf16.msrb.mxu3 %v8388_v37 }
 0x6c8   :  { %3500 = vmatpush.bf16.msra.mxu0 %v8389_v36  ;;  %3526 = vmatpush.bf16.msrb.mxu2 %v8390_v47 }
 0x6ca   :  { %3512 = vmatpush.bf16.msra.mxu1 %v8391_v0  ;;  %3538 = vmatpush.bf16.msrb.mxu3 %v8392_v56 }
 0x6cc   :  { %3501 = vmatpush.bf16.msra.mxu0 %v8393_v5  ;;  %3527 = vmatpush.bf16.msrb.mxu2 %v8394_v63 }
 0x6ce   :  { %3513 = vmatpush.bf16.msra.mxu1 %v8395_v8  ;;  %3539 = vmatpush.bf16.msrb.mxu3 %v8396_v48 }
 0x6cf   :  { %3454 = vmatmul.bf16.vlgmr.msrb.gmra.mxu0 %v7354_v38  ;;  %3480 = vmatmul.bf16.vlgmr.msra.gmra.mxu2 %v7354_v38 }
 0x6d0   :  { %3502 = vmatpush.bf16.msra.mxu0 %v8397_v19  ;;  %3528 = vmatpush.bf16.msrb.mxu2 %v8398_v42 }
 0x6d2   :  { %3514 = vmatpush.bf16.msra.mxu1 %v8399_v59  ;;  %3540 = vmatpush.bf16.msrb.mxu3 %v8400_v44 }
 0x6d4   :  { %3503 = vmatpush.bf16.msra.mxu0 %v8401_v20  ;;  %3529 = vmatpush.bf16.msrb.mxu2 %v8402_v3 }
 0x6d5   :  { %3467 = vmatmul.bf16.vlgmr.msrb.gmra.mxu1 %v7360_v6  ;;  %3493 = vmatmul.bf16.vlgmr.msra.gmra.mxu3 %v7360_v6 }
 0x6d6   :  { %3515 = vmatpush.bf16.msra.mxu1 %v8403_v26  ;;  %3541 = vmatpush.bf16.msrb.mxu3 %v8492_v49 }
 0x6d8   :  { %3504 = vmatpush.bf16.msra.mxu0 %v8493_v11  ;;  %3530 = vmatpush.bf16.msrb.mxu2 %v8494_v23 }
 0x6da   :  { %3516 = vmatpush.bf16.msra.mxu1 %v8495_v46  ;;  %3542 = vmatpush.bf16.msrb.mxu3 %v8496_v34 }
 0x6dc   :  { %3505 = vmatpush.bf16.msra.mxu0 %v8497_v43  ;;  %3531 = vmatpush.bf16.msrb.mxu2 %v8498_v60 }
 0x6de   :  { %3517 = vmatpush.bf16.msra.mxu1 %v8940_v53  ;;  %3543 = vmatpush.bf16.msrb.mxu3 %v8941_v22 }
 0x6df   :  { %3506 = vmatmul.bf16.vlgmr.msra.gmra.mxu0 %v7354_v38  ;;  %3532 = vmatmul.bf16.vlgmr.msrb.gmra.mxu2 %v7354_v38 }
 0x6e0   :  { %3550 = vmatpush.bf16.msrb.mxu0 %v8499_v18  ;;  %3576 = vmatpush.bf16.msra.mxu2 %v8500_v51 }
 0x6e2   :  { %3518 = vmatpush.bf16.msra.mxu1 %v8944_v62  ;;  %3544 = vmatpush.bf16.msrb.mxu3 %v8945_v13 }
 0x6e4   :  { %3551 = vmatpush.bf16.msrb.mxu0 %v8942_v45  ;;  %3577 = vmatpush.bf16.msra.mxu2 %v8943_v52  ;;  %v9043_v45 = vld [vmem:[#allocation62_spill] sm:$0xff] }
 0x6e5   :  { %3519 = vmatmul.bf16.vlgmr.msra.gmra.mxu1 %v7360_v6  ;;  %3545 = vmatmul.bf16.vlgmr.msrb.gmra.mxu3 %v7360_v6 }
 0x6e6   :  { %3563 = vmatpush.bf16.msrb.mxu1 %v8946_v14  ;;  %3589 = vmatpush.bf16.msra.mxu3 %v8947_v40  ;;  %v9040_v40 = vld [vmem:[#allocation41_spill] sm:$0xff] }
 0x6e8   :  { %3552 = vmatpush.bf16.msrb.mxu0 %v8948_v25  ;;  %3578 = vmatpush.bf16.msra.mxu2 %v8949_v33  ;;  %v9039_v33 = vld [vmem:[#allocation34_spill] sm:$0xff] }
 0x6ea   :  { %3564 = vmatpush.bf16.msrb.mxu1 %v8950_v55  ;;  %3590 = vmatpush.bf16.msra.mxu3 %v8951_v58 }
 0x6ec   :  { %3553 = vmatpush.bf16.msrb.mxu0 %v8952_v16  ;;  %3579 = vmatpush.bf16.msra.mxu2 %v8953_v7  ;;  %v9038_v16 = vld [vmem:[#allocation40_spill] sm:$0xff] }
 0x6ee   :  { %3565 = vmatpush.bf16.msrb.mxu1 %v8954_v27  ;;  %3591 = vmatpush.bf16.msra.mxu3 %v8955_v15 }
 0x6f0   :  { %3554 = vmatpush.bf16.msrb.mxu0 %v8956_v41  ;;  %3580 = vmatpush.bf16.msra.mxu2 %v8957_v28 }
 0x6f2   :  { %3566 = vmatpush.bf16.msrb.mxu1 %v8958_v4  ;;  %3592 = vmatpush.bf16.msra.mxu3 %v8959_v29  ;;  %v8970_v29 = vld [vmem:[#allocation74_spill] sm:$0xff] }
 0x6f4   :  { %3555 = vmatpush.bf16.msrb.mxu0 %v8960_v57  ;;  %3581 = vmatpush.bf16.msra.mxu2 %v8961_v31  ;;  %v8971_v57 = vld [vmem:[#allocation76_spill] sm:$0xff]  ;;  %v8972_v31 = vld [vmem:[#allocation195_spill] sm:$0xff] }
 0x6f6   :  { %3567 = vmatpush.bf16.msrb.mxu1 %v8962_v21  ;;  %3593 = vmatpush.bf16.msra.mxu3 %v8963_v1  ;;  %v8973_v21 = vld [vmem:[#allocation197_spill] sm:$0xff] }
 0x6f8   :  { %3556 = vmatpush.bf16.msrb.mxu0 %v8964_v61  ;;  %3582 = vmatpush.bf16.msra.mxu2 %v8965_v12  ;;  %v8974_v12 = vld [vmem:[#allocation78_spill] sm:$0xff] }
 0x6fa   :  { %3568 = vmatpush.bf16.msrb.mxu1 %v8966_v24  ;;  %3594 = vmatpush.bf16.msra.mxu3 %v8967_v2  ;;  %v8975_v24 = vld [vmem:[#allocation80_spill] sm:$0xff]  ;;  %v8976_v2 = vld [vmem:[#allocation199_spill] sm:$0xff] }
 0x6fc   :  { %3557 = vmatpush.bf16.msrb.mxu0 %v8968_v50  ;;  %3583 = vmatpush.bf16.msra.mxu2 %v8969_v30  ;;  %v8977_v50 = vld [vmem:[#allocation201_spill] sm:$0xff]  ;;  %v8978_v30 = vld [vmem:[#allocation75_spill] sm:$0xff] }
 0x6fe   :  { %3569 = vmatpush.bf16.msrb.mxu1 %v8972_v31  ;;  %3595 = vmatpush.bf16.msra.mxu3 %v8973_v21  ;;  %v8981_v21 = vld [vmem:[#allocation84_spill] sm:$0xff] }
 0x6ff   :  { %3558 = vmatmul.bf16.vlgmr.msrb.gmra.mxu0 %v7354_v38  ;;  %3584 = vmatmul.bf16.vlgmr.msra.gmra.mxu2 %v7354_v38  ;;  %v8982_v38 = vld [vmem:[#allocation79_spill] sm:$0xff]  ;;  %v8989_v31 = vld [vmem:[#allocation92_spill] sm:$0xff] }
 0x700   :  { %3746 = vmatpush.bf16.msra.mxu0 %v8970_v29  ;;  %3772 = vmatpush.bf16.msrb.mxu2 %v8971_v57  ;;  %v8979_v29 = vld [vmem:[#allocation77_spill] sm:$0xff]  ;;  %v8980_v57 = vld [vmem:[#allocation82_spill] sm:$0xff] }
 0x702   :  { %3570 = vmatpush.bf16.msrb.mxu1 %v8976_v2  ;;  %3596 = vmatpush.bf16.msra.mxu3 %v8977_v50  ;;  %v8985_v2 = vld [vmem:[#allocation88_spill] sm:$0xff]  ;;  %v8986_v50 = vld [vmem:[#allocation83_spill] sm:$0xff] }
 0x704   :  { %3747 = vmatpush.bf16.msra.mxu0 %v8974_v12  ;;  %3773 = vmatpush.bf16.msrb.mxu2 %v8975_v24  ;;  %v8983_v12 = vld [vmem:[#allocation81_spill] sm:$0xff]  ;;  %v8984_v24 = vld [vmem:[#allocation86_spill] sm:$0xff] }
 0x705   :  { %3571 = vmatmul.bf16.vlgmr.msrb.gmra.mxu1 %v7360_v6  ;;  %3597 = vmatmul.bf16.vlgmr.msra.gmra.mxu3 %v7360_v6  ;;  %v8990_v6 = vld [vmem:[#allocation87_spill] sm:$0xff] }
 0x706   :  { %3759 = vmatpush.bf16.msra.mxu1 %v8978_v30  ;;  %3785 = vmatpush.bf16.msrb.mxu3 %v8979_v29  ;;  %v8987_v30 = vld [vmem:[#allocation85_spill] sm:$0xff]  ;;  %v8988_v29 = vld [vmem:[#allocation90_spill] sm:$0xff] }
 0x708   :  { %3748 = vmatpush.bf16.msra.mxu0 %v8980_v57  ;;  %3774 = vmatpush.bf16.msrb.mxu2 %v8981_v21  ;;  %v8991_v57 = vld [vmem:[#allocation89_spill] sm:$0xff]  ;;  %v8992_v21 = vld [vmem:[#allocation94_spill] sm:$0xff] }
 0x70a   :  { %3760 = vmatpush.bf16.msra.mxu1 %v8982_v38  ;;  %3786 = vmatpush.bf16.msrb.mxu3 %v8983_v12  ;;  %v8993_v38 = vld [vmem:[#allocation96_spill] sm:$0xff]  ;;  %v8994_v12 = vld [vmem:[#allocation91_spill] sm:$0xff] }
 0x70c   :  { %3749 = vmatpush.bf16.msra.mxu0 %v8984_v24  ;;  %3775 = vmatpush.bf16.msrb.mxu2 %v8985_v2  ;;  %v8995_v24 = vld [vmem:[#allocation93_spill] sm:$0xff]  ;;  %v8996_v2 = vld [vmem:[#allocation98_spill] sm:$0xff] }
 0x70e   :  { %3761 = vmatpush.bf16.msra.mxu1 %v8986_v50  ;;  %3787 = vmatpush.bf16.msrb.mxu3 %v8987_v30  ;;  %v8997_v50 = vld [vmem:[#allocation100_spill] sm:$0xff]  ;;  %v8998_v30 = vld [vmem:[#allocation95_spill] sm:$0xff] }
 0x710   :  { %3750 = vmatpush.bf16.msra.mxu0 %v8988_v29  ;;  %3776 = vmatpush.bf16.msrb.mxu2 %v8989_v31  ;;  %v8999_v29 = vld [vmem:[#allocation97_spill] sm:$0xff]  ;;  %v9000_v31 = vld [vmem:[#allocation102_spill] sm:$0xff] }
 0x712   :  { %3762 = vmatpush.bf16.msra.mxu1 %v8990_v6  ;;  %3788 = vmatpush.bf16.msrb.mxu3 %v8991_v57  ;;  %v9001_v6 = vld [vmem:[#allocation104_spill] sm:$0xff]  ;;  %v9002_v57 = vld [vmem:[#allocation106_spill] sm:$0xff] }
 0x714   :  { %3751 = vmatpush.bf16.msra.mxu0 %v8992_v21  ;;  %3777 = vmatpush.bf16.msrb.mxu2 %v8993_v38  ;;  %v9003_v21 = vld [vmem:[#allocation108_spill] sm:$0xff]  ;;  %v9004_v38 = vld [vmem:[#allocation99_spill] sm:$0xff] }
 0x716   :  { %3763 = vmatpush.bf16.msra.mxu1 %v8994_v12  ;;  %3789 = vmatpush.bf16.msrb.mxu3 %v8995_v24  ;;  %v9005_v12 = vld [vmem:[#allocation101_spill] sm:$0xff]  ;;  %v9006_v24 = vld [vmem:[#allocation110_spill] sm:$0xff] }
 0x718   :  { %3752 = vmatpush.bf16.msra.mxu0 %v8996_v2  ;;  %3778 = vmatpush.bf16.msrb.mxu2 %v8997_v50  ;;  %v9007_v2 = vld [vmem:[#allocation112_spill] sm:$0xff]  ;;  %v9008_v50 = vld [vmem:[#allocation103_spill] sm:$0xff] }
 0x71a   :  { %3764 = vmatpush.bf16.msra.mxu1 %v8998_v30  ;;  %3790 = vmatpush.bf16.msrb.mxu3 %v8999_v29  ;;  %v9009_v30 = vld [vmem:[#allocation105_spill] sm:$0xff]  ;;  %v9010_v29 = vld [vmem:[#allocation107_spill] sm:$0xff] }
 0x71c   :  { %3753 = vmatpush.bf16.msra.mxu0 %v9000_v31  ;;  %3779 = vmatpush.bf16.msrb.mxu2 %v9001_v6  ;;  %v9011_v31 = vld [vmem:[#allocation109_spill] sm:$0xff]  ;;  %v9012_v6 = vld [vmem:[#allocation114_spill] sm:$0xff] }
 0x71e   :  { %3765 = vmatpush.bf16.msra.mxu1 %v9004_v38  ;;  %3791 = vmatpush.bf16.msrb.mxu3 %v9005_v12  ;;  %v9015_v38 = vld [vmem:[#allocation113_spill] sm:$0xff]  ;;  %v9016_v12 = vld [vmem:[#allocation118_spill] sm:$0xff] }
 0x720   :  { %3798 = vmatpush.bf16.msrb.mxu0 %v9002_v57  ;;  %3824 = vmatpush.bf16.msra.mxu2 %v9003_v21  ;;  %v9013_v57 = vld [vmem:[#allocation116_spill] sm:$0xff]  ;;  %v9014_v21 = vld [vmem:[#allocation111_spill] sm:$0xff] }
 0x722   :  { %3766 = vmatpush.bf16.msra.mxu1 %v9008_v50  ;;  %3792 = vmatpush.bf16.msrb.mxu3 %v9009_v30  ;;  %v9019_v50 = vld [vmem:[#allocation117_spill] sm:$0xff]  ;;  %v9020_v30 = vld [vmem:[#allocation122_spill] sm:$0xff] }
 0x724   :  { %3799 = vmatpush.bf16.msrb.mxu0 %v9006_v24  ;;  %3825 = vmatpush.bf16.msra.mxu2 %v9007_v2  ;;  %v9017_v24 = vld [vmem:[#allocation120_spill] sm:$0xff]  ;;  %v9018_v2 = vld [vmem:[#allocation115_spill] sm:$0xff] }
 0x726   :  { %3811 = vmatpush.bf16.msrb.mxu1 %v9010_v29  ;;  %3837 = vmatpush.bf16.msra.mxu3 %v9011_v31  ;;  %v9021_v29 = vld [vmem:[#allocation124_spill] sm:$0xff]  ;;  %v9022_v31 = vld [vmem:[#allocation119_spill] sm:$0xff] }
 0x728   :  { %3800 = vmatpush.bf16.msrb.mxu0 %v9012_v6  ;;  %3826 = vmatpush.bf16.msra.mxu2 %v9013_v57  ;;  %v9023_v6 = vld [vmem:[#allocation121_spill] sm:$0xff]  ;;  %v9024_v57 = vld [vmem:[#allocation126_spill] sm:$0xff] }
 0x72a   :  { %3812 = vmatpush.bf16.msrb.mxu1 %v9014_v21  ;;  %3838 = vmatpush.bf16.msra.mxu3 %v9015_v38  ;;  %v9025_v21 = vld [vmem:[#allocation128_spill] sm:$0xff]  ;;  %v9026_v38 = vld [vmem:[#allocation123_spill] sm:$0xff] }
 0x72c   :  { %3801 = vmatpush.bf16.msrb.mxu0 %v9016_v12  ;;  %3827 = vmatpush.bf16.msra.mxu2 %v9017_v24  ;;  %v9027_v12 = vld [vmem:[#allocation125_spill] sm:$0xff]  ;;  %v9028_v24 = vld [vmem:[#allocation130_spill] sm:$0xff] }
 0x72e   :  { %3813 = vmatpush.bf16.msrb.mxu1 %v9018_v2  ;;  %3839 = vmatpush.bf16.msra.mxu3 %v9019_v50  ;;  %v9029_v2 = vld [vmem:[#allocation132_spill] sm:$0xff]  ;;  %v9030_v50 = vld [vmem:[#allocation127_spill] sm:$0xff] }
 0x730   :  { %3802 = vmatpush.bf16.msrb.mxu0 %v9020_v30  ;;  %3828 = vmatpush.bf16.msra.mxu2 %v9021_v29  ;;  %v9031_v30 = vld [vmem:[#allocation129_spill] sm:$0xff]  ;;  %v9032_v29 = vld [vmem:[#allocation134_spill] sm:$0xff] }
 0x732   :  { %3814 = vmatpush.bf16.msrb.mxu1 %v9022_v31  ;;  %3840 = vmatpush.bf16.msra.mxu3 %v9023_v6  ;;  %v9033_v31 = vld [vmem:[#allocation136_spill] sm:$0xff]  ;;  %v9034_v6 = vld [vmem:[#allocation131_spill] sm:$0xff] }
 0x734   :  { %3803 = vmatpush.bf16.msrb.mxu0 %v9024_v57  ;;  %3829 = vmatpush.bf16.msra.mxu2 %v9025_v21  ;;  %v9035_v57 = vld [vmem:[#allocation133_spill] sm:$0xff]  ;;  %v9036_v21 = vld [vmem:[#allocation135_spill] sm:$0xff] }
 0x736   :  { %3815 = vmatpush.bf16.msrb.mxu1 %v9026_v38  ;;  %3841 = vmatpush.bf16.msra.mxu3 %v9027_v12  ;;  %v9037_v38 = vld [vmem:[#allocation137_spill] sm:$0xff] }
 0x738   :  { %3804 = vmatpush.bf16.msrb.mxu0 %v9028_v24  ;;  %3830 = vmatpush.bf16.msra.mxu2 %v9029_v2 }
 0x73a   :  { %3816 = vmatpush.bf16.msrb.mxu1 %v9030_v50  ;;  %3842 = vmatpush.bf16.msra.mxu3 %v9031_v30 }
 0x73c   :  { %3805 = vmatpush.bf16.msrb.mxu0 %v9032_v29  ;;  %3831 = vmatpush.bf16.msra.mxu2 %v9033_v31  ;;  %v3403_v12 = vpop.f32.mrf.mxu0 }
 0x73e   :  { %3817 = vmatpush.bf16.msrb.mxu1 %v9034_v6  ;;  %3843 = vmatpush.bf16.msra.mxu3 %v9035_v57 }
 0x742   :  { %3818 = vmatpush.bf16.msrb.mxu1 %v9036_v21  ;;  %3844 = vmatpush.bf16.msra.mxu3 %v9037_v38  ;;  %v3416_v24 = vpop.f32.mrf.mxu1  ;;  %v3429_v61 = vpop.f32.mrf.mxu2 }
 0x743   :  { %v3417_v21 = vadd.f32 %v3416_v24, %v3403_v12 }
 0x744   :  { %v3405_v2 = vpop.f32.mrf.mxu0 }
 0x745   :  { %v3602_v2 = vadd.f32 %v3417_v21, %v9039_v33 }
 0x748   :  { %v3442_v1 = vpop.f32.mrf.mxu3 }
 0x74a   :  { %v3418_v50 = vpop.f32.mrf.mxu1  ;;  %v3431_v4 = vpop.f32.mrf.mxu2 }
 0x74b   :  { %v3443_v50 = vadd.f32 %v3442_v1, %v3429_v61 }
 0x74c   :  { %v3455_v30 = vpop.f32.mrf.mxu0 }
 0x750   :  { %v3444_v28 = vpop.f32.mrf.mxu3 }
 0x752   :  { %v3468_v29 = vpop.f32.mrf.mxu1  ;;  %v3481_v41 = vpop.f32.mrf.mxu2 }
 0x753   :  { %v3469_v6 = vadd.f32 %v3468_v29, %v3455_v30  ;;  %v9041_v30 = vld [vmem:[#allocation35_spill] sm:$0xff] }
 0x754   :  { %v3457_v31 = vpop.f32.mrf.mxu0 }
 0x755   :  { %v3604_v38 = vadd.f32 %v3469_v6, %v9038_v16  ;;  %v4800_v31 = vmul.f32 -1.442695, %v3602_v2 }
 0x757   :  { %v4802_v25 = vmul.f32 -1.442695, %v3604_v38 }
 0x758   :  { %v3494_v15 = vpop.f32.mrf.mxu3 }
 0x759   :  { %v3495_v58 = vadd.f32 %v3494_v15, %v3481_v41  ;;  %5142 = vpow2.f32 %v4802_v25 }
 0x75a   :  { %v3470_v27 = vpop.f32.mrf.mxu1  ;;  %v3483_v57 = vpop.f32.mrf.mxu2  ;;  %5144 = vpow2.f32 %v4800_v31 }
 0x75b   :  { %v3605_v28 = vadd.f32 %v3495_v58, %v9040_v40  ;;  %v3603_v27 = vadd.f32 %v3443_v50, %v9041_v30 }
 0x75c   :  { %v3507_v7 = vpop.f32.mrf.mxu0 }
 0x75d   :  { %v4803_v29 = vmul.f32 -1.442695, %v3605_v28  ;;  %v4801_v24 = vmul.f32 -1.442695, %v3603_v27 }
 0x75f   :  { %v5143_v15 = vpop.eup %5142  ;;  %5146 = vpow2.f32 %v4803_v29 }
 0x760   :  { %v3496_v55 = vpop.f32.mrf.mxu3  ;;  %5148 = vpow2.f32 %v4801_v24  ;;  %v7506_v33 = vadd.f32 1.0, %v5143_v15  ;;  %v5145_v41 = vpop.eup %5144 }
 0x761   :  { %v7508_v58 = vadd.f32 1.0, %v5145_v41 }
 0x762   :  { %v3533_v4 = vpop.f32.mrf.mxu2  ;;  %v3520_v14 = vpop.f32.mrf.mxu1  ;;  %5150 = vrcp.f32 %v7506_v33  ;;  %vm3661_vm2 = vweird.f32 %v7506_v33 }
 0x763   :  { %5152 = vrcp.f32 %v7508_v58  ;;  %v3521_v15 = vadd.f32 %v3520_v14, %v3507_v7  ;;  %vm3623_vm4 = vweird.f32 %v7508_v58 }
 0x764   :  { %v3509_v13 = vpop.f32.mrf.mxu0 }
 0x765   :  { %v5147_v1 = vpop.eup %5146  ;;  %v3606_v22 = vadd.f32 %v3521_v15, %v9043_v45  ;;  %v3665_v45 = vand.u32 2147483647, %v7506_v33 }
 0x766   :  { %v5149_v13 = vpop.eup %5148  ;;  %v7511_v25 = vadd.f32 1.0, %v5147_v1 }
 0x767   :  { %v7514_v61 = vadd.f32 1.0, %v5149_v13  ;;  %vm3666_vm7 = vcmp.eq.f32.partialorder %v3665_v45, 8.507059e+37 }
 0x768   :  { %v3546_v12 = vpop.f32.mrf.mxu3  ;;  %v5151_v6 = vpop.eup %5150  ;;  %5154 = vrcp.f32 %v7511_v25  ;;  %vm3676_vm9 = vweird.f32 %v7511_v25 }
 0x769   :  { %5156 = vrcp.f32 %v7514_v61  ;;  %v3657_v21 = vmul.f32 %v5151_v6, %v7506_v33  ;;  %v7519_v38 = vpop.eup %5152  ;;  %vm3662_vm1 = vweird.f32 %v5151_v6  ;;  %vm3638_vm13 = vweird.f32 %v7514_v61 }
 0x76a   :  { %v3535_v16 = vpop.f32.mrf.mxu2  ;;  %v3522_v55 = vpop.f32.mrf.mxu1  ;;  %v3619_v50 = vmul.f32 %v7519_v38, %v7508_v58  ;;  %vm7539_vm3 = vmor %vm3661_vm2, %vm3662_vm1  ;;  %vm3624_vm5 = vweird.f32 %v7519_v38  ;;  %v3644_v45 = vand.u32 2147483648, %v7514_v61 }
 0x76b   :  { %v3658_v28 = vsub.f32 1.0, %v3657_v21  ;;  %v9042_v55 = vld [vmem:[#allocation70_spill] sm:$0xff]  ;;  %vm7557_vm8 = vmor %vm3623_vm4, %vm3624_vm5 }
 0x76c   :  { %v3620_v1 = vsub.f32 1.0, %v3619_v50  ;;  %v3667_v50 = vand.u32 2147483648, %v7506_v33 }
 0x76e   :  { %v7521_v2 = vpop.eup %5154 }
 0x76f   :  { %v7525_v29 = vpop.eup %5156  ;;  %v3672_v24 = vmul.f32 %v7521_v2, %v7511_v25  ;;  %vm3677_vm6 = vweird.f32 %v7521_v2 }
 0x770   :  { %v3548_v40 = vpop.f32.mrf.mxu3  ;;  %v3634_v13 = vmul.f32 %v7525_v29, %v7514_v61  ;;  %vm7566_vm10 = vmor %vm3676_vm9, %vm3677_vm6  ;;  %vm3639_vm12 = vweird.f32 %v7525_v29 }
 0x771   :  { %v3659_v40 = vmul.f32 %v5151_v6, %v3658_v28  ;;  %v3673_v52 = vsub.f32 1.0, %v3672_v24  ;;  %v3547_v28 = vadd.f32 %v3546_v12, %v3533_v4  ;;  %v3629_v12 = vand.u32 2147483648, %v7508_v58  ;;  %vm3640_vm15 = vmor %vm3638_vm13, %vm3639_vm12 }
 0x772   :  { %v3635_v7 = vsub.f32 1.0, %v3634_v13 }
 0x773   :  { %v3660_v53 = vadd.f32 %v5151_v6, %v3659_v40  ;;  %v3674_v24 = vmul.f32 %v7521_v2, %v3673_v52 }
 0x774   :  { %v3636_v13 = vmul.f32 %v7525_v29, %v3635_v7 }
 0x775   :  { %v3664_v52 = vsel %vm7539_vm3, %v5151_v6, %v3660_v53 }
 0x77c   :  { %v3559_v57 = vpop.f32.mrf.mxu0 }
 0x782   :  { %v3572_v31 = vpop.f32.mrf.mxu1  ;;  %v3585_v30 = vpop.f32.mrf.mxu2 }
 0x783   :  { %v3573_v27 = vadd.f32 %v3572_v31, %v3559_v57  ;;  %v3621_v31 = vmul.f32 %v7519_v38, %v3620_v1  ;;  %v9047_v1 = vld [vmem:[#allocation63_spill] sm:$0xff] }
 0x784   :  { %v3561_v16 = vpop.f32.mrf.mxu0  ;;  %v3607_v40 = vadd.f32 %v3547_v28, %v9047_v1 }
 0x785   :  { %v3608_v41 = vadd.f32 %v3573_v27, %v9042_v55  ;;  %v9044_v27 = vld [vmem:[#allocation71_spill] sm:$0xff]  ;;  %v3622_v4 = vadd.f32 %v7519_v38, %v3621_v31  ;;  %v3682_v31 = vand.u32 2147483648, %v7511_v25 }
 0x787   :  { %v4804_v62 = vmul.f32 -1.442695, %v3608_v41  ;;  %v3668_v41 = vor.u32 1.1754944e-38, %v3667_v50 }
 0x788   :  { %v3598_v21 = vpop.f32.mrf.mxu3 }
 0x789   :  { %5158 = vpow2.f32 %v4804_v62  ;;  %v3599_v57 = vadd.f32 %v3598_v21, %v3585_v30  ;;  %v3627_v30 = vand.u32 2147483647, %v7508_v58  ;;  %v3669_v6 = vsel %vm3666_vm7, %v3668_v41, %v3664_v52 }
 0x78a   :  { %v3574_v16 = vpop.f32.mrf.mxu1  ;;  %v3587_v14 = vpop.f32.mrf.mxu2  ;;  %5160 = vtanh.f32 %v3606_v22  ;;  %v3675_v22 = vadd.f32 %v7521_v2, %v3674_v24  ;;  %v3630_v58 = vor.u32 1.1754944e-38, %v3629_v12  ;;  %v3726_v28 = vmul.f32 %v3669_v6, %v7346_v35 }
 0x78b   :  { %v3609_v55 = vadd.f32 %v3599_v57, %v9044_v27  ;;  %v3626_v16 = vsel %vm7557_vm8, %v7519_v38, %v3622_v4  ;;  %v3680_v14 = vand.u32 2147483647, %v7511_v25  ;;  %vm3628_vm11 = vcmp.eq.f32.partialorder %v3627_v30, 8.507059e+37 }
 0x78c   :  { %v3637_v27 = vadd.f32 %v7525_v29, %v3636_v13  ;;  %v3679_v38 = vsel %vm7566_vm10, %v7521_v2, %v3675_v22  ;;  %v3631_v24 = vsel %vm3628_vm11, %v3630_v58, %v3626_v16  ;;  %v3642_v30 = vand.u32 2147483647, %v7514_v61 }
 0x78d   :  { %v4805_v15 = vmul.f32 -1.442695, %v3609_v55  ;;  %v3683_v55 = vor.u32 1.1754944e-38, %v3682_v31  ;;  %vm3681_vm14 = vcmp.eq.f32.partialorder %v3680_v14, 8.507059e+37 }
 0x78e   :  { %v3641_v52 = vsel %vm3640_vm15, %v7525_v29, %v3637_v27  ;;  %vm3643_vm0 = vcmp.eq.f32.partialorder %v3642_v30, 8.507059e+37 }
 0x78f   :  { %v5159_v33 = vpop.eup %5158  ;;  %5162 = vpow2.f32 %v4805_v15  ;;  %v3684_v15 = vsel %vm3681_vm14, %v3683_v55, %v3679_v38 }
 0x790   :  { %v3694_v21 = vadd.f32 1.0, %v5159_v33  ;;  %v3600_v57 = vpop.f32.mrf.mxu3  ;;  %v5161_v7 = vpop.eup %5160  ;;  %v3645_v33 = vor.u32 1.1754944e-38, %v3644_v45  ;;  %v3727_v1 = vmul.f32 %v3684_v15, %v7351_v39 }
 0x791   :  { %v3728_v62 = vmul.f32 %v5161_v7, %v3631_v24 }
 0x792   :  { %5164 = vrcp.f32 %v3694_v21  ;;  %v3707_v22 = vand.u32 2147483648, %v3694_v21  ;;  %v3705_v31 = vand.u32 2147483647, %v3694_v21  ;;  %vm3701_vm2 = vweird.f32 %v3694_v21 }
 0x793   :  { %5166 = vtanh.f32 %v3607_v40  ;;  %v7579_v12 = vadd.f32 %v3728_v62, %v3726_v28  ;;  %v3646_v40 = vsel %vm3643_vm0, %v3645_v33, %v3641_v52  ;;  %v9083_v52 = vld [vmem:[#allocation197_spill] sm:$0xff] }
 0x794   :  { %v3708_v14 = vor.u32 1.1754944e-38, %v3707_v22  ;;  %vm3706_vm4 = vcmp.eq.f32.partialorder %v3705_v31, 8.507059e+37  ;;  %v9085_v33 = vld [vmem:[#allocation201_spill] sm:$0xff] }
 0x795   :  { %v5163_v25 = vpop.eup %5162 }
 0x796   :  { %v3695_v35 = vadd.f32 1.0, %v5163_v25 }
 0x798   :  { %v5165_v4 = vpop.eup %5164  ;;  %5168 = vrcp.f32 %v3695_v35  ;;  %v3722_v28 = vand.u32 2147483648, %v3695_v35  ;;  %v3720_v25 = vand.u32 2147483647, %v3695_v35  ;;  %vm3716_vm6 = vweird.f32 %v3695_v35 }
 0x799   :  { %v5167_v2 = vpop.eup %5166  ;;  %v3697_v41 = vmul.f32 %v5165_v4, %v3694_v21  ;;  %5170 = vtanh.f32 %v7579_v12  ;;  %vm3702_vm1 = vweird.f32 %v5165_v4 }
 0x79a   :  { %v3729_v61 = vmul.f32 %v5167_v2, %v3646_v40  ;;  %vm3703_vm3 = vmor %vm3701_vm2, %vm3702_vm1  ;;  %v3723_v21 = vor.u32 1.1754944e-38, %v3722_v28  ;;  %vm3721_vm8 = vcmp.eq.f32.partialorder %v3720_v25, 8.507059e+37  ;;  %v9084_v2 = vld [vmem:[#allocation199_spill] sm:$0xff] }
 0x79b   :  { %v3698_v13 = vsub.f32 1.0, %v3697_v41 }
 0x79c   :  { %v7584_v6 = vadd.f32 %v3729_v61, %v3727_v1 }
 0x79d   :  { %v3699_v57 = vmul.f32 %v5165_v4, %v3698_v13 }
 0x79e   :  { %v5169_v53 = vpop.eup %5168  ;;  %5172 = vtanh.f32 %v7584_v6 }
 0x79f   :  { %v3700_v29 = vadd.f32 %v5165_v4, %v3699_v57  ;;  %v3712_v16 = vmul.f32 %v5169_v53, %v3695_v35  ;;  %v5171_v50 = vpop.eup %5170  ;;  %vm3717_vm5 = vweird.f32 %v5169_v53  ;;  %v9082_v35 = vld [vmem:[#allocation195_spill] sm:$0xff] }
 0x7a0   :  { %vm3718_vm7 = vmor %vm3716_vm6, %vm3717_vm5 }
 0x7a1   :  { %v3704_v7 = vsel %vm3703_vm3, %v5165_v4, %v3700_v29  ;;  %v3713_v39 = vsub.f32 1.0, %v3712_v16 }
 0x7a2   :  { %v3709_v58 = vsel %vm3706_vm4, %v3708_v14, %v3704_v7 }
 0x7a3   :  { %v3734_v27 = vmul.f32 %v5171_v50, %v3709_v58  ;;  %v3714_v38 = vmul.f32 %v5169_v53, %v3713_v39 }
 0x7a4   :  { %v5173_v62 = vpop.eup %5172 }
 0x7a5   :  { %v7587_v55 = vpack.c.bf16 %v3734_v27, %v3734_v27  ;;  %v3715_v24 = vadd.f32 %v5169_v53, %v3714_v38  ;;  %v9086_v38 = vld [vmem:[#allocation44_spill] sm:$0xff] }
 0x7a7   :  { %v3719_v45 = vsel %vm3718_vm7, %v5169_v53, %v3715_v24  ;;  %3754 = vmatmul.bf16.vlgmr.msra.gmra.mxu0 %v7587_v55  ;;  %3780 = vmatmul.bf16.vlgmr.msrb.gmra.mxu2 %v7587_v55 }
 0x7a8   :  { %v3724_v30 = vsel %vm3721_vm8, %v3723_v21, %v3719_v45  ;;  %3850 = vmatpush.bf16.msra.mxu0 %v8383_v10  ;;  %3876 = vmatpush.bf16.msrb.mxu2 %v8384_v32  ;;  %v9052_v10 = vld [vmem:[#allocation163_spill] sm:$0xff]  ;;  %v9053_v32 = vld [vmem:[#allocation165_spill] sm:$0xff]  ;;  %v9087_v21 = vld [vmem:[#allocation12_spill] sm:$0xff] }
 0x7a9   :  { %v3735_v15 = vmul.f32 %v5173_v62, %v3724_v30 }
 0x7ab   :  { %v7593_v4 = vpack.c.bf16 %v3735_v15, %v3735_v15 }
 0x7ac   :  { %3851 = vmatpush.bf16.msra.mxu0 %v8385_v54  ;;  %3877 = vmatpush.bf16.msrb.mxu2 %v8386_v9  ;;  %v9054_v54 = vld [vmem:[#allocation174_spill] sm:$0xff]  ;;  %v9055_v9 = vld [vmem:[#allocation176_spill] sm:$0xff] }
 0x7ad   :  { %3767 = vmatmul.bf16.vlgmr.msra.gmra.mxu1 %v7593_v4  ;;  %3793 = vmatmul.bf16.vlgmr.msrb.gmra.mxu3 %v7593_v4 }
 0x7ae   :  { %3863 = vmatpush.bf16.msra.mxu1 %v8387_v17  ;;  %3889 = vmatpush.bf16.msrb.mxu3 %v8388_v37  ;;  %v9056_v17 = vld [vmem:[#allocation167_spill] sm:$0xff]  ;;  %v9057_v37 = vld [vmem:[#allocation169_spill] sm:$0xff] }
 0x7b0   :  { %3852 = vmatpush.bf16.msra.mxu0 %v8389_v36  ;;  %3878 = vmatpush.bf16.msrb.mxu2 %v8390_v47  ;;  %v9058_v36 = vld [vmem:[#allocation171_spill] sm:$0xff]  ;;  %v9059_v47 = vld [vmem:[#allocation173_spill] sm:$0xff] }
 0x7b2   :  { %3864 = vmatpush.bf16.msra.mxu1 %v8391_v0  ;;  %3890 = vmatpush.bf16.msrb.mxu3 %v8392_v56  ;;  %v9060_v0 = vld [vmem:[#allocation178_spill] sm:$0xff]  ;;  %v9061_v56 = vld [vmem:[#allocation180_spill] sm:$0xff] }
 0x7b4   :  { %3853 = vmatpush.bf16.msra.mxu0 %v8393_v5  ;;  %3879 = vmatpush.bf16.msrb.mxu2 %v8394_v63  ;;  %v9062_v5 = vld [vmem:[#allocation175_spill] sm:$0xff]  ;;  %v9063_v63 = vld [vmem:[#allocation177_spill] sm:$0xff] }
 0x7b6   :  { %3865 = vmatpush.bf16.msra.mxu1 %v8395_v8  ;;  %3891 = vmatpush.bf16.msrb.mxu3 %v8396_v48  ;;  %v9064_v8 = vld [vmem:[#allocation182_spill] sm:$0xff]  ;;  %v9065_v48 = vld [vmem:[#allocation184_spill] sm:$0xff] }
 0x7b7   :  { %3806 = vmatmul.bf16.vlgmr.msrb.gmra.mxu0 %v7587_v55  ;;  %3832 = vmatmul.bf16.vlgmr.msra.gmra.mxu2 %v7587_v55 }
 0x7b8   :  { %3854 = vmatpush.bf16.msra.mxu0 %v8397_v19  ;;  %3880 = vmatpush.bf16.msrb.mxu2 %v8398_v42  ;;  %v9066_v19 = vld [vmem:[#allocation179_spill] sm:$0xff]  ;;  %v9067_v42 = vld [vmem:[#allocation181_spill] sm:$0xff] }
 0x7ba   :  { %3866 = vmatpush.bf16.msra.mxu1 %v8399_v59  ;;  %3892 = vmatpush.bf16.msrb.mxu3 %v8400_v44  ;;  %v9068_v59 = vld [vmem:[#allocation186_spill] sm:$0xff]  ;;  %v9069_v44 = vld [vmem:[#allocation188_spill] sm:$0xff] }
 0x7bc   :  { %3855 = vmatpush.bf16.msra.mxu0 %v8401_v20  ;;  %3881 = vmatpush.bf16.msrb.mxu2 %v8402_v3  ;;  %v9070_v20 = vld [vmem:[#allocation183_spill] sm:$0xff]  ;;  %v9071_v3 = vld [vmem:[#allocation185_spill] sm:$0xff] }
 0x7bd   :  { %3819 = vmatmul.bf16.vlgmr.msrb.gmra.mxu1 %v7593_v4  ;;  %3845 = vmatmul.bf16.vlgmr.msra.gmra.mxu3 %v7593_v4 }
 0x7be   :  { %3867 = vmatpush.bf16.msra.mxu1 %v8403_v26  ;;  %3893 = vmatpush.bf16.msrb.mxu3 %v8492_v49  ;;  %v9072_v26 = vld [vmem:[#allocation190_spill] sm:$0xff]  ;;  %v9073_v49 = vld [vmem:[#allocation192_spill] sm:$0xff] }
 0x7c0   :  { %3856 = vmatpush.bf16.msra.mxu0 %v8493_v11  ;;  %3882 = vmatpush.bf16.msrb.mxu2 %v8494_v23  ;;  %v9074_v11 = vld [vmem:[#allocation187_spill] sm:$0xff]  ;;  %v9075_v23 = vld [vmem:[#allocation189_spill] sm:$0xff] }
 0x7c2   :  { %3868 = vmatpush.bf16.msra.mxu1 %v8495_v46  ;;  %3894 = vmatpush.bf16.msrb.mxu3 %v8496_v34  ;;  %v9076_v46 = vld [vmem:[#allocation194_spill] sm:$0xff]  ;;  %v9077_v34 = vld [vmem:[#allocation196_spill] sm:$0xff] }
 0x7c4   :  { %3857 = vmatpush.bf16.msra.mxu0 %v8497_v43  ;;  %3883 = vmatpush.bf16.msrb.mxu2 %v8498_v60  ;;  %v9078_v43 = vld [vmem:[#allocation191_spill] sm:$0xff]  ;;  %v9079_v60 = vld [vmem:[#allocation193_spill] sm:$0xff] }
 0x7c6   :  { %3869 = vmatpush.bf16.msra.mxu1 %v9052_v10  ;;  %3895 = vmatpush.bf16.msrb.mxu3 %v9053_v32 }
 0x7c7   :  { %3858 = vmatmul.bf16.vlgmr.msra.gmra.mxu0 %v7587_v55  ;;  %3884 = vmatmul.bf16.vlgmr.msrb.gmra.mxu2 %v7587_v55 }
 0x7c8   :  { %3902 = vmatpush.bf16.msrb.mxu0 %v8499_v18  ;;  %3928 = vmatpush.bf16.msra.mxu2 %v8500_v51  ;;  %v9080_v18 = vld [vmem:[#allocation198_spill] sm:$0xff]  ;;  %v9081_v51 = vld [vmem:[#allocation200_spill] sm:$0xff] }
 0x7ca   :  { %3870 = vmatpush.bf16.msra.mxu1 %v9056_v17  ;;  %3896 = vmatpush.bf16.msrb.mxu3 %v9057_v37  ;;  %v4102_v37 = vld [vmem:[%s7878_s4 + $0x70] sm:$0xff] }
 0x7cc   :  { %3903 = vmatpush.bf16.msrb.mxu0 %v9054_v54  ;;  %3929 = vmatpush.bf16.msra.mxu2 %v9055_v9  ;;  %v4103_v54 = vld [vmem:[%s7878_s4 + $0x78] sm:$0xff] }
 0x7cd   :  { %3871 = vmatmul.bf16.vlgmr.msra.gmra.mxu1 %v7593_v4  ;;  %3897 = vmatmul.bf16.vlgmr.msrb.gmra.mxu3 %v7593_v4 }
 0x7ce   :  { %3915 = vmatpush.bf16.msrb.mxu1 %v9058_v36  ;;  %3941 = vmatpush.bf16.msra.mxu3 %v9059_v47  ;;  %v9089_v36 = vld [vmem:[#allocation13_spill] sm:$0xff] }
 0x7d0   :  { %3904 = vmatpush.bf16.msrb.mxu0 %v9060_v0  ;;  %3930 = vmatpush.bf16.msra.mxu2 %v9061_v56  ;;  %v4101_v56 = vld [vmem:[%s7878_s4 + $0x68] sm:$0xff] }
 0x7d2   :  { %3916 = vmatpush.bf16.msrb.mxu1 %v9062_v5  ;;  %3942 = vmatpush.bf16.msra.mxu3 %v9063_v63  ;;  %v4100_v63 = vld [vmem:[%s7878_s4 + $0x60] sm:$0xff] }
 0x7d4   :  { %3905 = vmatpush.bf16.msrb.mxu0 %v9064_v8  ;;  %3931 = vmatpush.bf16.msra.mxu2 %v9065_v48  ;;  %v4119_v8 = vld [vmem:[%s7878_s4 + $0xf8] sm:$0xff] }
 0x7d6   :  { %3917 = vmatpush.bf16.msrb.mxu1 %v9066_v19  ;;  %3943 = vmatpush.bf16.msra.mxu3 %v9067_v42 }
 0x7d8   :  { %3906 = vmatpush.bf16.msrb.mxu0 %v9068_v59  ;;  %3932 = vmatpush.bf16.msra.mxu2 %v9069_v44  ;;  %v4099_v44 = vld [vmem:[%s7878_s4 + $0x58] sm:$0xff] }
 0x7da   :  { %3918 = vmatpush.bf16.msrb.mxu1 %v9070_v20  ;;  %3944 = vmatpush.bf16.msra.mxu3 %v9071_v3  ;;  %v4118_v20 = vld [vmem:[%s7878_s4 + $0xf0] sm:$0xff] }
 0x7db   :  { %v4098_v3 = vld [vmem:[%s7878_s4 + $0x50] sm:$0xff] }
 0x7dc   :  { %3907 = vmatpush.bf16.msrb.mxu0 %v9072_v26  ;;  %3933 = vmatpush.bf16.msra.mxu2 %v9073_v49  ;;  %v4117_v26 = vld [vmem:[%s7878_s4 + $0xe8] sm:$0xff] }
 0x7de   :  { %3919 = vmatpush.bf16.msrb.mxu1 %v9074_v11  ;;  %3945 = vmatpush.bf16.msra.mxu3 %v9075_v23  ;;  %v4097_v23 = vld [vmem:[%s7878_s4 + $0x48] sm:$0xff] }
 0x7e0   :  { %3908 = vmatpush.bf16.msrb.mxu0 %v9076_v46  ;;  %3934 = vmatpush.bf16.msra.mxu2 %v9077_v34  ;;  %v4116_v46 = vld [vmem:[%s7878_s4 + $0xe0] sm:$0xff] }
 0x7e2   :  { %3920 = vmatpush.bf16.msrb.mxu1 %v9078_v43  ;;  %3946 = vmatpush.bf16.msra.mxu3 %v9079_v60  ;;  %v4096_v60 = vld [vmem:[%s7878_s4 + $0x40] sm:$0xff] }
 0x7e4   :  { %3909 = vmatpush.bf16.msrb.mxu0 %v9080_v18  ;;  %3935 = vmatpush.bf16.msra.mxu2 %v9081_v51  ;;  %v4115_v18 = vld [vmem:[%s7878_s4 + $0xd8] sm:$0xff] }
 0x7e6   :  { %3921 = vmatpush.bf16.msrb.mxu1 %v9082_v35  ;;  %3947 = vmatpush.bf16.msra.mxu3 %v9083_v52  ;;  %v4095_v35 = vld [vmem:[%s7878_s4 + $0x38] sm:$0xff]  ;;  %v4114_v52 = vld [vmem:[%s7878_s4 + $0xd0] sm:$0xff] }
 0x7e7   :  { %3910 = vmatmul.bf16.vlgmr.msrb.gmra.mxu0 %v7587_v55  ;;  %3936 = vmatmul.bf16.vlgmr.msra.gmra.mxu2 %v7587_v55 }
 0x7e8   :  { %4124 = vmatpush.msra.mxu0 %v4103_v54 }
 0x7ea   :  { %3922 = vmatpush.bf16.msrb.mxu1 %v9084_v2  ;;  %3948 = vmatpush.bf16.msra.mxu3 %v9085_v33 }
 0x7eb   :  { %4125 = vmatpush.msra.mxu0 %v4102_v37 }
 0x7ed   :  { %3923 = vmatmul.bf16.vlgmr.msrb.gmra.mxu1 %v7593_v4  ;;  %3949 = vmatmul.bf16.vlgmr.msra.gmra.mxu3 %v7593_v4  ;;  %v9088_v4 = vld [vmem:[#allocation45_spill] sm:$0xff] }
 0x7ee   :  { %4126 = vmatpush.msra.mxu0 %v4101_v56  ;;  %4144 = vmatpush.msra.mxu1 %v4119_v8  ;;  %v4105_v56 = vld [vmem:[%s7878_s4 + $0x88] sm:$0xff] }
 0x7f0   :  { %4127 = vmatpush.msra.mxu0 %v4100_v63  ;;  %4145 = vmatpush.msra.mxu1 %v4118_v20 }
 0x7f2   :  { %4128 = vmatpush.msra.mxu0 %v4099_v44  ;;  %4146 = vmatpush.msra.mxu1 %v4117_v26 }
 0x7f4   :  { %4129 = vmatpush.msra.mxu0 %v4098_v3  ;;  %4147 = vmatpush.msra.mxu1 %v4116_v46 }
 0x7f6   :  { %4130 = vmatpush.msra.mxu0 %v4097_v23  ;;  %4148 = vmatpush.msra.mxu1 %v4115_v18 }
 0x7f8   :  { %4131 = vmatpush.msra.mxu0 %v4096_v60  ;;  %4149 = vmatpush.msra.mxu1 %v4114_v52 }
 0x7fa   :  { %4132 = vmatpush.msra.mxu0 %v4095_v35 }
 0x824   :  { %v3755_v41 = vpop.f32.mrf.mxu0 }
 0x82a   :  { %v3768_v1 = vpop.f32.mrf.mxu1  ;;  %v3781_v40 = vpop.f32.mrf.mxu2 }
 0x82b   :  { %v3769_v27 = vadd.f32 %v3768_v1, %v3755_v41  ;;  %v4094_v41 = vld [vmem:[%s7878_s4 + $0x30] sm:$0xff]  ;;  %v4113_v1 = vld [vmem:[%s7878_s4 + $0xc8] sm:$0xff] }
 0x82c   :  { %v3757_v13 = vpop.f32.mrf.mxu0  ;;  %4133 = vmatpush.msra.mxu0 %v4094_v41  ;;  %4150 = vmatpush.msra.mxu1 %v4113_v1 }
 0x82d   :  { %v3954_v45 = vadd.f32 %v3769_v27, %v9087_v21  ;;  %v4093_v13 = vld [vmem:[%s7878_s4 + $0x28] sm:$0xff]  ;;  %v4108_v21 = vld [vmem:[%s7878_s4 + $0xa0] sm:$0xff] }
 0x82e   :  { %4134 = vmatpush.msra.mxu0 %v4093_v13  ;;  %v9095_v13 = vld [vmem:[#allocation67_spill] sm:$0xff] }
 0x82f   :  { %v4806_v17 = vmul.f32 -1.442695, %v3954_v45 }
 0x830   :  { %v3794_v61 = vpop.f32.mrf.mxu3 }
 0x831   :  { %v3795_v30 = vadd.f32 %v3794_v61, %v3781_v40  ;;  %v4112_v61 = vld [vmem:[%s7878_s4 + $0xc0] sm:$0xff] }
 0x832   :  { %v3770_v22 = vpop.f32.mrf.mxu1  ;;  %v3783_v57 = vpop.f32.mrf.mxu2  ;;  %4151 = vmatpush.msra.mxu1 %v4112_v61 }
 0x833   :  { %v3955_v47 = vadd.f32 %v3795_v30, %v9089_v36  ;;  %v4107_v30 = vld [vmem:[%s7878_s4 + $0x98] sm:$0xff]  ;;  %v4106_v36 = vld [vmem:[%s7878_s4 + $0x90] sm:$0xff] }
 0x834   :  { %v3807_v31 = vpop.f32.mrf.mxu0 }
 0x835   :  { %v4807_v48 = vmul.f32 -1.442695, %v3955_v47 }
 0x838   :  { %v3796_v53 = vpop.f32.mrf.mxu3 }
 0x839   :  { %v4111_v53 = vld [vmem:[%s7878_s4 + $0xb8] sm:$0xff] }
 0x83a   :  { %v3820_v29 = vpop.f32.mrf.mxu1  ;;  %v3833_v16 = vpop.f32.mrf.mxu2  ;;  %4152 = vmatpush.msra.mxu1 %v4111_v53 }
 0x83b   :  { %v3821_v39 = vadd.f32 %v3820_v29, %v3807_v31  ;;  %v4092_v31 = vld [vmem:[%s7878_s4 + $0x20] sm:$0xff] }
 0x83c   :  { %v3809_v14 = vpop.f32.mrf.mxu0  ;;  %4135 = vmatpush.msra.mxu0 %v4092_v31 }
 0x83d   :  { %v3956_v25 = vadd.f32 %v3821_v39, %v9086_v38  ;;  %v4110_v14 = vld [vmem:[%s7878_s4 + $0xb0] sm:$0xff] }
 0x83e   :  { %4153 = vmatpush.msra.mxu1 %v4110_v14  ;;  %v4090_v39 = vld [vmem:[%s7878_s4 + $0x10] sm:$0xff] }
 0x83f   :  { %v4808_v62 = vmul.f32 -1.442695, %v3956_v25 }
 0x840   :  { %v3846_v7 = vpop.f32.mrf.mxu3 }
 0x841   :  { %v3847_v55 = vadd.f32 %v3846_v7, %v3833_v16  ;;  %5174 = vpow2.f32 %v4808_v62  ;;  %v4091_v16 = vld [vmem:[%s7878_s4 + $0x18] sm:$0xff]  ;;  %v4088_v62 = vld [vmem:[%s7878_s4] sm:$0xff] }
 0x842   :  { %v3822_v50 = vpop.f32.mrf.mxu1  ;;  %v3835_v58 = vpop.f32.mrf.mxu2  ;;  %5176 = vpow2.f32 %v4806_v17  ;;  %4136 = vmatpush.msra.mxu0 %v4091_v16  ;;  %v9090_v17 = vld [vmem:[#allocation72_spill] sm:$0xff] }
 0x843   :  { %v3957_v10 = vadd.f32 %v3847_v55, %v9088_v4  ;;  %v4109_v50 = vld [vmem:[%s7878_s4 + $0xa8] sm:$0xff] }
 0x844   :  { %v7671_v28 = vpop.f32.mrf.mxu0  ;;  %4137 = vmatpush.msra.mxu0 %v4090_v39  ;;  %4154 = vmatpush.msra.mxu1 %v4109_v50 }
 0x845   :  { %v4809_v0 = vmul.f32 -1.442695, %v3957_v10 }
 0x846   :  { %4155 = vmatpush.msra.mxu1 %v4108_v21 }
 0x847   :  { %v5175_v42 = vpop.eup %5174  ;;  %5178 = vpow2.f32 %v4809_v0 }
 0x848   :  { %v3848_v24 = vpop.f32.mrf.mxu3  ;;  %5180 = vpow2.f32 %v4807_v48  ;;  %v7710_v49 = vadd.f32 1.0, %v5175_v42  ;;  %v5177_v11 = vpop.eup %5176  ;;  %4156 = vmatpush.msra.mxu1 %v4107_v30  ;;  %v4104_v48 = vld [vmem:[%s7878_s4 + $0x80] sm:$0xff] }
 0x849   :  { %v7724_v51 = vadd.f32 1.0, %v5177_v11  ;;  %v4089_v24 = vld [vmem:[%s7878_s4 + $0x8] sm:$0xff] }
 0x84a   :  { %v7675_v15 = vpop.f32.mrf.mxu2  ;;  %v7678_v32 = vpop.f32.mrf.mxu1  ;;  %5182 = vrcp.f32 %v7710_v49  ;;  %4138 = vmatpush.msra.mxu0 %v4089_v24  ;;  %4157 = vmatpush.msra.mxu1 %v4106_v36  ;;  %v4019_v23 = vand.u32 2147483648, %v7710_v49  ;;  %vm4013_vm10 = vweird.f32 %v7710_v49  ;;  %v4017_v18 = vand.u32 2147483647, %v7710_v49 }
 0x84b   :  { %5184 = vrcp.f32 %v7724_v51  ;;  %vm3975_vm12 = vweird.f32 %v7724_v51  ;;  %v3979_v52 = vand.u32 2147483647, %v7724_v51 }
 0x84c   :  { %v3861_v9 = vpop.f32.mrf.mxu0  ;;  %4139 = vmatpush.msra.mxu0 %v4088_v62  ;;  %4158 = vmatpush.msra.mxu1 %v4105_v56  ;;  %v4020_v1 = vor.u32 1.1754944e-38, %v4019_v23  ;;  %vm4018_vm15 = vcmp.eq.f32.partialorder %v4017_v18, 8.507059e+37 }
 0x84d   :  { %v5179_v34 = vpop.eup %5178  ;;  %v3873_v9 = vadd.f32 %v7678_v32, %v7671_v28  ;;  %vm3980_vm3 = vcmp.eq.f32.partialorder %v3979_v52, 8.507059e+37  ;;  %v4949_v52 = vld [vmem:[%s7879_s5] ss:$0 sm:$0xff] }
 0x84e   :  { %v5181_v2 = vpop.eup %5180  ;;  %v7733_v33 = vadd.f32 1.0, %v5179_v34  ;;  %v9092_v34 = vld [vmem:[#allocation73_spill] sm:$0xff]  ;;  %4159 = vmatpush.msra.mxu1 %v4104_v48 }
 0x84f   :  { %v7742_v40 = vadd.f32 1.0, %v5181_v2 }
 0x850   :  { %v7690_v5 = vpop.f32.mrf.mxu3  ;;  %v7750_v22 = vpop.eup %5182  ;;  %5186 = vrcp.f32 %v7733_v33  ;;  %v4034_v16 = vand.u32 2147483648, %v7733_v33  ;;  %vm4028_vm1 = vweird.f32 %v7733_v33  ;;  %v4032_v50 = vand.u32 2147483647, %v7733_v33 }
 0x851   :  { %5188 = vrcp.f32 %v7742_v40  ;;  %v4009_v29 = vmul.f32 %v7750_v22, %v7710_v49  ;;  %v7768_v7 = vpop.eup %5184  ;;  %vm4014_vm9 = vweird.f32 %v7750_v22  ;;  %v3899_v46 = vadd.f32 %v7690_v5, %v7675_v15 }
 0x852   :  { %v3887_v19 = vpop.f32.mrf.mxu2  ;;  %v3874_v59 = vpop.f32.mrf.mxu1  ;;  %v3971_v27 = vmul.f32 %v7768_v7, %v7724_v51  ;;  %vm7822_vm11 = vmor %vm4013_vm10, %vm4014_vm9  ;;  %vm3976_vm13 = vweird.f32 %v7768_v7  ;;  %v3981_v5 = vand.u32 2147483648, %v7724_v51  ;;  %v4035_v24 = vor.u32 1.1754944e-38, %v4034_v16 }
 0x853   :  { %v4010_v38 = vsub.f32 1.0, %v4009_v29  ;;  %v9091_v19 = vld [vmem:[#allocation66_spill] sm:$0xff]  ;;  %v3959_v61 = vadd.f32 %v3899_v46, %v9095_v13  ;;  %vm7841_vm0 = vmor %vm3975_vm12, %vm3976_vm13  ;;  %vm3990_vm5 = vweird.f32 %v7742_v40  ;;  %v3994_v30 = vand.u32 2147483647, %v7742_v40 }
 0x854   :  { %v3972_v47 = vsub.f32 1.0, %v3971_v27  ;;  %v3958_v42 = vadd.f32 %v3873_v9, %v9091_v19  ;;  %v3982_v51 = vor.u32 1.1754944e-38, %v3981_v5  ;;  %vm4033_vm6 = vcmp.eq.f32.partialorder %v4032_v50, 8.507059e+37 }
 0x855   :  { %v4011_v0 = vmul.f32 %v7750_v22, %v4010_v38  ;;  %vm3995_vm8 = vcmp.eq.f32.partialorder %v3994_v30, 8.507059e+37 }
 0x856   :  { %v7776_v58 = vpop.eup %5186  ;;  %v3973_v44 = vmul.f32 %v7768_v7, %v3972_v47 }
 0x857   :  { %v7792_v4 = vpop.eup %5188  ;;  %v4024_v10 = vmul.f32 %v7776_v58, %v7733_v33  ;;  %v4012_v20 = vadd.f32 %v7750_v22, %v4011_v0  ;;  %vm4029_vm14 = vweird.f32 %v7776_v58 }
 0x858   :  { %v3900_v43 = vpop.f32.mrf.mxu3  ;;  %v3986_v63 = vmul.f32 %v7792_v4, %v7742_v40  ;;  %v3974_v15 = vadd.f32 %v7768_v7, %v3973_v44  ;;  %vm7850_vm2 = vmor %vm4028_vm1, %vm4029_vm14  ;;  %vm3991_vm4 = vweird.f32 %v7792_v4  ;;  %vm4164_vm1 = vcmask 80896  }
 0x859   :  { %v4025_v28 = vsub.f32 1.0, %v4024_v10  ;;  %v4016_v49 = vsel %vm7822_vm11, %v7750_v22, %v4012_v20  ;;  %vm3992_vm7 = vmor %vm3990_vm5, %vm3991_vm4 }
 0x85a   :  { %v3987_v11 = vsub.f32 1.0, %v3986_v63  ;;  %v4021_v14 = vsel %vm4018_vm15, %v4020_v1, %v4016_v49  ;;  %v3978_v39 = vsel %vm7841_vm0, %v7768_v7, %v3974_v15 }
 0x85b   :  { %v4026_v60 = vmul.f32 %v7776_v58, %v4025_v28  ;;  %v3983_v21 = vsel %vm3980_vm3, %v3982_v51, %v3978_v39 }
 0x85d   :  { %v4027_v31 = vadd.f32 %v7776_v58, %v4026_v60 }
 0x85f   :  { %v4031_v7 = vsel %vm7850_vm2, %v7776_v58, %v4027_v31 }
 0x860   :  { %v4036_v10 = vsel %vm4033_vm6, %v4035_v24, %v4031_v7 }
 0x861   :  { %v4079_v47 = vmul.f32 %v4036_v10, %v7584_v6 }
 0x864   :  { %v3911_v57 = vpop.f32.mrf.mxu0 }
 0x86a   :  { %v3924_v25 = vpop.f32.mrf.mxu1  ;;  %v3937_v55 = vpop.f32.mrf.mxu2 }
 0x86b   :  { %v3925_v45 = vadd.f32 %v3924_v25, %v3911_v57  ;;  %v3988_v57 = vmul.f32 %v7792_v4, %v3987_v11  ;;  %v4078_v25 = vmul.f32 %v4021_v14, %v7579_v12 }
 0x86c   :  { %v3913_v54 = vpop.f32.mrf.mxu0 }
 0x86d   :  { %v3960_v37 = vadd.f32 %v3925_v45, %v9090_v17  ;;  %v3996_v45 = vand.u32 2147483648, %v7742_v40 }
 0x86f   :  { %v4810_v8 = vmul.f32 -1.442695, %v3960_v37  ;;  %v3997_v37 = vor.u32 1.1754944e-38, %v3996_v45 }
 0x870   :  { %v3950_v32 = vpop.f32.mrf.mxu3 }
 0x871   :  { %5190 = vpow2.f32 %v4810_v8  ;;  %v3951_v59 = vadd.f32 %v3950_v32, %v3937_v55  ;;  %v3989_v55 = vadd.f32 %v7792_v4, %v3988_v57 }
 0x872   :  { %v3926_v3 = vpop.f32.mrf.mxu1  ;;  %v3939_v26 = vpop.f32.mrf.mxu2  ;;  %5192 = vtanh.f32 %v3958_v42 }
 0x873   :  { %v3961_v43 = vadd.f32 %v3951_v59, %v9092_v34  ;;  %v3993_v17 = vsel %vm3992_vm7, %v7792_v4, %v3989_v55 }
 0x874   :  { %v3998_v0 = vsel %vm3995_vm8, %v3997_v37, %v3993_v17 }
 0x875   :  { %v4811_v2 = vmul.f32 -1.442695, %v3961_v43 }
 0x877   :  { %v5191_v41 = vpop.eup %5190  ;;  %5194 = vpow2.f32 %v4811_v2 }
 0x878   :  { %v4046_v53 = vadd.f32 1.0, %v5191_v41  ;;  %v3952_v29 = vpop.f32.mrf.mxu3  ;;  %v5193_v27 = vpop.eup %5192 }
 0x879   :  { %v4080_v62 = vmul.f32 %v5193_v27, %v3983_v21 }
 0x87a   :  { %5196 = vrcp.f32 %v4046_v53  ;;  %v4059_v40 = vand.u32 2147483648, %v4046_v53  ;;  %v4057_v28 = vand.u32 2147483647, %v4046_v53  ;;  %vm4053_vm10 = vweird.f32 %v4046_v53 }
 0x87b   :  { %5198 = vtanh.f32 %v3959_v61  ;;  %v4082_v9 = vadd.f32 %v4080_v62, %v4078_v25 }
 0x87c   :  { %v4060_v42 = vor.u32 1.1754944e-38, %v4059_v40  ;;  %vm4058_vm12 = vcmp.eq.f32.partialorder %v4057_v28, 8.507059e+37 }
 0x87d   :  { %v5195_v33 = vpop.eup %5194 }
 0x87e   :  { %v4047_v12 = vadd.f32 1.0, %v5195_v33 }
 0x880   :  { %v5197_v54 = vpop.eup %5196  ;;  %5200 = vrcp.f32 %v4047_v12  ;;  %v4074_v6 = vand.u32 2147483648, %v4047_v12  ;;  %v4072_v23 = vand.u32 2147483647, %v4047_v12  ;;  %vm4068_vm14 = vweird.f32 %v4047_v12 }
 0x881   :  { %v5199_v58 = vpop.eup %5198  ;;  %v4049_v36 = vmul.f32 %v5197_v54, %v4046_v53  ;;  %5202 = vtanh.f32 %v4082_v9  ;;  %vm4054_vm9 = vweird.f32 %v5197_v54 }
 0x882   :  { %v4081_v63 = vmul.f32 %v5199_v58, %v3998_v0  ;;  %vm4055_vm11 = vmor %vm4053_vm10, %vm4054_vm9  ;;  %v4075_v34 = vor.u32 1.1754944e-38, %v4074_v6  ;;  %vm4073_vm0 = vcmp.eq.f32.partialorder %v4072_v23, 8.507059e+37 }
 0x883   :  { %v4050_v56 = vsub.f32 1.0, %v4049_v36 }
 0x884   :  { %v4083_v48 = vadd.f32 %v4081_v63, %v4079_v47 }
 0x885   :  { %v4051_v8 = vmul.f32 %v5197_v54, %v4050_v56 }
 0x886   :  { %v5201_v32 = vpop.eup %5200  ;;  %5204 = vtanh.f32 %v4083_v48 }
 0x887   :  { %v4064_v19 = vmul.f32 %v5201_v32, %v4047_v12  ;;  %v4052_v4 = vadd.f32 %v5197_v54, %v4051_v8  ;;  %v5203_v20 = vpop.eup %5202  ;;  %vm4069_vm13 = vweird.f32 %v5201_v32 }
 0x888   :  { %vm4070_vm15 = vmor %vm4068_vm14, %vm4069_vm13 }
 0x889   :  { %v4065_v59 = vsub.f32 1.0, %v4064_v19  ;;  %v4056_v44 = vsel %vm4055_vm11, %v5197_v54, %v4052_v4 }
 0x88a   :  { %v4061_v3 = vsel %vm4058_vm12, %v4060_v42, %v4056_v44 }
 0x88b   :  { %v4066_v26 = vmul.f32 %v5201_v32, %v4065_v59  ;;  %v4086_v11 = vmul.f32 %v5203_v20, %v4061_v3 }
 0x88c   :  { %v5205_v60 = vpop.eup %5204 }
 0x88d   :  { %4140 = vmatmul.f32.vlgmr.msra.gmra.mxu0 %v4086_v11  ;;  %v4067_v46 = vadd.f32 %v5201_v32, %v4066_v26 }
 0x88f   :  { %v4071_v43 = vsel %vm4070_vm15, %v5201_v32, %v4067_v46 }
 0x890   :  { %v4076_v18 = vsel %vm4073_vm0, %v4075_v34, %v4071_v43 }
 0x891   :  { %v4087_v35 = vmul.f32 %v5205_v60, %v4076_v18 }
 0x893   :  { %4160 = vmatmul.f32.vlgmr.msra.gmra.mxu1 %v4087_v35 }
 0x90a   :  { %v4141_v2 = vpop.f32.mrf.mxu0 }
 0x90b   :  { %v4142_v15 = vadd.f32 %v4949_v52, %v4141_v2 }
 0x910   :  { %v4161_v5 = vpop.f32.mrf.mxu1 }
 0x911   :  { %v4162_v49 = vadd.f32 %v4161_v5, %v4142_v15 }
 0x913   :  { %v4165_v41 = vsel %vm4164_vm1, %v4162_v49, -inf }
 0x914   :  { %4166 = vmax.xlane.f32.xlu0 %v4165_v41 }
 0x987   :  { %v4167_v1 = vpop.xlane.xlu0 %4166 }
 0x988   :  { %v4168_v13 = vsub.f32 %v4162_v49, %v4167_v1 }
 0x98a   :  { %v4169_v61 = vmul.f32 1.442695, %v4168_v13 }
 0x98c   :  { %5206 = vpow2.f32 %v4169_v61 }
 0x992   :  { %v5207_v57 = vpop.eup %5206 }
 0x993   :  { %v4171_v31 = vsel %vm4164_vm1, %v5207_v57, 0.0 }
 0x994   :  { %4172 = vadd.xlane.f32.xlu0 %v4171_v31 }
 0xa07   :  { %v4173_v53 = vpop.xlane.xlu0 %4172 }
 0xa08   :  { %5208 = vlog2.f32 %v4173_v53 }
 0xa0e   :  { %v5209_v29 = vpop.eup %5208 }
 0xa0f   :  { %v4175_v16 = vmul.f32 0.6931472, %v5209_v29 }
 0xa11   :  { %v4176_v22 = vsub.f32 %v4168_v13, %v4175_v16 }
 0xa13   :  { %4177 = vst.msk [vmem:[%s7880_s6] sm:$0xff] %vm4164_vm1, %v4176_v22 }
 0xa14   :  { %4182 = vsyncmov [#allocation4] }
 0xa17   :  { %s4183_s26 = vpop.sfrf %4182 }
 0xa18   :  { %p4812_p0 = scmp.ne.s32.totalorder %s4183_s26, 0 }
 0xa1a   :  { %4187 = shalt.err (%p4812_p0)  }

</bundles_post_ra>
